<compile_context>
chip_gen: v7x
topology: tpu7x:2x2x1
jax: 0.10.0
libtpu: 0.0.40
codegen_flags: <defaults>
</compile_context>

<pallas_src>
import functools

import jax
import jax.numpy as jnp
from jax.experimental import pallas as pl
from jax.experimental.pallas import tpu as pltpu

HIDDEN = 64          # hidden_dim
HEADS = 8            # GATConv heads
DH = HIDDEN // HEADS # per-head output dim (hidden_dim // 8)
NUM_LAYERS = 3
EDGE_TYPES = 3       # ['AST', 'DDG', 'CFG']
NEG_SLOPE = 0.2      # GATConv LeakyReLU slope
BN_EPS = 1e-5


# ------------------------------- kernel --------------------------------------

def gnn_kernel(x_ref, adj_ref, pw_ref, w_ref, a_ref, vec_ref, pool_ref, *,
               num_layers, edge_types, heads, dh, hidden, neg_slope):
    """Fused per-graph GNN: input_proj -> num_layers x (hetero-GAT mean, folded BN, ReLU,
    residual) -> [mean | max] pooling.  One grid step per node type (vuln / patch)."""
    f32 = jnp.float32
    n = x_ref.shape[0]
    hn = heads * n                 # columns per edge type in the wide layout
    eh = edge_types * heads        # number of (edge type, head) blocks
    ehn = edge_types * hn          # total wide width (k-major, k = e*heads + h, then j)

    def iota(shape, dim):
        return jax.lax.broadcasted_iota(jnp.int32, shape, dim)

    def fdiv(x, d):
        # exact floor-div of small non-negative int32 via f32 (robust, always lowers)
        return jnp.floor((x.astype(f32) + 0.5) * (1.0 / d)).astype(jnp.int32)

    def fmod(x, d):
        return x - d * fdiv(x, d)

    # ---- hoisted selector constants (reused by all layers; cheap iota VALU work) ----
    # sel_kw[k, c] = 1 iff c // n == k        (eh, ehn): expand per-(e,h) values to the wide axis
    kn = iota((eh, ehn), 0) * n
    c0 = iota((eh, ehn), 1)
    sel_kw = ((c0 >= kn) & (c0 < kn + n)).astype(f32)
    # sel_wk[c, k] = 1 iff c // n == k        (ehn, eh): per-(e,h) row sums via one MXU pass
    kn2 = iota((ehn, eh), 1) * n
    c1 = iota((ehn, eh), 0)
    sel_wk = ((c1 >= kn2) & (c1 < kn2 + n)).astype(f32)
    # eyemask[j, c] = 1 iff c % n == j        (n, ehn): transpose-free "pick source node j"
    eyemask = (fmod(iota((n, ehn), 1), n) == iota((n, ehn), 0)).astype(f32)
    # row_expand[r, j] = 1 iff r % n == j     (ehn, n): replicate xp rows into the wide row axis
    row_expand = (fmod(iota((ehn, n), 0), n) == iota((ehn, n), 1)).astype(f32)
    # block-diag masks for the aggregation right operand:
    #   bd_masks[e][r, d] = 1 iff r // hn == e and d // dh == (r // n) % heads
    r_idx = iota((ehn, hidden), 0)
    d_idx = iota((ehn, hidden), 1)
    head_match = (fmod(fdiv(r_idx, n), heads) == fdiv(d_idx, dh))
    bd_masks = [((fdiv(r_idx, hn) == e) & head_match).astype(f32) for e in range(edge_types)]

    # ---- additive attention mask, built ONCE per graph and reused by all layers ----
    adj = adj_ref[...]                                                   # (E, n, n)
    eyemask_h = eyemask[:, :hn]                                          # (n, hn)
    adj_wide = jnp.concatenate(
        [jnp.dot(adj[e], eyemask_h, preferred_element_type=f32) for e in range(edge_types)],
        axis=1)                                                          # (n, ehn)
    neg_mask = jnp.where(adj_wide > 0.0, 0.0, -1e30)                     # (n, ehn)

    # ---- input projection (proj_b is row 0 of the packed vector block) ----
    h = jnp.dot(x_ref[...], pw_ref[...], preferred_element_type=f32) + vec_ref[0:1, :]

    for l in range(num_layers):
        scale = vec_ref[1 + 2 * l:2 + 2 * l, :]   # folded bn_scale / edge_types
        shift = vec_ref[2 + 2 * l:3 + 2 * l, :]   # folded mean(bias)*bn_scale + bn_shift

        # all 3 edge-type projections and all 2*3*8 attention logits as two wide matmuls
        xp = jnp.dot(h, w_ref[l], preferred_element_type=f32)            # (n, E*H)
        att = jnp.dot(xp, a_ref[l], preferred_element_type=f32)          # (n, 2*eh)
        att_dst = att[:, :eh]                                            # (n, eh)
        att_src = att[:, eh:]                                            # (n, eh)

        # wide scores: sc[i, k*n + j] = LeakyReLU(att_dst[i,k] + att_src[j,k]) + mask
        dst_wide = jnp.dot(att_dst, sel_kw, preferred_element_type=f32)  # (n, ehn)
        src_row = jnp.sum(jnp.dot(att_src, sel_kw, preferred_element_type=f32) * eyemask,
                          axis=0, keepdims=True)                         # (1, ehn)
        sc = dst_wide + src_row
        sc = jnp.where(sc >= 0.0, sc, neg_slope * sc) + neg_mask

        # per-(row, edge, head) upper bound (LeakyReLU monotone) -> exp(sc - ub) <= 1
        ub = att_dst + jnp.max(att_src, axis=0, keepdims=True)           # (n, eh)
        ub = jnp.where(ub >= 0.0, ub, neg_slope * ub)
        ub_wide = jnp.dot(ub, sel_kw, preferred_element_type=f32)        # (n, ehn)

        p = jnp.exp(sc - ub_wide)                                        # (n, ehn)
        # softmax denominators per (row, edge, head) on the MXU; reciprocal on the EUP
        rs = jnp.dot(p, sel_wk, preferred_element_type=f32)              # (n, eh)
        p = p * jnp.dot(pl.reciprocal(rs, approx=True), sel_kw,
                        preferred_element_type=f32)                      # normalized

        # block-diagonal projected features; ONE fused K = E*heads*n aggregation matmul
        xp_rows = jnp.dot(row_expand, xp, preferred_element_type=f32)    # (ehn, E*H)
        xp_bd = bd_masks[0] * xp_rows[:, :hidden]
        for e in range(1, edge_types):
            xp_bd = xp_bd + bd_masks[e] * xp_rows[:, e * hidden:(e + 1) * hidden]
        agg = jnp.dot(p, xp_bd, preferred_element_type=f32)              # (n, H)

        # HeteroConv mean + GAT bias + eval BatchNorm folded into scale/shift; ReLU; residual
        h = jnp.maximum(agg * scale + shift, 0.0) + h                    # dropout = identity

    # global mean / max pooling (single graph per node type) -> lane-dense (1, 2H) output
    pool_ref[...] = jnp.concatenate(
        [jnp.mean(h, axis=0, keepdims=True), jnp.max(h, axis=0, keepdims=True)], axis=1)


# ------------------------------ wrappers --------------------------------------

def gnn_forward(x, adj, proj_w, w_all, a_comb, vecs):
    _, n, d_in = x.shape
    kern = functools.partial(gnn_kernel, num_layers=NUM_LAYERS, edge_types=EDGE_TYPES,
                             heads=HEADS, dh=DH, hidden=HIDDEN, neg_slope=NEG_SLOPE)
    return pl.pallas_call(
        kern,
        grid=(2,),
        out_shape=jax.ShapeDtypeStruct((2, 1, 2 * HIDDEN), jnp.float32),
        in_specs=[
            pl.BlockSpec((None, n, d_in), lambda t: (t, 0, 0)),
            pl.BlockSpec((None, EDGE_TYPES, n, n), lambda t: (t, 0, 0, 0)),
            pl.BlockSpec((None, d_in, HIDDEN), lambda t: (t, 0, 0)),
            pl.BlockSpec((None, NUM_LAYERS, HIDDEN, EDGE_TYPES * HIDDEN),
                         lambda t: (t, 0, 0, 0)),
            pl.BlockSpec((None, NUM_LAYERS, EDGE_TYPES * HIDDEN, 2 * EDGE_TYPES * HEADS),
                         lambda t: (t, 0, 0, 0)),
            pl.BlockSpec((None, 8, HIDDEN), lambda t: (t, 0, 0)),
        ],
        out_specs=pl.BlockSpec((None, 1, 2 * HIDDEN), lambda t: (t, 0, 0)),
        compiler_params=pltpu.CompilerParams(dimension_semantics=("parallel",)),
    )(x, adj, proj_w, w_all, a_comb, vecs)


def forward(packed, x_vuln, x_patch, adj_vuln, adj_patch):
    assert x_vuln.shape == x_patch.shape, "equal node counts required (see TODO)"
    assert adj_vuln.shape == adj_patch.shape
    x = jnp.stack([x_vuln, x_patch])            # (2, N, D_in)
    adj = jnp.stack([adj_vuln, adj_patch])      # (2, E, N, N)
    pooled = gnn_forward(x, adj, packed['proj_w'], packed['w_all'], packed['a_comb'],
                         packed['vecs'])        # (2, 1, 2H)
    # readout in plain jnp (removes a second pallas_call launch on a tiny workload)
    graph_emb = pooled.reshape(1, 4 * HIDDEN)   # [vuln_mean|vuln_max|patch_mean|patch_max]
    g = jnp.maximum(graph_emb @ packed['graph_proj_w'] + packed['graph_proj_b'], 0.0)
    logit = jnp.sum(g * packed['classifier_w'], axis=1, keepdims=True) + packed['classifier_b']
    return jax.nn.sigmoid(logit)


# ------------------------- deterministic parameters --------------------------

def init_params(key, input_dim):
    keys = iter(jax.random.split(key, 256))

    def dense(k, fan_in, shape):
        return jax.random.normal(k, shape, jnp.float32) / jnp.sqrt(float(fan_in))

    params = {}
    for nt in ('vuln', 'patch'):
        params[f'proj_{nt}_w'] = dense(next(keys), input_dim, (input_dim, HIDDEN))
        params[f'proj_{nt}_b'] = jnp.zeros((1, HIDDEN), jnp.float32)

    params['layers'] = []
    for _ in range(NUM_LAYERS):
        layer = {}
        for nt in ('vuln', 'patch'):
            ws, asrcs, adsts, biases = [], [], [], []
            for _e in range(EDGE_TYPES):
                ws.append(dense(next(keys), HIDDEN, (HIDDEN, HIDDEN)))
                # GAT attention vectors a_src/a_dst of shape (heads, dh), laid out
                # block-diagonally in (H, heads) so that (x' @ A)[:, h] = a_h . x'_h
                a_src = dense(next(keys), DH, (HEADS, DH))
                a_dst = dense(next(keys), DH, (HEADS, DH))
                A_src = jnp.zeros((HIDDEN, HEADS), jnp.float32)
                A_dst = jnp.zeros((HIDDEN, HEADS), jnp.float32)
                for hh in range(HEADS):
                    A_src = A_src.at[hh * DH:(hh + 1) * DH, hh].set(a_src[hh])
                    A_dst = A_dst.at[hh * DH:(hh + 1) * DH, hh].set(a_dst[hh])
                asrcs.append(A_src)
                adsts.append(A_dst)
                biases.append(jnp.zeros((1, HIDDEN), jnp.float32))
            layer[nt] = dict(
                w=jnp.stack(ws), asrc=jnp.stack(asrcs), adst=jnp.stack(adsts),
                bias=jnp.stack(biases),
                gamma=jnp.ones((1, HIDDEN), jnp.float32),
                beta=jnp.zeros((1, HIDDEN), jnp.float32),
                rmean=jnp.zeros((1, HIDDEN), jnp.float32),
                rvar=jnp.ones((1, HIDDEN), jnp.float32))
        params['layers'].append(layer)

    params['graph_proj_w'] = dense(next(keys), 4 * HIDDEN, (4 * HIDDEN, HIDDEN))
    params['graph_proj_b'] = jnp.zeros((1, HIDDEN), jnp.float32)
    params['classifier_w'] = dense(next(keys), HIDDEN, (1, HIDDEN))
    params['classifier_b'] = jnp.zeros((1, 1), jnp.float32)
    return params


def pack_params(params):
    """Host-side repacking into the fused kernel's wide / folded layout."""
    EH = EDGE_TYPES * HEADS
    proj_w = jnp.stack([params['proj_vuln_w'], params['proj_patch_w']])   # (2, D_in, H)

    w_all, a_comb, vecs = [], [], []
    for nt in ('vuln', 'patch'):
        w_l, a_l = [], []
        rows = [params[f'proj_{nt}_b']]                                   # row 0: proj bias
        for layer in params['layers']:
            lp = layer[nt]
            # concat edge-type weights along the output axis: (H, E*H)
            w_l.append(jnp.concatenate([lp['w'][e] for e in range(EDGE_TYPES)], axis=1))
            # attention packing: (E*H, 2*EH); cols [0,EH) = dst, [EH,2EH) = src, k = e*heads+h
            A = jnp.zeros((EDGE_TYPES * HIDDEN, 2 * EH), jnp.float32)
            for e in range(EDGE_TYPES):
                r0 = e * HIDDEN
                A = A.at[r0:r0 + HIDDEN, e * HEADS:(e + 1) * HEADS].set(lp['adst'][e])
                A = A.at[r0:r0 + HIDDEN, EH + e * HEADS:EH + (e + 1) * HEADS].set(lp['asrc'][e])
            a_l.append(A)
            # fold HeteroConv mean + GAT bias + eval BatchNorm into one scale/shift pair
            s = lp['gamma'] * jax.lax.rsqrt(lp['rvar'] + BN_EPS)          # (1, H)
            bias_mean = jnp.mean(lp['bias'], axis=0)                      # (1, H)
            rows.append(s / EDGE_TYPES)                                   # scale_l
            rows.append(bias_mean * s + lp['beta'] - lp['rmean'] * s)     # shift_l
        rows.append(jnp.zeros((1, HIDDEN), jnp.float32))                  # pad to 8 rows
        w_all.append(jnp.stack(w_l))
        a_comb.append(jnp.stack(a_l))
        vecs.append(jnp.concatenate(rows, axis=0))                        # (8, H)

    return dict(
        proj_w=proj_w, w_all=jnp.stack(w_all), a_comb=jnp.stack(a_comb),
        vecs=jnp.stack(vecs),
        graph_proj_w=params['graph_proj_w'], graph_proj_b=params['graph_proj_b'],
        classifier_w=params['classifier_w'], classifier_b=params['classifier_b'])


if __name__ == "__main__":
    key = jax.random.PRNGKey(0)
    k_param, k_xv, k_xp, k_av, k_ap = jax.random.split(key, 5)

    input_dim = 32
    n_nodes = 16          # same node count for both graphs (see TODO at top)

    params = init_params(k_param, input_dim)
    packed = pack_params(params)

    x_vuln = jax.random.normal(k_xv, (n_nodes, input_dim), jnp.float32)
    x_patch = jax.random.normal(k_xp, (n_nodes, input_dim), jnp.float32)

    def make_adj(k, n):
        dense = jax.random.bernoulli(k, 0.3, (EDGE_TYPES, n, n)).astype(jnp.float32)
        eye = jnp.eye(n, dtype=jnp.float32)[None]
        return jnp.maximum(dense, eye)     # add self-loops (GATConv default)

    adj_vuln = make_adj(k_av, n_nodes)
    adj_patch = make_adj(k_ap, n_nodes)

    # self-loops are required: with none, a masked softmax row would silently diverge from PyG
    for a in (adj_vuln, adj_patch):
        assert bool(jnp.all(jnp.diagonal(a, axis1=1, axis2=2) > 0))

    out = jax.jit(forward)(packed, x_vuln, x_patch, adj_vuln, adj_patch)
    out = jax.block_until_ready(out)
    assert out.shape == (1, 1)
    assert bool(jnp.all(jnp.isfinite(out)))
    assert bool(jnp.all((out >= 0.0) & (out <= 1.0)))
    print("KERNEL_OK")
</pallas_src>

<mosaic_0001>
module attributes {stable_mosaic.version = 11 : i64} {
  func.func @gnn_kernel(%arg0: i32, %arg1: memref<1x16x32xf32, #tpu.memory_space<vmem>>, %arg2: memref<1x3x16x16xf32, #tpu.memory_space<vmem>>, %arg3: memref<1x32x64xf32, #tpu.memory_space<vmem>>, %arg4: memref<1x3x64x192xf32, #tpu.memory_space<vmem>>, %arg5: memref<1x3x192x48xf32, #tpu.memory_space<vmem>>, %arg6: memref<1x8x64xf32, #tpu.memory_space<vmem>>, %arg7: memref<1x1x128xf32, #tpu.memory_space<vmem>>) attributes {dimension_semantics = [#tpu.dimension_semantics<parallel>], iteration_bounds = array<i64: 2>, scalar_prefetch = 0 : i64, scratch_operands = 0 : i64, tpu.core_type = #tpu.core_type<tc>, window_params = [{transform_indices = @transform_0, window_bounds = array<i64: 1, 16, 32>}, {transform_indices = @transform_1, window_bounds = array<i64: 1, 3, 16, 16>}, {transform_indices = @transform_2, window_bounds = array<i64: 1, 32, 64>}, {transform_indices = @transform_3, window_bounds = array<i64: 1, 3, 64, 192>}, {transform_indices = @transform_4, window_bounds = array<i64: 1, 3, 192, 48>}, {transform_indices = @transform_5, window_bounds = array<i64: 1, 8, 64>}, {transform_indices = @transform_6, window_bounds = array<i64: 1, 1, 128>}]} {
    %0 = tpu.iota {dimensions = array<i32: 0>} : vector<24x384xi32>
    %c16_i32 = arith.constant 16 : i32
    %1 = vector.broadcast %c16_i32 : i32 to vector<24x384xi32>
    %2 = arith.muli %0, %1 : vector<24x384xi32>
    %3 = tpu.iota {dimensions = array<i32: 1>} : vector<24x384xi32>
    %4 = arith.cmpi sge, %3, %2 : vector<24x384xi32>
    %c16_i32_0 = arith.constant 16 : i32
    %5 = vector.broadcast %c16_i32_0 : i32 to vector<24x384xi32>
    %6 = arith.addi %2, %5 : vector<24x384xi32>
    %7 = arith.cmpi slt, %3, %6 : vector<24x384xi32>
    %8 = arith.andi %4, %7 : vector<24x384xi1>
    %9 = arith.extui %8 : vector<24x384xi1> to vector<24x384xi32>
    %10 = arith.sitofp %9 : vector<24x384xi32> to vector<24x384xf32>
    %11 = tpu.iota {dimensions = array<i32: 1>} : vector<384x24xi32>
    %c16_i32_1 = arith.constant 16 : i32
    %12 = vector.broadcast %c16_i32_1 : i32 to vector<384x24xi32>
    %13 = arith.muli %11, %12 : vector<384x24xi32>
    %14 = tpu.iota {dimensions = array<i32: 0>} : vector<384x24xi32>
    %15 = arith.cmpi sge, %14, %13 : vector<384x24xi32>
    %c16_i32_2 = arith.constant 16 : i32
    %16 = vector.broadcast %c16_i32_2 : i32 to vector<384x24xi32>
    %17 = arith.addi %13, %16 : vector<384x24xi32>
    %18 = arith.cmpi slt, %14, %17 : vector<384x24xi32>
    %19 = arith.andi %15, %18 : vector<384x24xi1>
    %20 = arith.extui %19 : vector<384x24xi1> to vector<384x24xi32>
    %21 = arith.sitofp %20 : vector<384x24xi32> to vector<384x24xf32>
    %22 = tpu.iota {dimensions = array<i32: 1>} : vector<16x384xi32>
    %23 = arith.sitofp %22 : vector<16x384xi32> to vector<16x384xf32>
    %cst = arith.constant 5.000000e-01 : f32
    %24 = vector.broadcast %cst : f32 to vector<16x384xf32>
    %25 = arith.addf %23, %24 : vector<16x384xf32>
    %cst_3 = arith.constant 6.250000e-02 : f32
    %26 = vector.broadcast %cst_3 : f32 to vector<16x384xf32>
    %27 = arith.mulf %25, %26 : vector<16x384xf32>
    %28 = math.floor %27 : vector<16x384xf32>
    %29 = arith.fptosi %28 : vector<16x384xf32> to vector<16x384xi32>
    %c16_i32_4 = arith.constant 16 : i32
    %30 = vector.broadcast %c16_i32_4 : i32 to vector<16x384xi32>
    %31 = arith.muli %30, %29 : vector<16x384xi32>
    %32 = arith.subi %22, %31 : vector<16x384xi32>
    %33 = tpu.iota {dimensions = array<i32: 0>} : vector<16x384xi32>
    %34 = arith.cmpi eq, %32, %33 : vector<16x384xi32>
    %35 = arith.extui %34 : vector<16x384xi1> to vector<16x384xi32>
    %36 = arith.sitofp %35 : vector<16x384xi32> to vector<16x384xf32>
    %37 = tpu.iota {dimensions = array<i32: 0>} : vector<384x16xi32>
    %38 = arith.sitofp %37 : vector<384x16xi32> to vector<384x16xf32>
    %cst_5 = arith.constant 5.000000e-01 : f32
    %39 = vector.broadcast %cst_5 : f32 to vector<384x16xf32>
    %40 = arith.addf %38, %39 : vector<384x16xf32>
    %cst_6 = arith.constant 6.250000e-02 : f32
    %41 = vector.broadcast %cst_6 : f32 to vector<384x16xf32>
    %42 = arith.mulf %40, %41 : vector<384x16xf32>
    %43 = math.floor %42 : vector<384x16xf32>
    %44 = arith.fptosi %43 : vector<384x16xf32> to vector<384x16xi32>
    %c16_i32_7 = arith.constant 16 : i32
    %45 = vector.broadcast %c16_i32_7 : i32 to vector<384x16xi32>
    %46 = arith.muli %45, %44 : vector<384x16xi32>
    %47 = arith.subi %37, %46 : vector<384x16xi32>
    %48 = tpu.iota {dimensions = array<i32: 1>} : vector<384x16xi32>
    %49 = arith.cmpi eq, %47, %48 : vector<384x16xi32>
    %50 = arith.extui %49 : vector<384x16xi1> to vector<384x16xi32>
    %51 = arith.sitofp %50 : vector<384x16xi32> to vector<384x16xf32>
    %52 = tpu.iota {dimensions = array<i32: 0>} : vector<384x64xi32>
    %53 = tpu.iota {dimensions = array<i32: 1>} : vector<384x64xi32>
    %54 = arith.sitofp %52 : vector<384x64xi32> to vector<384x64xf32>
    %cst_8 = arith.constant 5.000000e-01 : f32
    %55 = vector.broadcast %cst_8 : f32 to vector<384x64xf32>
    %56 = arith.addf %54, %55 : vector<384x64xf32>
    %cst_9 = arith.constant 6.250000e-02 : f32
    %57 = vector.broadcast %cst_9 : f32 to vector<384x64xf32>
    %58 = arith.mulf %56, %57 : vector<384x64xf32>
    %59 = math.floor %58 : vector<384x64xf32>
    %60 = arith.fptosi %59 : vector<384x64xf32> to vector<384x64xi32>
    %61 = arith.sitofp %60 : vector<384x64xi32> to vector<384x64xf32>
    %cst_10 = arith.constant 5.000000e-01 : f32
    %62 = vector.broadcast %cst_10 : f32 to vector<384x64xf32>
    %63 = arith.addf %61, %62 : vector<384x64xf32>
    %cst_11 = arith.constant 1.250000e-01 : f32
    %64 = vector.broadcast %cst_11 : f32 to vector<384x64xf32>
    %65 = arith.mulf %63, %64 : vector<384x64xf32>
    %66 = math.floor %65 : vector<384x64xf32>
    %67 = arith.fptosi %66 : vector<384x64xf32> to vector<384x64xi32>
    %c8_i32 = arith.constant 8 : i32
    %68 = vector.broadcast %c8_i32 : i32 to vector<384x64xi32>
    %69 = arith.muli %68, %67 : vector<384x64xi32>
    %70 = arith.subi %60, %69 : vector<384x64xi32>
    %71 = arith.sitofp %53 : vector<384x64xi32> to vector<384x64xf32>
    %cst_12 = arith.constant 5.000000e-01 : f32
    %72 = vector.broadcast %cst_12 : f32 to vector<384x64xf32>
    %73 = arith.addf %71, %72 : vector<384x64xf32>
    %cst_13 = arith.constant 1.250000e-01 : f32
    %74 = vector.broadcast %cst_13 : f32 to vector<384x64xf32>
    %75 = arith.mulf %73, %74 : vector<384x64xf32>
    %76 = math.floor %75 : vector<384x64xf32>
    %77 = arith.fptosi %76 : vector<384x64xf32> to vector<384x64xi32>
    %78 = arith.cmpi eq, %70, %77 : vector<384x64xi32>
    %79 = arith.sitofp %52 : vector<384x64xi32> to vector<384x64xf32>
    %cst_14 = arith.constant 5.000000e-01 : f32
    %80 = vector.broadcast %cst_14 : f32 to vector<384x64xf32>
    %81 = arith.addf %79, %80 : vector<384x64xf32>
    %cst_15 = arith.constant 7.812500e-03 : f32
    %82 = vector.broadcast %cst_15 : f32 to vector<384x64xf32>
    %83 = arith.mulf %81, %82 : vector<384x64xf32>
    %84 = math.floor %83 : vector<384x64xf32>
    %85 = arith.fptosi %84 : vector<384x64xf32> to vector<384x64xi32>
    %c0_i32 = arith.constant 0 : i32
    %86 = vector.broadcast %c0_i32 : i32 to vector<384x64xi32>
    %87 = arith.cmpi eq, %85, %86 : vector<384x64xi32>
    %88 = arith.andi %87, %78 : vector<384x64xi1>
    %89 = arith.extui %88 : vector<384x64xi1> to vector<384x64xi32>
    %90 = arith.sitofp %89 : vector<384x64xi32> to vector<384x64xf32>
    %91 = arith.sitofp %52 : vector<384x64xi32> to vector<384x64xf32>
    %cst_16 = arith.constant 5.000000e-01 : f32
    %92 = vector.broadcast %cst_16 : f32 to vector<384x64xf32>
    %93 = arith.addf %91, %92 : vector<384x64xf32>
    %cst_17 = arith.constant 7.812500e-03 : f32
    %94 = vector.broadcast %cst_17 : f32 to vector<384x64xf32>
    %95 = arith.mulf %93, %94 : vector<384x64xf32>
    %96 = math.floor %95 : vector<384x64xf32>
    %97 = arith.fptosi %96 : vector<384x64xf32> to vector<384x64xi32>
    %c1_i32 = arith.constant 1 : i32
    %98 = vector.broadcast %c1_i32 : i32 to vector<384x64xi32>
    %99 = arith.cmpi eq, %97, %98 : vector<384x64xi32>
    %100 = arith.andi %99, %78 : vector<384x64xi1>
    %101 = arith.extui %100 : vector<384x64xi1> to vector<384x64xi32>
    %102 = arith.sitofp %101 : vector<384x64xi32> to vector<384x64xf32>
    %103 = arith.sitofp %52 : vector<384x64xi32> to vector<384x64xf32>
    %cst_18 = arith.constant 5.000000e-01 : f32
    %104 = vector.broadcast %cst_18 : f32 to vector<384x64xf32>
    %105 = arith.addf %103, %104 : vector<384x64xf32>
    %cst_19 = arith.constant 7.812500e-03 : f32
    %106 = vector.broadcast %cst_19 : f32 to vector<384x64xf32>
    %107 = arith.mulf %105, %106 : vector<384x64xf32>
    %108 = math.floor %107 : vector<384x64xf32>
    %109 = arith.fptosi %108 : vector<384x64xf32> to vector<384x64xi32>
    %c2_i32 = arith.constant 2 : i32
    %110 = vector.broadcast %c2_i32 : i32 to vector<384x64xi32>
    %111 = arith.cmpi eq, %109, %110 : vector<384x64xi32>
    %112 = arith.andi %111, %78 : vector<384x64xi1>
    %113 = arith.extui %112 : vector<384x64xi1> to vector<384x64xi32>
    %114 = arith.sitofp %113 : vector<384x64xi32> to vector<384x64xf32>
    %c0 = arith.constant 0 : index
    %c0_20 = arith.constant 0 : index
    %c0_21 = arith.constant 0 : index
    %c0_22 = arith.constant 0 : index
    %115 = vector.load %arg2[%c0, %c0_20, %c0_21, %c0_22] : memref<1x3x16x16xf32, #tpu.memory_space<vmem>>, vector<1x3x16x16xf32>
    %116 = vector.shape_cast %115 : vector<1x3x16x16xf32> to vector<3x16x16xf32>
    %117 = vector.extract_strided_slice %36 {offsets = [0, 0], sizes = [16, 128], strides = [1, 1]} : vector<16x384xf32> to vector<16x128xf32>
    %118 = vector.extract_strided_slice %116 {offsets = [0, 0, 0], sizes = [1, 16, 16], strides = [1, 1, 1]} : vector<3x16x16xf32> to vector<1x16x16xf32>
    %119 = vector.shape_cast %118 : vector<1x16x16xf32> to vector<16x16xf32>
    %cst_23 = arith.constant dense<0.000000e+00> : vector<16x128xf32>
    %120 = tpu.matmul %119, %117, %cst_23 {dimension_numbers = #tpu.dot_dimension_numbers<[1], [0], [0], [1], [0, 0, 1, 1], [], []>} : vector<16x16xf32>, vector<16x128xf32>, vector<16x128xf32> -> vector<16x128xf32>
    %121 = vector.extract_strided_slice %116 {offsets = [1, 0, 0], sizes = [1, 16, 16], strides = [1, 1, 1]} : vector<3x16x16xf32> to vector<1x16x16xf32>
    %122 = vector.shape_cast %121 : vector<1x16x16xf32> to vector<16x16xf32>
    %cst_24 = arith.constant dense<0.000000e+00> : vector<16x128xf32>
    %123 = tpu.matmul %122, %117, %cst_24 {dimension_numbers = #tpu.dot_dimension_numbers<[1], [0], [0], [1], [0, 0, 1, 1], [], []>} : vector<16x16xf32>, vector<16x128xf32>, vector<16x128xf32> -> vector<16x128xf32>
    %124 = vector.extract_strided_slice %116 {offsets = [2, 0, 0], sizes = [1, 16, 16], strides = [1, 1, 1]} : vector<3x16x16xf32> to vector<1x16x16xf32>
    %125 = vector.shape_cast %124 : vector<1x16x16xf32> to vector<16x16xf32>
    %cst_25 = arith.constant dense<0.000000e+00> : vector<16x128xf32>
    %126 = tpu.matmul %125, %117, %cst_25 {dimension_numbers = #tpu.dot_dimension_numbers<[1], [0], [0], [1], [0, 0, 1, 1], [], []>} : vector<16x16xf32>, vector<16x128xf32>, vector<16x128xf32> -> vector<16x128xf32>
    %127 = tpu.concatenate %120, %123, %126 in 1 : vector<16x128xf32>, vector<16x128xf32>, vector<16x128xf32> -> vector<16x384xf32>
    %cst_26 = arith.constant 0.000000e+00 : f32
    %128 = vector.broadcast %cst_26 : f32 to vector<16x384xf32>
    %129 = arith.cmpf ogt, %127, %128 : vector<16x384xf32>
    %cst_27 = arith.constant 0.000000e+00 : f32
    %cst_28 = arith.constant -1.000000e+30 : f32
    %130 = vector.broadcast %cst_27 : f32 to vector<16x384xf32>
    %131 = vector.broadcast %cst_28 : f32 to vector<16x384xf32>
    %132 = arith.select %129, %130, %131 : vector<16x384xi1>, vector<16x384xf32>
    %c0_29 = arith.constant 0 : index
    %c0_30 = arith.constant 0 : index
    %c0_31 = arith.constant 0 : index
    %133 = vector.load %arg1[%c0_29, %c0_30, %c0_31] : memref<1x16x32xf32, #tpu.memory_space<vmem>>, vector<1x16x32xf32>
    %134 = vector.shape_cast %133 : vector<1x16x32xf32> to vector<16x32xf32>
    %c0_32 = arith.constant 0 : index
    %c0_33 = arith.constant 0 : index
    %c0_34 = arith.constant 0 : index
    %135 = vector.load %arg3[%c0_32, %c0_33, %c0_34] : memref<1x32x64xf32, #tpu.memory_space<vmem>>, vector<1x32x64xf32>
    %136 = vector.shape_cast %135 : vector<1x32x64xf32> to vector<32x64xf32>
    %cst_35 = arith.constant dense<0.000000e+00> : vector<16x64xf32>
    %137 = tpu.matmul %134, %136, %cst_35 {dimension_numbers = #tpu.dot_dimension_numbers<[1], [0], [0], [1], [0, 0, 1, 1], [], []>} : vector<16x32xf32>, vector<32x64xf32>, vector<16x64xf32> -> vector<16x64xf32>
    %c0_36 = arith.constant 0 : index
    %c0_37 = arith.constant 0 : index
    %c0_38 = arith.constant 0 : index
    %138 = vector.load %arg6[%c0_36, %c0_37, %c0_38] : memref<1x8x64xf32, #tpu.memory_space<vmem>>, vector<1x1x64xf32>
    %139 = vector.shape_cast %138 : vector<1x1x64xf32> to vector<1x64xf32>
    %140 = vector.broadcast %139 : vector<1x64xf32> to vector<16x64xf32>
    %141 = arith.addf %137, %140 : vector<16x64xf32>
    %c0_39 = arith.constant 0 : index
    %c1 = arith.constant 1 : index
    %c0_40 = arith.constant 0 : index
    %142 = vector.load %arg6[%c0_39, %c1, %c0_40] : memref<1x8x64xf32, #tpu.memory_space<vmem>>, vector<1x1x64xf32>
    %143 = vector.shape_cast %142 : vector<1x1x64xf32> to vector<1x64xf32>
    %c0_41 = arith.constant 0 : index
    %c2 = arith.constant 2 : index
    %c0_42 = arith.constant 0 : index
    %144 = vector.load %arg6[%c0_41, %c2, %c0_42] : memref<1x8x64xf32, #tpu.memory_space<vmem>>, vector<1x1x64xf32>
    %145 = vector.shape_cast %144 : vector<1x1x64xf32> to vector<1x64xf32>
    %c0_43 = arith.constant 0 : index
    %c0_44 = arith.constant 0 : index
    %c0_45 = arith.constant 0 : index
    %c0_46 = arith.constant 0 : index
    %146 = vector.load %arg4[%c0_43, %c0_44, %c0_45, %c0_46] : memref<1x3x64x192xf32, #tpu.memory_space<vmem>>, vector<1x1x64x192xf32>
    %147 = vector.shape_cast %146 : vector<1x1x64x192xf32> to vector<64x192xf32>
    %cst_47 = arith.constant dense<0.000000e+00> : vector<16x192xf32>
    %148 = tpu.matmul %141, %147, %cst_47 {dimension_numbers = #tpu.dot_dimension_numbers<[1], [0], [0], [1], [0, 0, 1, 1], [], []>} : vector<16x64xf32>, vector<64x192xf32>, vector<16x192xf32> -> vector<16x192xf32>
    %c0_48 = arith.constant 0 : index
    %c0_49 = arith.constant 0 : index
    %c0_50 = arith.constant 0 : index
    %c0_51 = arith.constant 0 : index
    %149 = vector.load %arg5[%c0_48, %c0_49, %c0_50, %c0_51] : memref<1x3x192x48xf32, #tpu.memory_space<vmem>>, vector<1x1x192x48xf32>
    %150 = vector.shape_cast %149 : vector<1x1x192x48xf32> to vector<192x48xf32>
    %cst_52 = arith.constant dense<0.000000e+00> : vector<16x48xf32>
    %151 = tpu.matmul %148, %150, %cst_52 {dimension_numbers = #tpu.dot_dimension_numbers<[1], [0], [0], [1], [0, 0, 1, 1], [], []>} : vector<16x192xf32>, vector<192x48xf32>, vector<16x48xf32> -> vector<16x48xf32>
    %152 = vector.extract_strided_slice %151 {offsets = [0, 0], sizes = [16, 24], strides = [1, 1]} : vector<16x48xf32> to vector<16x24xf32>
    %153 = vector.extract_strided_slice %151 {offsets = [0, 24], sizes = [16, 24], strides = [1, 1]} : vector<16x48xf32> to vector<16x24xf32>
    %cst_53 = arith.constant dense<0.000000e+00> : vector<16x384xf32>
    %154 = tpu.matmul %152, %10, %cst_53 {dimension_numbers = #tpu.dot_dimension_numbers<[1], [0], [0], [1], [0, 0, 1, 1], [], []>} : vector<16x24xf32>, vector<24x384xf32>, vector<16x384xf32> -> vector<16x384xf32>
    %cst_54 = arith.constant dense<0.000000e+00> : vector<16x384xf32>
    %155 = tpu.matmul %153, %10, %cst_54 {dimension_numbers = #tpu.dot_dimension_numbers<[1], [0], [0], [1], [0, 0, 1, 1], [], []>} : vector<16x24xf32>, vector<24x384xf32>, vector<16x384xf32> -> vector<16x384xf32>
    %156 = arith.mulf %155, %36 : vector<16x384xf32>
    %cst_55 = arith.constant dense<0.000000e+00> : vector<384xf32>
    %157 = vector.multi_reduction <add>, %156, %cst_55 [0] : vector<16x384xf32> to vector<384xf32>
    %158 = vector.shape_cast %157 : vector<384xf32> to vector<1x384xf32>
    %159 = vector.broadcast %158 : vector<1x384xf32> to vector<16x384xf32>
    %160 = arith.addf %154, %159 : vector<16x384xf32>
    %cst_56 = arith.constant 0.000000e+00 : f32
    %161 = vector.broadcast %cst_56 : f32 to vector<16x384xf32>
    %162 = arith.cmpf oge, %160, %161 : vector<16x384xf32>
    %cst_57 = arith.constant 2.000000e-01 : f32
    %163 = vector.broadcast %cst_57 : f32 to vector<16x384xf32>
    %164 = arith.mulf %163, %160 : vector<16x384xf32>
    %165 = arith.select %162, %160, %164 : vector<16x384xi1>, vector<16x384xf32>
    %166 = arith.addf %165, %132 : vector<16x384xf32>
    %cst_58 = arith.constant dense<0xFF800000> : vector<24xf32>
    %167 = vector.multi_reduction <maximumf>, %153, %cst_58 [0] : vector<16x24xf32> to vector<24xf32>
    %168 = vector.shape_cast %167 : vector<24xf32> to vector<1x24xf32>
    %169 = vector.broadcast %168 : vector<1x24xf32> to vector<16x24xf32>
    %170 = arith.addf %152, %169 : vector<16x24xf32>
    %cst_59 = arith.constant 0.000000e+00 : f32
    %171 = vector.broadcast %cst_59 : f32 to vector<16x24xf32>
    %172 = arith.cmpf oge, %170, %171 : vector<16x24xf32>
    %cst_60 = arith.constant 2.000000e-01 : f32
    %173 = vector.broadcast %cst_60 : f32 to vector<16x24xf32>
    %174 = arith.mulf %173, %170 : vector<16x24xf32>
    %175 = arith.select %172, %170, %174 : vector<16x24xi1>, vector<16x24xf32>
    %cst_61 = arith.constant dense<0.000000e+00> : vector<16x384xf32>
    %176 = tpu.matmul %175, %10, %cst_61 {dimension_numbers = #tpu.dot_dimension_numbers<[1], [0], [0], [1], [0, 0, 1, 1], [], []>} : vector<16x24xf32>, vector<24x384xf32>, vector<16x384xf32> -> vector<16x384xf32>
    %177 = arith.subf %166, %176 : vector<16x384xf32>
    %178 = math.exp %177 : vector<16x384xf32>
    %cst_62 = arith.constant dense<0.000000e+00> : vector<16x24xf32>
    %179 = tpu.matmul %178, %21, %cst_62 {dimension_numbers = #tpu.dot_dimension_numbers<[1], [0], [0], [1], [0, 0, 1, 1], [], []>} : vector<16x384xf32>, vector<384x24xf32>, vector<16x24xf32> -> vector<16x24xf32>
    %180 = tpu.reciprocal %179 {approx = true} : vector<16x24xf32> -> vector<16x24xf32>
    %cst_63 = arith.constant dense<0.000000e+00> : vector<16x384xf32>
    %181 = tpu.matmul %180, %10, %cst_63 {dimension_numbers = #tpu.dot_dimension_numbers<[1], [0], [0], [1], [0, 0, 1, 1], [], []>} : vector<16x24xf32>, vector<24x384xf32>, vector<16x384xf32> -> vector<16x384xf32>
    %182 = arith.mulf %178, %181 : vector<16x384xf32>
    %cst_64 = arith.constant dense<0.000000e+00> : vector<384x192xf32>
    %183 = tpu.matmul %51, %148, %cst_64 {dimension_numbers = #tpu.dot_dimension_numbers<[1], [0], [0], [1], [0, 0, 1, 1], [], []>} : vector<384x16xf32>, vector<16x192xf32>, vector<384x192xf32> -> vector<384x192xf32>
    %184 = vector.extract_strided_slice %183 {offsets = [0, 0], sizes = [384, 64], strides = [1, 1]} : vector<384x192xf32> to vector<384x64xf32>
    %185 = arith.mulf %90, %184 : vector<384x64xf32>
    %186 = vector.extract_strided_slice %183 {offsets = [0, 64], sizes = [384, 64], strides = [1, 1]} : vector<384x192xf32> to vector<384x64xf32>
    %187 = arith.mulf %102, %186 : vector<384x64xf32>
    %188 = arith.addf %185, %187 : vector<384x64xf32>
    %189 = vector.extract_strided_slice %183 {offsets = [0, 128], sizes = [384, 64], strides = [1, 1]} : vector<384x192xf32> to vector<384x64xf32>
    %190 = arith.mulf %114, %189 : vector<384x64xf32>
    %191 = arith.addf %188, %190 : vector<384x64xf32>
    %cst_65 = arith.constant dense<0.000000e+00> : vector<16x64xf32>
    %192 = tpu.matmul %182, %191, %cst_65 {dimension_numbers = #tpu.dot_dimension_numbers<[1], [0], [0], [1], [0, 0, 1, 1], [], []>} : vector<16x384xf32>, vector<384x64xf32>, vector<16x64xf32> -> vector<16x64xf32>
    %193 = vector.broadcast %143 : vector<1x64xf32> to vector<16x64xf32>
    %194 = arith.mulf %192, %193 : vector<16x64xf32>
    %195 = vector.broadcast %145 : vector<1x64xf32> to vector<16x64xf32>
    %196 = arith.addf %194, %195 : vector<16x64xf32>
    %cst_66 = arith.constant 0.000000e+00 : f32
    %197 = vector.broadcast %cst_66 : f32 to vector<16x64xf32>
    %198 = arith.maximumf %196, %197 : vector<16x64xf32>
    %199 = arith.addf %198, %141 : vector<16x64xf32>
    %c0_67 = arith.constant 0 : index
    %c3 = arith.constant 3 : index
    %c0_68 = arith.constant 0 : index
    %200 = vector.load %arg6[%c0_67, %c3, %c0_68] : memref<1x8x64xf32, #tpu.memory_space<vmem>>, vector<1x1x64xf32>
    %201 = vector.shape_cast %200 : vector<1x1x64xf32> to vector<1x64xf32>
    %c0_69 = arith.constant 0 : index
    %c4 = arith.constant 4 : index
    %c0_70 = arith.constant 0 : index
    %202 = vector.load %arg6[%c0_69, %c4, %c0_70] : memref<1x8x64xf32, #tpu.memory_space<vmem>>, vector<1x1x64xf32>
    %203 = vector.shape_cast %202 : vector<1x1x64xf32> to vector<1x64xf32>
    %c0_71 = arith.constant 0 : index
    %c1_72 = arith.constant 1 : index
    %c0_73 = arith.constant 0 : index
    %c0_74 = arith.constant 0 : index
    %204 = vector.load %arg4[%c0_71, %c1_72, %c0_73, %c0_74] : memref<1x3x64x192xf32, #tpu.memory_space<vmem>>, vector<1x1x64x192xf32>
    %205 = vector.shape_cast %204 : vector<1x1x64x192xf32> to vector<64x192xf32>
    %cst_75 = arith.constant dense<0.000000e+00> : vector<16x192xf32>
    %206 = tpu.matmul %199, %205, %cst_75 {dimension_numbers = #tpu.dot_dimension_numbers<[1], [0], [0], [1], [0, 0, 1, 1], [], []>} : vector<16x64xf32>, vector<64x192xf32>, vector<16x192xf32> -> vector<16x192xf32>
    %c0_76 = arith.constant 0 : index
    %c1_77 = arith.constant 1 : index
    %c0_78 = arith.constant 0 : index
    %c0_79 = arith.constant 0 : index
    %207 = vector.load %arg5[%c0_76, %c1_77, %c0_78, %c0_79] : memref<1x3x192x48xf32, #tpu.memory_space<vmem>>, vector<1x1x192x48xf32>
    %208 = vector.shape_cast %207 : vector<1x1x192x48xf32> to vector<192x48xf32>
    %cst_80 = arith.constant dense<0.000000e+00> : vector<16x48xf32>
    %209 = tpu.matmul %206, %208, %cst_80 {dimension_numbers = #tpu.dot_dimension_numbers<[1], [0], [0], [1], [0, 0, 1, 1], [], []>} : vector<16x192xf32>, vector<192x48xf32>, vector<16x48xf32> -> vector<16x48xf32>
    %210 = vector.extract_strided_slice %209 {offsets = [0, 0], sizes = [16, 24], strides = [1, 1]} : vector<16x48xf32> to vector<16x24xf32>
    %211 = vector.extract_strided_slice %209 {offsets = [0, 24], sizes = [16, 24], strides = [1, 1]} : vector<16x48xf32> to vector<16x24xf32>
    %cst_81 = arith.constant dense<0.000000e+00> : vector<16x384xf32>
    %212 = tpu.matmul %210, %10, %cst_81 {dimension_numbers = #tpu.dot_dimension_numbers<[1], [0], [0], [1], [0, 0, 1, 1], [], []>} : vector<16x24xf32>, vector<24x384xf32>, vector<16x384xf32> -> vector<16x384xf32>
    %cst_82 = arith.constant dense<0.000000e+00> : vector<16x384xf32>
    %213 = tpu.matmul %211, %10, %cst_82 {dimension_numbers = #tpu.dot_dimension_numbers<[1], [0], [0], [1], [0, 0, 1, 1], [], []>} : vector<16x24xf32>, vector<24x384xf32>, vector<16x384xf32> -> vector<16x384xf32>
    %214 = arith.mulf %213, %36 : vector<16x384xf32>
    %cst_83 = arith.constant dense<0.000000e+00> : vector<384xf32>
    %215 = vector.multi_reduction <add>, %214, %cst_83 [0] : vector<16x384xf32> to vector<384xf32>
    %216 = vector.shape_cast %215 : vector<384xf32> to vector<1x384xf32>
    %217 = vector.broadcast %216 : vector<1x384xf32> to vector<16x384xf32>
    %218 = arith.addf %212, %217 : vector<16x384xf32>
    %cst_84 = arith.constant 0.000000e+00 : f32
    %219 = vector.broadcast %cst_84 : f32 to vector<16x384xf32>
    %220 = arith.cmpf oge, %218, %219 : vector<16x384xf32>
    %cst_85 = arith.constant 2.000000e-01 : f32
    %221 = vector.broadcast %cst_85 : f32 to vector<16x384xf32>
    %222 = arith.mulf %221, %218 : vector<16x384xf32>
    %223 = arith.select %220, %218, %222 : vector<16x384xi1>, vector<16x384xf32>
    %224 = arith.addf %223, %132 : vector<16x384xf32>
    %cst_86 = arith.constant dense<0xFF800000> : vector<24xf32>
    %225 = vector.multi_reduction <maximumf>, %211, %cst_86 [0] : vector<16x24xf32> to vector<24xf32>
    %226 = vector.shape_cast %225 : vector<24xf32> to vector<1x24xf32>
    %227 = vector.broadcast %226 : vector<1x24xf32> to vector<16x24xf32>
    %228 = arith.addf %210, %227 : vector<16x24xf32>
    %cst_87 = arith.constant 0.000000e+00 : f32
    %229 = vector.broadcast %cst_87 : f32 to vector<16x24xf32>
    %230 = arith.cmpf oge, %228, %229 : vector<16x24xf32>
    %cst_88 = arith.constant 2.000000e-01 : f32
    %231 = vector.broadcast %cst_88 : f32 to vector<16x24xf32>
    %232 = arith.mulf %231, %228 : vector<16x24xf32>
    %233 = arith.select %230, %228, %232 : vector<16x24xi1>, vector<16x24xf32>
    %cst_89 = arith.constant dense<0.000000e+00> : vector<16x384xf32>
    %234 = tpu.matmul %233, %10, %cst_89 {dimension_numbers = #tpu.dot_dimension_numbers<[1], [0], [0], [1], [0, 0, 1, 1], [], []>} : vector<16x24xf32>, vector<24x384xf32>, vector<16x384xf32> -> vector<16x384xf32>
    %235 = arith.subf %224, %234 : vector<16x384xf32>
    %236 = math.exp %235 : vector<16x384xf32>
    %cst_90 = arith.constant dense<0.000000e+00> : vector<16x24xf32>
    %237 = tpu.matmul %236, %21, %cst_90 {dimension_numbers = #tpu.dot_dimension_numbers<[1], [0], [0], [1], [0, 0, 1, 1], [], []>} : vector<16x384xf32>, vector<384x24xf32>, vector<16x24xf32> -> vector<16x24xf32>
    %238 = tpu.reciprocal %237 {approx = true} : vector<16x24xf32> -> vector<16x24xf32>
    %cst_91 = arith.constant dense<0.000000e+00> : vector<16x384xf32>
    %239 = tpu.matmul %238, %10, %cst_91 {dimension_numbers = #tpu.dot_dimension_numbers<[1], [0], [0], [1], [0, 0, 1, 1], [], []>} : vector<16x24xf32>, vector<24x384xf32>, vector<16x384xf32> -> vector<16x384xf32>
    %240 = arith.mulf %236, %239 : vector<16x384xf32>
    %cst_92 = arith.constant dense<0.000000e+00> : vector<384x192xf32>
    %241 = tpu.matmul %51, %206, %cst_92 {dimension_numbers = #tpu.dot_dimension_numbers<[1], [0], [0], [1], [0, 0, 1, 1], [], []>} : vector<384x16xf32>, vector<16x192xf32>, vector<384x192xf32> -> vector<384x192xf32>
    %242 = vector.extract_strided_slice %241 {offsets = [0, 0], sizes = [384, 64], strides = [1, 1]} : vector<384x192xf32> to vector<384x64xf32>
    %243 = arith.mulf %90, %242 : vector<384x64xf32>
    %244 = vector.extract_strided_slice %241 {offsets = [0, 64], sizes = [384, 64], strides = [1, 1]} : vector<384x192xf32> to vector<384x64xf32>
    %245 = arith.mulf %102, %244 : vector<384x64xf32>
    %246 = arith.addf %243, %245 : vector<384x64xf32>
    %247 = vector.extract_strided_slice %241 {offsets = [0, 128], sizes = [384, 64], strides = [1, 1]} : vector<384x192xf32> to vector<384x64xf32>
    %248 = arith.mulf %114, %247 : vector<384x64xf32>
    %249 = arith.addf %246, %248 : vector<384x64xf32>
    %cst_93 = arith.constant dense<0.000000e+00> : vector<16x64xf32>
    %250 = tpu.matmul %240, %249, %cst_93 {dimension_numbers = #tpu.dot_dimension_numbers<[1], [0], [0], [1], [0, 0, 1, 1], [], []>} : vector<16x384xf32>, vector<384x64xf32>, vector<16x64xf32> -> vector<16x64xf32>
    %251 = vector.broadcast %201 : vector<1x64xf32> to vector<16x64xf32>
    %252 = arith.mulf %250, %251 : vector<16x64xf32>
    %253 = vector.broadcast %203 : vector<1x64xf32> to vector<16x64xf32>
    %254 = arith.addf %252, %253 : vector<16x64xf32>
    %cst_94 = arith.constant 0.000000e+00 : f32
    %255 = vector.broadcast %cst_94 : f32 to vector<16x64xf32>
    %256 = arith.maximumf %254, %255 : vector<16x64xf32>
    %257 = arith.addf %256, %199 : vector<16x64xf32>
    %c0_95 = arith.constant 0 : index
    %c5 = arith.constant 5 : index
    %c0_96 = arith.constant 0 : index
    %258 = vector.load %arg6[%c0_95, %c5, %c0_96] : memref<1x8x64xf32, #tpu.memory_space<vmem>>, vector<1x1x64xf32>
    %259 = vector.shape_cast %258 : vector<1x1x64xf32> to vector<1x64xf32>
    %c0_97 = arith.constant 0 : index
    %c6 = arith.constant 6 : index
    %c0_98 = arith.constant 0 : index
    %260 = vector.load %arg6[%c0_97, %c6, %c0_98] : memref<1x8x64xf32, #tpu.memory_space<vmem>>, vector<1x1x64xf32>
    %261 = vector.shape_cast %260 : vector<1x1x64xf32> to vector<1x64xf32>
    %c0_99 = arith.constant 0 : index
    %c2_100 = arith.constant 2 : index
    %c0_101 = arith.constant 0 : index
    %c0_102 = arith.constant 0 : index
    %262 = vector.load %arg4[%c0_99, %c2_100, %c0_101, %c0_102] : memref<1x3x64x192xf32, #tpu.memory_space<vmem>>, vector<1x1x64x192xf32>
    %263 = vector.shape_cast %262 : vector<1x1x64x192xf32> to vector<64x192xf32>
    %cst_103 = arith.constant dense<0.000000e+00> : vector<16x192xf32>
    %264 = tpu.matmul %257, %263, %cst_103 {dimension_numbers = #tpu.dot_dimension_numbers<[1], [0], [0], [1], [0, 0, 1, 1], [], []>} : vector<16x64xf32>, vector<64x192xf32>, vector<16x192xf32> -> vector<16x192xf32>
    %c0_104 = arith.constant 0 : index
    %c2_105 = arith.constant 2 : index
    %c0_106 = arith.constant 0 : index
    %c0_107 = arith.constant 0 : index
    %265 = vector.load %arg5[%c0_104, %c2_105, %c0_106, %c0_107] : memref<1x3x192x48xf32, #tpu.memory_space<vmem>>, vector<1x1x192x48xf32>
    %266 = vector.shape_cast %265 : vector<1x1x192x48xf32> to vector<192x48xf32>
    %cst_108 = arith.constant dense<0.000000e+00> : vector<16x48xf32>
    %267 = tpu.matmul %264, %266, %cst_108 {dimension_numbers = #tpu.dot_dimension_numbers<[1], [0], [0], [1], [0, 0, 1, 1], [], []>} : vector<16x192xf32>, vector<192x48xf32>, vector<16x48xf32> -> vector<16x48xf32>
    %268 = vector.extract_strided_slice %267 {offsets = [0, 0], sizes = [16, 24], strides = [1, 1]} : vector<16x48xf32> to vector<16x24xf32>
    %269 = vector.extract_strided_slice %267 {offsets = [0, 24], sizes = [16, 24], strides = [1, 1]} : vector<16x48xf32> to vector<16x24xf32>
    %cst_109 = arith.constant dense<0.000000e+00> : vector<16x384xf32>
    %270 = tpu.matmul %268, %10, %cst_109 {dimension_numbers = #tpu.dot_dimension_numbers<[1], [0], [0], [1], [0, 0, 1, 1], [], []>} : vector<16x24xf32>, vector<24x384xf32>, vector<16x384xf32> -> vector<16x384xf32>
    %cst_110 = arith.constant dense<0.000000e+00> : vector<16x384xf32>
    %271 = tpu.matmul %269, %10, %cst_110 {dimension_numbers = #tpu.dot_dimension_numbers<[1], [0], [0], [1], [0, 0, 1, 1], [], []>} : vector<16x24xf32>, vector<24x384xf32>, vector<16x384xf32> -> vector<16x384xf32>
    %272 = arith.mulf %271, %36 : vector<16x384xf32>
    %cst_111 = arith.constant dense<0.000000e+00> : vector<384xf32>
    %273 = vector.multi_reduction <add>, %272, %cst_111 [0] : vector<16x384xf32> to vector<384xf32>
    %274 = vector.shape_cast %273 : vector<384xf32> to vector<1x384xf32>
    %275 = vector.broadcast %274 : vector<1x384xf32> to vector<16x384xf32>
    %276 = arith.addf %270, %275 : vector<16x384xf32>
    %cst_112 = arith.constant 0.000000e+00 : f32
    %277 = vector.broadcast %cst_112 : f32 to vector<16x384xf32>
    %278 = arith.cmpf oge, %276, %277 : vector<16x384xf32>
    %cst_113 = arith.constant 2.000000e-01 : f32
    %279 = vector.broadcast %cst_113 : f32 to vector<16x384xf32>
    %280 = arith.mulf %279, %276 : vector<16x384xf32>
    %281 = arith.select %278, %276, %280 : vector<16x384xi1>, vector<16x384xf32>
    %282 = arith.addf %281, %132 : vector<16x384xf32>
    %cst_114 = arith.constant dense<0xFF800000> : vector<24xf32>
    %283 = vector.multi_reduction <maximumf>, %269, %cst_114 [0] : vector<16x24xf32> to vector<24xf32>
    %284 = vector.shape_cast %283 : vector<24xf32> to vector<1x24xf32>
    %285 = vector.broadcast %284 : vector<1x24xf32> to vector<16x24xf32>
    %286 = arith.addf %268, %285 : vector<16x24xf32>
    %cst_115 = arith.constant 0.000000e+00 : f32
    %287 = vector.broadcast %cst_115 : f32 to vector<16x24xf32>
    %288 = arith.cmpf oge, %286, %287 : vector<16x24xf32>
    %cst_116 = arith.constant 2.000000e-01 : f32
    %289 = vector.broadcast %cst_116 : f32 to vector<16x24xf32>
    %290 = arith.mulf %289, %286 : vector<16x24xf32>
    %291 = arith.select %288, %286, %290 : vector<16x24xi1>, vector<16x24xf32>
    %cst_117 = arith.constant dense<0.000000e+00> : vector<16x384xf32>
    %292 = tpu.matmul %291, %10, %cst_117 {dimension_numbers = #tpu.dot_dimension_numbers<[1], [0], [0], [1], [0, 0, 1, 1], [], []>} : vector<16x24xf32>, vector<24x384xf32>, vector<16x384xf32> -> vector<16x384xf32>
    %293 = arith.subf %282, %292 : vector<16x384xf32>
    %294 = math.exp %293 : vector<16x384xf32>
    %cst_118 = arith.constant dense<0.000000e+00> : vector<16x24xf32>
    %295 = tpu.matmul %294, %21, %cst_118 {dimension_numbers = #tpu.dot_dimension_numbers<[1], [0], [0], [1], [0, 0, 1, 1], [], []>} : vector<16x384xf32>, vector<384x24xf32>, vector<16x24xf32> -> vector<16x24xf32>
    %296 = tpu.reciprocal %295 {approx = true} : vector<16x24xf32> -> vector<16x24xf32>
    %cst_119 = arith.constant dense<0.000000e+00> : vector<16x384xf32>
    %297 = tpu.matmul %296, %10, %cst_119 {dimension_numbers = #tpu.dot_dimension_numbers<[1], [0], [0], [1], [0, 0, 1, 1], [], []>} : vector<16x24xf32>, vector<24x384xf32>, vector<16x384xf32> -> vector<16x384xf32>
    %298 = arith.mulf %294, %297 : vector<16x384xf32>
    %cst_120 = arith.constant dense<0.000000e+00> : vector<384x192xf32>
    %299 = tpu.matmul %51, %264, %cst_120 {dimension_numbers = #tpu.dot_dimension_numbers<[1], [0], [0], [1], [0, 0, 1, 1], [], []>} : vector<384x16xf32>, vector<16x192xf32>, vector<384x192xf32> -> vector<384x192xf32>
    %300 = vector.extract_strided_slice %299 {offsets = [0, 0], sizes = [384, 64], strides = [1, 1]} : vector<384x192xf32> to vector<384x64xf32>
    %301 = arith.mulf %90, %300 : vector<384x64xf32>
    %302 = vector.extract_strided_slice %299 {offsets = [0, 64], sizes = [384, 64], strides = [1, 1]} : vector<384x192xf32> to vector<384x64xf32>
    %303 = arith.mulf %102, %302 : vector<384x64xf32>
    %304 = arith.addf %301, %303 : vector<384x64xf32>
    %305 = vector.extract_strided_slice %299 {offsets = [0, 128], sizes = [384, 64], strides = [1, 1]} : vector<384x192xf32> to vector<384x64xf32>
    %306 = arith.mulf %114, %305 : vector<384x64xf32>
    %307 = arith.addf %304, %306 : vector<384x64xf32>
    %cst_121 = arith.constant dense<0.000000e+00> : vector<16x64xf32>
    %308 = tpu.matmul %298, %307, %cst_121 {dimension_numbers = #tpu.dot_dimension_numbers<[1], [0], [0], [1], [0, 0, 1, 1], [], []>} : vector<16x384xf32>, vector<384x64xf32>, vector<16x64xf32> -> vector<16x64xf32>
    %309 = vector.broadcast %259 : vector<1x64xf32> to vector<16x64xf32>
    %310 = arith.mulf %308, %309 : vector<16x64xf32>
    %311 = vector.broadcast %261 : vector<1x64xf32> to vector<16x64xf32>
    %312 = arith.addf %310, %311 : vector<16x64xf32>
    %cst_122 = arith.constant 0.000000e+00 : f32
    %313 = vector.broadcast %cst_122 : f32 to vector<16x64xf32>
    %314 = arith.maximumf %312, %313 : vector<16x64xf32>
    %315 = arith.addf %314, %257 : vector<16x64xf32>
    %cst_123 = arith.constant dense<0.000000e+00> : vector<64xf32>
    %316 = vector.multi_reduction <add>, %315, %cst_123 [0] : vector<16x64xf32> to vector<64xf32>
    %317 = vector.shape_cast %316 : vector<64xf32> to vector<1x64xf32>
    %cst_124 = arith.constant 1.600000e+01 : f32
    %318 = vector.broadcast %cst_124 : f32 to vector<1x64xf32>
    %319 = arith.divf %317, %318 : vector<1x64xf32>
    %cst_125 = arith.constant dense<0xFF800000> : vector<64xf32>
    %320 = vector.multi_reduction <maximumf>, %315, %cst_125 [0] : vector<16x64xf32> to vector<64xf32>
    %321 = vector.shape_cast %320 : vector<64xf32> to vector<1x64xf32>
    %322 = tpu.concatenate %319, %321 in 1 : vector<1x64xf32>, vector<1x64xf32> -> vector<1x128xf32>
    %c0_126 = arith.constant 0 : index
    %c0_127 = arith.constant 0 : index
    %c0_128 = arith.constant 0 : index
    %323 = vector.load %arg7[%c0_126, %c0_127, %c0_128] : memref<1x1x128xf32, #tpu.memory_space<vmem>>, vector<1x1x128xf32>
    %324 = vector.shape_cast %323 : vector<1x1x128xf32> to vector<1x128xf32>
    %325 = vector.shape_cast %322 : vector<1x128xf32> to vector<1x1x128xf32>
    tpu.vector_store %arg7[%c0_126, %c0_127, %c0_128], %325 {strides = array<i32>} : memref<1x1x128xf32, #tpu.memory_space<vmem>>, vector<1x1x128xf32>,
    return
  }
  func.func @transform_0(%arg0: i32) -> (i32, i32, i32) {
    %c0_i32 = arith.constant 0 : i32
    %c0_i32_0 = arith.constant 0 : i32
    %c0_i32_1 = arith.constant 0 : i32
    return %arg0, %c0_i32, %c0_i32_0 : i32, i32, i32
  }
  func.func @transform_1(%arg0: i32) -> (i32, i32, i32, i32) {
    %c0_i32 = arith.constant 0 : i32
    %c0_i32_0 = arith.constant 0 : i32
    %c0_i32_1 = arith.constant 0 : i32
    %c0_i32_2 = arith.constant 0 : i32
    return %arg0, %c0_i32, %c0_i32_0, %c0_i32_1 : i32, i32, i32, i32
  }
  func.func @transform_2(%arg0: i32) -> (i32, i32, i32) {
    %c0_i32 = arith.constant 0 : i32
    %c0_i32_0 = arith.constant 0 : i32
    %c0_i32_1 = arith.constant 0 : i32
    return %arg0, %c0_i32, %c0_i32_0 : i32, i32, i32
  }
  func.func @transform_3(%arg0: i32) -> (i32, i32, i32, i32) {
    %c0_i32 = arith.constant 0 : i32
    %c0_i32_0 = arith.constant 0 : i32
    %c0_i32_1 = arith.constant 0 : i32
    %c0_i32_2 = arith.constant 0 : i32
    return %arg0, %c0_i32, %c0_i32_0, %c0_i32_1 : i32, i32, i32, i32
  }
  func.func @transform_4(%arg0: i32) -> (i32, i32, i32, i32) {
    %c0_i32 = arith.constant 0 : i32
    %c0_i32_0 = arith.constant 0 : i32
    %c0_i32_1 = arith.constant 0 : i32
    %c0_i32_2 = arith.constant 0 : i32
    return %arg0, %c0_i32, %c0_i32_0, %c0_i32_1 : i32, i32, i32, i32
  }
  func.func @transform_5(%arg0: i32) -> (i32, i32, i32) {
    %c0_i32 = arith.constant 0 : i32
    %c0_i32_0 = arith.constant 0 : i32
    %c0_i32_1 = arith.constant 0 : i32
    return %arg0, %c0_i32, %c0_i32_0 : i32, i32, i32
  }
  func.func @transform_6(%arg0: i32) -> (i32, i32, i32) {
    %c0_i32 = arith.constant 0 : i32
    %c0_i32_0 = arith.constant 0 : i32
    %c0_i32_1 = arith.constant 0 : i32
    return %arg0, %c0_i32, %c0_i32_0 : i32, i32, i32
  }
}

</mosaic_0001>

<bundles_post_ra>
// kernel: forward.1
= control target key start
LH: loop header
LB: loop body
LE: loop exit
PB: predicated region body
PF: predicated region fallthrough
CT: control target
= control target key end

     0   :  { %s11748_s21 = smov 0   ;;  %s18575_s0 = inlined_call_operand.vmem [shape: f32[2,16,32], index: 0, kind: input, shape index: {}]   ;;  %s18576_s1 = inlined_call_operand.vmem [shape: f32[2,3,16,16], index: 1, kind: input, shape index: {}]   ;;  %s18577_s2 = inlined_call_operand.vmem [shape: f32[2,32,64], index: 2, kind: input, shape index: {}]   ;;  %s18578_s3 = inlined_call_operand.vmem [shape: f32[2,3,64,192], index: 3, kind: input, shape index: {}]   ;;  %s18579_s4 = inlined_call_operand.vmem [shape: f32[2,3,192,48], index: 4, kind: input, shape index: {}]   ;;  %s18580_s5 = inlined_call_operand.vmem [shape: f32[2,8,64], index: 5, kind: input, shape index: {}]   ;;  %s18581_s6 = inlined_call_operand.vmem [shape: f32[2,1,128], index: 6, kind: output, shape index: {}]  }
   0x1 LB: > { %s9073_s22 = sadd.s32 4294967295, %s11704_s21   ;;  %p9077_p0 = scmp.ge.s32.totalorder %s11704_s21, 1  ;;  %s11704_s21 = sphi %s11748_s21, %s16_s21  }
   0x2   : > { %p261_p1 = scmp.lt.s32.totalorder %s11704_s21, 3 }
   0x4   : > { %p262_p2 = pnand %p9077_p0, %p261_p1 }
   0x6   : > { %265 = sbr.rel (%p262_p2) target bundleno = 5659 (0x161b), region = 44 }
   0xd   : > { %v345_v0 = vlaneseq  ;;  %p313_p3 = scmp.lt.s32.totalorder %s9073_s22, 1  ;;  %vm18583_vm0 = vcmask 130048   ;;  %v18622_v20 = vmov 1.0|1.0   ;;  %vm2590_vm4 = vcmask 261120   ;;  %s11710_s25 = smov 104  }
   0xe   : > { %v18614_v52 = vmov 0.0   ;;  %v18606_v56 = vmov 0.0|0.0   ;;  %vm18582_vm5 = vcmask 523264  }
   0xf   : > { %v11756_v1 = vand.u32 127, %v345_v0  ;;  %s21460_s22 = smov (!%p313_p3, %s9073_s22), 1  ;;  %v11775_v8 = vshrl.u32 %v345_v0, 7 }
  0x10   : > { %s11336_s23 = smul.u32 48, %s21460_s22  ;;  %s9901_s27 = sshll.u32 %s21460_s22, 5 }
  0x11   : > { %v691_v2 = vcvt.s32.f32 %v11756_v1  ;;  %s327_s30 = scalar_lea.vmem %s18577_s2, %s9901_s27  ;;  %s11337_s7 = smul.u32 384, %s21460_s22  ;;  %v11782_v11 = vadd.s32 8, %v11775_v8 }
  0x12   : > { %s11767_s26 = scalar_lea.vmem %s18576_s1, %s11336_s23  ;;  %v2581_v13 = vld [vmem:[%s327_s30] sm:$0xff]  ;;  %v2582_v14 = vld [vmem:[%s327_s30 + $0x8] sm:$0xff]  ;;  %s9900_s8 = sshll.u32 %s21460_s22, 4  ;;  %v2583_v18 = vld [vmem:[%s327_s30 + $0x10] sm:$0xff] }
  0x13   : > { %v11762_v3 = vadd.f32 0.5, %v691_v2  ;;  %v2319_v4 = vld [vmem:[%s11767_s26 + $0x10] sm:$0xff]  ;;  %v2317_v6 = vld [vmem:[%s11767_s26] sm:$0xff]  ;;  %s11791_s11 = scalar_lea.vmem %s18578_s3, %s11337_s7  ;;  %v10678_v16 = vpack.c.bf16 %v2582_v14, %v2581_v13  ;;  %v2584_v19 = vld [vmem:[%s327_s30 + $0x18] sm:$0xff]  ;;  %s317_s14 = scalar_lea.vmem %s18575_s0, %s9900_s8 }
  0x14   : > { %10327 = vmatprep.mubr.msk.f32.mxu1 %vm18583_vm0, %v2319_v4  ;;  %10320 = vmatprep.mubr.msk.f32.mxu0 %vm18583_vm0, %v2317_v6  ;;  %v2675_v21 = vld [vmem:[%s11791_s11 + $0x8] sm:$0xff]  ;;  %v2677_v22 = vld [vmem:[%s11791_s11 + $0x18] sm:$0xff]  ;;  %v10682_v25 = vpack.c.bf16 %v2584_v19, %v2583_v18  ;;  %v2579_v26 = vld [vmem:[%s317_s14] sm:$0xff]  ;;  %s11338_s15 = smul.u32 576, %s21460_s22  ;;  %s9085_s19 = sshll.u32 %s21460_s22, 3 }
  0x15   : > { %19405 = vst [vmem:[#allocation2_spill] sm:$0xff] %v11762_v3  ;;  %v697_v5 = vmul.f32 0.0625, %v11762_v3  ;;  %v2320_v23 = vld [vmem:[%s11767_s26 + $0x18] sm:$0xff]  ;;  %v2318_v24 = vld [vmem:[%s11767_s26 + $0x8] sm:$0xff]  ;;  %v10686_v27 = vpack.c.bf16 %v2677_v22, %v2675_v21  ;;  %v2674_v28 = vld [vmem:[%s11791_s11] sm:$0xff]  ;;  %s11907_s24 = scalar_lea.vmem %s18580_s5, %s9085_s19  ;;  %v19485_v3 = vmov 0  ;;  %s344_s29 = scalar_lea.vmem %s18581_s6, %s21460_s22 }
  0x16   : > { %v2676_v29 = vld [vmem:[%s11791_s11 + $0x10] sm:$0xff]  ;;  %v2321_v30 = vld [vmem:[%s11767_s26 + $0x20] sm:$0xff]  ;;  %v2322_v31 = vld [vmem:[%s11767_s26 + $0x28] sm:$0xff]  ;;  %s11859_s18 = scalar_lea.vmem %s18579_s4, %s11338_s15  ;;  %s11712_s26 = smov 64  }
  0x17   : > { %v700_v7 = vfloor.f32 %v697_v5  ;;  %v10688_v32 = vpack.c.bf16 %v2676_v29, %v2674_v28  ;;  %v2580_v33 = vld [vmem:[%s317_s14 + $0x8] sm:$0xff]  ;;  %v2681_v35 = vld [vmem:[%s11791_s11 + $0x38] sm:$0xff]  ;;  %v2678_v37 = vld [vmem:[%s11791_s11 + $0x20] sm:$0xff] }
  0x18   : > { %v2679_v34 = vld [vmem:[%s11791_s11 + $0x28] sm:$0xff]  ;;  %v2680_v38 = vld [vmem:[%s11791_s11 + $0x30] sm:$0xff]  ;;  %v2685_v41 = vld [vmem:[%s11791_s11 + $0x58] sm:$0xff] }
  0x19   : > { %v11339_v9 = vtrunc.f32 %v700_v7  ;;  %v10690_v36 = vpack.c.bf16 %v2681_v35, %v2679_v34  ;;  %v10692_v39 = vpack.c.bf16 %v2680_v38, %v2678_v37  ;;  %v2683_v40 = vld [vmem:[%s11791_s11 + $0x48] sm:$0xff]  ;;  %v2682_v43 = vld [vmem:[%s11791_s11 + $0x40] sm:$0xff]  ;;  %v2684_v44 = vld [vmem:[%s11791_s11 + $0x50] sm:$0xff] }
  0x1a   : > { %v10694_v42 = vpack.c.bf16 %v2685_v41, %v2683_v40  ;;  %v10696_v45 = vpack.c.bf16 %v2684_v44, %v2682_v43  ;;  %v2687_v46 = vld [vmem:[%s11791_s11 + $0x68] sm:$0xff]  ;;  %v2689_v47 = vld [vmem:[%s11791_s11 + $0x78] sm:$0xff]  ;;  %v2686_v49 = vld [vmem:[%s11791_s11 + $0x60] sm:$0xff] }
  0x1b   : > { %v11340_v10 = vcvt.f32.s32 %v11339_v9  ;;  %v10698_v48 = vpack.c.bf16 %v2689_v47, %v2687_v46  ;;  %v2688_v50 = vld [vmem:[%s11791_s11 + $0x70] sm:$0xff]  ;;  %v2774_v53 = vld [vmem:[%s11859_s18] sm:$0xff]  ;;  %v2775_v54 = vld [vmem:[%s11859_s18 + $0x8] sm:$0xff]  ;;  %v12323_v46 = vadd.s32 64, %v11775_v8 }
  0x1c   : > { %v10700_v51 = vpack.c.bf16 %v2688_v50, %v2686_v49  ;;  %v2776_v55 = vld [vmem:[%s11859_s18 + $0x10] sm:$0xff]  ;;  %v10703_v57 = vpack.c.bf16 %v2775_v54, %v2774_v53  ;;  %v2777_v58 = vld [vmem:[%s11859_s18 + $0x18] sm:$0xff]  ;;  %v2778_v60 = vld [vmem:[%s11859_s18 + $0x20] sm:$0xff]  ;;  %v349_v49 = vmul.u32 16, %v11775_v8  ;;  %v350_v50 = vmul.u32 16, %v11782_v11 }
  0x1d   : > { %v706_v12 = vmul.u32 16, %v11340_v10  ;;  %v10706_v59 = vpack.c.bf16 %v2777_v58, %v2776_v55  ;;  %v2779_v61 = vld [vmem:[%s11859_s18 + $0x28] sm:$0xff]  ;;  %v2780_v63 = vld [vmem:[%s11859_s18 + $0x30] sm:$0xff]  ;;  %v2781_v0 = vld [vmem:[%s11859_s18 + $0x38] sm:$0xff]  ;;  %v11950_v53 = vadd.s32 256, %v11756_v1  ;;  %v11953_v54 = vadd.s32 16, %v11775_v8 }
  0x1e   : > { %v10709_v62 = vpack.c.bf16 %v2779_v61, %v2778_v60  ;;  %v10712_v2 = vpack.c.bf16 %v2781_v0, %v2780_v63  ;;  %v2782_v4 = vld [vmem:[%s11859_s18 + $0x40] sm:$0xff]  ;;  %v2783_v5 = vld [vmem:[%s11859_s18 + $0x48] sm:$0xff]  ;;  %v2784_v7 = vld [vmem:[%s11859_s18 + $0x50] sm:$0xff]  ;;  %v365_v55 = vadd.s32 16, %v349_v49  ;;  %v19410_v60 = vmov 0 }
  0x1f   : > { %v11785_v15 = vsub.s32 %v11756_v1, %v706_v12  ;;  %v10715_v6 = vpack.c.bf16 %v2783_v5, %v2782_v4  ;;  %v2785_v9 = vld [vmem:[%s11859_s18 + $0x58] sm:$0xff]  ;;  %v2786_v12 = vld [vmem:[%s11859_s18 + $0x60] sm:$0xff]  ;;  %v2787_v13 = vld [vmem:[%s11859_s18 + $0x68] sm:$0xff]  ;;  %vm358_vm7 = vcmp.ge.s32.totalorder %v11950_v53, %v349_v49  ;;  %v351_v58 = vmul.u32 16, %v11953_v54 }
  0x20   : > { %v10718_v10 = vpack.c.bf16 %v2785_v9, %v2784_v7  ;;  %v10721_v14 = vpack.c.bf16 %v2787_v13, %v2786_v12  ;;  %v2789_v17 = vld [vmem:[%s11859_s18 + $0x78] sm:$0xff]  ;;  %v2790_v19 = vld [vmem:[%s11859_s18 + $0x80] sm:$0xff]  ;;  %v2791_v21 = vld [vmem:[%s11859_s18 + $0x88] sm:$0xff]  ;;  %vm370_vm10 = vcmp.lt.s32.totalorder %v11950_v53, %v365_v55  ;;  %vm361_vm12 = vcmp.ge.s32.totalorder %v11950_v53, %v350_v50 }
  0x21   : > { %vm18585_vm1 = vcmp.eq.s32.totalorder %v11785_v15, %v11775_v8  ;;  %vm18584_vm2 = vcmp.eq.s32.totalorder %v11785_v15, %v11782_v11  ;;  %v10727_v22 = vpack.c.bf16 %v2791_v21, %v2790_v19  ;;  %v9353_v35 = vld [vmem:[%s11907_s24] ss:$0 sm:$0xff]  ;;  %v2796_v40 = vld [vmem:[%s11859_s18 + $0xb0] sm:$0xff]  ;;  %v2797_v41 = vld [vmem:[%s11859_s18 + $0xb8] sm:$0xff]  ;;  %v19413_v61 = vmov 0 }
  0x22   : > { %vm11803_vm3 = vmpackc.low %vm18584_vm2, %vm18585_vm1  ;;  %vm359_vm1 = vcmp.ge.s32.totalorder %v11756_v1, %v350_v50  ;;  %v19419_v63 = vmov 0  ;;  %v19422_v0 = vmov 0  ;;  %v19425_v4 = vmov 0 }
  0x23   : > { %10671 = vmatprep.subr.msk.bf16.mxu1 %vm11803_vm3, %v18622_v20  ;;  %10667 = vmatprep.subr.msk.bf16.mxu0 %vm11803_vm3, %v18622_v20  ;;  %vm379_vm15 = vmand %vm358_vm7, %vm370_vm10 }
  0x24   : > { %10673 = vmatpush3.bf16.msk.msra.mxu1 %vm11803_vm3, %v18622_v20  ;;  %10669 = vmatpush3.bf16.msk.msra.mxu0 %vm11803_vm3, %v18622_v20 }
  0x25   : > { %10679 = vmatprep.subr.bf16.mxu1 %v10678_v16  ;;  %10675 = vmatprep.subr.msk.bf16.mxu0 %vm11803_vm3, %v18622_v20 }
  0x27   : > { %10328 = vmatmul.mubr.msk.f32.vlgmr.msra.gmra.mrb[0].mxu1 %vm18583_vm0, %v2320_v23  ;;  %10321 = vmatmul.mubr.msk.f32.vlgmr.msra.gmra.mrb[0].mxu0 %vm18583_vm0, %v2318_v24  ;;  %v2792_v23 = vld [vmem:[%s11859_s18 + $0x90] sm:$0xff]  ;;  %v2793_v24 = vld [vmem:[%s11859_s18 + $0x98] sm:$0xff] }
  0x28   : > { %10681 = vmatpush3.bf16.msra.mxu1 %v10678_v16  ;;  %10345 = vmatprep.mubr.msk.f32.mxu1 %vm2590_vm4, %v2579_v26  ;;  %v2788_v16 = vld [vmem:[%s11859_s18 + $0x70] sm:$0xff]  ;;  %v2794_v26 = vld [vmem:[%s11859_s18 + $0xa0] sm:$0xff] }
  0x29   : > { %10683 = vmatprep.subr.bf16.mxu1 %v10682_v25  ;;  %10677 = vmatpush3.bf16.msk.msra.mxu0 %vm11803_vm3, %v18622_v20  ;;  %v10724_v18 = vpack.c.bf16 %v2789_v17, %v2788_v16 }
  0x2a   : > { %10334 = vmatprep.mubr.msk.f32.mxu0 %vm18583_vm0, %v2321_v30  ;;  %10687 = vmatprep.subr.bf16.mxu0 %v10686_v27  ;;  %v2795_v27 = vld [vmem:[%s11859_s18 + $0xa8] sm:$0xff] }
  0x2b   : > { %v10733_v28 = vpack.c.bf16 %v2795_v27, %v2794_v26 }
  0x2c   : > { %10685 = vmatpush3.bf16.msra.mxu1 %v10682_v25  ;;  %10335 = vmatmul.mubr.msk.f32.vlgmr.msra.gmra.mrb[2].mxu0 %vm18583_vm0, %v2322_v31  ;;  %v10730_v25 = vpack.c.bf16 %v2793_v24, %v2792_v23  ;;  %vm368_vm0 = vcmp.lt.s32.totalorder %v11756_v1, %v365_v55 }
  0x2d   : > { %10689 = vmatpush1.bf16.msra.mxu0 %v10688_v32  ;;  %2761 = vmatprep.mubr.f32.mxu0 %v18614_v52 }
  0x2e   : > { %10691 = vmatprep.subr.bf16.mxu0 %v10690_v36  ;;  %10702 = vmatprep.subr.bf16.mxu1 %v18606_v56 }
  0x2f   : > { %10346 = vmatmul.mubr.msk.f32.vlgmr.msra.gmra.mrb[2].mxu1 %vm2590_vm4, %v2580_v33 }
  0x30   : > { %10704 = vmatpush1.bf16.msra.mxu1 %v10703_v57  ;;  %v366_v57 = vadd.s32 16, %v350_v50 }
  0x31   : > { %10693 = vmatpush1.bf16.msra.mxu0 %v10692_v39  ;;  %10705 = vmatprep.subr.bf16.mxu1 %v18606_v56 }
  0x32   : > { %10695 = vmatprep.subr.bf16.mxu0 %v10694_v42  ;;  %v10736_v42 = vpack.c.bf16 %v2797_v41, %v2796_v40  ;;  %vm373_vm13 = vcmp.lt.s32.totalorder %v11950_v53, %v366_v57  ;;  %v12096_v40 = vadd.s32 128, %v11775_v8  ;;  %v12099_v41 = vadd.s32 136, %v11775_v8 }
  0x33   : > { %vm382_vm4 = vmand %vm361_vm12, %vm373_vm13  ;;  %vm364_vm12 = vcmp.ge.s32.totalorder %v11950_v53, %v351_v58 }
  0x34   : > { %10707 = vmatpush1.bf16.msra.mxu1 %v10706_v59  ;;  %v367_v59 = vadd.s32 16, %v351_v58  ;;  %vm11975_vm7 = vmpackc.low %vm382_vm4, %vm379_vm15  ;;  %vm18586_vm4 = vcmask 392384   ;;  %19428 = vst [vmem:[#allocation11_spill] sm:$0xff] %v12096_v40 }
  0x35   : > { %10697 = vmatpush1.bf16.msra.mxu0 %v10696_v45  ;;  %10708 = vmatprep.subr.bf16.mxu1 %v18606_v56  ;;  %v19414_v61 = vsel %vm11975_vm7, 4294967295, %v19413_v61  ;;  %19429 = vst [vmem:[#allocation12_spill] sm:$0xff] %v12099_v41 }
  0x36   : > { %10699 = vmatprep.subr.bf16.mxu0 %v10698_v48  ;;  %19415 = vst [vmem:[#allocation6_spill] sm:$0xff] %v19414_v61  ;;  %vm376_vm13 = vcmp.lt.s32.totalorder %v11950_v53, %v367_v59  ;;  %vm374_vm15 = vcmp.lt.s32.totalorder %v11756_v1, %v367_v59  ;;  %v12333_v48 = vadd.s32 72, %v11775_v8 }
  0x38   : > { %10710 = vmatpush1.bf16.msra.mxu1 %v10709_v62  ;;  %v19416_v62 = vmov 0 }
  0x39   : > { %10701 = vmatpush1.bf16.msra.mxu0 %v10700_v51  ;;  %10711 = vmatprep.subr.bf16.mxu1 %v18606_v56  ;;  %v11947_v51 = vadd.s32 128, %v11756_v1 }
  0x3b   : > { %vm357_vm6 = vcmp.ge.s32.totalorder %v11947_v51, %v349_v49  ;;  %vm360_vm8 = vcmp.ge.s32.totalorder %v11947_v51, %v350_v50  ;;  %vm369_vm9 = vcmp.lt.s32.totalorder %v11947_v51, %v365_v55  ;;  %vm372_vm11 = vcmp.lt.s32.totalorder %v11947_v51, %v366_v57 }
  0x3c   : > { %10713 = vmatpush1.bf16.msra.mxu1 %v10712_v2  ;;  %vm378_vm14 = vmand %vm357_vm6, %vm369_vm9  ;;  %vm371_vm6 = vcmp.lt.s32.totalorder %v11756_v1, %v366_v57  ;;  %vm363_vm9 = vcmp.ge.s32.totalorder %v11947_v51, %v351_v58  ;;  %vm375_vm10 = vcmp.lt.s32.totalorder %v11947_v51, %v367_v59  ;;  %v18612_v2 = vmov 1.0   ;;  %v19613_v61 = vld [vmem:[#allocation12_spill] sm:$0xff] }
  0x3d   : > { %10714 = vmatprep.subr.bf16.mxu1 %v18606_v56  ;;  %vm381_vm3 = vmand %vm360_vm8, %vm372_vm11  ;;  %v12124_v50 = vadd.s32 152, %v11775_v8  ;;  %v19432_v55 = vmov 0  ;;  %v12138_v57 = vadd.s32 24, %v11775_v8  ;;  %v12149_v59 = vadd.s32 160, %v11775_v8 }
  0x3e   : > { %vm11966_vm2 = vmpackc.low %vm381_vm3, %vm378_vm14  ;;  %vm362_vm3 = vcmp.ge.s32.totalorder %v11756_v1, %v351_v58  ;;  %v19435_v58 = vmov 0 }
  0x3f   : > { %v19411_v60 = vsel %vm11966_vm2, 4294967295, %v19410_v60  ;;  %10739 = vmatprep.subr.msk.bf16.mxu0 %vm11966_vm2, %v18622_v20  ;;  %vm380_vm11 = vmand %vm359_vm1, %vm371_vm6  ;;  %vm18587_vm6 = vcmask 195584   ;;  %19431 = vst [vmem:[#allocation14_spill] sm:$0xff] %v12124_v50 }
  0x40   : > { %10716 = vmatpush1.bf16.msra.mxu1 %v10715_v6  ;;  %19412 = vst [vmem:[#allocation5_spill] sm:$0xff] %v19411_v60  ;;  %vm11996_vm1 = vmand %vm364_vm12, %vm376_vm13 }
  0x41   : > { %10717 = vmatprep.subr.bf16.mxu1 %v18606_v56  ;;  %v19423_v0 = vsel %vm11996_vm1, 4294967295, %v19422_v0  ;;  %19438 = vst [vmem:[#allocation17_spill] sm:$0xff] %v12149_v59 }
  0x42   : > { %19424 = vst [vmem:[#allocation9_spill] sm:$0xff] %v19423_v0 }
  0x44   : > { %10719 = vmatpush1.bf16.msra.mxu1 %v10718_v10 }
  0x45   : > { %10720 = vmatprep.subr.bf16.mxu1 %v18606_v56 }
  0x48   : > { %10722 = vmatpush1.bf16.msra.mxu1 %v10721_v14 }
  0x49   : > { %10723 = vmatprep.subr.bf16.mxu1 %v18606_v56 }
  0x4c   : > { %10725 = vmatpush1.bf16.msra.mxu1 %v10724_v18 }
  0x4d   : > { %10726 = vmatprep.subr.bf16.mxu1 %v18606_v56 }
  0x50   : > { %10728 = vmatpush1.bf16.msra.mxu1 %v10727_v22 }
  0x51   : > { %10729 = vmatprep.subr.bf16.mxu1 %v18606_v56 }
  0x54   : > { %10731 = vmatpush1.bf16.msra.mxu1 %v10730_v25 }
  0x55   : > { %10732 = vmatprep.subr.bf16.mxu1 %v18606_v56 }
  0x58   : > { %10734 = vmatpush1.bf16.msra.mxu1 %v10733_v28 }
  0x59   : > { %10735 = vmatprep.subr.bf16.mxu1 %v18606_v56  ;;  %v19471_v56 = vmov 0 }
  0x5c   : > { %10737 = vmatpush1.bf16.msra.mxu1 %v10736_v42 }
  0xfa   : > { %v11895_v29 = vpop.f32.mrb[0].mxu1  ;;  %v11897_v30 = vpop.f32.mrb[0].mxu0 }
  0xfb   : > { %v11899_v31 = vpop.f32.mrb[1].mxu1  ;;  %v11902_v32 = vpop.f32.mrb[1].mxu0 }
  0xff   : > { %v11909_v33 = vpop.f32.mrb[2].mxu0 }
 0x100   : > { %v11911_v34 = vpop.f32.mrb[3].mxu0 }
 0x102   : > { %v10347_v36 = vpop.f32.mrb[2].mxu1 }
 0x103   : > { %v2663_v37 = vpop.f32.mrb[3].mxu1  ;;  %v11919_v39 = vadd.f32 %v10347_v36, %v9353_v35 }
 0x104   : > { %v11914_v38 = vadd.f32 %v9353_v35, %v2663_v37  ;;  %v12093_v37 = vmul.u32 16, %v11756_v1 }
 0x105   : > { %19409 = vst [vmem:[#allocation4_spill] sm:$0xff] %v11919_v39 }
 0x106   : > { %19408 = vst [vmem:[#allocation3_spill] sm:$0xff] %v11914_v38  ;;  %9356 = vmatmul.mubr.msk.f32.vlgmr.msra.gmra.mrb[4].mxu0 %vm18582_vm5, %v11914_v38  ;;  %v12102_v42 = vadd.s32 16, %v12093_v37  ;;  %v12375_v38 = vadd.s32 312, %v11775_v8 }
 0x107   : > { %2767 = vmatprep.mubr.f32.mxu0 %v18614_v52 }
 0x108   : > { %vm515_vm12 = vcmp.lt.s32.totalorder %v12096_v40, %v12102_v42  ;;  %vm516_vm13 = vcmp.lt.s32.totalorder %v12099_v41, %v12102_v42  ;;  %19484 = vst [vmem:[#allocation42_spill] sm:$0xff] %v12375_v38 }
 0x10a   : > { %9357 = vmatmul.mubr.msk.f32.gmra.mrb[6].mxu0 %vm18582_vm5, %v11919_v39  ;;  %v19483_v39 = vmov 1.0|1.0  }
 0x10b   : > { %2954 = vmatprep.mubr.f32.mxu0 %v18614_v52 }
 0x1d9   : > { %v11926_v43 = vpop.f32.mrb[4].mxu0 }
 0x1da   : > { %v11928_v44 = vpop.f32.mrb[5].mxu0 }
 0x1db   : > { %9358 = vmatprep.mubr.msk.f32.mxu1 %vm18582_vm5, %v11928_v44 }
 0x1dc   : > { %2869 = vmatmul.mubr.f32.vlgmr.msra.gmra.mrb[4].mxu1 %v11926_v43 }
 0x1dd   : > { %v11933_v45 = vpop.f32.mrb[6].mxu0 }
 0x1de   : > { %v11937_v47 = vpop.f32.mrb[7].mxu0 }
 0x1df   : > { %9359 = vmatprep.mubr.msk.f32.mxu1 %vm18582_vm5, %v11937_v47  ;;  %vm356_vm5 = vcmp.ge.s32.totalorder %v11756_v1, %v349_v49  ;;  %v12121_v49 = vadd.s32 144, %v11775_v8 }
 0x1e0   : > { %2874 = vmatmul.mubr.f32.gmra.mrb[6].mxu1 %v11933_v45  ;;  %vm377_vm8 = vmand %vm356_vm5, %vm368_vm0 }
 0x1e1   : > { %vm11983_vm14 = vmpackc.low %vm380_vm11, %vm377_vm8  ;;  %vm467_vm11 = vcmp.ge.s32.totalorder %v12099_v41, %v12093_v37  ;;  %19430 = vst [vmem:[#allocation13_spill] sm:$0xff] %v12121_v49 }
 0x1e2   : > { %v19417_v62 = vsel %vm11983_vm14, 4294967295, %v19416_v62  ;;  %10741 = vmatpush1.bf16.msk.msra.mxu0 %vm11983_vm14, %v18622_v20  ;;  %vm11992_vm0 = vmand %vm363_vm9, %vm375_vm10  ;;  %vm466_vm10 = vcmp.ge.s32.totalorder %v12096_v40, %v12093_v37 }
 0x1e3   : > { %19418 = vst [vmem:[#allocation7_spill] sm:$0xff] %v19417_v62  ;;  %v19420_v63 = vsel %vm11992_vm0, 4294967295, %v19419_v63  ;;  %9364 = vmatprep.subr.msk.mxu0 %vm11992_vm0, %v18612_v2  ;;  %vm12003_vm5 = vmand %vm362_vm3, %vm374_vm15  ;;  %vm450_vm15 = vcmp.ge.s32.totalorder %v11775_v8, %v12093_v37 }
 0x1e4   : > { %19421 = vst [vmem:[#allocation8_spill] sm:$0xff] %v19420_v63  ;;  %v19426_v4 = vsel %vm12003_vm5, 4294967295, %v19425_v4  ;;  %vm563_vm3 = vmand %vm466_vm10, %vm515_vm12  ;;  %vm468_vm12 = vcmp.ge.s32.totalorder %v12121_v49, %v12093_v37 }
 0x1e5   : > { %19427 = vst [vmem:[#allocation10_spill] sm:$0xff] %v19426_v4 }
 0x1e6   : > { %9365 = vmatpush1.msk.msra.mxu0 %vm12003_vm5, %v18612_v2 }
 0x1e7   : > { %10743 = vmatprep.subr.msk.bf16.mxu0 %vm11975_vm7, %v18622_v20 }
 0x2af   : > { %v2870_v5 = vpop.f32.mrb[4].mxu1 }
 0x2b0   : > { %2881 = vrot.lane.b32.xlu0 %v2870_v5, %s11710_s25  ;;  %v2872_v6 = vpop.f32.mrb[5].mxu1  ;;  %v3250_v10 = vsel %vm18586_vm4, %v2870_v5, -inf }
 0x2b1   : > { %v19440_v6 = vmov 0 }
 0x2b3   : > { %v2875_v7 = vpop.f32.mrb[6].mxu1 }
 0x2b4   : > { %2883 = vrot.lane.b32.xlu0 %v2875_v7, %s11710_s25  ;;  %v2877_v9 = vpop.f32.mrb[7].mxu1  ;;  %v3251_v12 = vsel %vm18586_vm4, %v2875_v7, -inf  ;;  %vm451_vm4 = vcmp.ge.s32.totalorder %v11782_v11, %v12093_v37 }
 0x2b5   : > { %v3252_v13 = vmax.f32 %v3250_v10, %v3251_v12  ;;  %v12180_v9 = vadd.s32 264, %v11775_v8  ;;  %v19445_v10 = vmov 0  ;;  %v12191_v12 = vadd.s32 32, %v11775_v8 }
 0x2b7   : > { %v3253_v14 = vrot.slane %v3252_v13, 4  ;;  %19444 = vst [vmem:[#allocation21_spill] sm:$0xff] %v12180_v9 }
 0x2b9   : > { %v3254_v16 = vmax.f32 %v3252_v13, %v3253_v14  ;;  %v12201_v13 = vadd.s32 40, %v11775_v8  ;;  %v19448_v14 = vmov 0 }
 0x2bb   : > { %v3255_v17 = vrot.slane %v3254_v16, 2 }
 0x2bd   : > { %v3256_v18 = vmax.f32 %v3254_v16, %v3255_v17  ;;  %v12212_v16 = vadd.s32 176, %v11775_v8  ;;  %v12222_v17 = vadd.s32 184, %v11775_v8 }
 0x2bf   : > { %v3257_v19 = vrot.slane %v3256_v18, 1  ;;  %19451 = vst [vmem:[#allocation24_spill] sm:$0xff] %v12212_v16  ;;  %19452 = vst [vmem:[#allocation25_spill] sm:$0xff] %v12222_v17 }
 0x2c1   : > { %v3258_v21 = vmax.f32 %v3256_v18, %v3257_v19  ;;  %v19453_v18 = vmov 0  ;;  %v12233_v19 = vadd.s32 272, %v11775_v8 }
 0x2c3   : > { %3260 = vrot.lane.b32.xlu1 %v3258_v21, %s11710_s25  ;;  %19456 = vst [vmem:[#allocation27_spill] sm:$0xff] %v12233_v19  ;;  %v12243_v21 = vadd.s32 280, %v11775_v8 }
 0x2c5   : > { %19457 = vst [vmem:[#allocation28_spill] sm:$0xff] %v12243_v21 }
 0x322   : > { %v2882_v22 = vpop.permute.xlu0 %2881 }
 0x323   : > { %9366 = vmatmul.mubr.msk.f32.vlgmr.msra.gmra.mrb[8].mxu0 %vm18587_vm6, %v2882_v22 }
 0x324   : > { %10745 = vmatpush3.bf16.msk.msra.mxu0 %vm11975_vm7, %v18622_v20  ;;  %2960 = vmatprep.mubr.f32.mxu0 %v18614_v52 }
 0x325   : > { %10352 = vmatprep.subr.msk.mxu0 %vm11996_vm1, %v18612_v2 }
 0x326   : > { %v2884_v23 = vpop.permute.xlu0 %2883 }
 0x327   : > { %9367 = vmatmul.mubr.msk.f32.gmra.mrb[10].mxu0 %vm18587_vm6, %v2884_v23 }
 0x328   : > { %10353 = vmatpush3.msk.msra.mxu0 %vm11996_vm1, %v18612_v2  ;;  %10354 = vmatprep.mubr.msk.f32.mxu0 %vm18587_vm6, %v2882_v22  ;;  %v19458_v22 = vmov 0 }
 0x329   : > { %10747 = vmatprep.subr.msk.bf16.mxu0 %vm11966_vm2, %v18622_v20 }
 0x32b   : > { %10355 = vmatmul.mubr.msk.f32.vlgmr.msra.gmra.mrb[12].mxu0 %vm18587_vm6, %v2884_v23  ;;  %v12257_v23 = vadd.s32 48, %v11775_v8 }
 0x32c   : > { %10749 = vmatpush1.bf16.msk.msra.mxu0 %vm11983_vm14, %v18622_v20  ;;  %3137 = vmatprep.mubr.f32.mxu0 %v18614_v52 }
 0x32d   : > { %9377 = vmatprep.subr.msk.mxu0 %vm11992_vm0, %v18612_v2 }
 0x330   : > { %9378 = vmatpush1.msk.msra.mxu0 %vm12003_vm5, %v18612_v2 }
 0x331   : > { %9379 = vmatmul.mubr.msk.f32.vlgmr.msra.gmra.mrb[14].mxu0 %vm18587_vm6, %v2870_v5  ;;  %10751 = vmatprep.subr.msk.bf16.mxu0 %vm11975_vm7, %v18622_v20 }
 0x332   : > { %10753 = vmatpush3.bf16.msk.msra.mxu0 %vm11975_vm7, %v18622_v20  ;;  %3143 = vmatprep.mubr.f32.mxu0 %v18614_v52 }
 0x333   : > { %10361 = vmatprep.subr.msk.mxu0 %vm11996_vm1, %v18612_v2 }
 0x335   : > { %9380 = vmatmul.mubr.msk.f32.gmra.mrb[16].mxu0 %vm18587_vm6, %v2875_v7  ;;  %v3261_v24 = vpop.permute.xlu1 %3260 }
 0x336   : > { %10362 = vmatpush3.msk.msra.mxu0 %vm11996_vm1, %v18612_v2  ;;  %10363 = vmatprep.mubr.msk.f32.mxu0 %vm18587_vm6, %v2870_v5  ;;  %v3263_v25 = vadd.f32 %v3261_v24, %v2870_v5  ;;  %v3264_v26 = vadd.f32 %v3261_v24, %v2875_v7  ;;  %v12159_v5 = vadd.s32 168, %v11775_v8  ;;  %v12267_v24 = vadd.s32 56, %v11775_v8 }
 0x337   : > { %10755 = vmatprep.subr.msk.bf16.mxu0 %vm11966_vm2, %v18622_v20 }
 0x338   : > { %v3267_v27 = vmul.f32 0.2, %v3263_v25  ;;  %vm3265_vm8 = vcmp.ge.f32.partialorder %v3263_v25, 0.0  ;;  %v3268_v35 = vmul.f32 0.2, %v3264_v26  ;;  %vm3266_vm9 = vcmp.ge.f32.partialorder %v3264_v26, 0.0 }
 0x339   : > { %10364 = vmatmul.mubr.msk.f32.vlgmr.msra.gmra.mrb[18].mxu0 %vm18587_vm6, %v2875_v7  ;;  %19439 = vst [vmem:[#allocation18_spill] sm:$0xff] %v12159_v5  ;;  %v12170_v7 = vadd.s32 256, %v11775_v8 }
 0x33a   : > { %10757 = vmatpush1.bf16.msk.msra.mxu0 %vm11983_vm14, %v18622_v20  ;;  %3341 = vmatprep.mubr.f32.mxu0 %v18614_v52  ;;  %v3269_v28 = vsel %vm3265_vm8, %v3263_v25, %v3267_v27  ;;  %v3270_v36 = vsel %vm3266_vm9, %v3264_v26, %v3268_v35  ;;  %vm499_vm8 = vcmp.lt.s32.totalorder %v11775_v8, %v12102_v42  ;;  %vm564_vm9 = vmand %vm467_vm11, %vm516_vm13  ;;  %v19461_v25 = vmov 0 }
 0x33b   : > { %9390 = vmatprep.subr.msk.mxu0 %vm11992_vm0, %v18612_v2  ;;  %vm12126_vm10 = vmpackc.low %vm564_vm9, %vm563_vm3  ;;  %vm517_vm13 = vcmp.lt.s32.totalorder %v12121_v49, %v12102_v42  ;;  %vm469_vm3 = vcmp.ge.s32.totalorder %v12124_v50, %v12093_v37  ;;  %vm518_vm9 = vcmp.lt.s32.totalorder %v12124_v50, %v12102_v42  ;;  %19443 = vst [vmem:[#allocation20_spill] sm:$0xff] %v12170_v7  ;;  %v12278_v26 = vadd.s32 192, %v11775_v8 }
 0x33c   : > { %v19433_v55 = vsel %vm12126_vm10, 4294967295, %v19432_v55  ;;  %10763 = vmatprep.subr.msk.bf16.mxu1 %vm12126_vm10, %v18622_v20  ;;  %vm547_vm11 = vmand %vm450_vm15, %vm499_vm8  ;;  %vm453_vm8 = vcmp.ge.s32.totalorder %v12138_v57, %v12093_v37  ;;  %v12288_v27 = vadd.s32 200, %v11775_v8  ;;  %v12299_v35 = vadd.s32 288, %v11775_v8 }
 0x33d   : > { %19434 = vst [vmem:[#allocation15_spill] sm:$0xff] %v19433_v55  ;;  %vm565_vm15 = vmand %vm468_vm12, %vm517_vm13  ;;  %vm470_vm13 = vcmp.ge.s32.totalorder %v12149_v59, %v12093_v37 }
 0x33e   : > { %9391 = vmatpush1.msk.msra.mxu0 %vm12003_vm5, %v18612_v2  ;;  %19464 = vst [vmem:[#allocation31_spill] sm:$0xff] %v12278_v26  ;;  %19465 = vst [vmem:[#allocation32_spill] sm:$0xff] %v12288_v27 }
 0x33f   : > { %9392 = vmatmul.mubr.msk.f32.vlgmr.msra.gmra.mrb[20].mxu0 %vm18587_vm6, %v3269_v28  ;;  %10759 = vmatprep.subr.msk.bf16.mxu0 %vm11975_vm7, %v18622_v20  ;;  %19469 = vst [vmem:[#allocation34_spill] sm:$0xff] %v12299_v35 }
 0x340   : > { %10761 = vmatpush3.bf16.msk.msra.mxu0 %vm11975_vm7, %v18622_v20  ;;  %3347 = vmatprep.mubr.f32.mxu0 %v18614_v52  ;;  %v12344_v52 = vadd.s32 208, %v11775_v8 }
 0x341   : > { %10370 = vmatprep.subr.msk.mxu0 %vm11996_vm1, %v18612_v2 }
 0x342   : > { %19477 = vst [vmem:[#allocation38_spill] sm:$0xff] %v12344_v52 }
 0x343   : > { %9393 = vmatmul.mubr.msk.f32.gmra.mrb[22].mxu0 %vm18587_vm6, %v3270_v36 }
 0x344   : > { %10371 = vmatpush3.msk.msra.mxu0 %vm11996_vm1, %v18612_v2  ;;  %10372 = vmatprep.mubr.msk.f32.mxu0 %vm18587_vm6, %v3269_v28  ;;  %v19466_v28 = vmov 0  ;;  %v19474_v2 = vmov 0 }
 0x347   : > { %10373 = vmatmul.mubr.msk.f32.vlgmr.msra.gmra.mrb[24].mxu0 %vm18587_vm6, %v3270_v36  ;;  %vm500_vm6 = vcmp.lt.s32.totalorder %v11782_v11, %v12102_v42  ;;  %v12309_v36 = vadd.s32 296, %v11775_v8 }
 0x348   : > { %vm548_vm1 = vmand %vm451_vm4, %vm500_vm6  ;;  %vm452_vm4 = vcmp.ge.s32.totalorder %v11953_v54, %v12093_v37  ;;  %vm501_vm6 = vcmp.lt.s32.totalorder %v11953_v54, %v12102_v42 }
 0x349   : > { %vm12144_vm5 = vmpackc.low %vm548_vm1, %vm547_vm11  ;;  %vm502_vm11 = vcmp.lt.s32.totalorder %v12138_v57, %v12102_v42  ;;  %19470 = vst [vmem:[#allocation35_spill] sm:$0xff] %v12309_v36 }
 0x34a   : > { %v19436_v58 = vsel %vm12144_vm5, 4294967295, %v19435_v58  ;;  %10765 = vmatpush3.bf16.msk.msra.mxu1 %vm12144_vm5, %v18622_v20  ;;  %vm566_vm1 = vmand %vm469_vm3, %vm518_vm9  ;;  %vm519_vm3 = vcmp.lt.s32.totalorder %v12149_v59, %v12102_v42  ;;  %v19527_v59 = vmov 0 }
 0x34b   : > { %19437 = vst [vmem:[#allocation16_spill] sm:$0xff] %v19436_v58  ;;  %vm12165_vm10 = vmpackc.low %vm566_vm1, %vm565_vm15  ;;  %vm471_vm15 = vcmp.ge.s32.totalorder %v12159_v5, %v12093_v37  ;;  %vm520_vm1 = vcmp.lt.s32.totalorder %v12159_v5, %v12102_v42  ;;  %v12573_v5 = vadd.s32 376, %v11775_v8 }
 0x34c   : > { %v19441_v6 = vsel %vm12165_vm10, 4294967295, %v19440_v6  ;;  %10767 = vmatprep.subr.msk.bf16.mxu1 %vm12165_vm10, %v18622_v20  ;;  %vm549_vm12 = vmand %vm452_vm4, %vm501_vm6  ;;  %vm482_vm6 = vcmp.ge.s32.totalorder %v12170_v7, %v12093_v37 }
 0x34d   : > { %19442 = vst [vmem:[#allocation19_spill] sm:$0xff] %v19441_v6  ;;  %vm550_vm9 = vmand %vm453_vm8, %vm502_vm11  ;;  %vm531_vm8 = vcmp.lt.s32.totalorder %v12170_v7, %v12102_v42  ;;  %v19498_v7 = vmov 0 }
 0x34e   : > { %vm12186_vm5 = vmpackc.low %vm550_vm9, %vm549_vm12  ;;  %vm483_vm12 = vcmp.ge.s32.totalorder %v12180_v9, %v12093_v37  ;;  %vm532_vm9 = vcmp.lt.s32.totalorder %v12180_v9, %v12102_v42  ;;  %v12441_v9 = vadd.s32 328, %v11775_v8  ;;  %19526 = vst [vmem:[#allocation66_spill] sm:$0xff] %v12573_v5 }
 0x34f   : > { %v19446_v10 = vsel %vm12186_vm5, 4294967295, %v19445_v10  ;;  %10769 = vmatpush3.bf16.msk.msra.mxu1 %vm12186_vm5, %v18622_v20  ;;  %vm567_vm4 = vmand %vm470_vm13, %vm519_vm3  ;;  %vm454_vm3 = vcmp.ge.s32.totalorder %v12191_v12, %v12093_v37 }
 0x350   : > { %19447 = vst [vmem:[#allocation22_spill] sm:$0xff] %v19446_v10  ;;  %vm568_vm11 = vmand %vm471_vm15, %vm520_vm1  ;;  %vm503_vm15 = vcmp.lt.s32.totalorder %v12191_v12, %v12102_v42 }
 0x351   : > { %vm12207_vm10 = vmpackc.low %vm568_vm11, %vm567_vm4  ;;  %vm455_vm4 = vcmp.ge.s32.totalorder %v12201_v13, %v12093_v37  ;;  %vm504_vm11 = vcmp.lt.s32.totalorder %v12201_v13, %v12102_v42  ;;  %19497 = vst [vmem:[#allocation49_spill] sm:$0xff] %v12441_v9 }
 0x352   : > { %v19449_v14 = vsel %vm12207_vm10, 4294967295, %v19448_v14  ;;  %10771 = vmatprep.subr.msk.bf16.mxu1 %vm12207_vm10, %v18622_v20  ;;  %vm579_vm13 = vmand %vm482_vm6, %vm531_vm8  ;;  %vm472_vm8 = vcmp.ge.s32.totalorder %v12212_v16, %v12093_v37 }
 0x353   : > { %19450 = vst [vmem:[#allocation23_spill] sm:$0xff] %v19449_v14  ;;  %vm580_vm1 = vmand %vm483_vm12, %vm532_vm9  ;;  %vm521_vm12 = vcmp.lt.s32.totalorder %v12212_v16, %v12102_v42  ;;  %v12563_v16 = vadd.s32 368, %v11775_v8 }
 0x354   : > { %vm12228_vm5 = vmpackc.low %vm580_vm1, %vm579_vm13  ;;  %vm473_vm13 = vcmp.ge.s32.totalorder %v12222_v17, %v12093_v37 }
 0x355   : > { %v19454_v18 = vsel %vm12228_vm5, 4294967295, %v19453_v18  ;;  %10795 = vmatprep.subr.msk.bf16.mxu0 %vm12228_vm5, %v18622_v20  ;;  %vm551_vm6 = vmand %vm454_vm3, %vm503_vm15  ;;  %vm522_vm3 = vcmp.lt.s32.totalorder %v12222_v17, %v12102_v42  ;;  %v12542_v17 = vadd.s32 352, %v11775_v8  ;;  %19525 = vst [vmem:[#allocation65_spill] sm:$0xff] %v12563_v16 }
 0x356   : > { %19455 = vst [vmem:[#allocation26_spill] sm:$0xff] %v19454_v18  ;;  %vm552_vm9 = vmand %vm455_vm4, %vm504_vm11  ;;  %10797 = vmatpush3.bf16.msk.msra.mxu0 %vm12228_vm5, %v18622_v20  ;;  %vm484_vm4 = vcmp.ge.s32.totalorder %v12233_v19, %v12093_v37  ;;  %vm533_vm11 = vcmp.lt.s32.totalorder %v12233_v19, %v12102_v42  ;;  %vm534_vm5 = vcmp.lt.s32.totalorder %v12243_v21, %v12102_v42  ;;  %v19479_v18 = vmov 0 }
 0x357   : > { %vm12252_vm15 = vmpackc.low %vm552_vm9, %vm551_vm6  ;;  %vm485_vm9 = vcmp.ge.s32.totalorder %v12243_v21, %v12093_v37  ;;  %v12410_v21 = vadd.s32 224, %v11775_v8  ;;  %v12431_v19 = vadd.s32 320, %v11775_v8  ;;  %19520 = vst [vmem:[#allocation62_spill] sm:$0xff] %v12542_v17 }
 0x358   : > { %v19459_v22 = vsel %vm12252_vm15, 4294967295, %v19458_v22  ;;  %10773 = vmatpush3.bf16.msk.msra.mxu1 %vm12252_vm15, %v18622_v20  ;;  %vm569_vm1 = vmand %vm472_vm8, %vm521_vm12  ;;  %vm456_vm12 = vcmp.ge.s32.totalorder %v12257_v23, %v12093_v37 }
 0x359   : > { %19460 = vst [vmem:[#allocation29_spill] sm:$0xff] %v19459_v22  ;;  %vm570_vm6 = vmand %vm473_vm13, %vm522_vm3  ;;  %vm505_vm13 = vcmp.lt.s32.totalorder %v12257_v23, %v12102_v42 }
 0x35a   : > { %vm12273_vm10 = vmpackc.low %vm570_vm6, %vm569_vm1  ;;  %vm457_vm1 = vcmp.ge.s32.totalorder %v12267_v24, %v12093_v37  ;;  %vm506_vm6 = vcmp.lt.s32.totalorder %v12267_v24, %v12102_v42  ;;  %19491 = vst [vmem:[#allocation45_spill] sm:$0xff] %v12410_v21 }
 0x35b   : > { %v19462_v25 = vsel %vm12273_vm10, 4294967295, %v19461_v25  ;;  %10775 = vmatprep.subr.msk.bf16.mxu1 %vm12273_vm10, %v18622_v20  ;;  %vm581_vm8 = vmand %vm484_vm4, %vm533_vm11  ;;  %vm523_vm11 = vcmp.lt.s32.totalorder %v12278_v26, %v12102_v42  ;;  %19496 = vst [vmem:[#allocation48_spill] sm:$0xff] %v12431_v19 }
 0x35c   : > { %19463 = vst [vmem:[#allocation30_spill] sm:$0xff] %v19462_v25  ;;  %vm582_vm3 = vmand %vm485_vm9, %vm534_vm5  ;;  %vm474_vm5 = vcmp.ge.s32.totalorder %v12278_v26, %v12093_v37  ;;  %v19512_v26 = vmov 0 }
 0x35d   : > { %vm12294_vm15 = vmpackc.low %vm582_vm3, %vm581_vm8  ;;  %vm475_vm8 = vcmp.ge.s32.totalorder %v12288_v27, %v12093_v37 }
 0x35e   : > { %v19467_v28 = vsel %vm12294_vm15, 4294967295, %v19466_v28  ;;  %10799 = vmatprep.subr.msk.bf16.mxu0 %vm12294_vm15, %v18622_v20  ;;  %vm553_vm4 = vmand %vm456_vm12, %vm505_vm13  ;;  %vm524_vm12 = vcmp.lt.s32.totalorder %v12288_v27, %v12102_v42  ;;  %v12507_v27 = vadd.s32 344, %v11775_v8 }
 0x35f   : > { %19468 = vst [vmem:[#allocation33_spill] sm:$0xff] %v19467_v28  ;;  %vm554_vm9 = vmand %vm457_vm1, %vm506_vm6  ;;  %10801 = vmatpush3.bf16.msk.msra.mxu0 %vm12294_vm15, %v18622_v20  ;;  %vm486_vm1 = vcmp.ge.s32.totalorder %v12299_v35, %v12093_v37  ;;  %vm535_vm6 = vcmp.lt.s32.totalorder %v12299_v35, %v12102_v42  ;;  %vm536_vm15 = vcmp.lt.s32.totalorder %v12309_v36, %v12102_v42  ;;  %v12354_v28 = vadd.s32 216, %v11775_v8 }
 0x360   : > { %vm12318_vm13 = vmpackc.low %vm554_vm9, %vm553_vm4  ;;  %vm487_vm9 = vcmp.ge.s32.totalorder %v12309_v36, %v12093_v37  ;;  %v12389_v36 = vadd.s32 80, %v11775_v8  ;;  %v19488_v35 = vmov 0  ;;  %19511 = vst [vmem:[#allocation57_spill] sm:$0xff] %v12507_v27 }
 0x361   : > { %v19472_v56 = vsel %vm12318_vm13, 4294967295, %v19471_v56  ;;  %10777 = vmatpush3.bf16.msk.msra.mxu1 %vm12318_vm13, %v18622_v20  ;;  %vm571_vm3 = vmand %vm474_vm5, %vm523_vm11  ;;  %vm458_vm11 = vcmp.ge.s32.totalorder %v12323_v46, %v12093_v37  ;;  %19478 = vst [vmem:[#allocation39_spill] sm:$0xff] %v12354_v28 }
 0x362   : > { %19473 = vst [vmem:[#allocation36_spill] sm:$0xff] %v19472_v56  ;;  %vm572_vm4 = vmand %vm475_vm8, %vm524_vm12  ;;  %vm507_vm8 = vcmp.lt.s32.totalorder %v12323_v46, %v12102_v42 }
 0x363   : > { %vm12339_vm10 = vmpackc.low %vm572_vm4, %vm571_vm3  ;;  %vm459_vm3 = vcmp.ge.s32.totalorder %v12333_v48, %v12093_v37  ;;  %vm508_vm4 = vcmp.lt.s32.totalorder %v12333_v48, %v12102_v42 }
 0x364   : > { %v19475_v2 = vsel %vm12339_vm10, 4294967295, %v19474_v2  ;;  %10779 = vmatprep.subr.msk.bf16.mxu1 %vm12339_vm10, %v18622_v20  ;;  %vm583_vm5 = vmand %vm486_vm1, %vm535_vm6  ;;  %v12365_v20 = vadd.s32 304, %v11775_v8  ;;  %vm525_vm6 = vcmp.lt.s32.totalorder %v12344_v52, %v12102_v42 }
 0x365   : > { %19476 = vst [vmem:[#allocation37_spill] sm:$0xff] %v19475_v2  ;;  %vm584_vm12 = vmand %vm487_vm9, %vm536_vm15  ;;  %vm476_vm15 = vcmp.ge.s32.totalorder %v12344_v52, %v12093_v37  ;;  %v12497_v52 = vadd.s32 336, %v11775_v8 }
 0x366   : > { %vm12360_vm13 = vmpackc.low %vm584_vm12, %vm583_vm5  ;;  %19482 = vst [vmem:[#allocation41_spill] sm:$0xff] %v12365_v20  ;;  %vm477_vm5 = vcmp.ge.s32.totalorder %v12354_v28, %v12093_v37 }
 0x367   : > { %v19480_v18 = vsel %vm12360_vm13, 4294967295, %v19479_v18  ;;  %10803 = vmatprep.subr.msk.bf16.mxu0 %vm12360_vm13, %v19483_v39  ;;  %vm555_vm1 = vmand %vm458_vm11, %vm507_vm8  ;;  %vm526_vm11 = vcmp.lt.s32.totalorder %v12354_v28, %v12102_v42  ;;  %v12476_v28 = vadd.s32 240, %v11775_v8  ;;  %19510 = vst [vmem:[#allocation56_spill] sm:$0xff] %v12497_v52 }
 0x368   : > { %19481 = vst [vmem:[#allocation40_spill] sm:$0xff] %v19480_v18  ;;  %vm556_vm9 = vmand %vm459_vm3, %vm508_vm4  ;;  %10805 = vmatpush3.bf16.msk.msra.mxu0 %vm12360_vm13, %v19483_v39  ;;  %vm488_vm3 = vcmp.ge.s32.totalorder %v12365_v20, %v12093_v37  ;;  %vm537_vm4 = vcmp.lt.s32.totalorder %v12365_v20, %v12102_v42  ;;  %v12399_v18 = vadd.s32 88, %v11775_v8  ;;  %vm538_vm13 = vcmp.lt.s32.totalorder %v12375_v38, %v12102_v42 }
 0x369   : > { %vm12384_vm8 = vmpackc.low %vm556_vm9, %vm555_vm1  ;;  %vm489_vm9 = vcmp.ge.s32.totalorder %v12375_v38, %v12093_v37  ;;  %v12420_v38 = vadd.s32 232, %v11775_v8  ;;  %v19493_v20 = vmov 0  ;;  %19505 = vst [vmem:[#allocation53_spill] sm:$0xff] %v12476_v28 }
 0x36a   : > { %v19486_v3 = vsel %vm12384_vm8, 4294967295, %v19485_v3  ;;  %10781 = vmatpush3.bf16.msk.msra.mxu1 %vm12384_vm8, %v19483_v39  ;;  %vm573_vm12 = vmand %vm476_vm15, %vm525_vm6  ;;  %vm460_vm6 = vcmp.ge.s32.totalorder %v12389_v36, %v12093_v37 }
 0x36b   : > { %19487 = vst [vmem:[#allocation43_spill] sm:$0xff] %v19486_v3  ;;  %vm574_vm1 = vmand %vm477_vm5, %vm526_vm11  ;;  %vm509_vm5 = vcmp.lt.s32.totalorder %v12389_v36, %v12102_v42 }
 0x36c   : > { %vm12405_vm10 = vmpackc.low %vm574_vm1, %vm573_vm12  ;;  %19492 = vst [vmem:[#allocation46_spill] sm:$0xff] %v12420_v38  ;;  %vm461_vm12 = vcmp.ge.s32.totalorder %v12399_v18, %v12093_v37  ;;  %vm510_vm1 = vcmp.lt.s32.totalorder %v12399_v18, %v12102_v42 }
 0x36d   : > { %v19489_v35 = vsel %vm12405_vm10, 4294967295, %v19488_v35  ;;  %10783 = vmatprep.subr.msk.bf16.mxu1 %vm12405_vm10, %v19483_v39  ;;  %vm585_vm15 = vmand %vm488_vm3, %vm537_vm4  ;;  %vm527_vm4 = vcmp.lt.s32.totalorder %v12410_v21, %v12102_v42 }
 0x36e   : > { %19490 = vst [vmem:[#allocation44_spill] sm:$0xff] %v19489_v35  ;;  %vm586_vm11 = vmand %vm489_vm9, %vm538_vm13  ;;  %vm478_vm13 = vcmp.ge.s32.totalorder %v12410_v21, %v12093_v37  ;;  %v12455_v21 = vadd.s32 96, %v11775_v8 }
 0x36f   : > { %vm12426_vm8 = vmpackc.low %vm586_vm11, %vm585_vm15  ;;  %vm479_vm15 = vcmp.ge.s32.totalorder %v12420_v38, %v12093_v37 }
 0x370   : > { %v19494_v20 = vsel %vm12426_vm8, 4294967295, %v19493_v20  ;;  %10807 = vmatprep.subr.msk.bf16.mxu0 %vm12426_vm8, %v19483_v39  ;;  %vm557_vm3 = vmand %vm460_vm6, %vm509_vm5  ;;  %vm528_vm6 = vcmp.lt.s32.totalorder %v12420_v38, %v12102_v42  ;;  %v19502_v38 = vmov 0 }
 0x371   : > { %19495 = vst [vmem:[#allocation47_spill] sm:$0xff] %v19494_v20  ;;  %vm558_vm9 = vmand %vm461_vm12, %vm510_vm1  ;;  %10809 = vmatpush3.bf16.msk.msra.mxu0 %vm12426_vm8, %v19483_v39  ;;  %vm490_vm12 = vcmp.ge.s32.totalorder %v12431_v19, %v12093_v37  ;;  %vm539_vm1 = vcmp.lt.s32.totalorder %v12431_v19, %v12102_v42  ;;  %v12465_v20 = vadd.s32 104, %v11775_v8  ;;  %vm540_vm8 = vcmp.lt.s32.totalorder %v12441_v9, %v12102_v42 }
 0x372   : > { %vm12450_vm5 = vmpackc.low %vm558_vm9, %vm557_vm3  ;;  %vm491_vm9 = vcmp.ge.s32.totalorder %v12441_v9, %v12093_v37  ;;  %v12486_v9 = vadd.s32 248, %v11775_v8  ;;  %v19507_v19 = vmov 0 }
 0x373   : > { %v19499_v7 = vsel %vm12450_vm5, 4294967295, %v19498_v7  ;;  %10785 = vmatpush3.bf16.msk.msra.mxu1 %vm12450_vm5, %v19483_v39  ;;  %vm575_vm11 = vmand %vm478_vm13, %vm527_vm4  ;;  %19501 = vst [vmem:[#allocation51_spill] sm:$0xff] %v12465_v20  ;;  %vm462_vm4 = vcmp.ge.s32.totalorder %v12455_v21, %v12093_v37 }
 0x374   : > { %19500 = vst [vmem:[#allocation50_spill] sm:$0xff] %v19499_v7  ;;  %vm576_vm3 = vmand %vm479_vm15, %vm528_vm6  ;;  %vm511_vm15 = vcmp.lt.s32.totalorder %v12455_v21, %v12102_v42 }
 0x375   : > { %vm12471_vm10 = vmpackc.low %vm576_vm3, %vm575_vm11  ;;  %19506 = vst [vmem:[#allocation54_spill] sm:$0xff] %v12486_v9  ;;  %vm463_vm11 = vcmp.ge.s32.totalorder %v12465_v20, %v12093_v37  ;;  %vm512_vm3 = vcmp.lt.s32.totalorder %v12465_v20, %v12102_v42 }
 0x376   : > { %v19503_v38 = vsel %vm12471_vm10, 4294967295, %v19502_v38  ;;  %10787 = vmatprep.subr.msk.bf16.mxu1 %vm12471_vm10, %v19483_v39  ;;  %vm587_vm13 = vmand %vm490_vm12, %vm539_vm1  ;;  %vm529_vm1 = vcmp.lt.s32.totalorder %v12476_v28, %v12102_v42 }
 0x377   : > { %19504 = vst [vmem:[#allocation52_spill] sm:$0xff] %v19503_v38  ;;  %vm588_vm6 = vmand %vm491_vm9, %vm540_vm8  ;;  %vm480_vm8 = vcmp.ge.s32.totalorder %v12476_v28, %v12093_v37  ;;  %v12521_v28 = vadd.s32 112, %v11775_v8 }
 0x378   : > { %vm12492_vm5 = vmpackc.low %vm588_vm6, %vm587_vm13  ;;  %vm481_vm13 = vcmp.ge.s32.totalorder %v12486_v9, %v12093_v37 }
 0x379   : > { %v19508_v19 = vsel %vm12492_vm5, 4294967295, %v19507_v19  ;;  %10811 = vmatprep.subr.msk.bf16.mxu0 %vm12492_vm5, %v19483_v39  ;;  %vm559_vm12 = vmand %vm462_vm4, %vm511_vm15  ;;  %vm530_vm4 = vcmp.lt.s32.totalorder %v12486_v9, %v12102_v42  ;;  %19515 = vst [vmem:[#allocation59_spill] sm:$0xff] %v12521_v28  ;;  %v19517_v9 = vmov 0 }
 0x37a   : > { %19509 = vst [vmem:[#allocation55_spill] sm:$0xff] %v19508_v19  ;;  %vm560_vm9 = vmand %vm463_vm11, %vm512_vm3  ;;  %10813 = vmatpush3.bf16.msk.msra.mxu0 %vm12492_vm5, %v19483_v39  ;;  %vm492_vm11 = vcmp.ge.s32.totalorder %v12497_v52, %v12093_v37  ;;  %vm541_vm3 = vcmp.lt.s32.totalorder %v12497_v52, %v12102_v42  ;;  %v12531_v19 = vadd.s32 120, %v11775_v8  ;;  %vm542_vm5 = vcmp.lt.s32.totalorder %v12507_v27, %v12102_v42 }
 0x37b   : > { %vm12516_vm15 = vmpackc.low %vm560_vm9, %vm559_vm12  ;;  %vm493_vm9 = vcmp.ge.s32.totalorder %v12507_v27, %v12093_v37  ;;  %v12552_v27 = vadd.s32 360, %v11775_v8  ;;  %v19522_v52 = vmov 0 }
 0x37c   : > { %v19513_v26 = vsel %vm12516_vm15, 4294967295, %v19512_v26  ;;  %10789 = vmatpush3.bf16.msk.msra.mxu1 %vm12516_vm15, %v19483_v39  ;;  %vm577_vm6 = vmand %vm480_vm8, %vm529_vm1  ;;  %19516 = vst [vmem:[#allocation60_spill] sm:$0xff] %v12531_v19  ;;  %vm464_vm1 = vcmp.ge.s32.totalorder %v12521_v28, %v12093_v37 }
 0x37d   : > { %19514 = vst [vmem:[#allocation58_spill] sm:$0xff] %v19513_v26  ;;  %vm578_vm12 = vmand %vm481_vm13, %vm530_vm4  ;;  %vm513_vm13 = vcmp.lt.s32.totalorder %v12521_v28, %v12102_v42 }
 0x37e   : > { %vm12537_vm10 = vmpackc.low %vm578_vm12, %vm577_vm6  ;;  %19521 = vst [vmem:[#allocation63_spill] sm:$0xff] %v12552_v27  ;;  %vm465_vm6 = vcmp.ge.s32.totalorder %v12531_v19, %v12093_v37  ;;  %vm514_vm12 = vcmp.lt.s32.totalorder %v12531_v19, %v12102_v42 }
 0x37f   : > { %v19518_v9 = vsel %vm12537_vm10, 4294967295, %v19517_v9  ;;  %10791 = vmatprep.subr.msk.bf16.mxu1 %vm12537_vm10, %v19483_v39  ;;  %vm589_vm8 = vmand %vm492_vm11, %vm541_vm3  ;;  %vm543_vm3 = vcmp.lt.s32.totalorder %v12542_v17, %v12102_v42 }
 0x380   : > { %19519 = vst [vmem:[#allocation61_spill] sm:$0xff] %v19518_v9  ;;  %vm590_vm4 = vmand %vm493_vm9, %vm542_vm5  ;;  %vm494_vm5 = vcmp.ge.s32.totalorder %v12542_v17, %v12093_v37 }
 0x381   : > { %vm12558_vm15 = vmpackc.low %vm590_vm4, %vm589_vm8  ;;  %vm495_vm8 = vcmp.ge.s32.totalorder %v12552_v27, %v12093_v37 }
 0x382   : > { %v19523_v52 = vsel %vm12558_vm15, 4294967295, %v19522_v52  ;;  %10815 = vmatprep.subr.msk.bf16.mxu0 %vm12558_vm15, %v19483_v39  ;;  %vm561_vm11 = vmand %vm464_vm1, %vm513_vm13  ;;  %vm544_vm1 = vcmp.lt.s32.totalorder %v12552_v27, %v12102_v42 }
 0x383   : > { %19524 = vst [vmem:[#allocation64_spill] sm:$0xff] %v19523_v52  ;;  %vm562_vm9 = vmand %vm465_vm6, %vm514_vm12  ;;  %10817 = vmatpush3.bf16.msk.msra.mxu0 %vm12558_vm15, %v19483_v39  ;;  %vm496_vm6 = vcmp.ge.s32.totalorder %v12563_v16, %v12093_v37  ;;  %vm545_vm12 = vcmp.lt.s32.totalorder %v12563_v16, %v12102_v42  ;;  %v19530_v52 = vmov 0  ;;  %v19533_v16 = vmov 0 }
 0x384   : > { %vm12582_vm13 = vmpackc.low %vm562_vm9, %vm561_vm11  ;;  %vm497_vm11 = vcmp.ge.s32.totalorder %v12573_v5, %v12093_v37  ;;  %vm546_vm9 = vcmp.lt.s32.totalorder %v12573_v5, %v12102_v42  ;;  %v692_v37 = vcvt.s32.f32 %v11947_v51  ;;  %v693_v42 = vcvt.s32.f32 %v11950_v53 }
 0x385   : > { %v19528_v59 = vsel %vm12582_vm13, 4294967295, %v19527_v59  ;;  %10793 = vmatpush3.bf16.msk.msra.mxu1 %vm12582_vm13, %v19483_v39  ;;  %vm591_vm4 = vmand %vm494_vm5, %vm543_vm3 }
 0x386   : > { %19529 = vst [vmem:[#allocation67_spill] sm:$0xff] %v19528_v59  ;;  %vm592_vm15 = vmand %vm495_vm8, %vm544_vm1  ;;  %10827 = vmatprep.subr.msk.bf16.mxu1 %vm11966_vm2, %v19483_v39  ;;  %v696_v5 = vadd.f32 0.5, %v693_v42 }
 0x387   : > { %vm12600_vm10 = vmpackc.low %vm592_vm15, %vm591_vm4  ;;  %vm19537_vm4 = vcmp.eq.s32.totalorder %v11785_v15, %v11775_v8 }
 0x388   : > { %v19531_v52 = vsel %vm12600_vm10, 4294967295, %v19530_v52  ;;  %10819 = vmatprep.subr.msk.bf16.mxu0 %vm12600_vm10, %v19483_v39  ;;  %vm593_vm5 = vmand %vm496_vm6, %vm545_vm12  ;;  %v699_v17 = vmul.f32 0.0625, %v696_v5  ;;  %vm19539_vm6 = vcmp.eq.s32.totalorder %v11785_v15, %v11782_v11 }
 0x389   : > { %19532 = vst [vmem:[#allocation68_spill] sm:$0xff] %v19531_v52  ;;  %10821 = vmatpush3.bf16.msk.msra.mxu0 %vm12600_vm10, %v19483_v39  ;;  %vm594_vm3 = vmand %vm497_vm11, %vm546_vm9  ;;  %v695_v52 = vadd.f32 0.5, %v692_v37  ;;  %vm2567_vm9 = vcmp.gt.f32.partialorder %v11902_v32, 0.0 }
 0x38a   : > { %vm12610_vm8 = vmpackc.low %vm594_vm3, %vm593_vm5  ;;  %v702_v49 = vfloor.f32 %v699_v17  ;;  %vm2568_vm5 = vcmp.gt.f32.partialorder %v11899_v31, 0.0 }
 0x38b   : > { %v19534_v16 = vsel %vm12610_vm8, 4294967295, %v19533_v16  ;;  %10823 = vmatprep.subr.msk.bf16.mxu0 %vm12610_vm8, %v19483_v39  ;;  %v698_v27 = vmul.f32 0.0625, %v695_v52  ;;  %v19536_v52 = vmov 0.0  }
 0x38c   : > { %19535 = vst [vmem:[#allocation69_spill] sm:$0xff] %v19534_v16  ;;  %v11343_v41 = vtrunc.f32 %v702_v49 }
 0x38d   : > { %10825 = vmatpush3.bf16.msk.msra.mxu0 %vm12610_vm8, %v19483_v39  ;;  %v701_v50 = vfloor.f32 %v698_v27 }
 0x38e   : > { %10831 = vmatprep.subr.msk.bf16.mxu0 %vm11975_vm7, %v19483_v39  ;;  %v11344_v9 = vcvt.f32.s32 %v11343_v41 }
 0x38f   : > { %v11341_v60 = vtrunc.f32 %v701_v50  ;;  %v12633_v50 = vsel %vm19537_vm4, 1.0, %v19536_v52 }
 0x390   : > { %v708_v40 = vmul.u32 16, %v11344_v9  ;;  %19538 = vst [vmem:[#allocation70_spill] sm:$0xff] %v12633_v50 }
 0x391   : > { %v11342_v59 = vcvt.f32.s32 %v11341_v60  ;;  %v12639_v60 = vsel %vm19539_vm6, 1.0, %v19536_v52  ;;  %vm2570_vm6 = vcmp.gt.f32.partialorder %v11897_v30, 0.0 }
 0x392   : > { %v711_v38 = vsub.s32 %v11950_v53, %v708_v40  ;;  %19540 = vst [vmem:[#allocation71_spill] sm:$0xff] %v12639_v60 }
 0x393   : > { %v707_v16 = vmul.u32 16, %v11342_v59 }
 0x394   : > { %vm717_vm12 = vcmp.eq.s32.totalorder %v711_v38, %v11782_v11  ;;  %vm714_vm11 = vcmp.eq.s32.totalorder %v711_v38, %v11775_v8 }
 0x395   : > { %v710_v26 = vsub.s32 %v11947_v51, %v707_v16  ;;  %v12654_v9 = vsel %vm717_vm12, 1.0, %v19536_v52  ;;  %v12657_v17 = vsel %vm714_vm11, 1.0, %v19536_v52  ;;  %vm2571_vm12 = vcmp.gt.f32.partialorder %v11895_v29, 0.0 }
 0x396   : > { %19543 = vst [vmem:[#allocation74_spill] sm:$0xff] %v12654_v9  ;;  %19544 = vst [vmem:[#allocation75_spill] sm:$0xff] %v12657_v17 }
 0x397   : > { %vm713_vm15 = vcmp.eq.s32.totalorder %v710_v26, %v11775_v8  ;;  %vm716_vm1 = vcmp.eq.s32.totalorder %v710_v26, %v11782_v11 }
 0x398   : > { %v12642_v51 = vsel %vm713_vm15, 1.0, %v19536_v52  ;;  %v12645_v53 = vsel %vm716_vm1, 1.0, %v19536_v52 }
 0x399   : > { %19541 = vst [vmem:[#allocation72_spill] sm:$0xff] %v12642_v51  ;;  %19542 = vst [vmem:[#allocation73_spill] sm:$0xff] %v12645_v53 }
 0x3f6   : > { %v2956_v7 = vpop.f32.mrb[8].mxu0 }
 0x3f7   : > { %v2958_v37 = vpop.f32.mrb[9].mxu0  ;;  %v3042_v41 = vmul.f32 %v12633_v50, %v2956_v7 }
 0x3f8   : > { %v3043_v15 = vmul.f32 %v12642_v51, %v2958_v37 }
 0x3fa   : > { %v2962_v40 = vpop.f32.mrb[10].mxu0 }
 0x3fb   : > { %v3045_v49 = vmul.f32 %v12639_v60, %v2962_v40  ;;  %v2964_v59 = vpop.f32.mrb[11].mxu0 }
 0x3fc   : > { %v3046_v5 = vmul.f32 %v12645_v53, %v2964_v59 }
 0x3fd   : > { %v3048_v16 = vadd.f32 %v3045_v49, %v3042_v41 }
 0x3fe   : > { %v3055_v26 = vadd.f32 %v3046_v5, %v3043_v15  ;;  %v10356_v27 = vpop.f32.mrb[12].mxu0 }
 0x3ff   : > { %v3049_v42 = vrot.slane %v3048_v16, 4  ;;  %v3047_v38 = vmul.f32 %v10356_v27, %v12654_v9  ;;  %v3033_v7 = vpop.f32.mrb[13].mxu0 }
 0x400   : > { %v3056_v50 = vrot.slane %v3055_v26, 4  ;;  %v3044_v40 = vmul.f32 %v12657_v17, %v3033_v7  ;;  %v19604_v17 = vld [vmem:[#allocation58_spill] sm:$0xff] }
 0x401   : > { %v3050_v60 = vadd.f32 %v3049_v42, %v3048_v16 }
 0x402   : > { %v3057_v37 = vadd.f32 %v3056_v50, %v3055_v26  ;;  %v3062_v51 = vadd.f32 %v3047_v38, %v3044_v40 }
 0x403   : > { %v3051_v59 = vrot.slane %v3050_v60, 2 }
 0x404   : > { %v3063_v53 = vrot.slane %v3062_v51, 4  ;;  %v3139_v19 = vpop.f32.mrb[14].mxu0  ;;  %v3058_v35 = vrot.slane %v3057_v37, 2 }
 0x405   : > { %v3052_v41 = vadd.f32 %v3051_v59, %v3050_v60  ;;  %v3141_v49 = vpop.f32.mrb[15].mxu0  ;;  %v11711_v60 = vmov -1e+30  }
 0x406   : > { %v3064_v3 = vadd.f32 %v3063_v53, %v3062_v51  ;;  %v3059_v28 = vadd.f32 %v3058_v35, %v3057_v37  ;;  %v12663_v51 = vsel %vm2567_vm9, 0.0, %v11711_v60 }
 0x407   : > { %v3053_v15 = vrot.slane %v3052_v41, 1  ;;  %19545 = vst [vmem:[#allocation76_spill] sm:$0xff] %v12663_v51 }
 0x408   : > { %v3060_v5 = vrot.slane %v3059_v28, 1  ;;  %v3145_v2 = vpop.f32.mrb[16].mxu0  ;;  %v3065_v56 = vrot.slane %v3064_v3, 2 }
 0x409   : > { %v3054_v27 = vadd.f32 %v3053_v15, %v3052_v41  ;;  %v3147_v9 = vpop.f32.mrb[17].mxu0 }
 0x40a   : > { %v3061_v20 = vadd.f32 %v3060_v5, %v3059_v28  ;;  %v3066_v25 = vadd.f32 %v3065_v56, %v3064_v3  ;;  %v12671_v5 = vsel %vm2570_vm6, 0.0, %v11711_v60 }
 0x40b   : > { %v3140_v50 = vadd.f32 %v3139_v19, %v3054_v27  ;;  %v3146_v16 = vadd.f32 %v3145_v2, %v3054_v27  ;;  %v12665_v2 = vsel %vm2568_vm5, 0.0, %v11711_v60  ;;  %19547 = vst [vmem:[#allocation78_spill] sm:$0xff] %v12671_v5  ;;  %vm2572_vm5 = vcmp.gt.f32.partialorder %v11909_v33, 0.0 }
 0x40c   : > { %v3142_v26 = vadd.f32 %v3141_v49, %v3061_v20  ;;  %v3148_v42 = vadd.f32 %v3147_v9, %v3061_v20  ;;  %v3067_v38 = vrot.slane %v3066_v25, 1  ;;  %v10365_v7 = vpop.f32.mrb[18].mxu0  ;;  %19546 = vst [vmem:[#allocation77_spill] sm:$0xff] %v12665_v2 }
 0x40d   : > { %vm3225_vm3 = vcmp.ge.f32.partialorder %v3140_v50, 0.0  ;;  %v3231_v35 = vmul.f32 0.2, %v3140_v50  ;;  %v3234_v40 = vmul.f32 0.2, %v3146_v16  ;;  %vm3228_vm1 = vcmp.ge.f32.partialorder %v3146_v16, 0.0 }
 0x40e   : > { %vm3226_vm15 = vcmp.ge.f32.partialorder %v3142_v26, 0.0  ;;  %v3232_v53 = vmul.f32 0.2, %v3142_v26  ;;  %v3235_v3 = vmul.f32 0.2, %v3148_v42  ;;  %v3068_v56 = vadd.f32 %v3067_v38, %v3066_v25  ;;  %v3216_v32 = vpop.f32.mrb[19].mxu0 }
 0x40f   : > { %v3237_v19 = vsel %vm3225_vm3, %v3140_v50, %v3231_v35  ;;  %vm3229_vm4 = vcmp.ge.f32.partialorder %v3148_v42, 0.0  ;;  %v3240_v41 = vsel %vm3228_vm1, %v3146_v16, %v3234_v40  ;;  %vm2569_vm3 = vcmp.gt.f32.partialorder %v11911_v34, 0.0 }
 0x410   : > { %v3243_v20 = vadd.f32 %v3237_v19, %v12663_v51  ;;  %v3238_v28 = vsel %vm3226_vm15, %v3142_v26, %v3232_v53  ;;  %v3222_v31 = vadd.f32 %v10365_v7, %v3068_v56  ;;  %v3217_v9 = vadd.f32 %v3216_v32, %v3068_v56 }
 0x411   : > { %v3244_v37 = vadd.f32 %v3238_v28, %v12665_v2  ;;  %v3241_v15 = vsel %vm3229_vm4, %v3148_v42, %v3235_v3  ;;  %v12673_v26 = vsel %vm2571_vm12, 0.0, %v11711_v60  ;;  %v3246_v38 = vadd.f32 %v3240_v41, %v12671_v5  ;;  %v19596_v2 = vld [vmem:[#allocation60_spill] sm:$0xff] }
 0x412   : > { %v3343_v59 = vpop.f32.mrb[20].mxu0  ;;  %vm3230_vm11 = vcmp.ge.f32.partialorder %v3222_v31, 0.0  ;;  %v3236_v25 = vmul.f32 0.2, %v3222_v31  ;;  %v3233_v49 = vmul.f32 0.2, %v3217_v9  ;;  %v3247_v7 = vadd.f32 %v3241_v15, %v12673_v26 }
 0x413   : > { %vm3227_vm9 = vcmp.ge.f32.partialorder %v3217_v9, 0.0  ;;  %v3429_v27 = vsub.f32 %v3243_v20, %v3343_v59  ;;  %v3345_v50 = vpop.f32.mrb[21].mxu0  ;;  %19548 = vst [vmem:[#allocation79_spill] sm:$0xff] %v12673_v26  ;;  %v12680_v56 = vsel %vm2572_vm5, 0.0, %v11711_v60  ;;  %v12682_v19 = vsel %vm2569_vm3, 0.0, %v11711_v60 }
 0x414   : > { %v3430_v30 = vsub.f32 %v3244_v37, %v3345_v50  ;;  %v3242_v42 = vsel %vm3230_vm11, %v3222_v31, %v3236_v25  ;;  %v3239_v3 = vsel %vm3227_vm9, %v3217_v9, %v3233_v49  ;;  %19549 = vst [vmem:[#allocation80_spill] sm:$0xff] %v12680_v56  ;;  %19550 = vst [vmem:[#allocation81_spill] sm:$0xff] %v12682_v19  ;;  %vm19556_vm15 = vnez %v19426_v4 }
 0x415   : > { %v3435_v29 = vmul.f32 1.442695, %v3429_v27  ;;  %v3248_v33 = vadd.f32 %v3242_v42, %v12680_v56  ;;  %v3245_v37 = vadd.f32 %v3239_v3, %v12682_v19  ;;  %v19553_v27 = vmov 1.0  }
 0x416   : > { %v3349_v16 = vpop.f32.mrb[22].mxu0  ;;  %v3437_v35 = vmul.f32 1.442695, %v3430_v30  ;;  %vm19559_vm1 = vnez %v19423_v0  ;;  %vm19560_vm4 = vcmask 195584   ;;  %vm19564_vm9 = vnez %v19433_v55 }
 0x417   : > { %v3432_v53 = vsub.f32 %v3246_v38, %v3349_v16  ;;  %v3351_v40 = vpop.f32.mrb[23].mxu0  ;;  %v730_v16 = vcvt.s32.f32 %v11775_v8  ;;  %vm19561_vm6 = vmmov %vm19560_vm4  ;;  %v740_v55 = vcvt.s32.f32 %v12389_v36  ;;  %v745_v51 = vcvt.s32.f32 %v19596_v2 }
 0x418   : > { %v3433_v32 = vsub.f32 %v3247_v7, %v3351_v40  ;;  %11650 = vpow2.f32 %v3437_v35  ;;  %v732_v35 = vcvt.s32.f32 %v11953_v54  ;;  %vm19563_vm12 = vmmov %vm19560_vm4 }
 0x419   : > { %11652 = vpow2.f32 %v3435_v29  ;;  %v3441_v34 = vmul.f32 1.442695, %v3432_v53  ;;  %v19558_v29 = vpack.c.bf16 %v11937_v47, %v11928_v44  ;;  %v12727_v44 = vadd.f32 0.5, %v730_v16  ;;  %vm19565_vm5 = vmmov %vm19560_vm4 }
 0x41a   : > { %v3443_v20 = vmul.f32 1.442695, %v3433_v32  ;;  %v10374_v28 = vpop.f32.mrb[24].mxu0  ;;  %v731_v47 = vcvt.s32.f32 %v11782_v11 }
 0x41b   : > { %v3434_v59 = vsub.f32 %v3248_v33, %v10374_v28  ;;  %v3420_v31 = vpop.f32.mrb[25].mxu0  ;;  %v826_v7 = vmul.f32 0.0625, %v12727_v44  ;;  %v733_v28 = vcvt.s32.f32 %v12138_v57 }
 0x41c   : > { %11654 = vpow2.f32 %v3443_v20  ;;  %v3431_v41 = vsub.f32 %v3245_v37, %v3420_v31  ;;  %v12731_v42 = vadd.f32 0.5, %v731_v47 }
 0x41d   : > { %v3445_v25 = vmul.f32 1.442695, %v3434_v59  ;;  %11656 = vpow2.f32 %v3441_v34  ;;  %v874_v32 = vfloor.f32 %v826_v7  ;;  %v12735_v34 = vadd.f32 0.5, %v732_v35 }
 0x41e   : > { %v3439_v9 = vmul.f32 1.442695, %v3431_v41  ;;  %v827_v33 = vmul.f32 0.0625, %v12731_v42  ;;  %v12739_v47 = vadd.f32 0.5, %v733_v28  ;;  %v734_v7 = vcvt.s32.f32 %v12191_v12 }
 0x41f   : > { %v11345_v41 = vtrunc.f32 %v874_v32  ;;  %v735_v32 = vcvt.s32.f32 %v12201_v13 }
 0x420   : > { %11658 = vpow2.f32 %v3439_v9  ;;  %v828_v9 = vmul.f32 0.0625, %v12735_v34 }
 0x421   : > { %11660 = vpow2.f32 %v3445_v25  ;;  %v875_v25 = vfloor.f32 %v827_v33  ;;  %v12742_v35 = vcvt.f32.s32 %v11345_v41  ;;  %v736_v33 = vcvt.s32.f32 %v12257_v23 }
 0x422   : > { %v12686_v60 = vpop.eup %11650  ;;  %v876_v19 = vfloor.f32 %v828_v9  ;;  %v737_v9 = vcvt.s32.f32 %v12267_v24 }
 0x423   : > { %v12688_v49 = vpop.eup %11652  ;;  %3511 = vmatprep.mubr.f32.mxu1 %v12686_v60  ;;  %v970_v28 = vmul.u32 16, %v12742_v35 }
 0x424   : > { %19551 = vst [vmem:[#allocation82_spill] sm:$0xff] %v12688_v49  ;;  %3512 = vmatmul.mubr.f32.vlgmr.msra.gmra.mrb[8].mxu1 %v12688_v49  ;;  %v12764_v5 = vadd.f32 0.5, %v737_v9  ;;  %v19632_v49 = vld [vmem:[#allocation24_spill] sm:$0xff] }
 0x425   : > { %10829 = vmatpush1.bf16.msk.msra.mxu1 %vm11983_vm14, %v19483_v39 }
 0x426   : > { %v12692_v15 = vpop.eup %11654  ;;  %9451 = vmatprep.subr.msk.mxu1 %vm11992_vm0, %v19553_v27 }
 0x427   : > { %19552 = vst [vmem:[#allocation83_spill] sm:$0xff] %v12692_v15  ;;  %3516 = vmatprep.mubr.f32.mxu1 %v12692_v15  ;;  %v12701_v50 = vpop.eup %11656 }
 0x428   : > { %19554 = vst [vmem:[#allocation84_spill] sm:$0xff] %v12701_v50  ;;  %3517 = vmatmul.mubr.f32.gmra.mrb[10].mxu1 %v12701_v50  ;;  %v19628_v50 = vld [vmem:[#allocation18_spill] sm:$0xff] }
 0x429   : > { %9452 = vmatpush1.msk.msra.mxu1 %vm19556_vm15, %v19553_v27  ;;  %3669 = vmatprep.mubr.f32.mxu1 %v19536_v52 }
 0x42a   : > { %v12704_v30 = vpop.eup %11658  ;;  %10835 = vmatprep.subr.bf16.mxu1 %v19558_v29 }
 0x42b   : > { %19555 = vst [vmem:[#allocation85_spill] sm:$0xff] %v12704_v30  ;;  %v12710_v38 = vpop.eup %11660  ;;  %10407 = vmatprep.mubr.f32.mxu0 %v12704_v30  ;;  %v751_v30 = vcvt.s32.f32 %v19628_v50 }
 0x42c   : > { %19557 = vst [vmem:[#allocation86_spill] sm:$0xff] %v12710_v38  ;;  %10408 = vmatmul.mubr.f32.vlgmr.msra.gmra.mrb[26].mxu0 %v12710_v38 }
 0x42d   : > { %10833 = vmatpush3.bf16.msk.msra.mxu0 %vm11975_vm7, %v19483_v39 }
 0x42e   : > { %10414 = vmatprep.subr.msk.mxu0 %vm19559_vm1, %v19553_v27 }
 0x431   : > { %10415 = vmatpush3.msk.msra.mxu0 %vm19559_vm1, %v19553_v27 }
 0x4f7   : > { %v9967_v53 = vpop.f32.mrb[8].mxu1 }
 0x4f8   : > { %v9968_v40 = vpop.f32.mrb[9].mxu1 }
 0x4f9   : > { %v9969_v3 = vadd.f32 %v9968_v40, %v9967_v53  ;;  %v11347_v40 = vtrunc.f32 %v875_v25  ;;  %v12755_v25 = vadd.f32 0.5, %v736_v33  ;;  %v19562_v33 = vpack.c.bf16 %v11933_v45, %v11926_v43 }
 0x4fa   : > { %v833_v45 = vmul.f32 0.0625, %v12764_v5 }
 0x4fb   : > { %v9970_v20 = vpop.f32.mrb[10].mxu1 }
 0x4fc   : > { %v9971_v37 = vpop.f32.mrb[11].mxu1 }
 0x4fd   : > { %v9972_v59 = vadd.f32 %v9971_v37, %v9970_v20  ;;  %v829_v20 = vmul.f32 0.0625, %v12739_v47  ;;  %v12745_v37 = vadd.f32 0.5, %v734_v7 }
 0x4ff   : > { %v10409_v31 = vpop.f32.mrb[26].mxu0  ;;  %v830_v41 = vmul.f32 0.0625, %v12745_v37 }
 0x500   : > { %v3594_v29 = vadd.f32 %v10409_v31, %v9972_v59  ;;  %v3588_v16 = vpop.f32.mrb[27].mxu0  ;;  %v12750_v59 = vcvt.f32.s32 %v11347_v40  ;;  %v11349_v31 = vtrunc.f32 %v876_v19 }
 0x501   : > { %v3589_v53 = vadd.f32 %v9969_v3, %v3588_v16  ;;  %v877_v3 = vfloor.f32 %v829_v20  ;;  %v12753_v16 = vadd.f32 0.5, %v735_v32  ;;  %v878_v26 = vfloor.f32 %v830_v41 }
 0x502   : > { %v971_v7 = vmul.u32 16, %v12750_v59  ;;  %v832_v20 = vmul.f32 0.0625, %v12755_v25 }
 0x503   : > { %11662 = vrcp.f32 %v3589_v53  ;;  %v12760_v53 = vcvt.f32.s32 %v11349_v31  ;;  %v11351_v56 = vtrunc.f32 %v877_v3  ;;  %v831_v40 = vmul.f32 0.0625, %v12753_v16 }
 0x504   : > { %11664 = vrcp.f32 %v3594_v29  ;;  %v1018_v29 = vsub.s32 %v11775_v8, %v970_v28  ;;  %v738_v8 = vcvt.s32.f32 %v12323_v46  ;;  %v1019_v28 = vsub.s32 %v11782_v11, %v971_v7 }
 0x505   : > { %v972_v31 = vmul.u32 16, %v12760_v53  ;;  %v12777_v3 = vcvt.f32.s32 %v11351_v56  ;;  %v11353_v41 = vtrunc.f32 %v878_v26  ;;  %v879_v9 = vfloor.f32 %v831_v40 }
 0x506   : > { %vm1066_vm11 = vcmp.eq.s32.totalorder %v1018_v29, %v11756_v1  ;;  %v880_v43 = vfloor.f32 %v832_v20  ;;  %v12784_v29 = vadd.f32 0.5, %v738_v8  ;;  %v739_v11 = vcvt.s32.f32 %v12333_v48 }
 0x507   : > { %v12789_v56 = vsel %vm1066_vm11, 1.0, %v19536_v52  ;;  %vm1067_vm3 = vcmp.eq.s32.totalorder %v1019_v28, %v11756_v1  ;;  %v1020_v26 = vsub.s32 %v11953_v54, %v972_v31  ;;  %v973_v7 = vmul.u32 16, %v12777_v3 }
 0x508   : > { %19566 = vst [vmem:[#allocation87_spill] sm:$0xff] %v12789_v56  ;;  %v12794_v40 = vcvt.f32.s32 %v11353_v41  ;;  %v11357_v20 = vtrunc.f32 %v880_v43  ;;  %v834_v8 = vmul.f32 0.0625, %v12784_v29  ;;  %v12804_v54 = vsel %vm1067_vm3, 1.0, %v19536_v52 }
 0x509   : > { %19568 = vst [vmem:[#allocation88_spill] sm:$0xff] %v12804_v54  ;;  %v1021_v28 = vsub.s32 %v12138_v57, %v973_v7  ;;  %vm19570_vm11 = vnez %v19441_v6  ;;  %v741_v57 = vcvt.s32.f32 %v12399_v18  ;;  %vm19573_vm3 = vnez %v19446_v10 }
 0x50a   : > { %v974_v31 = vmul.u32 16, %v12794_v40 }
 0x50d   : > { %v11663_v19 = vpop.eup %11662 }
 0x50e   : > { %v11665_v32 = vpop.eup %11664  ;;  %9453 = vmatmul.mubr.msk.f32.vlgmr.msra.gmra.mrb[12].mxu1 %vm19560_vm4, %v11663_v19  ;;  %10416 = vmatprep.mubr.msk.f32.mxu0 %vm19561_vm6, %v11663_v19  ;;  %v11355_v19 = vtrunc.f32 %v879_v9  ;;  %vm19567_vm4 = vcmask 130048   ;;  %vm19569_vm6 = vnez %v19436_v58  ;;  %v12817_v9 = vcvt.f32.s32 %v11357_v20 }
 0x50f   : > { %10837 = vmatpush1.bf16.msra.mxu1 %v19562_v33  ;;  %10417 = vmatmul.mubr.msk.f32.vlgmr.msra.gmra.mrb[28].mxu0 %vm19563_vm12, %v11665_v32  ;;  %v12799_v33 = vadd.f32 0.5, %v739_v11  ;;  %vm1068_vm12 = vcmp.eq.s32.totalorder %v1020_v26, %v11756_v1  ;;  %v12822_v26 = vadd.f32 0.5, %v740_v55 }
 0x510   : > { %3675 = vmatprep.mubr.f32.mxu1 %v19536_v52  ;;  %10979 = vmatprep.subr.msk.bf16.mxu1 %vm19564_vm9, %v19483_v39  ;;  %v12812_v41 = vcvt.f32.s32 %v11355_v19  ;;  %v12827_v7 = vsel %vm1068_vm12, 1.0, %v19536_v52  ;;  %v1022_v19 = vsub.s32 %v12191_v12, %v974_v31  ;;  %v976_v55 = vmul.u32 16, %v12817_v9 }
 0x511   : > { %v835_v11 = vmul.f32 0.0625, %v12799_v33  ;;  %19572 = vst [vmem:[#allocation89_spill] sm:$0xff] %v12827_v7  ;;  %vm19575_vm12 = vcmask 130048   ;;  %v742_v31 = vcvt.s32.f32 %v12455_v21 }
 0x512   : > { %9454 = vmatmul.mubr.msk.f32.gmra.mrb[14].mxu1 %vm19565_vm5, %v11665_v32  ;;  %v881_v32 = vfloor.f32 %v833_v45  ;;  %vm19571_vm5 = vmmov %vm19567_vm4  ;;  %v882_v45 = vfloor.f32 %v834_v8  ;;  %v975_v20 = vmul.u32 16, %v12812_v41 }
 0x513   : > { %3971 = vmatprep.mubr.f32.mxu1 %v19536_v52  ;;  %v883_v10 = vfloor.f32 %v835_v11  ;;  %v1024_v11 = vsub.s32 %v12257_v23, %v976_v55  ;;  %v19583_v55 = vld [vmem:[#allocation36_spill] sm:$0xff] }
 0x514   : > { %v11359_v43 = vtrunc.f32 %v881_v32  ;;  %v11361_v8 = vtrunc.f32 %v882_v45  ;;  %v19578_v45 = vld [vmem:[#allocation30_spill] sm:$0xff] }
 0x516   : > { %9460 = vmatmul.mubr.msk.f32.vlgmr.msra.gmra.mrb[16].mxu1 %vm19567_vm4, %v12789_v56  ;;  %vm1069_vm4 = vcmp.eq.s32.totalorder %v1021_v28, %v11756_v1  ;;  %v12839_v32 = vcvt.f32.s32 %v11359_v43  ;;  %v12844_v28 = vadd.f32 0.5, %v741_v57  ;;  %v1023_v43 = vsub.s32 %v12201_v13, %v975_v20  ;;  %v19582_v20 = vld [vmem:[#allocation51_spill] sm:$0xff] }
 0x517   : > { %3977 = vmatprep.mubr.f32.mxu1 %v19536_v52  ;;  %10981 = vmatpush3.bf16.msk.msra.mxu1 %vm19569_vm6, %v19483_v39  ;;  %v12848_v12 = vsel %vm1069_vm4, 1.0, %v19536_v52  ;;  %vm19580_vm4 = vcmask 130048   ;;  %v743_v23 = vcvt.s32.f32 %v19582_v20 }
 0x518   : > { %10983 = vmatprep.subr.msk.bf16.mxu1 %vm19570_vm11, %v19483_v39  ;;  %19576 = vst [vmem:[#allocation90_spill] sm:$0xff] %v12848_v12  ;;  %v977_v57 = vmul.u32 16, %v12839_v32  ;;  %v837_v6 = vmul.f32 0.0625, %v12844_v28  ;;  %vm1072_vm11 = vcmp.eq.s32.totalorder %v1024_v11, %v11756_v1  ;;  %v19589_v11 = vld [vmem:[#allocation59_spill] sm:$0xff] }
 0x51a   : > { %9461 = vmatmul.mubr.msk.f32.gmra.mrb[18].mxu1 %vm19571_vm5, %v12804_v54  ;;  %vm19574_vm5 = vnez %v19449_v14  ;;  %v836_v54 = vmul.f32 0.0625, %v12822_v26  ;;  %v11363_v14 = vtrunc.f32 %v883_v10  ;;  %v19585_v10 = vld [vmem:[#allocation37_spill] sm:$0xff] }
 0x51b   : > { %3983 = vmatprep.mubr.f32.mxu1 %v19536_v52  ;;  %10985 = vmatpush3.bf16.msk.msra.mxu1 %vm19573_vm3, %v19483_v39  ;;  %vm1070_vm3 = vcmp.eq.s32.totalorder %v1022_v19, %v11756_v1  ;;  %v12870_v19 = vadd.f32 0.5, %v742_v31 }
 0x51c   : > { %10987 = vmatprep.subr.msk.bf16.mxu1 %vm19574_vm5, %v19483_v39  ;;  %vm19577_vm5 = vnez %v19459_v22  ;;  %v884_v22 = vfloor.f32 %v836_v54  ;;  %v12868_v13 = vsel %vm1070_vm3, 1.0, %v19536_v52  ;;  %v1025_v54 = vsub.s32 %v12267_v24, %v977_v57  ;;  %v19590_v57 = vld [vmem:[#allocation43_spill] sm:$0xff] }
 0x51d   : > { %19581 = vst [vmem:[#allocation91_spill] sm:$0xff] %v12868_v13  ;;  %vm19587_vm3 = vcmask 130048   ;;  %v12885_v31 = vcvt.f32.s32 %v11363_v14  ;;  %v744_v24 = vcvt.s32.f32 %v19589_v11  ;;  %v19592_v14 = vld [vmem:[#allocation44_spill] sm:$0xff] }
 0x51e   : > { %9462 = vmatmul.mubr.msk.f32.gmra.mrb[20].mxu1 %vm19575_vm12, %v12827_v7  ;;  %vm19579_vm12 = vnez %v19578_v45  ;;  %v12863_v7 = vcvt.f32.s32 %v11361_v8  ;;  %v12892_v45 = vadd.f32 0.5, %v743_v23 }
 0x51f   : > { %3989 = vmatprep.mubr.f32.mxu1 %v19536_v52  ;;  %10989 = vmatpush3.bf16.msk.msra.mxu1 %vm19577_vm5, %v19483_v39  ;;  %vm19586_vm5 = vnez %v19585_v10  ;;  %v838_v10 = vmul.f32 0.0625, %v12870_v19  ;;  %v979_v23 = vmul.u32 16, %v12885_v31  ;;  %v12913_v56 = vadd.f32 0.5, %v744_v24 }
 0x520   : > { %10991 = vmatprep.subr.msk.bf16.mxu1 %vm19579_vm12, %v19483_v39  ;;  %vm19584_vm12 = vnez %v19583_v55  ;;  %v978_v8 = vmul.u32 16, %v12863_v7  ;;  %v885_v55 = vfloor.f32 %v837_v6  ;;  %v12902_v6 = vsel %vm1072_vm11, 1.0, %v19536_v52 }
 0x521   : > { %19594 = vst [vmem:[#allocation59_spill] sm:$0xff] %v12902_v6  ;;  %v886_v58 = vfloor.f32 %v838_v10 }
 0x522   : > { %9463 = vmatmul.mubr.msk.f32.gmra.mrb[22].mxu1 %vm19580_vm4, %v12848_v12  ;;  %vm1071_vm4 = vcmp.eq.s32.totalorder %v1023_v43, %v11756_v1  ;;  %v11365_v12 = vtrunc.f32 %v884_v22  ;;  %v1026_v22 = vsub.s32 %v12323_v46, %v978_v8  ;;  %v19599_v46 = vld [vmem:[#allocation52_spill] sm:$0xff] }
 0x523   : > { %3995 = vmatprep.mubr.f32.mxu1 %v19536_v52  ;;  %10993 = vmatpush3.bf16.msk.msra.mxu1 %vm19584_vm12, %v19483_v39  ;;  %v12889_v43 = vsel %vm1071_vm4, 1.0, %v19536_v52  ;;  %vm1073_vm4 = vcmp.eq.s32.totalorder %v1025_v54, %v11756_v1  ;;  %vm19595_vm12 = vcmask 130048   ;;  %v19597_v54 = vld [vmem:[#allocation50_spill] sm:$0xff]  ;;  %v11369_v24 = vtrunc.f32 %v886_v58 }
 0x524   : > { %10995 = vmatprep.subr.msk.bf16.mxu1 %vm19586_vm5, %v19483_v39  ;;  %19588 = vst [vmem:[#allocation51_spill] sm:$0xff] %v12889_v43  ;;  %vm19593_vm5 = vnez %v19592_v14  ;;  %v839_v14 = vmul.f32 0.0625, %v12892_v45  ;;  %vm19598_vm11 = vnez %v19597_v54 }
 0x526   : > { %9464 = vmatmul.mubr.msk.f32.gmra.mrb[24].mxu1 %vm19587_vm3, %v12868_v13  ;;  %vm19591_vm3 = vnez %v19590_v57  ;;  %v12909_v13 = vcvt.f32.s32 %v11365_v12  ;;  %v11367_v57 = vtrunc.f32 %v885_v55  ;;  %v12923_v12 = vsel %vm1073_vm4, 1.0, %v19536_v52 }
 0x527   : > { %4001 = vmatprep.mubr.f32.mxu1 %v19536_v52  ;;  %10997 = vmatpush3.bf16.msk.msra.mxu1 %vm19591_vm3, %v19483_v39  ;;  %19601 = vst [vmem:[#allocation60_spill] sm:$0xff] %v12923_v12  ;;  %vm1074_vm3 = vcmp.eq.s32.totalorder %v1026_v22, %v11756_v1  ;;  %v1027_v55 = vsub.s32 %v12333_v48, %v979_v23  ;;  %v887_v54 = vfloor.f32 %v839_v14  ;;  %vm19605_vm4 = vnez %v19604_v17  ;;  %v19607_v48 = vld [vmem:[#allocation61_spill] sm:$0xff] }
 0x528   : > { %10999 = vmatprep.subr.msk.bf16.mxu1 %vm19593_vm5, %v19483_v39  ;;  %vm19602_vm5 = vcmask 130048   ;;  %v980_v10 = vmul.u32 16, %v12909_v13  ;;  %v12930_v8 = vcvt.f32.s32 %v11367_v57  ;;  %v12946_v58 = vsel %vm1074_vm3, 1.0, %v19536_v52 }
 0x529   : > { %v12952_v14 = vcvt.f32.s32 %v11369_v24  ;;  %v11371_v23 = vtrunc.f32 %v887_v54 }
 0x52a   : > { %9465 = vmatmul.mubr.msk.f32.gmra.mrb[26].mxu1 %vm19595_vm12, %v12889_v43  ;;  %vm19600_vm12 = vnez %v19599_v46  ;;  %v840_v46 = vmul.f32 0.0625, %v12913_v56  ;;  %v12934_v43 = vadd.f32 0.5, %v745_v51  ;;  %v1028_v51 = vsub.s32 %v12389_v36, %v980_v10 }
 0x52b   : > { %4007 = vmatprep.mubr.f32.mxu1 %v19536_v52  ;;  %11001 = vmatpush3.bf16.msk.msra.mxu1 %vm19598_vm11, %v19483_v39  ;;  %vm1075_vm11 = vcmp.eq.s32.totalorder %v1027_v55, %v11756_v1  ;;  %v981_v57 = vmul.u32 16, %v12930_v8  ;;  %v747_v55 = vcvt.s32.f32 %v19613_v61  ;;  %v982_v10 = vmul.u32 16, %v12952_v14 }
 0x52c   : > { %11003 = vmatprep.subr.msk.bf16.mxu1 %vm19600_vm12, %v19483_v39  ;;  %19603 = vst [vmem:[#allocation92_spill] sm:$0xff] %v12934_v43  ;;  %vm19609_vm12 = vcmask 130048   ;;  %v888_v17 = vfloor.f32 %v840_v46  ;;  %v12967_v54 = vsel %vm1075_vm11, 1.0, %v19536_v52  ;;  %v12973_v24 = vcvt.f32.s32 %v11371_v23 }
 0x52d   : > { %vm19615_vm3 = vmmov %vm19609_vm12  ;;  %19616 = vst [vmem:[#allocation12_spill] sm:$0xff] %v12967_v54  ;;  %v1029_v46 = vsub.s32 %v12399_v18, %v981_v57  ;;  %v12976_v63 = vadd.f32 0.5, %v747_v55  ;;  %v1030_v18 = vsub.s32 %v12455_v21, %v982_v10 }
 0x52e   : > { %9466 = vmatmul.mubr.msk.f32.gmra.mrb[28].mxu1 %vm19602_vm5, %v12902_v6  ;;  %v19606_v6 = vld [vmem:[#allocation11_spill] sm:$0xff]  ;;  %vm19608_vm5 = vnez %v19607_v48  ;;  %v841_v48 = vmul.f32 0.0625, %v12934_v43  ;;  %vm19619_vm11 = vmmov %vm19615_vm3 }
 0x52f   : > { %4013 = vmatprep.mubr.f32.mxu1 %v19536_v52  ;;  %11005 = vmatpush3.bf16.msk.msra.mxu1 %vm19605_vm4, %v19483_v39  ;;  %v746_v22 = vcvt.s32.f32 %v19606_v6  ;;  %19610 = vst [vmem:[#allocation11_spill] sm:$0xff] %v12946_v58  ;;  %19617 = vst [vmem:[#allocation94_spill] sm:$0xff] %v12976_v63  ;;  %v843_v55 = vmul.f32 0.0625, %v12976_v63 }
 0x530   : > { %11007 = vmatprep.subr.msk.bf16.mxu1 %vm19608_vm5, %v19483_v39  ;;  %v889_v0 = vfloor.f32 %v841_v48 }
 0x531   : > { %v891_v10 = vfloor.f32 %v843_v55 }
 0x532   : > { %9467 = vmatmul.mubr.msk.f32.gmra.mrb[30].mxu1 %vm19609_vm12, %v12923_v12  ;;  %v12958_v12 = vadd.f32 0.5, %v746_v22  ;;  %vm1076_vm12 = vcmp.eq.s32.totalorder %v1028_v51, %v11756_v1  ;;  %v11373_v22 = vtrunc.f32 %v888_v17  ;;  %v983_v17 = vmul.u32 16, %v12973_v24 }
 0x533   : > { %4019 = vmatprep.mubr.f32.mxu1 %v19536_v52  ;;  %11009 = vmatpush3.bf16.msk.msra.mxu1 %vm12582_vm13, %v19483_v39  ;;  %v12982_v51 = vsel %vm1076_vm12, 1.0, %v19536_v52  ;;  %v11375_v57 = vtrunc.f32 %v889_v0  ;;  %vm19624_vm12 = vmmov %vm19619_vm11 }
 0x534   : > { %19612 = vst [vmem:[#allocation93_spill] sm:$0xff] %v12958_v12  ;;  %11043 = vmatprep.subr.msk.bf16.mxu1 %vm11966_vm2, %v19483_v39  ;;  %v842_v4 = vmul.f32 0.0625, %v12958_v12  ;;  %v12988_v48 = vcvt.f32.s32 %v11373_v22  ;;  %v19623_v39 = vld [vmem:[#allocation17_spill] sm:$0xff]  ;;  %v1031_v0 = vsub.s32 %v19582_v20, %v983_v17 }
 0x535   : > { %v750_v38 = vcvt.s32.f32 %v19623_v39  ;;  %v13004_v21 = vcvt.f32.s32 %v11375_v57 }
 0x536   : > { %9468 = vmatmul.mubr.msk.f32.gmra.mrb[32].mxu1 %vm19615_vm3, %v12946_v58  ;;  %v19618_v58 = vld [vmem:[#allocation13_spill] sm:$0xff]  ;;  %vm1077_vm3 = vcmp.eq.s32.totalorder %v1029_v46, %v11756_v1  ;;  %v890_v23 = vfloor.f32 %v842_v4  ;;  %v984_v4 = vmul.u32 16, %v12988_v48 }
 0x537   : > { %4025 = vmatprep.mubr.f32.mxu1 %v19536_v52  ;;  %v748_v27 = vcvt.s32.f32 %v19618_v58  ;;  %19620 = vst [vmem:[#allocation13_spill] sm:$0xff] %v12982_v51  ;;  %v12998_v46 = vsel %vm1077_vm3, 1.0, %v19536_v52  ;;  %vm19629_vm3 = vmmov %vm19624_vm12  ;;  %v985_v17 = vmul.u32 16, %v13004_v21 }
 0x539   : > { %v12991_v62 = vadd.f32 0.5, %v748_v27  ;;  %v11377_v27 = vtrunc.f32 %v890_v23 }
 0x53a   : > { %9469 = vmatmul.mubr.msk.f32.gmra.mrb[34].mxu1 %vm19619_vm11, %v12967_v54  ;;  %v19622_v54 = vld [vmem:[#allocation14_spill] sm:$0xff]  ;;  %vm1078_vm11 = vcmp.eq.s32.totalorder %v1030_v18, %v11756_v1  ;;  %v1032_v18 = vsub.s32 %v19589_v11, %v984_v4 }
 0x53b   : > { %4031 = vmatprep.mubr.f32.mxu1 %v19536_v52  ;;  %19621 = vst [vmem:[#allocation95_spill] sm:$0xff] %v12991_v62  ;;  %v749_v36 = vcvt.s32.f32 %v19622_v54  ;;  %19625 = vst [vmem:[#allocation14_spill] sm:$0xff] %v12998_v46  ;;  %v844_v22 = vmul.f32 0.0625, %v12991_v62  ;;  %v13016_v20 = vsel %vm1078_vm11, 1.0, %v19536_v52  ;;  %v752_v62 = vcvt.s32.f32 %v19632_v49 }
 0x53c   : > { %19630 = vst [vmem:[#allocation18_spill] sm:$0xff] %v13016_v20  ;;  %vm1080_vm11 = vcmp.eq.s32.totalorder %v1032_v18, %v11756_v1 }
 0x53d   : > { %v13007_v15 = vadd.f32 0.5, %v749_v36  ;;  %v13021_v36 = vcvt.f32.s32 %v11377_v27  ;;  %v892_v57 = vfloor.f32 %v844_v22 }
 0x53e   : > { %9470 = vmatmul.mubr.msk.f32.gmra.mrb[36].mxu1 %vm19624_vm12, %v12982_v51  ;;  %v13009_v51 = vadd.f32 0.5, %v750_v38  ;;  %vm1079_vm12 = vcmp.eq.s32.totalorder %v1031_v0, %v11756_v1  ;;  %v11379_v38 = vtrunc.f32 %v891_v10  ;;  %v1033_v0 = vsub.s32 %v19596_v2, %v985_v17 }
 0x53f   : > { %4037 = vmatprep.mubr.f32.mxu1 %v19536_v52  ;;  %19626 = vst [vmem:[#allocation17_spill] sm:$0xff] %v13007_v15  ;;  %v845_v23 = vmul.f32 0.0625, %v13007_v15  ;;  %v13032_v11 = vsel %vm1079_vm12, 1.0, %v19536_v52  ;;  %v986_v4 = vmul.u32 16, %v13021_v36  ;;  %v19635_v15 = vld [vmem:[#allocation25_spill] sm:$0xff]  ;;  %v13047_v2 = vsel %vm1080_vm11, 1.0, %v19536_v52 }
 0x540   : > { %19627 = vst [vmem:[#allocation96_spill] sm:$0xff] %v13009_v51  ;;  %v846_v55 = vmul.f32 0.0625, %v13009_v51  ;;  %19633 = vst [vmem:[#allocation24_spill] sm:$0xff] %v13032_v11  ;;  %v13037_v27 = vcvt.f32.s32 %v11379_v38  ;;  %v13042_v51 = vadd.f32 0.5, %v752_v62  ;;  %v753_v63 = vcvt.s32.f32 %v19635_v15 }
 0x541   : > { %v893_v10 = vfloor.f32 %v845_v23  ;;  %19636 = vst [vmem:[#allocation25_spill] sm:$0xff] %v13047_v2  ;;  %vm1081_vm12 = vcmp.eq.s32.totalorder %v1033_v0, %v11756_v1  ;;  %v1034_v18 = vsub.s32 %v19606_v6, %v986_v4 }
 0x542   : > { %9471 = vmatmul.mubr.msk.f32.gmra.mrb[38].mxu1 %vm19629_vm3, %v12998_v46  ;;  %v13025_v46 = vadd.f32 0.5, %v751_v30  ;;  %v11381_v30 = vtrunc.f32 %v892_v57  ;;  %v894_v22 = vfloor.f32 %v846_v55  ;;  %19634 = vst [vmem:[#allocation98_spill] sm:$0xff] %v13042_v51  ;;  %v987_v17 = vmul.u32 16, %v13037_v27 }
 0x543   : > { %4043 = vmatprep.mubr.f32.mxu1 %v19536_v52  ;;  %v11383_v57 = vtrunc.f32 %v893_v10  ;;  %v848_v62 = vmul.f32 0.0625, %v13042_v51  ;;  %v13062_v6 = vsel %vm1081_vm12, 1.0, %v19536_v52  ;;  %vm1082_vm11 = vcmp.eq.s32.totalorder %v1034_v18, %v11756_v1  ;;  %v19644_v51 = vld [vmem:[#allocation32_spill] sm:$0xff] }
 0x544   : > { %19631 = vst [vmem:[#allocation97_spill] sm:$0xff] %v13025_v46  ;;  %v13052_v38 = vcvt.f32.s32 %v11381_v30  ;;  %v11385_v23 = vtrunc.f32 %v894_v22  ;;  %v1035_v0 = vsub.s32 %v19613_v61, %v987_v17  ;;  %v755_v43 = vcvt.s32.f32 %v19644_v51 }
 0x545   : > { %v13067_v4 = vcvt.f32.s32 %v11383_v57  ;;  %v13079_v61 = vsel %vm1082_vm11, 1.0, %v19536_v52 }
 0x546   : > { %9472 = vmatmul.mubr.msk.f32.gmra.mrb[40].mxu1 %vm19629_vm3, %v13016_v20  ;;  %v847_v20 = vmul.f32 0.0625, %v13025_v46  ;;  %19637 = vst [vmem:[#allocation99_spill] sm:$0xff] %v13052_v38  ;;  %v19639_v46 = vld [vmem:[#allocation31_spill] sm:$0xff]  ;;  %v13069_v30 = vcvt.f32.s32 %v11385_v23  ;;  %19645 = vst [vmem:[#allocation32_spill] sm:$0xff] %v13079_v61  ;;  %vm1083_vm12 = vcmp.eq.s32.totalorder %v1035_v0, %v11756_v1 }
 0x547   : > { %4049 = vmatprep.mubr.f32.mxu1 %v19536_v52  ;;  %v754_v12 = vcvt.s32.f32 %v19639_v46  ;;  %19640 = vst [vmem:[#allocation31_spill] sm:$0xff] %v13062_v6  ;;  %19641 = vst [vmem:[#allocation101_spill] sm:$0xff] %v13067_v4  ;;  %v989_v17 = vmul.u32 16, %v13067_v4  ;;  %v13094_v0 = vsel %vm1083_vm12, 1.0, %v19536_v52 }
 0x548   : > { %v895_v55 = vfloor.f32 %v847_v20  ;;  %v988_v20 = vmul.u32 16, %v13052_v38  ;;  %19642 = vst [vmem:[#allocation102_spill] sm:$0xff] %v13069_v30  ;;  %v990_v57 = vmul.u32 16, %v13069_v30  ;;  %19648 = vst [vmem:[#allocation106_spill] sm:$0xff] %v13094_v0 }
 0x54a   : > { %9473 = vmatmul.mubr.msk.f32.gmra.mrb[42].mxu1 %vm19629_vm3, %v13032_v11  ;;  %v13057_v11 = vadd.f32 0.5, %v753_v63  ;;  %v11387_v10 = vtrunc.f32 %v895_v55  ;;  %v896_v63 = vfloor.f32 %v848_v62  ;;  %v1036_v18 = vsub.s32 %v19618_v58, %v988_v20  ;;  %v19649_v58 = vld [vmem:[#allocation38_spill] sm:$0xff] }
 0x54b   : > { %4055 = vmatprep.mubr.f32.mxu1 %v19536_v52  ;;  %v756_v20 = vcvt.s32.f32 %v19649_v58 }
 0x54c   : > { %19638 = vst [vmem:[#allocation100_spill] sm:$0xff] %v13057_v11  ;;  %v849_v22 = vmul.f32 0.0625, %v13057_v11  ;;  %v13085_v23 = vcvt.f32.s32 %v11387_v10  ;;  %vm1084_vm11 = vcmp.eq.s32.totalorder %v1036_v18, %v11756_v1  ;;  %v1037_v10 = vsub.s32 %v19622_v54, %v989_v17  ;;  %v19653_v54 = vld [vmem:[#allocation39_spill] sm:$0xff] }
 0x54d   : > { %v1038_v11 = vsub.s32 %v19623_v39, %v990_v57  ;;  %v13108_v30 = vsel %vm1084_vm11, 1.0, %v19536_v52  ;;  %v13110_v18 = vadd.f32 0.5, %v756_v20  ;;  %v757_v39 = vcvt.s32.f32 %v19653_v54 }
 0x54e   : > { %9474 = vmatmul.mubr.msk.f32.gmra.mrb[44].mxu1 %vm19629_vm3, %v13047_v2  ;;  %v13074_v2 = vadd.f32 0.5, %v754_v12  ;;  %19646 = vst [vmem:[#allocation104_spill] sm:$0xff] %v13085_v23  ;;  %v11389_v12 = vtrunc.f32 %v896_v63  ;;  %v897_v55 = vfloor.f32 %v849_v22  ;;  %v991_v63 = vmul.u32 16, %v13085_v23  ;;  %19651 = vst [vmem:[#allocation107_spill] sm:$0xff] %v13108_v30 }
 0x54f   : > { %4061 = vmatprep.mubr.f32.mxu1 %v19536_v52  ;;  %19652 = vst [vmem:[#allocation108_spill] sm:$0xff] %v13110_v18  ;;  %vm1085_vm12 = vcmp.eq.s32.totalorder %v1037_v10, %v11756_v1  ;;  %vm1086_vm13 = vcmp.eq.s32.totalorder %v1038_v11, %v11756_v1  ;;  %v852_v10 = vmul.f32 0.0625, %v13110_v18  ;;  %v19657_v11 = vld [vmem:[#allocation45_spill] sm:$0xff] }
 0x550   : > { %19643 = vst [vmem:[#allocation103_spill] sm:$0xff] %v13074_v2  ;;  %v850_v62 = vmul.f32 0.0625, %v13074_v2  ;;  %v11391_v22 = vtrunc.f32 %v897_v55  ;;  %v1039_v17 = vsub.s32 %v19628_v50, %v991_v63  ;;  %v13123_v20 = vsel %vm1085_vm12, 1.0, %v19536_v52 }
 0x551   : > { %19655 = vst [vmem:[#allocation109_spill] sm:$0xff] %v13123_v20  ;;  %v758_v50 = vcvt.s32.f32 %v19657_v11  ;;  %v13130_v63 = vsel %vm1086_vm13, 1.0, %v19536_v52  ;;  %vm19663_vm13 = vmmov %vm19629_vm3 }
 0x552   : > { %9475 = vmatmul.mubr.msk.f32.gmra.mrb[46].mxu1 %vm19629_vm3, %v13062_v6  ;;  %v13090_v6 = vadd.f32 0.5, %v755_v43  ;;  %v13103_v43 = vcvt.f32.s32 %v11389_v12  ;;  %v13119_v12 = vcvt.f32.s32 %v11391_v22  ;;  %19658 = vst [vmem:[#allocation45_spill] sm:$0xff] %v13130_v63  ;;  %vm1087_vm11 = vcmp.eq.s32.totalorder %v1039_v17, %v11756_v1 }
 0x553   : > { %4067 = vmatprep.mubr.f32.mxu1 %v19536_v52  ;;  %v13145_v17 = vsel %vm1087_vm11, 1.0, %v19536_v52  ;;  %vm19667_vm11 = vmmov %vm19629_vm3 }
 0x554   : > { %19647 = vst [vmem:[#allocation105_spill] sm:$0xff] %v13090_v6  ;;  %19650 = vst [vmem:[#allocation38_spill] sm:$0xff] %v13103_v43  ;;  %v851_v2 = vmul.f32 0.0625, %v13090_v6  ;;  %v992_v57 = vmul.u32 16, %v13103_v43  ;;  %v13141_v6 = vadd.f32 0.5, %v758_v50  ;;  %v19661_v43 = vld [vmem:[#allocation46_spill] sm:$0xff] }
 0x555   : > { %19654 = vst [vmem:[#allocation39_spill] sm:$0xff] %v13119_v12  ;;  %v759_v23 = vcvt.s32.f32 %v19661_v43  ;;  %19662 = vst [vmem:[#allocation46_spill] sm:$0xff] %v13145_v17 }
 0x556   : > { %9476 = vmatmul.mubr.msk.f32.gmra.mrb[48].mxu1 %vm19629_vm3, %v13079_v61  ;;  %v898_v61 = vfloor.f32 %v850_v62  ;;  %v899_v62 = vfloor.f32 %v851_v2  ;;  %v1040_v2 = vsub.s32 %v19632_v49, %v992_v57  ;;  %19660 = vst [vmem:[#allocation112_spill] sm:$0xff] %v13141_v6  ;;  %v854_v50 = vmul.f32 0.0625, %v13141_v6 }
 0x557   : > { %4073 = vmatprep.mubr.f32.mxu1 %v19536_v52 }
 0x558   : > { %v11393_v55 = vtrunc.f32 %v898_v61  ;;  %v993_v61 = vmul.u32 16, %v13119_v12  ;;  %vm1088_vm12 = vcmp.eq.s32.totalorder %v1040_v2, %v11756_v1 }
 0x559   : > { %v13162_v2 = vsel %vm1088_vm12, 1.0, %v19536_v52 }
 0x55a   : > { %9477 = vmatmul.mubr.msk.f32.gmra.mrb[50].mxu1 %vm19629_vm3, %v13094_v0  ;;  %v13126_v0 = vadd.f32 0.5, %v757_v39  ;;  %v13137_v22 = vcvt.f32.s32 %v11393_v55  ;;  %v900_v39 = vfloor.f32 %v852_v10  ;;  %v1041_v49 = vsub.s32 %v19635_v15, %v993_v61 }
 0x55b   : > { %4079 = vmatprep.mubr.f32.mxu1 %v19536_v52  ;;  %v902_v61 = vfloor.f32 %v854_v50 }
 0x55c   : > { %19656 = vst [vmem:[#allocation110_spill] sm:$0xff] %v13126_v0  ;;  %19659 = vst [vmem:[#allocation111_spill] sm:$0xff] %v13137_v22  ;;  %v853_v18 = vmul.f32 0.0625, %v13126_v0  ;;  %v994_v57 = vmul.u32 16, %v13137_v22  ;;  %v19666_v0 = vld [vmem:[#allocation53_spill] sm:$0xff]  ;;  %v19681_v22 = vld [vmem:[#allocation27_spill] sm:$0xff] }
 0x55d   : > { %v760_v12 = vcvt.s32.f32 %v19666_v0  ;;  %19668 = vst [vmem:[#allocation53_spill] sm:$0xff] %v13162_v2  ;;  %v764_v4 = vcvt.s32.f32 %v19681_v22 }
 0x55e   : > { %9478 = vmatmul.mubr.msk.f32.gmra.mrb[52].mxu1 %vm19629_vm3, %v13108_v30  ;;  %v11395_v30 = vtrunc.f32 %v899_v62  ;;  %v11397_v62 = vtrunc.f32 %v900_v39  ;;  %v901_v10 = vfloor.f32 %v853_v18  ;;  %v1042_v15 = vsub.s32 %v19639_v46, %v994_v57 }
 0x55f   : > { %4085 = vmatprep.mubr.f32.mxu1 %v19536_v52 }
 0x560   : > { %v13152_v55 = vcvt.f32.s32 %v11395_v30  ;;  %v13168_v18 = vcvt.f32.s32 %v11397_v62  ;;  %vm1090_vm12 = vcmp.eq.s32.totalorder %v1042_v15, %v11756_v1 }
 0x561   : > { %v13192_v15 = vsel %vm1090_vm12, 1.0, %v19536_v52 }
 0x562   : > { %9479 = vmatmul.mubr.msk.f32.gmra.mrb[54].mxu1 %vm19629_vm3, %v13123_v20  ;;  %19664 = vst [vmem:[#allocation113_spill] sm:$0xff] %v13152_v55  ;;  %v13156_v20 = vadd.f32 0.5, %v759_v23  ;;  %vm1089_vm3 = vcmp.eq.s32.totalorder %v1041_v49, %v11756_v1  ;;  %v995_v30 = vmul.u32 16, %v13152_v55  ;;  %19669 = vst [vmem:[#allocation115_spill] sm:$0xff] %v13168_v18  ;;  %v11399_v23 = vtrunc.f32 %v901_v10 }
 0x563   : > { %4091 = vmatprep.mubr.f32.mxu1 %v19536_v52  ;;  %v13177_v49 = vsel %vm1089_vm3, 1.0, %v19536_v52  ;;  %v996_v57 = vmul.u32 16, %v13168_v18 }
 0x564   : > { %19665 = vst [vmem:[#allocation114_spill] sm:$0xff] %v13156_v20  ;;  %v855_v39 = vmul.f32 0.0625, %v13156_v20  ;;  %v1043_v46 = vsub.s32 %v19644_v51, %v995_v30  ;;  %v13183_v62 = vcvt.f32.s32 %v11399_v23 }
 0x565   : > { %v1044_v51 = vsub.s32 %v19649_v58, %v996_v57 }
 0x566   : > { %9480 = vmatmul.mubr.msk.f32.gmra.mrb[56].mxu1 %vm19663_vm13, %v13130_v63  ;;  %v13171_v63 = vadd.f32 0.5, %v760_v12  ;;  %vm19672_vm13 = vmmov %vm19667_vm11  ;;  %19674 = vst [vmem:[#allocation117_spill] sm:$0xff] %v13183_v62  ;;  %v11401_v12 = vtrunc.f32 %v902_v61  ;;  %v903_v10 = vfloor.f32 %v855_v39  ;;  %vm1091_vm3 = vcmp.eq.s32.totalorder %v1043_v46, %v11756_v1 }
 0x567   : > { %4097 = vmatprep.mubr.f32.mxu1 %v19536_v52  ;;  %v997_v30 = vmul.u32 16, %v13183_v62  ;;  %v13208_v46 = vsel %vm1091_vm3, 1.0, %v19536_v52  ;;  %vm1092_vm12 = vcmp.eq.s32.totalorder %v1044_v51, %v11756_v1  ;;  %v19687_v62 = vld [vmem:[#allocation28_spill] sm:$0xff] }
 0x568   : > { %19670 = vst [vmem:[#allocation116_spill] sm:$0xff] %v13171_v63  ;;  %v856_v50 = vmul.f32 0.0625, %v13171_v63  ;;  %v13198_v23 = vcvt.f32.s32 %v11401_v12  ;;  %v765_v38 = vcvt.s32.f32 %v19687_v62 }
 0x569   : > { %v1045_v58 = vsub.s32 %v19653_v54, %v997_v30  ;;  %v13226_v54 = vsel %vm1092_vm12, 1.0, %v19536_v52 }
 0x56a   : > { %9481 = vmatmul.mubr.msk.f32.gmra.mrb[58].mxu1 %vm19667_vm11, %v13145_v17  ;;  %v19671_v17 = vld [vmem:[#allocation54_spill] sm:$0xff]  ;;  %19678 = vst [vmem:[#allocation119_spill] sm:$0xff] %v13198_v23  ;;  %v904_v61 = vfloor.f32 %v856_v50  ;;  %v998_v57 = vmul.u32 16, %v13198_v23  ;;  %19688 = vst [vmem:[#allocation28_spill] sm:$0xff] %v13226_v54 }
 0x56b   : > { %4103 = vmatprep.mubr.f32.mxu1 %v19536_v52  ;;  %v761_v6 = vcvt.s32.f32 %v19671_v17  ;;  %19673 = vst [vmem:[#allocation54_spill] sm:$0xff] %v13177_v49  ;;  %vm1093_vm3 = vcmp.eq.s32.totalorder %v1045_v58, %v11756_v1 }
 0x56c   : > { %v11405_v12 = vtrunc.f32 %v904_v61  ;;  %v1046_v51 = vsub.s32 %v19657_v11, %v998_v57  ;;  %v13242_v11 = vsel %vm1093_vm3, 1.0, %v19536_v52 }
 0x56d   : > { %v13186_v20 = vadd.f32 0.5, %v761_v6  ;;  %v11403_v6 = vtrunc.f32 %v903_v10 }
 0x56e   : > { %9482 = vmatmul.mubr.msk.f32.gmra.mrb[60].mxu1 %vm19672_vm13, %v13162_v2  ;;  %v19676_v2 = vld [vmem:[#allocation20_spill] sm:$0xff]  ;;  %vm19682_vm13 = vmmov %vm19667_vm11  ;;  %vm1094_vm12 = vcmp.eq.s32.totalorder %v1046_v51, %v11756_v1 }
 0x56f   : > { %4109 = vmatprep.mubr.f32.mxu1 %v19536_v52  ;;  %19675 = vst [vmem:[#allocation118_spill] sm:$0xff] %v13186_v20  ;;  %v762_v55 = vcvt.s32.f32 %v19676_v2  ;;  %19677 = vst [vmem:[#allocation20_spill] sm:$0xff] %v13192_v15  ;;  %v857_v39 = vmul.f32 0.0625, %v13186_v20 }
 0x571   : > { %v13201_v63 = vadd.f32 0.5, %v762_v55  ;;  %v13214_v55 = vcvt.f32.s32 %v11403_v6  ;;  %v905_v10 = vfloor.f32 %v857_v39 }
 0x572   : > { %9483 = vmatmul.mubr.msk.f32.gmra.mrb[62].mxu1 %vm19667_vm11, %v13177_v49  ;;  %v19680_v49 = vld [vmem:[#allocation21_spill] sm:$0xff] }
 0x573   : > { %4115 = vmatprep.mubr.f32.mxu1 %v19536_v52  ;;  %19679 = vst [vmem:[#allocation120_spill] sm:$0xff] %v13201_v63  ;;  %v763_v18 = vcvt.s32.f32 %v19680_v49  ;;  %19683 = vst [vmem:[#allocation21_spill] sm:$0xff] %v13208_v46  ;;  %v858_v50 = vmul.f32 0.0625, %v13201_v63  ;;  %v999_v30 = vmul.u32 16, %v13214_v55  ;;  %v19692_v63 = vld [vmem:[#allocation34_spill] sm:$0xff] }
 0x574   : > { %19684 = vst [vmem:[#allocation27_spill] sm:$0xff] %v13214_v55  ;;  %v766_v23 = vcvt.s32.f32 %v19692_v63  ;;  %19693 = vst [vmem:[#allocation34_spill] sm:$0xff] %v13242_v11 }
 0x575   : > { %v13217_v20 = vadd.f32 0.5, %v763_v18  ;;  %v13231_v18 = vcvt.f32.s32 %v11405_v12  ;;  %v906_v6 = vfloor.f32 %v858_v50  ;;  %v1047_v58 = vsub.s32 %v19661_v43, %v999_v30 }
 0x576   : > { %9484 = vmatmul.mubr.msk.f32.gmra.mrb[64].mxu1 %vm19682_vm13, %v13192_v15  ;;  %v13219_v15 = vadd.f32 0.5, %v764_v4  ;;  %v11407_v4 = vtrunc.f32 %v905_v10  ;;  %vm19691_vm13 = vmmov %vm19667_vm11  ;;  %v13257_v43 = vsel %vm1094_vm12, 1.0, %v19536_v52 }
 0x577   : > { %4121 = vmatprep.mubr.f32.mxu1 %v19536_v52  ;;  %19685 = vst [vmem:[#allocation121_spill] sm:$0xff] %v13217_v20  ;;  %19689 = vst [vmem:[#allocation123_spill] sm:$0xff] %v13231_v18  ;;  %v859_v61 = vmul.f32 0.0625, %v13217_v20  ;;  %v1000_v57 = vmul.u32 16, %v13231_v18  ;;  %v19696_v20 = vld [vmem:[#allocation35_spill] sm:$0xff]  ;;  %vm1095_vm3 = vcmp.eq.s32.totalorder %v1047_v58, %v11756_v1 }
 0x578   : > { %19686 = vst [vmem:[#allocation122_spill] sm:$0xff] %v13219_v15  ;;  %v860_v39 = vmul.f32 0.0625, %v13219_v15  ;;  %v13247_v12 = vcvt.f32.s32 %v11407_v4  ;;  %v13252_v15 = vadd.f32 0.5, %v766_v23  ;;  %v767_v55 = vcvt.s32.f32 %v19696_v20  ;;  %19697 = vst [vmem:[#allocation35_spill] sm:$0xff] %v13257_v43 }
 0x579   : > { %v907_v10 = vfloor.f32 %v859_v61  ;;  %v1048_v51 = vsub.s32 %v19666_v0, %v1000_v57  ;;  %v13272_v0 = vsel %vm1095_vm3, 1.0, %v19536_v52 }
 0x57a   : > { %9485 = vmatmul.mubr.msk.f32.gmra.mrb[66].mxu1 %vm19667_vm11, %v13208_v46  ;;  %v13235_v46 = vadd.f32 0.5, %v765_v38  ;;  %19694 = vst [vmem:[#allocation125_spill] sm:$0xff] %v13247_v12  ;;  %v11409_v38 = vtrunc.f32 %v906_v6  ;;  %v908_v50 = vfloor.f32 %v860_v39  ;;  %19695 = vst [vmem:[#allocation126_spill] sm:$0xff] %v13252_v15  ;;  %v1001_v30 = vmul.u32 16, %v13247_v12 }
 0x57b   : > { %4127 = vmatprep.mubr.f32.mxu1 %v19536_v52  ;;  %v11411_v6 = vtrunc.f32 %v907_v10  ;;  %v862_v23 = vmul.f32 0.0625, %v13252_v15  ;;  %vm1096_vm12 = vcmp.eq.s32.totalorder %v1048_v51, %v11756_v1  ;;  %v19706_v15 = vld [vmem:[#allocation42_spill] sm:$0xff] }
 0x57c   : > { %19690 = vst [vmem:[#allocation124_spill] sm:$0xff] %v13235_v46  ;;  %v13262_v4 = vcvt.f32.s32 %v11409_v38  ;;  %v11413_v61 = vtrunc.f32 %v908_v50  ;;  %v1049_v58 = vsub.s32 %v19671_v17, %v1001_v30  ;;  %v769_v12 = vcvt.s32.f32 %v19706_v15 }
 0x57d   : > { %v13277_v57 = vcvt.f32.s32 %v11411_v6  ;;  %v13289_v17 = vsel %vm1096_vm12, 1.0, %v19536_v52 }
 0x57e   : > { %9486 = vmatmul.mubr.msk.f32.gmra.mrb[68].mxu1 %vm19691_vm13, %v13226_v54  ;;  %v861_v54 = vmul.f32 0.0625, %v13235_v46  ;;  %19698 = vst [vmem:[#allocation127_spill] sm:$0xff] %v13262_v4  ;;  %vm19699_vm13 = vmmov %vm19667_vm11  ;;  %v19701_v46 = vld [vmem:[#allocation41_spill] sm:$0xff]  ;;  %v13279_v38 = vcvt.f32.s32 %v11413_v61  ;;  %vm1097_vm3 = vcmp.eq.s32.totalorder %v1049_v58, %v11756_v1 }
 0x57f   : > { %4133 = vmatprep.mubr.f32.mxu1 %v19536_v52  ;;  %v768_v18 = vcvt.s32.f32 %v19701_v46  ;;  %19702 = vst [vmem:[#allocation41_spill] sm:$0xff] %v13272_v0  ;;  %19703 = vst [vmem:[#allocation129_spill] sm:$0xff] %v13277_v57  ;;  %v1003_v30 = vmul.u32 16, %v13277_v57  ;;  %v13304_v58 = vsel %vm1097_vm3, 1.0, %v19536_v52 }
 0x580   : > { %v909_v39 = vfloor.f32 %v861_v54  ;;  %v1002_v54 = vmul.u32 16, %v13262_v4  ;;  %19704 = vst [vmem:[#allocation130_spill] sm:$0xff] %v13279_v38  ;;  %19707 = vst [vmem:[#allocation42_spill] sm:$0xff] %v13289_v17  ;;  %v1004_v6 = vmul.u32 16, %v13279_v38 }
 0x581   : > { %19711 = vst [vmem:[#allocation134_spill] sm:$0xff] %v13304_v58 }
 0x582   : > { %9487 = vmatmul.mubr.msk.f32.gmra.mrb[70].mxu1 %vm19667_vm11, %v13242_v11  ;;  %v13267_v11 = vadd.f32 0.5, %v767_v55  ;;  %v11415_v10 = vtrunc.f32 %v909_v39  ;;  %v910_v55 = vfloor.f32 %v862_v23  ;;  %v1050_v51 = vsub.s32 %v19676_v2, %v1002_v54  ;;  %v19712_v2 = vld [vmem:[#allocation48_spill] sm:$0xff] }
 0x583   : > { %4139 = vmatprep.mubr.f32.mxu1 %v19536_v52  ;;  %v770_v54 = vcvt.s32.f32 %v19712_v2 }
 0x584   : > { %19700 = vst [vmem:[#allocation128_spill] sm:$0xff] %v13267_v11  ;;  %v863_v50 = vmul.f32 0.0625, %v13267_v11  ;;  %v13295_v61 = vcvt.f32.s32 %v11415_v10  ;;  %vm1098_vm12 = vcmp.eq.s32.totalorder %v1050_v51, %v11756_v1  ;;  %v1051_v10 = vsub.s32 %v19680_v49, %v1003_v30  ;;  %v19716_v49 = vld [vmem:[#allocation49_spill] sm:$0xff] }
 0x585   : > { %v1052_v11 = vsub.s32 %v19681_v22, %v1004_v6  ;;  %v13318_v38 = vsel %vm1098_vm12, 1.0, %v19536_v52  ;;  %v13320_v51 = vadd.f32 0.5, %v770_v54  ;;  %v771_v22 = vcvt.s32.f32 %v19716_v49 }
 0x586   : > { %9488 = vmatmul.mubr.msk.f32.gmra.mrb[72].mxu1 %vm19699_vm13, %v13257_v43  ;;  %v13284_v43 = vadd.f32 0.5, %v768_v18  ;;  %19708 = vst [vmem:[#allocation132_spill] sm:$0xff] %v13295_v61  ;;  %vm19709_vm13 = vmmov %vm19667_vm11  ;;  %v11417_v18 = vtrunc.f32 %v910_v55  ;;  %v911_v39 = vfloor.f32 %v863_v50  ;;  %v1005_v55 = vmul.u32 16, %v13295_v61 }
 0x587   : > { %4145 = vmatprep.mubr.f32.mxu1 %v19536_v52  ;;  %19714 = vst [vmem:[#allocation135_spill] sm:$0xff] %v13318_v38  ;;  %19715 = vst [vmem:[#allocation136_spill] sm:$0xff] %v13320_v51  ;;  %vm1099_vm3 = vcmp.eq.s32.totalorder %v1051_v10, %v11756_v1  ;;  %v866_v10 = vmul.f32 0.0625, %v13320_v51 }
 0x588   : > { %19705 = vst [vmem:[#allocation131_spill] sm:$0xff] %v13284_v43  ;;  %v864_v23 = vmul.f32 0.0625, %v13284_v43  ;;  %v11419_v50 = vtrunc.f32 %v911_v39  ;;  %v1053_v30 = vsub.s32 %v19687_v62, %v1005_v55  ;;  %v13333_v54 = vsel %vm1099_vm3, 1.0, %v19536_v52  ;;  %vm19726_vm3 = vmmov %vm19667_vm11 }
 0x589   : > { %19718 = vst [vmem:[#allocation137_spill] sm:$0xff] %v13333_v54 }
 0x58a   : > { %9489 = vmatmul.mubr.msk.f32.gmra.mrb[74].mxu1 %vm19667_vm11, %v13272_v0  ;;  %v13300_v0 = vadd.f32 0.5, %v769_v12  ;;  %v13313_v12 = vcvt.f32.s32 %v11417_v18  ;;  %v13329_v18 = vcvt.f32.s32 %v11419_v50  ;;  %vm1101_vm12 = vcmp.eq.s32.totalorder %v1053_v30, %v11756_v1 }
 0x58b   : > { %4151 = vmatprep.mubr.f32.mxu1 %v19536_v52  ;;  %v13355_v30 = vsel %vm1101_vm12, 1.0, %v19536_v52  ;;  %vm19730_vm12 = vmmov %vm19726_vm3 }
 0x58c   : > { %19710 = vst [vmem:[#allocation133_spill] sm:$0xff] %v13300_v0  ;;  %19713 = vst [vmem:[#allocation48_spill] sm:$0xff] %v13313_v12  ;;  %v865_v43 = vmul.f32 0.0625, %v13300_v0  ;;  %v1006_v6 = vmul.u32 16, %v13313_v12  ;;  %v19724_v12 = vld [vmem:[#allocation57_spill] sm:$0xff] }
 0x58d   : > { %19717 = vst [vmem:[#allocation49_spill] sm:$0xff] %v13329_v18  ;;  %v773_v61 = vcvt.s32.f32 %v19724_v12  ;;  %19725 = vst [vmem:[#allocation57_spill] sm:$0xff] %v13355_v30 }
 0x58e   : > { %9490 = vmatmul.mubr.msk.f32.gmra.mrb[76].mxu1 %vm19709_vm13, %v13289_v17  ;;  %v912_v17 = vfloor.f32 %v864_v23  ;;  %vm1100_vm13 = vcmp.eq.s32.totalorder %v1052_v11, %v11756_v1  ;;  %v913_v23 = vfloor.f32 %v865_v43  ;;  %v19720_v11 = vld [vmem:[#allocation56_spill] sm:$0xff]  ;;  %v1054_v43 = vsub.s32 %v19692_v63, %v1006_v6 }
 0x58f   : > { %4157 = vmatprep.mubr.f32.mxu1 %v19536_v52  ;;  %v772_v62 = vcvt.s32.f32 %v19720_v11  ;;  %v13340_v55 = vsel %vm1100_vm13, 1.0, %v19536_v52 }
 0x590   : > { %v11421_v39 = vtrunc.f32 %v912_v17  ;;  %19721 = vst [vmem:[#allocation56_spill] sm:$0xff] %v13340_v55  ;;  %v1007_v17 = vmul.u32 16, %v13329_v18  ;;  %vm1102_vm13 = vcmp.eq.s32.totalorder %v1054_v43, %v11756_v1 }
 0x591   : > { %v13351_v0 = vadd.f32 0.5, %v772_v62  ;;  %v13372_v43 = vsel %vm1102_vm13, 1.0, %v19536_v52 }
 0x592   : > { %9491 = vmatmul.mubr.msk.f32.gmra.mrb[78].mxu1 %vm19667_vm11, %v13304_v58  ;;  %v13336_v58 = vadd.f32 0.5, %v771_v22  ;;  %v13347_v50 = vcvt.f32.s32 %v11421_v39  ;;  %v914_v22 = vfloor.f32 %v866_v10  ;;  %v1055_v63 = vsub.s32 %v19696_v20, %v1007_v17 }
 0x593   : > { %4163 = vmatprep.mubr.f32.mxu1 %v19536_v52  ;;  %19723 = vst [vmem:[#allocation140_spill] sm:$0xff] %v13351_v0  ;;  %v868_v62 = vmul.f32 0.0625, %v13351_v0 }
 0x594   : > { %19719 = vst [vmem:[#allocation138_spill] sm:$0xff] %v13336_v58  ;;  %19722 = vst [vmem:[#allocation139_spill] sm:$0xff] %v13347_v50  ;;  %v867_v51 = vmul.f32 0.0625, %v13336_v58  ;;  %v1008_v6 = vmul.u32 16, %v13347_v50  ;;  %v19729_v58 = vld [vmem:[#allocation62_spill] sm:$0xff] }
 0x595   : > { %v774_v18 = vcvt.s32.f32 %v19729_v58  ;;  %19731 = vst [vmem:[#allocation62_spill] sm:$0xff] %v13372_v43  ;;  %v916_v17 = vfloor.f32 %v868_v62 }
 0x596   : > { %9492 = vmatmul.mubr.msk.f32.gmra.mrb[80].mxu1 %vm19667_vm11, %v13318_v38  ;;  %v11423_v38 = vtrunc.f32 %v913_v23  ;;  %v11425_v23 = vtrunc.f32 %v914_v22  ;;  %v915_v10 = vfloor.f32 %v867_v51  ;;  %v1056_v20 = vsub.s32 %v19701_v46, %v1008_v6 }
 0x597   : > { %4169 = vmatprep.mubr.f32.mxu1 %v19536_v52 }
 0x598   : > { %v13362_v39 = vcvt.f32.s32 %v11423_v38  ;;  %v13378_v51 = vcvt.f32.s32 %v11425_v23  ;;  %vm1104_vm13 = vcmp.eq.s32.totalorder %v1056_v20, %v11756_v1 }
 0x599   : > { %v13402_v20 = vsel %vm1104_vm13, 1.0, %v19536_v52 }
 0x59a   : > { %9493 = vmatmul.mubr.msk.f32.gmra.mrb[82].mxu1 %vm19667_vm11, %v13333_v54  ;;  %19727 = vst [vmem:[#allocation141_spill] sm:$0xff] %v13362_v39  ;;  %v13366_v54 = vadd.f32 0.5, %v773_v61  ;;  %vm1103_vm11 = vcmp.eq.s32.totalorder %v1055_v63, %v11756_v1  ;;  %v1009_v38 = vmul.u32 16, %v13362_v39  ;;  %19732 = vst [vmem:[#allocation143_spill] sm:$0xff] %v13378_v51  ;;  %v11427_v61 = vtrunc.f32 %v915_v10 }
 0x59b   : > { %4175 = vmatprep.mubr.f32.mxu1 %v19536_v52  ;;  %v13387_v63 = vsel %vm1103_vm11, 1.0, %v19536_v52  ;;  %v1010_v6 = vmul.u32 16, %v13378_v51 }
 0x59c   : > { %19728 = vst [vmem:[#allocation142_spill] sm:$0xff] %v13366_v54  ;;  %v869_v22 = vmul.f32 0.0625, %v13366_v54  ;;  %v1057_v46 = vsub.s32 %v19706_v15, %v1009_v38  ;;  %v13393_v23 = vcvt.f32.s32 %v11427_v61 }
 0x59d   : > { %v1058_v15 = vsub.s32 %v19712_v2, %v1010_v6 }
 0x59e   : > { %9494 = vmatmul.mubr.msk.f32.gmra.mrb[84].mxu1 %vm19726_vm3, %v13340_v55  ;;  %v13381_v55 = vadd.f32 0.5, %v774_v18  ;;  %19736 = vst [vmem:[#allocation145_spill] sm:$0xff] %v13393_v23  ;;  %v11429_v18 = vtrunc.f32 %v916_v17  ;;  %v917_v10 = vfloor.f32 %v869_v22  ;;  %vm1105_vm11 = vcmp.eq.s32.totalorder %v1057_v46, %v11756_v1 }
 0x59f   : > { %4181 = vmatprep.mubr.f32.mxu1 %v19536_v52  ;;  %v1011_v38 = vmul.u32 16, %v13393_v23  ;;  %v13417_v46 = vsel %vm1105_vm11, 1.0, %v19536_v52  ;;  %vm1106_vm13 = vcmp.eq.s32.totalorder %v1058_v15, %v11756_v1 }
 0x5a0   : > { %19733 = vst [vmem:[#allocation144_spill] sm:$0xff] %v13381_v55  ;;  %v870_v62 = vmul.f32 0.0625, %v13381_v55  ;;  %v13408_v61 = vcvt.f32.s32 %v11429_v18 }
 0x5a1   : > { %v1059_v2 = vsub.s32 %v19716_v49, %v1011_v38 }
 0x5a2   : > { %9495 = vmatmul.mubr.msk.f32.gmra.mrb[86].mxu1 %vm19730_vm12, %v13355_v30  ;;  %v19734_v30 = vld [vmem:[#allocation63_spill] sm:$0xff]  ;;  %vm19739_vm12 = vmmov %vm19726_vm3  ;;  %19741 = vst [vmem:[#allocation147_spill] sm:$0xff] %v13408_v61  ;;  %v918_v17 = vfloor.f32 %v870_v62  ;;  %v1012_v6 = vmul.u32 16, %v13408_v61 }
 0x5a3   : > { %4187 = vmatprep.mubr.f32.mxu1 %v19536_v52  ;;  %v775_v0 = vcvt.s32.f32 %v19734_v30  ;;  %19735 = vst [vmem:[#allocation63_spill] sm:$0xff] %v13387_v63  ;;  %vm1107_vm11 = vcmp.eq.s32.totalorder %v1059_v2, %v11756_v1 }
 0x5a4   : > { %v1060_v49 = vsub.s32 %v19720_v11, %v1012_v6 }
 0x5a5   : > { %v13396_v54 = vadd.f32 0.5, %v775_v0  ;;  %v11431_v0 = vtrunc.f32 %v917_v10 }
 0x5a6   : > { %9496 = vmatmul.mubr.msk.f32.gmra.mrb[88].mxu1 %vm19726_vm3, %v13372_v43  ;;  %v19738_v43 = vld [vmem:[#allocation65_spill] sm:$0xff] }
 0x5a7   : > { %4193 = vmatprep.mubr.f32.mxu1 %v19536_v52  ;;  %19737 = vst [vmem:[#allocation146_spill] sm:$0xff] %v13396_v54  ;;  %v776_v39 = vcvt.s32.f32 %v19738_v43  ;;  %19740 = vst [vmem:[#allocation65_spill] sm:$0xff] %v13402_v20  ;;  %v871_v22 = vmul.f32 0.0625, %v13396_v54  ;;  %v13423_v18 = vcvt.f32.s32 %v11431_v0 }
 0x5a9   : > { %v13411_v55 = vadd.f32 0.5, %v776_v39  ;;  %19745 = vst [vmem:[#allocation149_spill] sm:$0xff] %v13423_v18  ;;  %v11433_v39 = vtrunc.f32 %v918_v17  ;;  %v919_v10 = vfloor.f32 %v871_v22  ;;  %v1013_v15 = vmul.u32 16, %v13423_v18 }
 0x5aa   : > { %9497 = vmatmul.mubr.msk.f32.gmra.mrb[90].mxu1 %vm19739_vm12, %v13387_v63  ;;  %v19743_v63 = vld [vmem:[#allocation66_spill] sm:$0xff]  ;;  %vm19747_vm12 = vmmov %vm19726_vm3  ;;  %v13444_v22 = vsel %vm1107_vm11, 1.0, %v19536_v52 }
 0x5ab   : > { %4199 = vmatprep.mubr.f32.mxu1 %v19536_v52  ;;  %19742 = vst [vmem:[#allocation148_spill] sm:$0xff] %v13411_v55  ;;  %v777_v51 = vcvt.s32.f32 %v19743_v63  ;;  %19744 = vst [vmem:[#allocation66_spill] sm:$0xff] %v13417_v46  ;;  %v872_v62 = vmul.f32 0.0625, %v13411_v55  ;;  %v13437_v38 = vcvt.f32.s32 %v11433_v39  ;;  %v11435_v0 = vtrunc.f32 %v919_v10 }
 0x5ac   : > { %19750 = vst [vmem:[#allocation153_spill] sm:$0xff] %v13444_v22  ;;  %v1061_v11 = vsub.s32 %v19724_v12, %v1013_v15 }
 0x5ad   : > { %v13426_v54 = vadd.f32 0.5, %v777_v51  ;;  %19749 = vst [vmem:[#allocation152_spill] sm:$0xff] %v13437_v38  ;;  %v920_v17 = vfloor.f32 %v872_v62  ;;  %v1014_v2 = vmul.u32 16, %v13437_v38  ;;  %v13449_v6 = vcvt.f32.s32 %v11435_v0 }
 0x5ae   : > { %9498 = vmatmul.mubr.msk.f32.gmra.mrb[92].mxu1 %vm19726_vm3, %v13402_v20  ;;  %v13432_v20 = vsel %vm1106_vm13, 1.0, %v19536_v52  ;;  %vm1108_vm13 = vcmp.eq.s32.totalorder %v1060_v49, %v11756_v1  ;;  %vm1109_vm11 = vcmp.eq.s32.totalorder %v1061_v11, %v11756_v1  ;;  %v1215_v38 = vcvt.s32.f32 %v12812_v41 }
 0x5af   : > { %4205 = vmatprep.mubr.f32.mxu1 %v19536_v52  ;;  %19746 = vst [vmem:[#allocation150_spill] sm:$0xff] %v13426_v54  ;;  %19748 = vst [vmem:[#allocation151_spill] sm:$0xff] %v13432_v20  ;;  %v873_v51 = vmul.f32 0.0625, %v13426_v54  ;;  %v11437_v39 = vtrunc.f32 %v920_v17  ;;  %v13455_v62 = vsel %vm1108_vm13, 1.0, %v19536_v52  ;;  %v1062_v49 = vsub.s32 %v19729_v58, %v1014_v2 }
 0x5b0   : > { %19751 = vst [vmem:[#allocation154_spill] sm:$0xff] %v13449_v6  ;;  %19753 = vst [vmem:[#allocation155_spill] sm:$0xff] %v13455_v62  ;;  %v1015_v12 = vmul.u32 16, %v13449_v6  ;;  %v13466_v17 = vsel %vm1109_vm11, 1.0, %v19536_v52 }
 0x5b1   : > { %v921_v10 = vfloor.f32 %v873_v51  ;;  %v13460_v15 = vcvt.f32.s32 %v11437_v39  ;;  %19755 = vst [vmem:[#allocation157_spill] sm:$0xff] %v13466_v17  ;;  %vm1110_vm13 = vcmp.eq.s32.totalorder %v1062_v49, %v11756_v1 }
 0x5b2   : > { %9499 = vmatmul.mubr.msk.f32.gmra.mrb[94].mxu1 %vm19747_vm12, %v13417_v46  ;;  %vm19752_vm12 = vmmov %vm19726_vm3  ;;  %v1063_v51 = vsub.s32 %v19734_v30, %v1015_v12  ;;  %v13477_v2 = vsel %vm1110_vm13, 1.0, %v19536_v52 }
 0x5b3   : > { %4211 = vmatprep.mubr.f32.mxu1 %v19536_v52  ;;  %19754 = vst [vmem:[#allocation156_spill] sm:$0xff] %v13460_v15  ;;  %v11439_v0 = vtrunc.f32 %v921_v10  ;;  %v1016_v11 = vmul.u32 16, %v13460_v15  ;;  %19758 = vst [vmem:[#allocation159_spill] sm:$0xff] %v13477_v2  ;;  %v1597_v15 = vmul.f32 0.0078125, %v12727_v44  ;;  %v1599_v44 = vmul.f32 0.0078125, %v12735_v34 }
 0x5b5   : > { %v13471_v58 = vcvt.f32.s32 %v11439_v0  ;;  %v1064_v39 = vsub.s32 %v19738_v43, %v1016_v11  ;;  %v1647_v57 = vfloor.f32 %v1599_v44 }
 0x5b6   : > { %9500 = vmatmul.mubr.msk.f32.gmra.mrb[96].mxu1 %vm19726_vm3, %v13432_v20  ;;  %v1213_v20 = vcvt.s32.f32 %v12777_v3 }
 0x5b7   : > { %4217 = vmatprep.mubr.f32.mxu1 %v19536_v52  ;;  %19756 = vst [vmem:[#allocation158_spill] sm:$0xff] %v13471_v58  ;;  %v1017_v10 = vmul.u32 16, %v13471_v58 }
 0x5b9   : > { %v1065_v49 = vsub.s32 %v19743_v63, %v1017_v10  ;;  %v1210_v63 = vcvt.s32.f32 %v12742_v35 }
 0x5ba   : > { %9501 = vmatmul.mubr.msk.f32.gmra.mrb[98].mxu1 %vm19752_vm12, %v13444_v22  ;;  %vm19757_vm12 = vmmov %vm19726_vm3 }
 0x5bb   : > { %4223 = vmatprep.mubr.f32.mxu1 %v19536_v52  ;;  %vm19759_vm11 = vmmov %vm19757_vm12  ;;  %vm1113_vm5 = vcmp.eq.s32.totalorder %v1065_v49, %v11756_v1  ;;  %v1258_v49 = vadd.f32 0.5, %v1210_v63 }
 0x5bc   : > { %vm19761_vm13 = vmmov %vm19759_vm11  ;;  %v13501_v12 = vsel %vm1113_vm5, 1.0, %v19536_v52 }
 0x5bd   : > { %19763 = vst [vmem:[#allocation162_spill] sm:$0xff] %v13501_v12 }
 0x5be   : > { %9502 = vmatmul.mubr.msk.f32.gmra.mrb[100].mxu1 %vm19726_vm3, %v13455_v62  ;;  %vm1111_vm3 = vcmp.eq.s32.totalorder %v1063_v51, %v11756_v1 }
 0x5bf   : > { %4229 = vmatprep.mubr.f32.mxu1 %v19536_v52  ;;  %v13486_v30 = vsel %vm1111_vm3, 1.0, %v19536_v52  ;;  %vm19764_vm3 = vmmov %vm19759_vm11 }
 0x5c0   : > { %19760 = vst [vmem:[#allocation160_spill] sm:$0xff] %v13486_v30 }
 0x5c2   : > { %9503 = vmatmul.mubr.msk.f32.gmra.mrb[102].mxu1 %vm19757_vm12, %v13466_v17  ;;  %vm1112_vm12 = vcmp.eq.s32.totalorder %v1064_v39, %v11756_v1  ;;  %v1211_v1 = vcvt.s32.f32 %v12750_v59  ;;  %v1306_v17 = vmul.f32 0.125, %v1258_v49  ;;  %v19770_v49 = vld [vmem:[#allocation2_spill] sm:$0xff] }
 0x5c3   : > { %4235 = vmatprep.mubr.f32.mxu1 %v19536_v52  ;;  %v13494_v43 = vsel %vm1112_vm12, 1.0, %v19536_v52  ;;  %v1546_v55 = vmul.f32 0.125, %v19770_v49 }
 0x5c4   : > { %19762 = vst [vmem:[#allocation161_spill] sm:$0xff] %v13494_v43 }
 0x5c5   : > { %v1547_v61 = vfloor.f32 %v1546_v55 }
 0x5c6   : > { %9504 = vmatmul.mubr.msk.f32.gmra.mrb[104].mxu1 %vm19759_vm11, %v13477_v2  ;;  %v1259_v2 = vadd.f32 0.5, %v1211_v1  ;;  %v1214_v1 = vcvt.s32.f32 %v12794_v40 }
 0x5c7   : > { %4241 = vmatprep.mubr.f32.mxu1 %v19536_v52  ;;  %v11537_v55 = vtrunc.f32 %v1547_v61 }
 0x5c8   : > { %v1307_v63 = vmul.f32 0.125, %v1259_v2  ;;  %v1262_v18 = vadd.f32 0.5, %v1214_v1  ;;  %v1216_v1 = vcvt.s32.f32 %v12817_v9 }
 0x5c9   : > { %v13558_v61 = vcvt.f32.s32 %v11537_v55 }
 0x5ca   : > { %9505 = vmatmul.mubr.msk.f32.gmra.mrb[106].mxu1 %vm19761_vm13, %v13486_v30  ;;  %v1355_v54 = vfloor.f32 %v1307_v63  ;;  %v1264_v4 = vadd.f32 0.5, %v1216_v1 }
 0x5cb   : > { %4247 = vmatprep.mubr.f32.mxu1 %v19536_v52 }
 0x5cc   : > { %v1312_v1 = vmul.f32 0.125, %v1264_v4 }
 0x5ce   : > { %9506 = vmatmul.mubr.msk.f32.gmra.mrb[108].mxu1 %vm19759_vm11, %v13494_v43  ;;  %v1212_v43 = vcvt.s32.f32 %v12760_v53 }
 0x5cf   : > { %4253 = vmatprep.mubr.f32.mxu1 %v19536_v52 }
 0x5d0   : > { %v1260_v62 = vadd.f32 0.5, %v1212_v43 }
 0x5d2   : > { %9507 = vmatmul.mubr.msk.f32.gmra.mrb[110].mxu1 %vm19764_vm3, %v13501_v12  ;;  %v1308_v46 = vmul.f32 0.125, %v1260_v62 }
 0x5d4   : > { %v1356_v6 = vfloor.f32 %v1308_v46 }
 0x5d6   : > { %v11445_v23 = vtrunc.f32 %v1356_v6 }
 0x5d8   : > { %v11446_v6 = vcvt.f32.s32 %v11445_v23 }
 0x5e1   : > { %v13506_v0 = vpop.f32.mrb[12].mxu1 }
 0x5e2   : > { %19765 = vst [vmem:[#allocation163_spill] sm:$0xff] %v13506_v0  ;;  %v3673_v51 = vpop.f32.mrb[13].mxu1  ;;  %v13508_v11 = vpop.f32.mrb[28].mxu0 }
 0x5e3   : > { %19766 = vst [vmem:[#allocation164_spill] sm:$0xff] %v13508_v11  ;;  %v3758_v39 = vmul.f32 %v12686_v60, %v3673_v51  ;;  %v13512_v10 = vpop.f32.mrb[29].mxu0  ;;  %v1354_v51 = vfloor.f32 %v1306_v17  ;;  %v11443_v17 = vtrunc.f32 %v1355_v54 }
 0x5e4   : > { %19767 = vst [vmem:[#allocation165_spill] sm:$0xff] %v13512_v10 }
 0x5e5   : > { %v13515_v30 = vpop.f32.mrb[14].mxu1  ;;  %4756 = vmatprep.mubr.f32.mxu0 %v3758_v39  ;;  %v1261_v39 = vadd.f32 0.5, %v1213_v20  ;;  %v11441_v58 = vtrunc.f32 %v1354_v51  ;;  %v1598_v20 = vmul.f32 0.0078125, %v12731_v42  ;;  %v1645_v51 = vfloor.f32 %v1597_v15 }
 0x5e6   : > { %19768 = vst [vmem:[#allocation166_spill] sm:$0xff] %v13515_v30  ;;  %v13517_v12 = vpop.f32.mrb[15].mxu1  ;;  %v11444_v54 = vcvt.f32.s32 %v11443_v17  ;;  %v1310_v30 = vmul.f32 0.125, %v1262_v18 }
 0x5e7   : > { %19769 = vst [vmem:[#allocation167_spill] sm:$0xff] %v13517_v12  ;;  %v1309_v62 = vmul.f32 0.125, %v1261_v39  ;;  %v11442_v49 = vcvt.f32.s32 %v11441_v58  ;;  %v1646_v39 = vfloor.f32 %v1598_v20  ;;  %v1263_v12 = vadd.f32 0.5, %v1215_v38 }
 0x5e8   : > { %v11539_v15 = vtrunc.f32 %v1645_v51  ;;  %v1451_v17 = vmul.u32 8, %v11444_v54  ;;  %v1358_v38 = vfloor.f32 %v1310_v30  ;;  %v1452_v51 = vmul.u32 8, %v11446_v6 }
 0x5e9   : > { %v13519_v22 = vpop.f32.mrb[16].mxu1  ;;  %v1357_v46 = vfloor.f32 %v1309_v62  ;;  %v1450_v58 = vmul.u32 8, %v11442_v49  ;;  %v1600_v62 = vmul.f32 0.0078125, %v12739_v47  ;;  %v11541_v20 = vtrunc.f32 %v1646_v39 }
 0x5ea   : > { %4356 = vrot.lane.b32.xlu1 %v13519_v22, %s11712_s26  ;;  %v13524_v60 = vpop.f32.mrb[17].mxu1  ;;  %v1311_v18 = vmul.f32 0.125, %v1263_v12  ;;  %v13561_v49 = vcvt.f32.s32 %v11539_v15  ;;  %v11543_v47 = vtrunc.f32 %v1647_v57  ;;  %v1499_v39 = vsub.s32 %v12750_v59, %v1451_v17 }
 0x5eb   : > { %v11447_v34 = vtrunc.f32 %v1357_v46  ;;  %v1498_v23 = vsub.s32 %v12742_v35, %v1450_v58  ;;  %v1648_v46 = vfloor.f32 %v1600_v62  ;;  %v11449_v12 = vtrunc.f32 %v1358_v38 }
 0x5ec   : > { %v1601_v35 = vmul.f32 0.0078125, %v12745_v37  ;;  %v1217_v57 = vcvt.s32.f32 %v12839_v32  ;;  %vm1741_vm12 = vcmp.eq.s32.totalorder %v13561_v49, 0  ;;  %v1500_v59 = vsub.s32 %v12760_v53, %v1452_v51 }
 0x5ed   : > { %v13526_v11 = vpop.f32.mrb[18].mxu1  ;;  %v11448_v44 = vcvt.f32.s32 %v11447_v34  ;;  %vm13575_vm5 = vcmp.eq.s32.totalorder %v1498_v23, %v13558_v61  ;;  %v13582_v58 = vcvt.f32.s32 %v11543_v47  ;;  %v11545_v6 = vtrunc.f32 %v1648_v46 }
 0x5ee   : > { %4358 = vrot.lane.b32.xlu0 %v13526_v11, %s11712_s26  ;;  %v13530_v43 = vpop.f32.mrb[19].mxu1  ;;  %v1602_v37 = vmul.f32 0.0078125, %v12753_v16  ;;  %vm13588_vm11 = vcmp.eq.s32.totalorder %v1499_v39, %v13558_v61  ;;  %v1218_v17 = vcvt.s32.f32 %v12863_v7  ;;  %v1360_v16 = vfloor.f32 %v1312_v1  ;;  %vm13602_vm13 = vmand %vm1741_vm12, %vm13575_vm5 }
 0x5ef   : > { %v1453_v15 = vmul.u32 8, %v11448_v44  ;;  %v1265_v38 = vadd.f32 0.5, %v1217_v57  ;;  %vm13608_vm4 = vcmp.eq.s32.totalorder %v1500_v59, %v13558_v61  ;;  %v1219_v51 = vcvt.s32.f32 %v12885_v31 }
 0x5f0   : > { %vm19788_vm6 = vcmp.eq.s32.totalorder %v13561_v49, 2  ;;  %vm1743_vm12 = vcmp.eq.s32.totalorder %v13582_v58, 0  ;;  %v13623_v46 = vcvt.f32.s32 %v11545_v6  ;;  %v1650_v39 = vfloor.f32 %v1602_v37 }
 0x5f1   : > { %v13535_v2 = vpop.f32.mrb[20].mxu1  ;;  %vm13617_vm9 = vmand %vm19788_vm6, %vm13575_vm5  ;;  %v1501_v44 = vsub.s32 %v12777_v3, %v1453_v15  ;;  %v1603_v57 = vmul.f32 0.0078125, %v12755_v25  ;;  %v1266_v59 = vadd.f32 0.5, %v1218_v17  ;;  %v11453_v37 = vtrunc.f32 %v1360_v16 }
 0x5f2   : > { %4360 = vrot.lane.b32.xlu1 %v13535_v2, %s11712_s26  ;;  %v13540_v63 = vpop.f32.mrb[21].mxu1  ;;  %v1267_v17 = vadd.f32 0.5, %v1219_v51  ;;  %v11549_v23 = vtrunc.f32 %v1650_v39 }
 0x5f3   : > { %19771 = vst [vmem:[#allocation2_spill] sm:$0xff] %v13540_v63  ;;  %v1223_v63 = vcvt.s32.f32 %v12973_v24 }
 0x5f5   : > { %v13544_v50 = vpop.f32.mrb[22].mxu1 }
 0x5f6   : > { %19772 = vst [vmem:[#allocation168_spill] sm:$0xff] %v13544_v50  ;;  %4362 = vrot.lane.b32.xlu0 %v13544_v50, %s11712_s26  ;;  %v13548_v42 = vpop.f32.mrb[23].mxu1 }
 0x5f7   : > { %19773 = vst [vmem:[#allocation169_spill] sm:$0xff] %v13548_v42 }
 0x5f9   : > { %v13552_v10 = vpop.f32.mrb[24].mxu1 }
 0x5fa   : > { %19774 = vst [vmem:[#allocation170_spill] sm:$0xff] %v13552_v10  ;;  %4364 = vrot.lane.b32.xlu1 %v13552_v10, %s11712_s26  ;;  %v13556_v0 = vpop.f32.mrb[25].mxu1  ;;  %v13566_v10 = vcvt.f32.s32 %v11541_v20  ;;  %v11450_v20 = vcvt.f32.s32 %v11449_v12 }
 0x5fb   : > { %19775 = vst [vmem:[#allocation171_spill] sm:$0xff] %v13556_v0  ;;  %v1359_v0 = vfloor.f32 %v1311_v18  ;;  %v1649_v18 = vfloor.f32 %v1601_v35  ;;  %v1651_v35 = vfloor.f32 %v1603_v57 }
 0x5fc   : > { %vm19792_vm3 = vcmp.eq.s32.totalorder %v13566_v10, 0  ;;  %v1454_v15 = vmul.u32 8, %v11450_v20  ;;  %v1220_v20 = vcvt.s32.f32 %v12909_v13 }
 0x5fd   : > { %v13563_v54 = vpop.f32.mrb[26].mxu1  ;;  %v11451_v62 = vtrunc.f32 %v1359_v0  ;;  %vm13631_vm8 = vmand %vm19792_vm3, %vm13588_vm11  ;;  %v11547_v6 = vtrunc.f32 %v1649_v18  ;;  %vm19798_vm3 = vcmp.eq.s32.totalorder %v13566_v10, 2 }
 0x5fe   : > { %19776 = vst [vmem:[#allocation172_spill] sm:$0xff] %v13563_v54  ;;  %4366 = vrot.lane.b32.xlu0 %v13563_v54, %s11712_s26  ;;  %v13570_v30 = vpop.f32.mrb[27].mxu1  ;;  %vm13655_vm6 = vmand %vm19798_vm3, %vm13588_vm11  ;;  %v13663_v18 = vsel %vm13631_vm8, 1.0, %v19536_v52  ;;  %vm1744_vm3 = vcmp.eq.s32.totalorder %v13623_v46, 0  ;;  %vm19807_vm8 = vcmp.eq.s32.totalorder %v13582_v58, 2  ;;  %v11454_v54 = vcvt.f32.s32 %v11453_v37 }
 0x5ff   : > { %19777 = vst [vmem:[#allocation173_spill] sm:$0xff] %v13570_v30  ;;  %v11452_v1 = vcvt.f32.s32 %v11451_v62  ;;  %v13649_v62 = vsel %vm13617_vm9, 1.0, %v19536_v52  ;;  %19801 = vst [vmem:[#allocation180_spill] sm:$0xff] %v13663_v18  ;;  %v1502_v30 = vsub.s32 %v12794_v40, %v1454_v15  ;;  %v13691_v39 = vcvt.f32.s32 %v11547_v6 }
 0x600   : > { %19797 = vst [vmem:[#allocation179_spill] sm:$0xff] %v13649_v62  ;;  %vm13669_vm9 = vmand %vm1743_vm12, %vm13608_vm4  ;;  %v13696_v50 = vsel %vm13655_vm6, 1.0, %v19536_v52  ;;  %v1268_v57 = vadd.f32 0.5, %v1220_v20  ;;  %v13711_v40 = vcvt.f32.s32 %v11549_v23  ;;  %v1221_v15 = vcvt.s32.f32 %v12930_v8 }
 0x601   : > { %v13585_v4 = vpop.f32.mrb[28].mxu1  ;;  %vm2175_vm10 = vmand %vm19807_vm8, %vm13608_vm4  ;;  %v1455_v47 = vmul.u32 8, %v11452_v1  ;;  %19809 = vst [vmem:[#allocation183_spill] sm:$0xff] %v13696_v50  ;;  %v1315_v1 = vmul.f32 0.125, %v1267_v17  ;;  %vm2128_vm8 = vcmp.eq.s32.totalorder %v13623_v46, 2  ;;  %v11551_v37 = vtrunc.f32 %v1651_v35 }
 0x602   : > { %19780 = vst [vmem:[#allocation174_spill] sm:$0xff] %v13585_v4  ;;  %4368 = vrot.lane.b32.xlu1 %v13585_v4, %s11712_s26  ;;  %v13595_v53 = vpop.f32.mrb[29].mxu1  ;;  %v13644_v4 = vsel %vm13602_vm13, 1.0, %v19536_v52  ;;  %vm13674_vm13 = vcmp.eq.s32.totalorder %v1501_v44, %v13558_v61  ;;  %vm1745_vm6 = vcmp.eq.s32.totalorder %v13691_v39, 0  ;;  %v1456_v23 = vmul.u32 8, %v11454_v54 }
 0x603   : > { %19783 = vst [vmem:[#allocation175_spill] sm:$0xff] %v13595_v53  ;;  %v1313_v53 = vmul.f32 0.125, %v1265_v38  ;;  %19796 = vst [vmem:[#allocation178_spill] sm:$0xff] %v13644_v4  ;;  %v1503_v6 = vsub.s32 %v12812_v41, %v1455_v47  ;;  %v1363_v41 = vfloor.f32 %v1315_v1  ;;  %v1269_v47 = vadd.f32 0.5, %v1221_v15 }
 0x604   : > { %vm1792_vm12 = vmand %vm1744_vm3, %vm13674_vm13  ;;  %vm2129_vm3 = vcmp.eq.s32.totalorder %v13691_v39, 2  ;;  %v19822_v1 = vmov 0  ;;  %v1504_v15 = vsub.s32 %v12817_v9, %v1456_v23 }
 0x605   : > { %v13625_v12 = vpop.f32.mrb[30].mxu1  ;;  %v1361_v42 = vfloor.f32 %v1313_v53 }
 0x606   : > { %19791 = vst [vmem:[#allocation176_spill] sm:$0xff] %v13625_v12  ;;  %4370 = vrot.lane.b32.xlu0 %v13625_v12, %s11712_s26  ;;  %v13639_v3 = vpop.f32.mrb[31].mxu1  ;;  %v1314_v12 = vmul.f32 0.125, %v1266_v59  ;;  %v13704_v59 = vsel %vm2175_vm10, 1.0, %v19536_v52  ;;  %vm13722_vm10 = vcmp.eq.s32.totalorder %v1502_v30, %v13558_v61  ;;  %v1607_v30 = vmul.f32 0.0078125, %v12822_v26 }
 0x607   : > { %19795 = vst [vmem:[#allocation177_spill] sm:$0xff] %v13639_v3  ;;  %v1604_v3 = vmul.f32 0.0078125, %v12764_v5  ;;  %v13701_v5 = vsel %vm13669_vm9, 1.0, %v19536_v52  ;;  %19811 = vst [vmem:[#allocation185_spill] sm:$0xff] %v13704_v59  ;;  %v1606_v59 = vmul.f32 0.0078125, %v12799_v33  ;;  %vm13806_vm7 = vcmp.eq.s32.totalorder %v1504_v15, %v13558_v61 }
 0x608   : > { %19810 = vst [vmem:[#allocation184_spill] sm:$0xff] %v13701_v5  ;;  %v1362_v17 = vfloor.f32 %v1314_v12  ;;  %v1222_v12 = vcvt.s32.f32 %v12952_v14  ;;  %vm13735_vm9 = vmand %vm2128_vm8, %vm13674_vm13  ;;  %vm13751_vm8 = vcmp.eq.s32.totalorder %v1503_v6, %v13558_v61  ;;  %v11459_v6 = vtrunc.f32 %v1363_v41 }
 0x609   : > { %v13679_v51 = vpop.f32.mrb[32].mxu1  ;;  %v1652_v25 = vfloor.f32 %v1604_v3  ;;  %v1316_v3 = vmul.f32 0.125, %v1268_v57  ;;  %v19823_v1 = vsel %vm13751_vm8, 4294967295, %v19822_v1  ;;  %v13755_v57 = vcvt.f32.s32 %v11551_v37  ;;  %vm13779_vm1 = vmand %vm2129_vm3, %vm13722_vm10 }
 0x60a   : > { %19806 = vst [vmem:[#allocation181_spill] sm:$0xff] %v13679_v51  ;;  %4372 = vrot.lane.b32.xlu1 %v13679_v51, %s11712_s26  ;;  %v13688_v44 = vpop.f32.mrb[33].mxu1  ;;  %v13728_v51 = vsel %vm1792_vm12, 1.0, %v19536_v52  ;;  %vm13746_vm12 = vmand %vm1745_vm6, %vm13722_vm10  ;;  %v1270_v37 = vadd.f32 0.5, %v1222_v12  ;;  %vm19835_vm3 = vcmp.eq.s32.totalorder %v13711_v40, 2  ;;  %v1654_v35 = vfloor.f32 %v1606_v59 }
 0x60b   : > { %19808 = vst [vmem:[#allocation182_spill] sm:$0xff] %v13688_v44  ;;  %v11455_v44 = vtrunc.f32 %v1361_v42  ;;  %19816 = vst [vmem:[#allocation188_spill] sm:$0xff] %v13728_v51  ;;  %v1605_v42 = vmul.f32 0.0078125, %v12784_v29  ;;  %v1364_v5 = vfloor.f32 %v1316_v3  ;;  %v11460_v26 = vcvt.f32.s32 %v11459_v6 }
 0x60c   : > { %19824 = vst [vmem:[#allocation190_spill] sm:$0xff] %v19823_v1  ;;  %v1224_v15 = vcvt.s32.f32 %v12988_v48  ;;  %v1655_v6 = vfloor.f32 %v1607_v30 }
 0x60d   : > { %v13713_v53 = vpop.f32.mrb[34].mxu1  ;;  %v11456_v51 = vcvt.f32.s32 %v11455_v44  ;;  %v1653_v9 = vfloor.f32 %v1605_v42  ;;  %v1317_v44 = vmul.f32 0.125, %v1269_v47  ;;  %v19836_v47 = vmov 0 }
 0x60e   : > { %19812 = vst [vmem:[#allocation186_spill] sm:$0xff] %v13713_v53  ;;  %4374 = vrot.lane.b32.xlu0 %v13713_v53, %s11712_s26  ;;  %v13719_v20 = vpop.f32.mrb[35].mxu1  ;;  %v11457_v53 = vtrunc.f32 %v1362_v17  ;;  %v13773_v17 = vsel %vm13746_vm12, 1.0, %v19536_v52  ;;  %v19837_v47 = vsel %vm13806_vm7, 4294967295, %v19836_v47  ;;  %vm2131_vm12 = vcmp.eq.s32.totalorder %v13755_v57, 2 }
 0x60f   : > { %19813 = vst [vmem:[#allocation187_spill] sm:$0xff] %v13719_v20  ;;  %v11553_v20 = vtrunc.f32 %v1652_v25  ;;  %v13768_v25 = vsel %vm13735_vm9, 1.0, %v19536_v52  ;;  %19827 = vst [vmem:[#allocation193_spill] sm:$0xff] %v13773_v17  ;;  %vm19831_vm9 = vcmp.eq.s32.totalorder %v13711_v40, 0  ;;  %v1365_v17 = vfloor.f32 %v1317_v44 }
 0x610   : > { %19826 = vst [vmem:[#allocation192_spill] sm:$0xff] %v13768_v25  ;;  %vm13789_vm6 = vmand %vm19831_vm9, %vm13751_vm8  ;;  %v11458_v12 = vcvt.f32.s32 %v11457_v53  ;;  %v1271_v53 = vadd.f32 0.5, %v1223_v63  ;;  %v1459_v41 = vmul.u32 8, %v11460_v26 }
 0x611   : > { %v13742_v54 = vpop.f32.mrb[36].mxu1  ;;  %v13794_v3 = vcvt.f32.s32 %v11553_v20  ;;  %vm2178_vm9 = vmand %vm19835_vm3, %vm13751_vm8  ;;  %19838 = vst [vmem:[#allocation196_spill] sm:$0xff] %v19837_v47  ;;  %v1457_v20 = vmul.u32 8, %v11456_v51  ;;  %v13822_v63 = vsel %vm13789_vm6, 1.0, %v19536_v52  ;;  %vm19843_vm3 = vcmp.eq.s32.totalorder %v13755_v57, 0 }
 0x612   : > { %19819 = vst [vmem:[#allocation189_spill] sm:$0xff] %v13742_v54  ;;  %4376 = vrot.lane.b32.xlu1 %v13742_v54, %s11712_s26  ;;  %v13759_v29 = vpop.f32.mrb[37].mxu1  ;;  %v11555_v54 = vtrunc.f32 %v1653_v9  ;;  %19841 = vst [vmem:[#allocation199_spill] sm:$0xff] %v13822_v63  ;;  %v13825_v51 = vsel %vm2178_vm9, 1.0, %v19536_v52  ;;  %v1458_v59 = vmul.u32 8, %v11458_v12  ;;  %v11557_v9 = vtrunc.f32 %v1654_v35 }
 0x613   : > { %19825 = vst [vmem:[#allocation191_spill] sm:$0xff] %v13759_v29  ;;  %v11461_v29 = vtrunc.f32 %v1364_v5  ;;  %19842 = vst [vmem:[#allocation200_spill] sm:$0xff] %v13825_v51  ;;  %v1505_v33 = vsub.s32 %v12839_v32, %v1457_v20  ;;  %vm1748_vm9 = vcmp.eq.s32.totalorder %v13794_v3, 0  ;;  %v1319_v44 = vmul.f32 0.125, %v1271_v53 }
 0x614   : > { %vm2179_vm6 = vmand %vm2131_vm12, %vm13806_vm7  ;;  %v13846_v51 = vcvt.f32.s32 %v11555_v54  ;;  %v1272_v47 = vadd.f32 0.5, %v1224_v15  ;;  %v1506_v35 = vsub.s32 %v12863_v7, %v1458_v59  ;;  %v1507_v26 = vsub.s32 %v12885_v31, %v1459_v41 }
 0x615   : > { %v13783_v23 = vpop.f32.mrb[38].mxu1  ;;  %v11462_v12 = vcvt.f32.s32 %v11461_v29  ;;  %v13857_v20 = vsel %vm2179_vm6, 1.0, %v19536_v52  ;;  %v11559_v29 = vtrunc.f32 %v1655_v6  ;;  %vm13865_vm12 = vcmp.eq.s32.totalorder %v1505_v33, %v13558_v61 }
 0x616   : > { %19830 = vst [vmem:[#allocation194_spill] sm:$0xff] %v13783_v23  ;;  %4378 = vrot.lane.b32.xlu0 %v13783_v23, %s11712_s26  ;;  %v13799_v42 = vpop.f32.mrb[39].mxu1  ;;  %v1318_v23 = vmul.f32 0.125, %v1270_v37  ;;  %19849 = vst [vmem:[#allocation204_spill] sm:$0xff] %v13857_v20  ;;  %v1367_v53 = vfloor.f32 %v1319_v44  ;;  %v1225_v5 = vcvt.s32.f32 %v13004_v21  ;;  %v19857_v31 = vmov 0 }
 0x617   : > { %19834 = vst [vmem:[#allocation195_spill] sm:$0xff] %v13799_v42  ;;  %v13814_v42 = vsel %vm13779_vm1, 1.0, %v19536_v52  ;;  %vm13831_vm1 = vmand %vm19843_vm3, %vm13806_vm7  ;;  %v1460_v15 = vmul.u32 8, %v11462_v12  ;;  %vm13886_vm3 = vcmp.eq.s32.totalorder %v1506_v35, %v13558_v61  ;;  %v1610_v41 = vmul.f32 0.0078125, %v12892_v45 }
 0x618   : > { %19839 = vst [vmem:[#allocation197_spill] sm:$0xff] %v13814_v42  ;;  %v1366_v30 = vfloor.f32 %v1318_v23  ;;  %v13854_v32 = vsel %vm13831_vm1, 1.0, %v19536_v52  ;;  %v1609_v23 = vmul.f32 0.0078125, %v12870_v19  ;;  %vm13881_vm6 = vmand %vm1748_vm9, %vm13865_vm12  ;;  %v19858_v31 = vsel %vm13886_vm3, 4294967295, %v19857_v31 }
 0x619   : > { %v13816_v1 = vpop.f32.mrb[40].mxu1  ;;  %19848 = vst [vmem:[#allocation203_spill] sm:$0xff] %v13854_v32  ;;  %19859 = vst [vmem:[#allocation208_spill] sm:$0xff] %v19858_v31  ;;  %vm19862_vm9 = vcmp.eq.s32.totalorder %v13794_v3, 2  ;;  %v11467_v44 = vtrunc.f32 %v1367_v53  ;;  %vm13905_vm1 = vcmp.eq.s32.totalorder %v1507_v26, %v13558_v61  ;;  %v19863_v12 = vmov 0 }
 0x61a   : > { %19840 = vst [vmem:[#allocation198_spill] sm:$0xff] %v13816_v1  ;;  %4380 = vrot.lane.b32.xlu1 %v13816_v1, %s11712_s26  ;;  %v13837_v37 = vpop.f32.mrb[41].mxu1  ;;  %v11463_v1 = vtrunc.f32 %v1365_v17  ;;  %v13869_v17 = vcvt.f32.s32 %v11557_v9  ;;  %v11465_v7 = vtrunc.f32 %v1366_v30  ;;  %vm2180_vm15 = vmand %vm19862_vm9, %vm13865_vm12  ;;  %v1657_v9 = vfloor.f32 %v1609_v23 }
 0x61b   : > { %19846 = vst [vmem:[#allocation201_spill] sm:$0xff] %v13837_v37  ;;  %v1608_v37 = vmul.f32 0.0078125, %v12844_v28  ;;  %v19851_v28 = vmov 0  ;;  %v19864_v12 = vsel %vm13905_vm1, 4294967295, %v19863_v12  ;;  %v1508_v30 = vsub.s32 %v12909_v13, %v1460_v15 }
 0x61c   : > { %v19852_v28 = vsel %vm13865_vm12, 4294967295, %v19851_v28  ;;  %19853 = vst [vmem:[#allocation206_spill] sm:$0xff] %v13869_v17  ;;  %v11464_v59 = vcvt.f32.s32 %v11463_v1  ;;  %v13891_v1 = vcvt.f32.s32 %v11559_v29  ;;  %19865 = vst [vmem:[#allocation211_spill] sm:$0xff] %v19864_v12  ;;  %v11466_v35 = vcvt.f32.s32 %v11465_v7 }
 0x61d   : > { %v13849_v63 = vpop.f32.mrb[42].mxu1  ;;  %v1656_v6 = vfloor.f32 %v1608_v37  ;;  %v1226_v37 = vcvt.s32.f32 %v13021_v36  ;;  %v1273_v29 = vadd.f32 0.5, %v1225_v5  ;;  %vm19867_vm9 = vcmp.eq.s32.totalorder %v13846_v51, 0 }
 0x61e   : > { %19847 = vst [vmem:[#allocation202_spill] sm:$0xff] %v13849_v63  ;;  %4382 = vrot.lane.b32.xlu0 %v13849_v63, %s11712_s26  ;;  %v13862_v54 = vpop.f32.mrb[43].mxu1  ;;  %19860 = vst [vmem:[#allocation209_spill] sm:$0xff] %v13891_v1  ;;  %v1461_v23 = vmul.u32 8, %v11464_v59  ;;  %v13926_v13 = vsel %vm2180_vm15, 1.0, %v19536_v52  ;;  %vm1751_vm2 = vcmp.eq.s32.totalorder %v13891_v1, 0  ;;  %v11563_v59 = vtrunc.f32 %v1657_v9 }
 0x61f   : > { %19850 = vst [vmem:[#allocation205_spill] sm:$0xff] %v13862_v54  ;;  %v1320_v54 = vmul.f32 0.125, %v1272_v47  ;;  %vm13919_vm0 = vmand %vm19867_vm9, %vm13886_vm3  ;;  %v11561_v53 = vtrunc.f32 %v1656_v6  ;;  %vm2134_vm9 = vcmp.eq.s32.totalorder %v13869_v17, 2  ;;  %v1274_v7 = vadd.f32 0.5, %v1226_v37 }
 0x620   : > { %19871 = vst [vmem:[#allocation214_spill] sm:$0xff] %v13926_v13  ;;  %vm19876_vm15 = vcmp.eq.s32.totalorder %v13869_v17, 0  ;;  %v11468_v6 = vcvt.f32.s32 %v11467_v44  ;;  %v1658_v19 = vfloor.f32 %v1610_v41  ;;  %v1611_v63 = vmul.f32 0.0078125, %v12913_v56  ;;  %v19927_v17 = vld [vmem:[#allocation104_spill] sm:$0xff] }
 0x621   : > { %v13875_v33 = vpop.f32.mrb[44].mxu1  ;;  %v1368_v26 = vfloor.f32 %v1320_v54  ;;  %vm13946_vm12 = vmand %vm19876_vm15, %vm13905_vm1  ;;  %v19879_v13 = vmov 0  ;;  %v1321_v37 = vmul.f32 0.125, %v1273_v29  ;;  %v1509_v9 = vsub.s32 %v12930_v8, %v1461_v23 }
 0x622   : > { %19854 = vst [vmem:[#allocation207_spill] sm:$0xff] %v13875_v33  ;;  %4384 = vrot.lane.b32.xlu1 %v13875_v33, %s11712_s26  ;;  %v13895_v47 = vpop.f32.mrb[45].mxu1  ;;  %vm13966_vm15 = vmand %vm2134_vm9, %vm13905_vm1  ;;  %v13971_v44 = vcvt.f32.s32 %v11561_v53  ;;  %v13983_v29 = vsel %vm13946_vm12, 1.0, %v19536_v52  ;;  %v1322_v45 = vmul.f32 0.125, %v1274_v7  ;;  %v13994_v23 = vcvt.f32.s32 %v11563_v59 }
 0x623   : > { %19861 = vst [vmem:[#allocation210_spill] sm:$0xff] %v13895_v47  ;;  %v13913_v47 = vsel %vm13881_vm6, 1.0, %v19536_v52  ;;  %vm19872_vm6 = vcmp.eq.s32.totalorder %v13846_v51, 2  ;;  %v11469_v41 = vtrunc.f32 %v1368_v26  ;;  %19888 = vst [vmem:[#allocation221_spill] sm:$0xff] %v13983_v29  ;;  %v1463_v53 = vmul.u32 8, %v11468_v6 }
 0x624   : > { %19866 = vst [vmem:[#allocation212_spill] sm:$0xff] %v13913_v47  ;;  %vm13932_vm14 = vmand %vm19872_vm6, %vm13886_vm3  ;;  %vm13952_vm6 = vcmp.eq.s32.totalorder %v1508_v30, %v13558_v61  ;;  %v13960_v47 = vsel %vm13919_vm0, 1.0, %v19536_v52  ;;  %vm2135_vm0 = vcmp.eq.s32.totalorder %v13891_v1, 2  ;;  %v11565_v26 = vtrunc.f32 %v1658_v19 }
 0x625   : > { %v13923_v33 = vpop.f32.mrb[46].mxu1  ;;  %v19880_v13 = vsel %vm13952_vm6, 4294967295, %v19879_v13  ;;  %19882 = vst [vmem:[#allocation217_spill] sm:$0xff] %v13960_v47  ;;  %19885 = vst [vmem:[#allocation218_spill] sm:$0xff] %v13971_v44  ;;  %v1659_v15 = vfloor.f32 %v1611_v63  ;;  %v13999_v5 = vsel %vm13966_vm15, 1.0, %v19536_v52  ;;  %v11470_v59 = vcvt.f32.s32 %v11469_v41 }
 0x626   : > { %19870 = vst [vmem:[#allocation213_spill] sm:$0xff] %v13923_v33  ;;  %4386 = vrot.lane.b32.xlu0 %v13923_v33, %s11712_s26  ;;  %v13940_v54 = vpop.f32.mrb[47].mxu1  ;;  %19881 = vst [vmem:[#allocation216_spill] sm:$0xff] %v19880_v13  ;;  %v1227_v33 = vcvt.s32.f32 %v13037_v27  ;;  %v14026_v41 = vcvt.f32.s32 %v11565_v26 }
 0x627   : > { %19875 = vst [vmem:[#allocation215_spill] sm:$0xff] %v13940_v54  ;;  %v1462_v54 = vmul.u32 8, %v11466_v35  ;;  %v13978_v35 = vsel %vm13932_vm14, 1.0, %v19536_v52  ;;  %vm1799_vm9 = vmand %vm1751_vm2, %vm13952_vm6  ;;  %vm14003_vm14 = vcmp.eq.s32.totalorder %v1509_v9, %v13558_v61  ;;  %vm1752_vm2 = vcmp.eq.s32.totalorder %v13971_v44, 0 }
 0x628   : > { %19887 = vst [vmem:[#allocation220_spill] sm:$0xff] %v13978_v35  ;;  %19890 = vst [vmem:[#allocation223_spill] sm:$0xff] %v13994_v23  ;;  %v1275_v29 = vadd.f32 0.5, %v1227_v33  ;;  %v14012_v6 = vsel %vm1799_vm9, 1.0, %v19536_v52  ;;  %v1511_v9 = vsub.s32 %v12973_v24, %v1463_v53  ;;  %v1464_v26 = vmul.u32 8, %v11470_v59  ;;  %v19914_v59 = vld [vmem:[#allocation102_spill] sm:$0xff] }
 0x629   : > { %v13973_v30 = vpop.f32.mrb[48].mxu1  ;;  %19891 = vst [vmem:[#allocation224_spill] sm:$0xff] %v13999_v5  ;;  %v1510_v7 = vsub.s32 %v12952_v14, %v1462_v54  ;;  %19896 = vst [vmem:[#allocation227_spill] sm:$0xff] %v14012_v6  ;;  %v19897_v14 = vld [vmem:[#allocation92_spill] sm:$0xff]  ;;  %v1370_v54 = vfloor.f32 %v1322_v45  ;;  %v11567_v6 = vtrunc.f32 %v1659_v15  ;;  %v19906_v5 = vld [vmem:[#allocation101_spill] sm:$0xff] }
 0x62a   : > { %19886 = vst [vmem:[#allocation219_spill] sm:$0xff] %v13973_v30  ;;  %4388 = vrot.lane.b32.xlu1 %v13973_v30, %s11712_s26  ;;  %v13988_v8 = vpop.f32.mrb[49].mxu1  ;;  %v1369_v30 = vfloor.f32 %v1321_v37  ;;  %vm2183_vm15 = vmand %vm2135_vm0, %vm13952_vm6  ;;  %v1612_v33 = vmul.f32 0.0078125, %v19897_v14  ;;  %v19899_v37 = vld [vmem:[#allocation99_spill] sm:$0xff]  ;;  %v19903_v14 = vmov 0  ;;  %v1229_v24 = vcvt.s32.f32 %v19906_v5  ;;  %v19908_v15 = vld [vmem:[#allocation93_spill] sm:$0xff] }
 0x62b   : > { %19889 = vst [vmem:[#allocation222_spill] sm:$0xff] %v13988_v8  ;;  %v19892_v8 = vmov 0  ;;  %v1228_v56 = vcvt.s32.f32 %v19899_v37  ;;  %19900 = vst [vmem:[#allocation99_spill] sm:$0xff] %v14026_v41  ;;  %vm14037_vm9 = vcmp.eq.s32.totalorder %v1510_v7, %v13558_v61  ;;  %v14043_v53 = vsel %vm2183_vm15, 1.0, %v19536_v52 }
 0x62c   : > { %v19893_v8 = vsel %vm14003_vm14, 4294967295, %v19892_v8  ;;  %vm14032_vm0 = vmand %vm1752_vm2, %vm14003_vm14  ;;  %v19904_v14 = vsel %vm14037_vm9, 4294967295, %v19903_v14  ;;  %19907 = vst [vmem:[#allocation101_spill] sm:$0xff] %v14043_v53  ;;  %v1613_v13 = vmul.f32 0.0078125, %v19908_v15  ;;  %vm19910_vm2 = vcmp.eq.s32.totalorder %v13971_v44, 2 }
 0x62d   : > { %19894 = vst [vmem:[#allocation225_spill] sm:$0xff] %v19893_v8  ;;  %v14009_v63 = vpop.f32.mrb[50].mxu1  ;;  %19905 = vst [vmem:[#allocation228_spill] sm:$0xff] %v19904_v14  ;;  %v1276_v47 = vadd.f32 0.5, %v1228_v56  ;;  %v1230_v15 = vcvt.s32.f32 %v19914_v59  ;;  %v14065_v8 = vsel %vm14032_vm0, 1.0, %v19536_v52  ;;  %vm19916_vm15 = vcmp.eq.s32.totalorder %v13994_v23, 0 }
 0x62e   : > { %19895 = vst [vmem:[#allocation226_spill] sm:$0xff] %v14009_v63  ;;  %4390 = vrot.lane.b32.xlu0 %v14009_v63, %s11712_s26  ;;  %v14021_v19 = vpop.f32.mrb[51].mxu1  ;;  %v1323_v63 = vmul.f32 0.125, %v1275_v29  ;;  %vm14053_vm6 = vmand %vm19910_vm2, %vm14003_vm14  ;;  %v11473_v29 = vtrunc.f32 %v1370_v54  ;;  %vm14076_vm12 = vcmp.eq.s32.totalorder %v1511_v9, %v13558_v61  ;;  %v19919_v54 = vmov 0 }
 0x62f   : > { %19898 = vst [vmem:[#allocation92_spill] sm:$0xff] %v14021_v19  ;;  %v11471_v19 = vtrunc.f32 %v1369_v30  ;;  %v1660_v30 = vfloor.f32 %v1612_v33  ;;  %19915 = vst [vmem:[#allocation102_spill] sm:$0xff] %v14065_v8  ;;  %v19920_v54 = vsel %vm14076_vm12, 4294967295, %v19919_v54  ;;  %vm1754_vm14 = vcmp.eq.s32.totalorder %v14026_v41, 0  ;;  %v19925_v8 = vld [vmem:[#allocation94_spill] sm:$0xff] }
 0x630   : > { %vm14071_vm2 = vmand %vm19916_vm15, %vm14037_vm9  ;;  %19921 = vst [vmem:[#allocation230_spill] sm:$0xff] %v19920_v54  ;;  %v14081_v56 = vcvt.f32.s32 %v11567_v6  ;;  %vm19922_vm0 = vcmp.eq.s32.totalorder %v13994_v23, 2  ;;  %v1614_v44 = vmul.f32 0.0078125, %v19925_v8  ;;  %v1277_v9 = vadd.f32 0.5, %v1229_v24 }
 0x631   : > { %v14047_v35 = vpop.f32.mrb[52].mxu1  ;;  %vm14087_vm1 = vmand %vm19922_vm0, %vm14037_vm9  ;;  %vm2138_vm15 = vcmp.eq.s32.totalorder %v14026_v41, 2  ;;  %v1512_v1 = vsub.s32 %v12988_v48, %v1464_v26  ;;  %v1661_v12 = vfloor.f32 %v1613_v13  ;;  %v1231_v14 = vcvt.s32.f32 %v19927_v17 }
 0x632   : > { %19909 = vst [vmem:[#allocation93_spill] sm:$0xff] %v14047_v35  ;;  %4392 = vrot.lane.b32.xlu1 %v14047_v35, %s11712_s26  ;;  %v14059_v53 = vpop.f32.mrb[53].mxu1  ;;  %v1371_v35 = vfloor.f32 %v1323_v63  ;;  %v11569_v31 = vtrunc.f32 %v1660_v30  ;;  %v11474_v23 = vcvt.f32.s32 %v11473_v29  ;;  %v1324_v20 = vmul.f32 0.125, %v1276_v47  ;;  %vm14120_vm0 = vmand %vm1754_vm14, %vm14076_vm12 }
 0x633   : > { %19913 = vst [vmem:[#allocation229_spill] sm:$0xff] %v14059_v53  ;;  %v11472_v53 = vcvt.f32.s32 %v11471_v19  ;;  %v1278_v63 = vadd.f32 0.5, %v1230_v15  ;;  %v14104_v8 = vsel %vm14053_vm6, 1.0, %v19536_v52  ;;  %v14109_v48 = vsel %vm14071_vm2, 1.0, %v19536_v52  ;;  %vm14129_vm2 = vmand %vm2138_vm15, %vm14076_vm12 }
 0x634   : > { %19929 = vst [vmem:[#allocation231_spill] sm:$0xff] %v14104_v8  ;;  %19930 = vst [vmem:[#allocation232_spill] sm:$0xff] %v14109_v48  ;;  %v14114_v47 = vsel %vm14087_vm1, 1.0, %v19536_v52  ;;  %vm1755_vm6 = vcmp.eq.s32.totalorder %v14081_v56, 0  ;;  %v11475_v7 = vtrunc.f32 %v1371_v35  ;;  %v1662_v30 = vfloor.f32 %v1614_v44 }
 0x635   : > { %v14094_v6 = vpop.f32.mrb[54].mxu1  ;;  %19931 = vst [vmem:[#allocation233_spill] sm:$0xff] %v14114_v47  ;;  %v1465_v26 = vmul.u32 8, %v11472_v53  ;;  %v1325_v29 = vmul.f32 0.125, %v1277_v9  ;;  %vm14134_vm1 = vcmp.eq.s32.totalorder %v1512_v1, %v13558_v61  ;;  %v19936_v15 = vmov 0 }
 0x636   : > { %19926 = vst [vmem:[#allocation94_spill] sm:$0xff] %v14094_v6  ;;  %4394 = vrot.lane.b32.xlu0 %v14094_v6, %s11712_s26  ;;  %v14099_v19 = vpop.f32.mrb[55].mxu1  ;;  %v19937_v15 = vsel %vm14134_vm1, 4294967295, %v19936_v15  ;;  %v11571_v33 = vtrunc.f32 %v1661_v12  ;;  %v19940_v6 = vld [vmem:[#allocation38_spill] sm:$0xff]  ;;  %v14141_v48 = vcvt.f32.s32 %v11569_v31  ;;  %v1466_v54 = vmul.u32 8, %v11474_v23  ;;  %v19945_v31 = vld [vmem:[#allocation95_spill] sm:$0xff]  ;;  %vm14163_vm15 = vmand %vm1755_vm6, %vm14134_vm1 }
 0x637   : > { %19928 = vst [vmem:[#allocation104_spill] sm:$0xff] %v14099_v19  ;;  %19938 = vst [vmem:[#allocation234_spill] sm:$0xff] %v19937_v15  ;;  %v1279_v19 = vadd.f32 0.5, %v1231_v14  ;;  %v1232_v47 = vcvt.s32.f32 %v19940_v6  ;;  %v1372_v8 = vfloor.f32 %v1324_v20  ;;  %v1326_v41 = vmul.f32 0.125, %v1278_v63  ;;  %v19995_v15 = vld [vmem:[#allocation113_spill] sm:$0xff] }
 0x638   : > { %19941 = vst [vmem:[#allocation38_spill] sm:$0xff] %v14141_v48  ;;  %v14150_v1 = vsel %vm14120_vm0, 1.0, %v19536_v52  ;;  %v14155_v12 = vsel %vm14129_vm2, 1.0, %v19536_v52  ;;  %vm2139_vm14 = vcmp.eq.s32.totalorder %v14081_v56, 2  ;;  %v1615_v20 = vmul.f32 0.0078125, %v19945_v31  ;;  %v19950_v31 = vld [vmem:[#allocation39_spill] sm:$0xff] }
 0x639   : > { %v14138_v45 = vpop.f32.mrb[56].mxu1  ;;  %19943 = vst [vmem:[#allocation237_spill] sm:$0xff] %v14150_v1  ;;  %19944 = vst [vmem:[#allocation238_spill] sm:$0xff] %v14155_v12  ;;  %v1513_v23 = vsub.s32 %v13004_v21, %v1465_v26  ;;  %v11476_v14 = vcvt.f32.s32 %v11475_v7  ;;  %v11573_v53 = vtrunc.f32 %v1662_v30  ;;  %v1373_v9 = vfloor.f32 %v1325_v29  ;;  %v19953_v26 = vld [vmem:[#allocation17_spill] sm:$0xff] }
 0x63a   : > { %19939 = vst [vmem:[#allocation235_spill] sm:$0xff] %v14138_v45  ;;  %4396 = vrot.lane.b32.xlu1 %v14138_v45, %s11712_s26  ;;  %v14145_v44 = vpop.f32.mrb[57].mxu1  ;;  %v14168_v63 = vcvt.f32.s32 %v11571_v33  ;;  %v1327_v13 = vmul.f32 0.125, %v1279_v19  ;;  %v1233_v45 = vcvt.s32.f32 %v19950_v31  ;;  %v1514_v12 = vsub.s32 %v13021_v36, %v1466_v54  ;;  %vm14190_vm2 = vmand %vm2139_vm14, %vm14134_vm1 }
 0x63b   : > { %19942 = vst [vmem:[#allocation236_spill] sm:$0xff] %v14145_v44  ;;  %v1280_v44 = vadd.f32 0.5, %v1232_v47  ;;  %v11477_v1 = vtrunc.f32 %v1372_v8  ;;  %v1374_v32 = vfloor.f32 %v1326_v41  ;;  %v14182_v19 = vsel %vm14163_vm15, 1.0, %v19536_v52 }
 0x63c   : > { %19948 = vst [vmem:[#allocation95_spill] sm:$0xff] %v14168_v63  ;;  %19952 = vst [vmem:[#allocation240_spill] sm:$0xff] %v14182_v19  ;;  %v1663_v47 = vfloor.f32 %v1615_v20  ;;  %v1616_v7 = vmul.f32 0.0078125, %v19953_v26  ;;  %vm14195_vm0 = vcmp.eq.s32.totalorder %v1513_v23, %v13558_v61  ;;  %v19956_v41 = vmov 0 }
 0x63d   : > { %v14170_v24 = vpop.f32.mrb[58].mxu1  ;;  %v19957_v41 = vsel %vm14195_vm0, 4294967295, %v19956_v41  ;;  %v1467_v54 = vmul.u32 8, %v11476_v14  ;;  %v14199_v8 = vcvt.f32.s32 %v11573_v53  ;;  %v11479_v30 = vtrunc.f32 %v1373_v9  ;;  %v19984_v9 = vld [vmem:[#allocation98_spill] sm:$0xff] }
 0x63e   : > { %19949 = vst [vmem:[#allocation239_spill] sm:$0xff] %v14170_v24  ;;  %4398 = vrot.lane.b32.xlu0 %v14170_v24, %s11712_s26  ;;  %v14177_v21 = vpop.f32.mrb[59].mxu1  ;;  %19958 = vst [vmem:[#allocation17_spill] sm:$0xff] %v19957_v41  ;;  %v1375_v29 = vfloor.f32 %v1327_v13  ;;  %v1328_v33 = vmul.f32 0.125, %v1280_v44  ;;  %v1281_v35 = vadd.f32 0.5, %v1233_v45  ;;  %vm14205_vm14 = vcmp.eq.s32.totalorder %v1514_v12, %v13558_v61  ;;  %v19963_v24 = vld [vmem:[#allocation96_spill] sm:$0xff] }
 0x63f   : > { %19951 = vst [vmem:[#allocation39_spill] sm:$0xff] %v14177_v21  ;;  %v19960_v26 = vmov 0  ;;  %v11478_v23 = vcvt.f32.s32 %v11477_v1  ;;  %v11481_v21 = vtrunc.f32 %v1374_v32  ;;  %v1617_v19 = vmul.f32 0.0078125, %v19963_v24  ;;  %v19969_v12 = vld [vmem:[#allocation97_spill] sm:$0xff] }
 0x640   : > { %v19961_v26 = vsel %vm14205_vm14, 4294967295, %v19960_v26  ;;  %v14217_v44 = vsel %vm14190_vm2, 1.0, %v19536_v52  ;;  %vm19966_vm15 = vcmp.eq.s32.totalorder %v14141_v48, 0  ;;  %v11575_v32 = vtrunc.f32 %v1663_v47 }
 0x641   : > { %v14202_v20 = vpop.f32.mrb[60].mxu1  ;;  %19962 = vst [vmem:[#allocation242_spill] sm:$0xff] %v19961_v26  ;;  %19965 = vst [vmem:[#allocation243_spill] sm:$0xff] %v14217_v44  ;;  %v1664_v1 = vfloor.f32 %v1616_v7  ;;  %v1618_v53 = vmul.f32 0.0078125, %v19969_v12  ;;  %vm19970_vm1 = vcmp.eq.s32.totalorder %v14141_v48, 2  ;;  %vm2141_vm2 = vcmp.eq.s32.totalorder %v14168_v63, 2 }
 0x642   : > { %19959 = vst [vmem:[#allocation241_spill] sm:$0xff] %v14202_v20  ;;  %4400 = vrot.lane.b32.xlu1 %v14202_v20, %s11712_s26  ;;  %v14212_v14 = vpop.f32.mrb[61].mxu1  ;;  %vm14223_vm6 = vmand %vm19966_vm15, %vm14195_vm0  ;;  %v1515_v13 = vsub.s32 %v13037_v27, %v1467_v54  ;;  %vm1758_vm15 = vcmp.eq.s32.totalorder %v14199_v8, 0  ;;  %v11480_v24 = vcvt.f32.s32 %v11479_v30  ;;  %vm19973_vm9 = vcmp.eq.s32.totalorder %v14168_v63, 0  ;;  %v19977_v20 = vld [vmem:[#allocation111_spill] sm:$0xff] }
 0x643   : > { %19964 = vst [vmem:[#allocation96_spill] sm:$0xff] %v14212_v14  ;;  %vm14232_vm12 = vmand %vm19970_vm1, %vm14195_vm0  ;;  %vm2142_vm1 = vcmp.eq.s32.totalorder %v14199_v8, 2  ;;  %v11483_v7 = vtrunc.f32 %v1375_v29  ;;  %v1376_v36 = vfloor.f32 %v1328_v33  ;;  %v1329_v12 = vmul.f32 0.125, %v1281_v35 }
 0x644   : > { %vm14243_vm3 = vmand %vm19973_vm9, %vm14205_vm14  ;;  %v1234_v27 = vcvt.s32.f32 %v19977_v20  ;;  %v14254_v54 = vsel %vm14223_vm6, 1.0, %v19536_v52  ;;  %v1468_v30 = vmul.u32 8, %v11478_v23  ;;  %v11482_v44 = vcvt.f32.s32 %v11481_v21 }
 0x645   : > { %v14248_v14 = vpop.f32.mrb[62].mxu1  ;;  %19978 = vst [vmem:[#allocation111_spill] sm:$0xff] %v14254_v54  ;;  %v1665_v41 = vfloor.f32 %v1617_v19  ;;  %v14263_v29 = vsel %vm14232_vm12, 1.0, %v19536_v52  ;;  %vm2189_vm9 = vmand %vm2141_vm2, %vm14205_vm14  ;;  %v14269_v33 = vcvt.f32.s32 %v11575_v32  ;;  %v11577_v35 = vtrunc.f32 %v1664_v1  ;;  %v20411_v55 = vld [vmem:[#allocation239_spill] sm:$0xff] }
 0x646   : > { %19976 = vst [vmem:[#allocation97_spill] sm:$0xff] %v14248_v14  ;;  %4402 = vrot.lane.b32.xlu0 %v14248_v14, %s11712_s26  ;;  %v14258_v48 = vpop.f32.mrb[63].mxu1  ;;  %19980 = vst [vmem:[#allocation245_spill] sm:$0xff] %v14263_v29  ;;  %v1666_v21 = vfloor.f32 %v1618_v53  ;;  %v14274_v19 = vsel %vm14243_vm3, 1.0, %v19536_v52  ;;  %vm14277_vm6 = vcmp.eq.s32.totalorder %v1515_v13, %v13558_v61  ;;  %v19982_v23 = vmov 0 }
 0x647   : > { %19979 = vst [vmem:[#allocation244_spill] sm:$0xff] %v14258_v48  ;;  %19981 = vst [vmem:[#allocation246_spill] sm:$0xff] %v14274_v19  ;;  %v19983_v23 = vsel %vm14277_vm6, 4294967295, %v19982_v23  ;;  %v1469_v45 = vmul.u32 8, %v11480_v24  ;;  %v1619_v48 = vmul.f32 0.0078125, %v19984_v9  ;;  %v11484_v14 = vcvt.f32.s32 %v11483_v7 }
 0x648   : > { %v11485_v29 = vtrunc.f32 %v1376_v36  ;;  %v1377_v54 = vfloor.f32 %v1329_v12  ;;  %v1282_v32 = vadd.f32 0.5, %v1234_v27  ;;  %v14285_v1 = vsel %vm2189_vm9, 1.0, %v19536_v52  ;;  %v19988_v36 = vld [vmem:[#allocation100_spill] sm:$0xff]  ;;  %vm14300_vm12 = vmand %vm1758_vm15, %vm14277_vm6  ;;  %v19991_v27 = vld [vmem:[#allocation103_spill] sm:$0xff] }
 0x649   : > { %v14282_v26 = vpop.f32.mrb[64].mxu1  ;;  %19986 = vst [vmem:[#allocation247_spill] sm:$0xff] %v14285_v1  ;;  %v1516_v53 = vsub.s32 %v19899_v37, %v1468_v30  ;;  %v1470_v47 = vmul.u32 8, %v11482_v44  ;;  %v11579_v19 = vtrunc.f32 %v1665_v41  ;;  %v14293_v24 = vcvt.f32.s32 %v11577_v35  ;;  %vm14334_vm2 = vmand %vm2142_vm1, %vm14277_vm6 }
 0x64a   : > { %19985 = vst [vmem:[#allocation98_spill] sm:$0xff] %v14282_v26  ;;  %4404 = vrot.lane.b32.xlu1 %v14282_v26, %s11712_s26  ;;  %v14290_v13 = vpop.f32.mrb[65].mxu1  ;;  %v11581_v7 = vtrunc.f32 %v1666_v21  ;;  %v1620_v12 = vmul.f32 0.0078125, %v19988_v36  ;;  %v1517_v41 = vsub.s32 %v19906_v5, %v1469_v45  ;;  %v1667_v44 = vfloor.f32 %v1619_v48 }
 0x64b   : > { %19987 = vst [vmem:[#allocation248_spill] sm:$0xff] %v14290_v13  ;;  %v1621_v30 = vmul.f32 0.0078125, %v19991_v27  ;;  %v1471_v35 = vmul.u32 8, %v11484_v14  ;;  %v11486_v9 = vcvt.f32.s32 %v11485_v29  ;;  %v11487_v21 = vtrunc.f32 %v1377_v54 }
 0x64c   : > { %v1330_v13 = vmul.f32 0.125, %v1282_v32  ;;  %vm14310_vm9 = vcmp.eq.s32.totalorder %v1516_v53, %v13558_v61  ;;  %v19993_v26 = vmov 0  ;;  %v1518_v1 = vsub.s32 %v19914_v59, %v1470_v47 }
 0x64d   : > { %v14307_v36 = vpop.f32.mrb[66].mxu1  ;;  %v19994_v26 = vsel %vm14310_vm9, 4294967295, %v19993_v26  ;;  %v14315_v63 = vcvt.f32.s32 %v11579_v19  ;;  %v1235_v5 = vcvt.s32.f32 %v19995_v15  ;;  %v14325_v14 = vsel %vm14300_vm12, 1.0, %v19536_v52 }
 0x64e   : > { %19992 = vst [vmem:[#allocation100_spill] sm:$0xff] %v14307_v36  ;;  %4406 = vrot.lane.b32.xlu0 %v14307_v36, %s11712_s26  ;;  %v14320_v48 = vpop.f32.mrb[67].mxu1  ;;  %19997 = vst [vmem:[#allocation113_spill] sm:$0xff] %v14325_v14  ;;  %v14328_v54 = vcvt.f32.s32 %v11581_v7  ;;  %v1668_v29 = vfloor.f32 %v1620_v12  ;;  %vm14339_vm3 = vcmp.eq.s32.totalorder %v1517_v41, %v13558_v61  ;;  %v20001_v19 = vmov 0 }
 0x64f   : > { %19996 = vst [vmem:[#allocation103_spill] sm:$0xff] %v14320_v48  ;;  %v20002_v19 = vsel %vm14339_vm3, 4294967295, %v20001_v19  ;;  %v11583_v45 = vtrunc.f32 %v1667_v44  ;;  %v1669_v32 = vfloor.f32 %v1621_v30  ;;  %vm20004_vm15 = vcmp.eq.s32.totalorder %v14269_v33, 0  ;;  %v20014_v30 = vld [vmem:[#allocation115_spill] sm:$0xff] }
 0x650   : > { %19998 = vst [vmem:[#allocation249_spill] sm:$0xff] %v14328_v54  ;;  %20003 = vst [vmem:[#allocation250_spill] sm:$0xff] %v20002_v19  ;;  %v1519_v47 = vsub.s32 %v19927_v17, %v1471_v35  ;;  %v1472_v7 = vmul.u32 8, %v11486_v9  ;;  %v11488_v12 = vcvt.f32.s32 %v11487_v21  ;;  %v1378_v37 = vfloor.f32 %v1330_v13 }
 0x651   : > { %vm14348_vm14 = vmand %vm20004_vm15, %vm14310_vm9  ;;  %v14353_v41 = vpop.f32.mrb[68].mxu1  ;;  %vm20008_vm1 = vcmp.eq.s32.totalorder %v14269_v33, 2  ;;  %vm14364_vm15 = vcmp.eq.s32.totalorder %v1518_v1, %v13558_v61  ;;  %v20011_v27 = vmov 0  ;;  %v1283_v17 = vadd.f32 0.5, %v1235_v5 }
 0x652   : > { %20007 = vst [vmem:[#allocation251_spill] sm:$0xff] %v14353_v41  ;;  %vm14359_vm12 = vmand %vm20008_vm1, %vm14310_vm9  ;;  %v20012_v27 = vsel %vm14364_vm15, 4294967295, %v20011_v27  ;;  %v1236_v13 = vcvt.s32.f32 %v20014_v30  ;;  %4408 = vrot.lane.b32.xlu1 %v14353_v41, %s11712_s26  ;;  %v14372_v35 = vpop.f32.mrb[69].mxu1  ;;  %v14377_v9 = vsel %vm14334_vm2, 1.0, %v19536_v52  ;;  %vm20017_vm1 = vcmp.eq.s32.totalorder %v14293_v24, 0  ;;  %v20023_v41 = vld [vmem:[#allocation105_spill] sm:$0xff] }
 0x653   : > { %20013 = vst [vmem:[#allocation252_spill] sm:$0xff] %v20012_v27  ;;  %20015 = vst [vmem:[#allocation115_spill] sm:$0xff] %v14372_v35  ;;  %vm2145_vm6 = vcmp.eq.s32.totalorder %v14315_v63, 2  ;;  %v11585_v21 = vtrunc.f32 %v1668_v29  ;;  %vm20020_vm7 = vcmp.eq.s32.totalorder %v14293_v24, 2  ;;  %v14397_v59 = vcvt.f32.s32 %v11583_v45 }
 0x654   : > { %20016 = vst [vmem:[#allocation253_spill] sm:$0xff] %v14377_v9  ;;  %vm14383_vm9 = vmand %vm20017_vm1, %vm14339_vm3  ;;  %v11587_v35 = vtrunc.f32 %v1669_v32  ;;  %v1622_v48 = vmul.f32 0.0078125, %v20023_v41  ;;  %vm20024_vm1 = vcmp.eq.s32.totalorder %v14315_v63, 0  ;;  %v20027_v36 = vmov 0 }
 0x655   : > { %vm14393_vm8 = vmand %vm20020_vm7, %vm14339_vm3  ;;  %vm14410_vm7 = vcmp.eq.s32.totalorder %v1519_v47, %v13558_v61  ;;  %v1520_v45 = vsub.s32 %v19940_v6, %v1472_v7  ;;  %v1473_v32 = vmul.u32 8, %v11488_v12  ;;  %v11489_v19 = vtrunc.f32 %v1378_v37  ;;  %v14415_v41 = vpop.f32.mrb[70].mxu1 }
 0x656   : > { %vm14405_vm0 = vmand %vm20024_vm1, %vm14364_vm15  ;;  %v20028_v36 = vsel %vm14410_vm7, 4294967295, %v20027_v36  ;;  %20030 = vst [vmem:[#allocation254_spill] sm:$0xff] %v14415_v41  ;;  %v14420_v9 = vsel %vm14348_vm14, 1.0, %v19536_v52  ;;  %v1331_v6 = vmul.f32 0.125, %v1283_v17  ;;  %v1284_v7 = vadd.f32 0.5, %v1236_v13  ;;  %4410 = vrot.lane.b32.xlu0 %v14415_v41, %s11712_s26  ;;  %v14433_v12 = vpop.f32.mrb[71].mxu1 }
 0x657   : > { %20029 = vst [vmem:[#allocation105_spill] sm:$0xff] %v20028_v36  ;;  %20031 = vst [vmem:[#allocation255_spill] sm:$0xff] %v14420_v9  ;;  %v14438_v53 = vsel %vm14359_vm12, 1.0, %v19536_v52  ;;  %v14443_v37 = vsel %vm14383_vm9, 1.0, %v19536_v52  ;;  %v14448_v17 = vsel %vm14393_vm8, 1.0, %v19536_v52  ;;  %v14450_v13 = vcvt.f32.s32 %v11585_v21 }
 0x658   : > { %vm14426_vm1 = vmand %vm2145_vm6, %vm14364_vm15  ;;  %20034 = vst [vmem:[#allocation256_spill] sm:$0xff] %v14433_v12  ;;  %vm20038_vm14 = vcmp.eq.s32.totalorder %v13561_v49, 1  ;;  %vm20041_vm9 = vcmp.eq.s32.totalorder %v14328_v54, 0  ;;  %vm1763_vm8 = vcmp.eq.s32.totalorder %v14397_v59, 0  ;;  %vm2147_vm2 = vcmp.eq.s32.totalorder %v14397_v59, 2 }
 0x659   : > { %20035 = vst [vmem:[#allocation257_spill] sm:$0xff] %v14438_v53  ;;  %20036 = vst [vmem:[#allocation258_spill] sm:$0xff] %v14443_v37  ;;  %v1670_v21 = vfloor.f32 %v1622_v48  ;;  %vm1934_vm15 = vcmp.eq.s32.totalorder %v13566_v10, 1  ;;  %v1521_v5 = vsub.s32 %v19950_v31, %v1473_v32  ;;  %v11490_v12 = vcvt.f32.s32 %v11489_v19  ;;  %v14487_v48 = vpop.f32.mrb[72].mxu1  ;;  %v20050_v37 = vld [vmem:[#allocation117_spill] sm:$0xff] }
 0x65a   : > { %20037 = vst [vmem:[#allocation259_spill] sm:$0xff] %v14448_v17  ;;  %vm14456_vm6 = vmand %vm20038_vm14, %vm13575_vm5  ;;  %vm20044_vm5 = vcmp.eq.s32.totalorder %v14328_v54, 2  ;;  %v14485_v41 = vcvt.f32.s32 %v11587_v35  ;;  %v1379_v17 = vfloor.f32 %v1331_v6  ;;  %v1332_v36 = vmul.f32 0.125, %v1284_v7  ;;  %4412 = vrot.lane.b32.xlu1 %v14487_v48, %s11712_s26  ;;  %v14492_v27 = vpop.f32.mrb[73].mxu1 }
 0x65b   : > { %vm14464_vm12 = vmand %vm20041_vm9, %vm14410_vm7  ;;  %vm14480_vm9 = vcmp.eq.s32.totalorder %v1520_v45, %v13558_v61  ;;  %20049 = vst [vmem:[#allocation260_spill] sm:$0xff] %v14487_v48  ;;  %v1237_v54 = vcvt.s32.f32 %v20050_v37  ;;  %v14497_v45 = vsel %vm14456_vm6, 1.0, %v19536_v52  ;;  %v14502_v31 = vsel %vm14405_vm0, 1.0, %v19536_v52 }
 0x65c   : > { %vm14475_vm14 = vmand %vm20044_vm5, %vm14410_vm7  ;;  %20051 = vst [vmem:[#allocation117_spill] sm:$0xff] %v14492_v27  ;;  %v14507_v19 = vsel %vm14426_vm1, 1.0, %v19536_v52  ;;  %v14512_v35 = vsel %vm14464_vm12, 1.0, %v19536_v52  ;;  %vm1764_vm5 = vcmp.eq.s32.totalorder %v14450_v13, 0  ;;  %vm2148_vm1 = vcmp.eq.s32.totalorder %v14450_v13, 2  ;;  %v4357_v34 = vpop.permute.xlu1 %4356 }
 0x65d   : > { %20052 = vst [vmem:[#allocation261_spill] sm:$0xff] %v14497_v45  ;;  %20053 = vst [vmem:[#allocation262_spill] sm:$0xff] %v14507_v19  ;;  %v14526_v32 = vsel %vm14475_vm14, 1.0, %v19536_v52  ;;  %v11589_v10 = vtrunc.f32 %v1670_v21  ;;  %v4260_v6 = vmul.f32 %v13644_v4, %v13519_v22  ;;  %vm14549_vm12 = vcmp.eq.s32.totalorder %v1521_v5, %v13558_v61  ;;  %v14555_v49 = vpop.f32.mrb[74].mxu1 }
 0x65e   : > { %20054 = vst [vmem:[#allocation263_spill] sm:$0xff] %v14512_v35  ;;  %vm14519_vm6 = vmand %vm1934_vm15, %vm13588_vm11  ;;  %vm1935_vm11 = vcmp.eq.s32.totalorder %v13582_v58, 1  ;;  %v1474_v1 = vmul.u32 8, %v11490_v12  ;;  %v4500_v21 = vmul.f32 %v14497_v45, %v4357_v34  ;;  %vm2149_vm14 = vcmp.eq.s32.totalorder %v14485_v41, 2  ;;  %4414 = vrot.lane.b32.xlu0 %v14555_v49, %s11712_s26  ;;  %v14560_v48 = vpop.f32.mrb[75].mxu1  ;;  %v20067_v34 = vld [vmem:[#allocation108_spill] sm:$0xff] }
 0x65f   : > { %20057 = vst [vmem:[#allocation264_spill] sm:$0xff] %v14526_v32  ;;  %vm14532_vm0 = vmand %vm1763_vm8, %vm14480_vm9  ;;  %vm1765_vm8 = vcmp.eq.s32.totalorder %v14485_v41, 0  ;;  %v11491_v22 = vtrunc.f32 %v1379_v17  ;;  %v1380_v4 = vfloor.f32 %v1332_v36  ;;  %v1285_v27 = vadd.f32 0.5, %v1237_v54  ;;  %v20068_v32 = vld [vmem:[#allocation119_spill] sm:$0xff] }
 0x660   : > { %vm14544_vm15 = vmand %vm2147_vm2, %vm14480_vm9  ;;  %20064 = vst [vmem:[#allocation265_spill] sm:$0xff] %v14555_v49  ;;  %v14565_v12 = vsel %vm14519_vm6, 1.0, %v19536_v52  ;;  %v4596_v5 = vmul.f32 %v13649_v62, %v13524_v60  ;;  %v1623_v45 = vmul.f32 0.0078125, %v20067_v34  ;;  %v1238_v35 = vcvt.s32.f32 %v20068_v32  ;;  %v4359_v29 = vpop.permute.xlu0 %4358 }
 0x661   : > { %20065 = vst [vmem:[#allocation266_spill] sm:$0xff] %v14560_v48  ;;  %20066 = vst [vmem:[#allocation267_spill] sm:$0xff] %v14565_v12  ;;  %v4548_v17 = vadd.f32 %v4500_v21, %v4260_v6  ;;  %v14582_v54 = vsel %vm14532_vm0, 1.0, %v19536_v52  ;;  %v14587_v60 = vsel %vm14544_vm15, 1.0, %v19536_v52  ;;  %v14597_v0 = vcvt.f32.s32 %v11589_v10  ;;  %v14614_v34 = vpop.f32.mrb[76].mxu1 }
 0x662   : > { %vm14575_vm2 = vmand %vm1935_vm11, %vm13608_vm4  ;;  %20071 = vst [vmem:[#allocation108_spill] sm:$0xff] %v14582_v54  ;;  %vm1936_vm4 = vcmp.eq.s32.totalorder %v13623_v46, 1  ;;  %v4261_v47 = vmul.f32 %v13663_v18, %v13526_v11  ;;  %v1522_v7 = vsub.s32 %v19977_v20, %v1474_v1  ;;  %v4501_v10 = vmul.f32 %v14565_v12, %v4359_v29  ;;  %4416 = vrot.lane.b32.xlu1 %v14614_v34, %s11712_s26  ;;  %v14618_v11 = vpop.f32.mrb[77].mxu1  ;;  %v20085_v46 = vld [vmem:[#allocation184_spill] sm:$0xff] }
 0x663   : > { %20072 = vst [vmem:[#allocation119_spill] sm:$0xff] %v14587_v60  ;;  %vm14593_vm6 = vmand %vm1764_vm5, %vm14549_vm12  ;;  %v14611_v21 = vadd.f32 %v4596_v5, %v4548_v17  ;;  %v11492_v62 = vcvt.f32.s32 %v11491_v22  ;;  %v11493_v48 = vtrunc.f32 %v1380_v4  ;;  %v1333_v49 = vmul.f32 0.125, %v1285_v27  ;;  %v20097_v4 = vld [vmem:[#allocation168_spill] sm:$0xff] }
 0x664   : > { %vm14606_vm0 = vmand %vm2148_vm1, %vm14549_vm12  ;;  %20077 = vst [vmem:[#allocation268_spill] sm:$0xff] %v14614_v34  ;;  %v14623_v18 = vsel %vm14575_vm2, 1.0, %v19536_v52  ;;  %v4597_v20 = vmul.f32 %v13696_v50, %v13530_v43  ;;  %v1671_v1 = vfloor.f32 %v1623_v45  ;;  %v1286_v5 = vadd.f32 0.5, %v1238_v35  ;;  %v20084_v45 = vld [vmem:[#allocation110_spill] sm:$0xff]  ;;  %v4361_v22 = vpop.permute.xlu1 %4360 }
 0x665   : > { %20078 = vst [vmem:[#allocation269_spill] sm:$0xff] %v14618_v11  ;;  %20079 = vst [vmem:[#allocation270_spill] sm:$0xff] %v14623_v18  ;;  %v4549_v17 = vadd.f32 %v4501_v10, %v4261_v47  ;;  %v14638_v27 = vsel %vm14593_vm6, 1.0, %v19536_v52  ;;  %v14643_v43 = vsel %vm14606_vm0, 1.0, %v19536_v52  ;;  %v1624_v35 = vmul.f32 0.0078125, %v20084_v45  ;;  %v14657_v47 = vpop.f32.mrb[78].mxu1 }
 0x666   : > { %vm14631_vm5 = vmand %vm1936_vm4, %vm13674_vm13  ;;  %20082 = vst [vmem:[#allocation271_spill] sm:$0xff] %v14638_v27  ;;  %vm1937_vm1 = vcmp.eq.s32.totalorder %v13691_v39, 1  ;;  %v4262_v38 = vmul.f32 %v20085_v46, %v13535_v2  ;;  %vm14650_vm13 = vcmp.eq.s32.totalorder %v1522_v7, %v13558_v61  ;;  %v4502_v29 = vmul.f32 %v14623_v18, %v4361_v22  ;;  %4418 = vrot.lane.b32.xlu0 %v14657_v47, %s11712_s26  ;;  %v14661_v50 = vpop.f32.mrb[79].mxu1  ;;  %v20091_v7 = vld [vmem:[#allocation2_spill] sm:$0xff] }
 0x667   : > { %20083 = vst [vmem:[#allocation272_spill] sm:$0xff] %v14643_v43  ;;  %v14654_v58 = vadd.f32 %v4597_v20, %v4549_v17  ;;  %20088 = vst [vmem:[#allocation110_spill] sm:$0xff] %v14657_v47  ;;  %v1475_v6 = vmul.u32 8, %v11492_v62  ;;  %v11494_v10 = vcvt.f32.s32 %v11493_v48  ;;  %v1381_v45 = vfloor.f32 %v1333_v49  ;;  %v20092_v20 = vld [vmem:[#allocation185_spill] sm:$0xff]  ;;  %v20101_v48 = vld [vmem:[#allocation112_spill] sm:$0xff] }
 0x668   : > { %20089 = vst [vmem:[#allocation273_spill] sm:$0xff] %v14661_v50  ;;  %v14666_v2 = vsel %vm14631_vm5, 1.0, %v19536_v52  ;;  %v4598_v17 = vmul.f32 %v20092_v20, %v20091_v7  ;;  %v1334_v46 = vmul.f32 0.125, %v1286_v5  ;;  %v4550_v22 = vadd.f32 %v4502_v29, %v4262_v38  ;;  %vm14674_vm11 = vmand %vm1937_vm1, %vm13722_vm10  ;;  %v4363_v39 = vpop.permute.xlu0 %4362  ;;  %v20098_v38 = vld [vmem:[#allocation188_spill] sm:$0xff]  ;;  %v20113_v49 = vld [vmem:[#allocation27_spill] sm:$0xff] }
 0x669   : > { %20090 = vst [vmem:[#allocation274_spill] sm:$0xff] %v14666_v2  ;;  %vm14684_vm15 = vmand %vm1765_vm8, %vm14650_vm13  ;;  %vm1766_vm2 = vcmp.eq.s32.totalorder %v14597_v0, 0  ;;  %v11591_v16 = vtrunc.f32 %v1671_v1  ;;  %v1672_v5 = vfloor.f32 %v1624_v35  ;;  %vm1938_vm10 = vcmp.eq.s32.totalorder %v13711_v40, 1  ;;  %v14706_v35 = vpop.f32.mrb[80].mxu1 }
 0x66a   : > { %v4263_v29 = vmul.f32 %v20098_v38, %v20097_v4  ;;  %vm14696_vm6 = vmand %vm2149_vm14, %vm14650_vm13  ;;  %v14701_v20 = vmul.f32 0.0078125, %v20101_v48  ;;  %v14703_v18 = vadd.f32 %v4598_v17, %v4550_v22  ;;  %v4503_v1 = vmul.f32 %v14666_v2, %v4363_v39  ;;  %20102 = vst [vmem:[#allocation2_spill] sm:$0xff] %v14706_v35  ;;  %4420 = vrot.lane.b32.xlu1 %v14706_v35, %s11712_s26  ;;  %v14712_v50 = vpop.f32.mrb[81].mxu1  ;;  %v20105_v22 = vld [vmem:[#allocation169_spill] sm:$0xff]  ;;  %v20126_v39 = vld [vmem:[#allocation123_spill] sm:$0xff] }
 0x66b   : > { %v1523_v12 = vsub.s32 %v19995_v15, %v1475_v6  ;;  %vm2150_vm8 = vcmp.eq.s32.totalorder %v14597_v0, 2  ;;  %v1476_v4 = vmul.u32 8, %v11494_v10  ;;  %v11495_v38 = vtrunc.f32 %v1381_v45  ;;  %20103 = vst [vmem:[#allocation168_spill] sm:$0xff] %v14712_v50  ;;  %v20107_v45 = vld [vmem:[#allocation190_spill] sm:$0xff] }
 0x66c   : > { %v14717_v17 = vsel %vm14674_vm11, 1.0, %v19536_v52  ;;  %v4599_v48 = vmul.f32 %v13768_v25, %v20105_v22  ;;  %v14724_v15 = vsel %vm14684_vm15, 1.0, %v19536_v52  ;;  %v1382_v6 = vfloor.f32 %v1334_v46  ;;  %v4365_v2 = vpop.permute.xlu1 %4364  ;;  %v20114_v46 = vld [vmem:[#allocation170_spill] sm:$0xff] }
 0x66d   : > { %20104 = vst [vmem:[#allocation112_spill] sm:$0xff] %v14717_v17  ;;  %20106 = vst [vmem:[#allocation169_spill] sm:$0xff] %v14724_v15  ;;  %v4551_v10 = vadd.f32 %v4503_v1, %v4263_v29  ;;  %vm20108_vm14 = vnez %v20107_v45  ;;  %v14737_v62 = vsel %vm14696_vm6, 1.0, %v19536_v52  ;;  %v14739_v22 = vcvt.f32.s32 %v11591_v16  ;;  %v20115_v29 = vld [vmem:[#allocation193_spill] sm:$0xff]  ;;  %v14748_v35 = vpop.f32.mrb[82].mxu1 }
 0x66e   : > { %vm14730_vm4 = vmand %vm1938_vm10, %vm20108_vm14  ;;  %20111 = vst [vmem:[#allocation190_spill] sm:$0xff] %v14737_v62  ;;  %v1239_v25 = vcvt.s32.f32 %v20113_v49  ;;  %vm1939_vm0 = vcmp.eq.s32.totalorder %v13755_v57, 1  ;;  %v4264_v1 = vmul.f32 %v20115_v29, %v20114_v46  ;;  %v11593_v40 = vtrunc.f32 %v1672_v5  ;;  %4422 = vrot.lane.b32.xlu0 %v14748_v35, %s11712_s26  ;;  %v14758_v11 = vpop.f32.mrb[83].mxu1  ;;  %v20122_v46 = vld [vmem:[#allocation196_spill] sm:$0xff] }
 0x66f   : > { %20112 = vst [vmem:[#allocation275_spill] sm:$0xff] %v14739_v22  ;;  %v14745_v45 = vadd.f32 %v4599_v48, %v4551_v10  ;;  %v4504_v50 = vmul.f32 %v14717_v17, %v4365_v2  ;;  %20116 = vst [vmem:[#allocation27_spill] sm:$0xff] %v14748_v35  ;;  %vm14751_vm5 = vcmp.eq.s32.totalorder %v1523_v12, %v13558_v61  ;;  %v11496_v47 = vcvt.f32.s32 %v11495_v38  ;;  %v20121_v2 = vld [vmem:[#allocation171_spill] sm:$0xff]  ;;  %v20155_v62 = vld [vmem:[#allocation208_spill] sm:$0xff] }
 0x670   : > { %v1524_v16 = vsub.s32 %v20014_v30, %v1476_v4  ;;  %20119 = vst [vmem:[#allocation170_spill] sm:$0xff] %v14758_v11  ;;  %v14763_v5 = vsel %vm14730_vm4, 1.0, %v19536_v52  ;;  %v4600_v48 = vmul.f32 %v13814_v42, %v20121_v2  ;;  %v11497_v12 = vtrunc.f32 %v1382_v6  ;;  %v4367_v29 = vpop.permute.xlu0 %4366  ;;  %v20128_v6 = vld [vmem:[#allocation199_spill] sm:$0xff]  ;;  %vm14786_vm6 = vmand %vm1766_vm2, %vm14751_vm5 }
 0x671   : > { %20120 = vst [vmem:[#allocation276_spill] sm:$0xff] %v14763_v5  ;;  %v4552_v10 = vadd.f32 %v4504_v50, %v4264_v1  ;;  %vm20123_vm1 = vnez %v20122_v46  ;;  %vm1767_vm15 = vcmp.eq.s32.totalorder %v14739_v22, 0  ;;  %v1287_v4 = vadd.f32 0.5, %v1239_v25  ;;  %v20127_v50 = vld [vmem:[#allocation172_spill] sm:$0xff]  ;;  %v14795_v38 = vpop.f32.mrb[84].mxu1 }
 0x672   : > { %vm14771_vm11 = vmand %vm1939_vm0, %vm20123_vm1  ;;  %v1240_v17 = vcvt.s32.f32 %v20126_v39  ;;  %vm1940_vm10 = vcmp.eq.s32.totalorder %v13794_v3, 1  ;;  %v4265_v1 = vmul.f32 %v20128_v6, %v20127_v50  ;;  %v14790_v2 = vcvt.f32.s32 %v11593_v40  ;;  %20131 = vst [vmem:[#allocation171_spill] sm:$0xff] %v14795_v38  ;;  %v20132_v6 = vld [vmem:[#allocation114_spill] sm:$0xff]  ;;  %4424 = vrot.lane.b32.xlu1 %v14795_v38, %s11712_s26  ;;  %v14802_v35 = vpop.f32.mrb[85].mxu1 }
 0x673   : > { %v14792_v46 = vadd.f32 %v4600_v48, %v4552_v10  ;;  %v4505_v25 = vmul.f32 %v14763_v5, %v4367_v29  ;;  %vm2151_vm14 = vcmp.eq.s32.totalorder %v14739_v22, 2  ;;  %v1477_v42 = vmul.u32 8, %v11496_v47  ;;  %20133 = vst [vmem:[#allocation196_spill] sm:$0xff] %v14802_v35  ;;  %v20135_v29 = vld [vmem:[#allocation173_spill] sm:$0xff]  ;;  %v20136_v48 = vld [vmem:[#allocation200_spill] sm:$0xff] }
 0x674   : > { %v1673_v50 = vfloor.f32 %v14701_v20  ;;  %v1626_v11 = vmul.f32 0.0078125, %v20132_v6  ;;  %v14807_v40 = vsel %vm14771_vm11, 1.0, %v19536_v52  ;;  %v4601_v10 = vmul.f32 %v20136_v48, %v20135_v29  ;;  %v4369_v48 = vpop.permute.xlu1 %4368  ;;  %vm14836_vm11 = vmand %vm2150_vm8, %vm14751_vm5 }
 0x675   : > { %20134 = vst [vmem:[#allocation123_spill] sm:$0xff] %v14807_v40  ;;  %vm14812_vm2 = vcmp.eq.s32.totalorder %v1524_v16, %v13558_v61  ;;  %v20137_v47 = vmov 0  ;;  %v11498_v20 = vcvt.f32.s32 %v11497_v12  ;;  %v4553_v6 = vadd.f32 %v4505_v25, %v4265_v1  ;;  %v20144_v12 = vld [vmem:[#allocation174_spill] sm:$0xff]  ;;  %v20145_v1 = vld [vmem:[#allocation203_spill] sm:$0xff] }
 0x676   : > { %v20138_v47 = vsel %vm14812_vm2, 4294967295, %v20137_v47  ;;  %vm20140_vm4 = vnez %v19852_v28  ;;  %v14827_v30 = vsel %vm14786_vm6, 1.0, %v19536_v52  ;;  %v1335_v29 = vmul.f32 0.125, %v1287_v4  ;;  %v14844_v4 = vpop.f32.mrb[86].mxu1  ;;  %vm14850_vm6 = vmand %vm1767_vm15, %vm14812_vm2 }
 0x677   : > { %20139 = vst [vmem:[#allocation172_spill] sm:$0xff] %v20138_v47  ;;  %vm14820_vm0 = vmand %vm1940_vm10, %vm20140_vm4  ;;  %v1288_v16 = vadd.f32 0.5, %v1240_v17  ;;  %vm1941_vm1 = vcmp.eq.s32.totalorder %v13846_v51, 1  ;;  %v4266_v25 = vmul.f32 %v20145_v1, %v20144_v12  ;;  %vm1768_vm10 = vcmp.eq.s32.totalorder %v14790_v2, 0  ;;  %4426 = vrot.lane.b32.xlu0 %v14844_v4, %s11712_s26 }
 0x678   : > { %20143 = vst [vmem:[#allocation114_spill] sm:$0xff] %v14827_v30  ;;  %v14841_v28 = vadd.f32 %v4601_v10, %v4553_v6  ;;  %v4506_v17 = vmul.f32 %v14807_v40, %v4369_v48  ;;  %20148 = vst [vmem:[#allocation173_spill] sm:$0xff] %v14844_v4  ;;  %v1525_v12 = vsub.s32 %v20050_v37, %v1477_v42  ;;  %v11595_v1 = vtrunc.f32 %v1673_v50  ;;  %v14857_v10 = vpop.f32.mrb[87].mxu1  ;;  %v20153_v6 = vld [vmem:[#allocation175_spill] sm:$0xff]  ;;  %v20154_v40 = vld [vmem:[#allocation204_spill] sm:$0xff]  ;;  %v4371_v50 = vpop.permute.xlu0 %4370 }
 0x679   : > { %v1674_v35 = vfloor.f32 %v1626_v11  ;;  %20151 = vst [vmem:[#allocation174_spill] sm:$0xff] %v14857_v10  ;;  %v14862_v48 = vsel %vm14820_vm0, 1.0, %v19536_v52  ;;  %v4602_v38 = vmul.f32 %v20154_v40, %v20153_v6  ;;  %v1478_v34 = vmul.u32 8, %v11498_v20  ;;  %v20159_v10 = vld [vmem:[#allocation206_spill] sm:$0xff]  ;;  %v20160_v20 = vld [vmem:[#allocation176_spill] sm:$0xff]  ;;  %v14888_v37 = vpop.f32.mrb[88].mxu1 }
 0x67a   : > { %20152 = vst [vmem:[#allocation277_spill] sm:$0xff] %v14862_v48  ;;  %v4554_v30 = vadd.f32 %v4506_v17, %v4266_v25  ;;  %vm20156_vm8 = vnez %v20155_v62  ;;  %vm2152_vm4 = vcmp.eq.s32.totalorder %v14790_v2, 2  ;;  %v1383_v11 = vfloor.f32 %v1335_v29  ;;  %v20161_v25 = vld [vmem:[#allocation212_spill] sm:$0xff]  ;;  %20164 = vst [vmem:[#allocation206_spill] sm:$0xff] %v14888_v37  ;;  %4428 = vrot.lane.b32.xlu1 %v14888_v37, %s11712_s26  ;;  %v14899_v3 = vpop.f32.mrb[89].mxu1  ;;  %v20180_v4 = vld [vmem:[#allocation181_spill] sm:$0xff] }
 0x67b   : > { %vm14870_vm15 = vmand %vm1941_vm1, %vm20156_vm8  ;;  %v1336_v5 = vmul.f32 0.125, %v1288_v16  ;;  %vm1942_vm0 = vcmp.eq.s32.totalorder %v20159_v10, 1  ;;  %v4267_v17 = vmul.f32 %v20161_v25, %v20160_v20  ;;  %v14883_v51 = vsel %vm14836_vm11, 1.0, %v19536_v52  ;;  %20167 = vst [vmem:[#allocation279_spill] sm:$0xff] %v14899_v3  ;;  %v20178_v37 = vld [vmem:[#allocation116_spill] sm:$0xff] }
 0x67c   : > { %20162 = vst [vmem:[#allocation175_spill] sm:$0xff] %v14883_v51  ;;  %v14885_v62 = vadd.f32 %v4602_v38, %v4554_v30  ;;  %v4507_v6 = vmul.f32 %v14862_v48, %v4371_v50  ;;  %v14893_v29 = vsel %vm14850_vm6, 1.0, %v19536_v52  ;;  %v14895_v16 = vcvt.f32.s32 %v11595_v1  ;;  %v20169_v30 = vld [vmem:[#allocation177_spill] sm:$0xff]  ;;  %v20170_v50 = vld [vmem:[#allocation214_spill] sm:$0xff]  ;;  %v20174_v48 = vld [vmem:[#allocation211_spill] sm:$0xff] }
 0x67d   : > { %20165 = vst [vmem:[#allocation176_spill] sm:$0xff] %v14893_v29  ;;  %v11597_v40 = vtrunc.f32 %v1674_v35  ;;  %v14904_v38 = vsel %vm14870_vm15, 1.0, %v19536_v52  ;;  %v4603_v20 = vmul.f32 %v20170_v50, %v20169_v30  ;;  %vm14909_vm1 = vcmp.eq.s32.totalorder %v1525_v12, %v13558_v61  ;;  %v4373_v50 = vpop.permute.xlu1 %4372  ;;  %v20179_v12 = vld [vmem:[#allocation209_spill] sm:$0xff]  ;;  %vm14930_vm15 = vmand %vm2151_vm14, %vm14812_vm2 }
 0x67e   : > { %20163 = vst [vmem:[#allocation208_spill] sm:$0xff] %v14885_v62  ;;  %20166 = vst [vmem:[#allocation278_spill] sm:$0xff] %v14895_v16  ;;  %v20171_v57 = vmov 0  ;;  %v1526_v35 = vsub.s32 %v20068_v32, %v1478_v34  ;;  %v4555_v1 = vadd.f32 %v4507_v6, %v4267_v17  ;;  %vm20175_vm11 = vnez %v20174_v48  ;;  %v20181_v29 = vld [vmem:[#allocation217_spill] sm:$0xff] }
 0x67f   : > { %20168 = vst [vmem:[#allocation280_spill] sm:$0xff] %v14904_v38  ;;  %v20172_v57 = vsel %vm14909_vm1, 4294967295, %v20171_v57  ;;  %vm14918_vm6 = vmand %vm1942_vm0, %vm20175_vm11  ;;  %v11499_v42 = vtrunc.f32 %v1383_v11  ;;  %v1384_v3 = vfloor.f32 %v1336_v5  ;;  %v1627_v30 = vmul.f32 0.0078125, %v20178_v37  ;;  %v20184_v34 = vld [vmem:[#allocation125_spill] sm:$0xff]  ;;  %v14938_v11 = vpop.f32.mrb[90].mxu1 }
 0x680   : > { %20173 = vst [vmem:[#allocation177_spill] sm:$0xff] %v20172_v57  ;;  %vm1943_vm8 = vcmp.eq.s32.totalorder %v20179_v12, 1  ;;  %v4268_v51 = vmul.f32 %v20181_v29, %v20180_v4  ;;  %v1241_v10 = vcvt.s32.f32 %v20184_v34  ;;  %v14935_v48 = vadd.f32 %v4603_v20, %v4555_v1  ;;  %20186 = vst [vmem:[#allocation116_spill] sm:$0xff] %v14938_v11  ;;  %4430 = vrot.lane.b32.xlu0 %v14938_v11, %s11712_s26  ;;  %v14954_v17 = vpop.f32.mrb[91].mxu1  ;;  %v20193_v20 = vld [vmem:[#allocation220_spill] sm:$0xff]  ;;  %v20203_v12 = vld [vmem:[#allocation218_spill] sm:$0xff] }
 0x681   : > { %v4508_v37 = vmul.f32 %v14904_v38, %v4373_v50  ;;  %vm14944_vm0 = vmand %vm1768_vm10, %vm14909_vm1  ;;  %v14950_v5 = vcvt.f32.s32 %v11597_v40  ;;  %20190 = vst [vmem:[#allocation181_spill] sm:$0xff] %v14954_v17  ;;  %v14959_v6 = vsel %vm14918_vm6, 1.0, %v19536_v52  ;;  %v20192_v50 = vld [vmem:[#allocation182_spill] sm:$0xff]  ;;  %vm14964_vm10 = vcmp.eq.s32.totalorder %v1526_v35, %v13558_v61  ;;  %v20197_v29 = vld [vmem:[#allocation216_spill] sm:$0xff]  ;;  %v14992_v57 = vpop.f32.mrb[92].mxu1 }
 0x682   : > { %20185 = vst [vmem:[#allocation211_spill] sm:$0xff] %v14935_v48  ;;  %20191 = vst [vmem:[#allocation125_spill] sm:$0xff] %v14959_v6  ;;  %v4604_v1 = vmul.f32 %v20193_v20, %v20192_v50  ;;  %v20194_v38 = vmov 0  ;;  %vm20198_vm11 = vnez %v20197_v29  ;;  %v1675_v29 = vfloor.f32 %v1627_v30  ;;  %v4375_v50 = vpop.permute.xlu0 %4374  ;;  %v20204_v20 = vld [vmem:[#allocation186_spill] sm:$0xff]  ;;  %v20205_v11 = vld [vmem:[#allocation221_spill] sm:$0xff]  ;;  %4432 = vrot.lane.b32.xlu1 %v14992_v57, %s11712_s26  ;;  %v15015_v32 = vpop.f32.mrb[93].mxu1 }
 0x683   : > { %20189 = vst [vmem:[#allocation209_spill] sm:$0xff] %v14950_v5  ;;  %v20195_v38 = vsel %vm14964_vm10, 4294967295, %v20194_v38  ;;  %v4556_v40 = vadd.f32 %v4508_v37, %v4268_v51  ;;  %vm14972_vm14 = vmand %vm1943_vm8, %vm20198_vm11  ;;  %v11500_v51 = vcvt.f32.s32 %v11499_v42  ;;  %v11501_v37 = vtrunc.f32 %v1384_v3  ;;  %v20213_v30 = vld [vmem:[#allocation127_spill] sm:$0xff]  ;;  %v20235_v48 = vld [vmem:[#allocation85_spill] sm:$0xff] }
 0x684   : > { %20196 = vst [vmem:[#allocation182_spill] sm:$0xff] %v20195_v38  ;;  %vm14982_vm6 = vmand %vm2152_vm4, %vm14909_vm1  ;;  %vm1944_vm8 = vcmp.eq.s32.totalorder %v20203_v12, 1  ;;  %v4269_v47 = vmul.f32 %v20205_v11, %v20204_v20  ;;  %v1289_v15 = vadd.f32 0.5, %v1241_v10  ;;  %v4509_v25 = vmul.f32 %v14959_v6, %v4375_v50  ;;  %v20216_v20 = vld [vmem:[#allocation163_spill] sm:$0xff]  ;;  %v20220_v6 = vld [vmem:[#allocation224_spill] sm:$0xff] }
 0x685   : > { %v14989_v22 = vadd.f32 %v4604_v1, %v4556_v40  ;;  %20207 = vst [vmem:[#allocation218_spill] sm:$0xff] %v14992_v57  ;;  %v14997_v62 = vsel %vm14930_vm15, 1.0, %v19536_v52  ;;  %v15002_v3 = vsel %vm14944_vm0, 1.0, %v19536_v52  ;;  %vm20210_vm4 = vcmp.eq.s32.totalorder %v14895_v16, 0  ;;  %20214 = vst [vmem:[#allocation127_spill] sm:$0xff] %v15015_v32  ;;  %v20217_v1 = vld [vmem:[#allocation82_spill] sm:$0xff] }
 0x686   : > { %20208 = vst [vmem:[#allocation186_spill] sm:$0xff] %v14997_v62  ;;  %20209 = vst [vmem:[#allocation281_spill] sm:$0xff] %v15002_v3  ;;  %v1242_v10 = vcvt.s32.f32 %v20213_v30  ;;  %v15020_v4 = vsel %vm14972_vm14, 1.0, %v19536_v52  ;;  %v15024_v40 = vmul.f32 %v20217_v1, %v20216_v20  ;;  %v20219_v50 = vld [vmem:[#allocation187_spill] sm:$0xff]  ;;  %v15031_v3 = vsel %vm14982_vm6, 1.0, %v19536_v52  ;;  %v20222_v62 = vld [vmem:[#allocation225_spill] sm:$0xff] }
 0x687   : > { %20206 = vst [vmem:[#allocation216_spill] sm:$0xff] %v14989_v22  ;;  %vm15008_vm11 = vmand %vm20210_vm4, %vm14964_vm10  ;;  %v4605_v11 = vmul.f32 %v20220_v6, %v20219_v50  ;;  %v4557_v57 = vadd.f32 %v4509_v25, %v4269_v47  ;;  %vm20223_vm15 = vnez %v20222_v62  ;;  %vm20226_vm14 = vcmp.eq.s32.totalorder %v14895_v16, 2  ;;  %v4377_v47 = vpop.permute.xlu1 %4376  ;;  %v20229_v25 = vld [vmem:[#allocation223_spill] sm:$0xff]  ;;  %v20230_v62 = vld [vmem:[#allocation189_spill] sm:$0xff]  ;;  %v15056_v38 = vpop.f32.mrb[94].mxu1 }
 0x688   : > { %20215 = vst [vmem:[#allocation282_spill] sm:$0xff] %v15020_v4  ;;  %20218 = vst [vmem:[#allocation163_spill] sm:$0xff] %v15024_v40  ;;  %v1479_v35 = vmul.u32 8, %v11500_v51  ;;  %v11502_v1 = vcvt.f32.s32 %v11501_v37  ;;  %v11599_v50 = vtrunc.f32 %v1675_v29  ;;  %vm1945_vm6 = vcmp.eq.s32.totalorder %v20229_v25, 1  ;;  %v20231_v12 = vld [vmem:[#allocation227_spill] sm:$0xff]  ;;  %v20234_v16 = vld [vmem:[#allocation165_spill] sm:$0xff]  ;;  %4434 = vrot.lane.b32.xlu0 %v15056_v38, %s11712_s26  ;;  %v4379_v20 = vpop.permute.xlu0 %4378 }
 0x689   : > { %20221 = vst [vmem:[#allocation82_spill] sm:$0xff] %v15031_v3  ;;  %vm15037_vm0 = vmand %vm1944_vm8, %vm20223_vm15  ;;  %v4270_v6 = vmul.f32 %v20231_v12, %v20230_v62  ;;  %vm1770_vm8 = vcmp.eq.s32.totalorder %v14950_v5, 0  ;;  %v1337_v32 = vmul.f32 0.125, %v1289_v15  ;;  %v15053_v40 = vadd.f32 %v4605_v11, %v4557_v57  ;;  %v15070_v15 = vpop.f32.mrb[95].mxu1 }
 0x68a   : > { %vm15045_vm4 = vmand %vm20226_vm14, %vm14964_vm10  ;;  %v4510_v3 = vmul.f32 %v15020_v4, %v4377_v47  ;;  %20233 = vst [vmem:[#allocation225_spill] sm:$0xff] %v15056_v38  ;;  %v15060_v51 = vmul.f32 %v20235_v48, %v20234_v16  ;;  %v15065_v37 = vsel %vm15008_vm11, 1.0, %v19536_v52  ;;  %v1290_v29 = vadd.f32 0.5, %v1242_v10  ;;  %v20240_v16 = vld [vmem:[#allocation191_spill] sm:$0xff]  ;;  %v20241_v48 = vld [vmem:[#allocation101_spill] sm:$0xff] }
 0x68b   : > { %20232 = vst [vmem:[#allocation187_spill] sm:$0xff] %v15053_v40  ;;  %20237 = vst [vmem:[#allocation189_spill] sm:$0xff] %v15065_v37  ;;  %v15075_v57 = vsel %vm15037_vm0, 1.0, %v19536_v52  ;;  %v4606_v11 = vmul.f32 %v20241_v48, %v20240_v16  ;;  %v15082_v42 = vsel %vm15045_vm4, 1.0, %v19536_v52  ;;  %v20243_v10 = vld [vmem:[#allocation228_spill] sm:$0xff]  ;;  %v1527_v4 = vsub.s32 %v20113_v49, %v1479_v35  ;;  %v20247_v48 = vld [vmem:[#allocation118_spill] sm:$0xff] }
 0x68c   : > { %20236 = vst [vmem:[#allocation223_spill] sm:$0xff] %v15060_v51  ;;  %20238 = vst [vmem:[#allocation165_spill] sm:$0xff] %v15070_v15  ;;  %v4558_v47 = vadd.f32 %v4510_v3, %v4270_v6  ;;  %vm20244_vm11 = vnez %v20243_v10  ;;  %v1480_v16 = vmul.u32 8, %v11502_v1  ;;  %v1628_v12 = vmul.f32 0.0078125, %v20247_v48  ;;  %v20248_v15 = vld [vmem:[#allocation99_spill] sm:$0xff]  ;;  %v20249_v6 = vld [vmem:[#allocation194_spill] sm:$0xff] }
 0x68d   : > { %20239 = vst [vmem:[#allocation85_spill] sm:$0xff] %v15075_v57  ;;  %20242 = vst [vmem:[#allocation191_spill] sm:$0xff] %v15082_v42  ;;  %vm1946_vm0 = vcmp.eq.s32.totalorder %v20248_v15, 1  ;;  %v20250_v3 = vld [vmem:[#allocation102_spill] sm:$0xff]  ;;  %v1385_v38 = vfloor.f32 %v1337_v32  ;;  %v4511_v51 = vmul.f32 %v15075_v57, %v4379_v20  ;;  %v15102_v42 = vpop.f32.mrb[96].mxu1  ;;  %v15104_v37 = vcvt.f32.s32 %v11599_v50  ;;  %v20253_v49 = vld [vmem:[#allocation129_spill] sm:$0xff] }
 0x68e   : > { %vm15088_vm14 = vmand %vm1945_vm6, %vm20244_vm11  ;;  %v4271_v10 = vmul.f32 %v20250_v3, %v20249_v6  ;;  %v15099_v25 = vadd.f32 %v4606_v11, %v4558_v47  ;;  %20252 = vst [vmem:[#allocation118_spill] sm:$0xff] %v15102_v42  ;;  %v1338_v17 = vmul.f32 0.125, %v1290_v29  ;;  %v1243_v35 = vcvt.s32.f32 %v20253_v49  ;;  %4436 = vrot.lane.b32.xlu1 %v15102_v42, %s11712_s26  ;;  %v15109_v1 = vpop.f32.mrb[97].mxu1  ;;  %v20256_v48 = vld [vmem:[#allocation166_spill] sm:$0xff]  ;;  %v20257_v11 = vld [vmem:[#allocation84_spill] sm:$0xff] }
 0x68f   : > { %20254 = vst [vmem:[#allocation99_spill] sm:$0xff] %v15109_v1  ;;  %v15114_v32 = vsel %vm15088_vm14, 1.0, %v19536_v52  ;;  %v15118_v47 = vmul.f32 %v20257_v11, %v20256_v48  ;;  %v20259_v20 = vld [vmem:[#allocation167_spill] sm:$0xff]  ;;  %v20264_v42 = vld [vmem:[#allocation230_spill] sm:$0xff]  ;;  %vm15135_vm11 = vcmp.eq.s32.totalorder %v1527_v4, %v13558_v61  ;;  %v20268_v48 = vmov 0  ;;  %v15146_v1 = vpop.f32.mrb[98].mxu1 }
 0x690   : > { %20251 = vst [vmem:[#allocation228_spill] sm:$0xff] %v15099_v25  ;;  %20255 = vst [vmem:[#allocation194_spill] sm:$0xff] %v15114_v32  ;;  %v20260_v50 = vld [vmem:[#allocation83_spill] sm:$0xff]  ;;  %v4559_v22 = vadd.f32 %v4511_v51, %v4271_v10  ;;  %vm20265_vm4 = vnez %v20264_v42  ;;  %v20269_v48 = vsel %vm15135_vm11, 4294967295, %v20268_v48  ;;  %v1528_v11 = vsub.s32 %v20126_v39, %v1480_v16  ;;  %v20271_v51 = vld [vmem:[#allocation198_spill] sm:$0xff]  ;;  %4438 = vrot.lane.b32.xlu0 %v15146_v1, %s11712_s26  ;;  %v15151_v39 = vpop.f32.mrb[99].mxu1 }
 0x691   : > { %20258 = vst [vmem:[#allocation129_spill] sm:$0xff] %v15118_v47  ;;  %v15122_v6 = vmul.f32 %v20260_v50, %v20259_v20  ;;  %v20262_v29 = vld [vmem:[#allocation195_spill] sm:$0xff]  ;;  %vm15130_vm6 = vmand %vm1946_vm0, %vm20265_vm4  ;;  %v1676_v20 = vfloor.f32 %v1628_v12  ;;  %v4381_v50 = vpop.permute.xlu1 %4380  ;;  %vm1947_vm14 = vcmp.eq.s32.totalorder %v14081_v56, 1  ;;  %v20272_v10 = vld [vmem:[#allocation232_spill] sm:$0xff]  ;;  %v1386_v4 = vfloor.f32 %v1338_v17 }
 0x692   : > { %v20263_v57 = vld [vmem:[#allocation231_spill] sm:$0xff]  ;;  %20270 = vst [vmem:[#allocation84_spill] sm:$0xff] %v20269_v48  ;;  %v4272_v42 = vmul.f32 %v20272_v10, %v20271_v51  ;;  %20274 = vst [vmem:[#allocation83_spill] sm:$0xff] %v15146_v1  ;;  %v1291_v47 = vadd.f32 0.5, %v1243_v35  ;;  %v15156_v12 = vsel %vm15130_vm6, 1.0, %v19536_v52  ;;  %vm15180_vm15 = vcmp.eq.s32.totalorder %v1528_v11, %v13558_v61  ;;  %v20297_v25 = vld [vmem:[#allocation130_spill] sm:$0xff] }
 0x693   : > { %20261 = vst [vmem:[#allocation166_spill] sm:$0xff] %v15122_v6  ;;  %v4607_v3 = vmul.f32 %v20263_v57, %v20262_v29  ;;  %v11503_v29 = vtrunc.f32 %v1385_v38  ;;  %v4512_v57 = vmul.f32 %v15114_v32, %v4381_v50  ;;  %20275 = vst [vmem:[#allocation195_spill] sm:$0xff] %v15151_v39  ;;  %v20278_v38 = vld [vmem:[#allocation233_spill] sm:$0xff]  ;;  %v20280_v32 = vld [vmem:[#allocation234_spill] sm:$0xff]  ;;  %v11601_v56 = vtrunc.f32 %v1676_v20  ;;  %v15199_v20 = vpop.f32.mrb[100].mxu1 }
 0x694   : > { %20276 = vst [vmem:[#allocation230_spill] sm:$0xff] %v15156_v12  ;;  %vm20281_vm4 = vnez %v20280_v32  ;;  %vm15175_vm6 = vmand %vm1770_vm8, %vm15135_vm11  ;;  %v4383_v32 = vpop.permute.xlu0 %4382  ;;  %vm20292_vm8 = vcmp.eq.s32.totalorder %v14950_v5, 2  ;;  %v11505_v1 = vtrunc.f32 %v1386_v4  ;;  %v1339_v6 = vmul.f32 0.125, %v1291_v47  ;;  %4440 = vrot.lane.b32.xlu1 %v15199_v20, %s11712_s26 }
 0x695   : > { %v15143_v15 = vadd.f32 %v4607_v3, %v4559_v22  ;;  %v20277_v22 = vld [vmem:[#allocation201_spill] sm:$0xff]  ;;  %v20279_v3 = vld [vmem:[#allocation120_spill] sm:$0xff]  ;;  %v4560_v51 = vadd.f32 %v4512_v57, %v4272_v42  ;;  %vm15165_vm0 = vmand %vm1947_vm14, %vm20281_vm4  ;;  %v20286_v57 = vmov 0  ;;  %v11504_v11 = vcvt.f32.s32 %v11503_v29  ;;  %v4385_v62 = vpop.permute.xlu1 %4384 }
 0x696   : > { %v4608_v16 = vmul.f32 %v20278_v38, %v20277_v22  ;;  %v1629_v50 = vmul.f32 0.0078125, %v20279_v3  ;;  %v20287_v57 = vsel %vm15180_vm15, 4294967295, %v20286_v57  ;;  %v20289_v42 = vld [vmem:[#allocation38_spill] sm:$0xff]  ;;  %v20291_v3 = vld [vmem:[#allocation237_spill] sm:$0xff]  ;;  %vm15192_vm10 = vmand %vm20292_vm8, %vm15135_vm11  ;;  %v4513_v39 = vmul.f32 %v15156_v12, %v4383_v32  ;;  %20296 = vst [vmem:[#allocation120_spill] sm:$0xff] %v15199_v20 }
 0x697   : > { %20273 = vst [vmem:[#allocation167_spill] sm:$0xff] %v15143_v15  ;;  %20288 = vst [vmem:[#allocation198_spill] sm:$0xff] %v20287_v57  ;;  %vm1948_vm4 = vcmp.eq.s32.totalorder %v20289_v42, 1  ;;  %v20290_v22 = vld [vmem:[#allocation202_spill] sm:$0xff]  ;;  %v1244_v15 = vcvt.s32.f32 %v20297_v25  ;;  %v20300_v29 = vld [vmem:[#allocation205_spill] sm:$0xff]  ;;  %v15216_v4 = vsel %vm15175_vm6, 1.0, %v19536_v52  ;;  %v11506_v48 = vcvt.f32.s32 %v11505_v1 }
 0x698   : > { %v4273_v35 = vmul.f32 %v20291_v3, %v20290_v22  ;;  %v15196_v10 = vadd.f32 %v4608_v16, %v4560_v51  ;;  %v15204_v22 = vpop.f32.mrb[101].mxu1  ;;  %v15209_v3 = vsel %vm15165_vm0, 1.0, %v19536_v52  ;;  %v20301_v16 = vld [vmem:[#allocation238_spill] sm:$0xff]  ;;  %20302 = vst [vmem:[#allocation202_spill] sm:$0xff] %v15216_v4  ;;  %v1677_v47 = vfloor.f32 %v1629_v50  ;;  %v20303_v12 = vld [vmem:[#allocation17_spill] sm:$0xff]  ;;  %v20312_v42 = vld [vmem:[#allocation95_spill] sm:$0xff] }
 0x699   : > { %20298 = vst [vmem:[#allocation234_spill] sm:$0xff] %v15204_v22  ;;  %20299 = vst [vmem:[#allocation38_spill] sm:$0xff] %v15209_v3  ;;  %v4609_v51 = vmul.f32 %v20301_v16, %v20300_v29  ;;  %vm20304_vm8 = vnez %v20303_v12  ;;  %v15229_v17 = vsel %vm15192_vm10, 1.0, %v19536_v52  ;;  %vm20308_vm0 = vcmp.eq.s32.totalorder %v15104_v37, 0  ;;  %v20311_v12 = vld [vmem:[#allocation121_spill] sm:$0xff]  ;;  %v20313_v29 = vld [vmem:[#allocation207_spill] sm:$0xff] }
 0x69a   : > { %20295 = vst [vmem:[#allocation201_spill] sm:$0xff] %v15196_v10  ;;  %v4561_v32 = vadd.f32 %v4513_v39, %v4273_v35  ;;  %vm15222_vm14 = vmand %vm1948_vm4, %vm20304_vm8  ;;  %v15239_v39 = vcvt.f32.s32 %v11601_v56  ;;  %v1630_v35 = vmul.f32 0.0078125, %v20311_v12  ;;  %vm1949_vm4 = vcmp.eq.s32.totalorder %v20312_v42, 1  ;;  %v20314_v16 = vld [vmem:[#allocation240_spill] sm:$0xff]  ;;  %v15256_v12 = vpop.f32.mrb[102].mxu1  ;;  %v20329_v42 = vld [vmem:[#allocation213_spill] sm:$0xff] }
 0x69b   : > { %20307 = vst [vmem:[#allocation130_spill] sm:$0xff] %v15229_v17  ;;  %vm15235_vm6 = vmand %vm20308_vm0, %vm15180_vm15  ;;  %v4274_v38 = vmul.f32 %v20314_v16, %v20313_v29  ;;  %vm20315_vm10 = vcmp.eq.s32.totalorder %v15104_v37, 2  ;;  %v1481_v17 = vmul.u32 8, %v11504_v11  ;;  %v4514_v56 = vmul.f32 %v15209_v3, %v4385_v62  ;;  %4442 = vrot.lane.b32.xlu0 %v15256_v12, %s11712_s26  ;;  %v15260_v29 = vpop.f32.mrb[103].mxu1  ;;  %v20321_v11 = vld [vmem:[#allocation210_spill] sm:$0xff] }
 0x69c   : > { %vm15249_vm8 = vmand %vm20315_vm10, %vm15180_vm15  ;;  %v15253_v4 = vadd.f32 %v4609_v51, %v4561_v32  ;;  %20318 = vst [vmem:[#allocation205_spill] sm:$0xff] %v15256_v12  ;;  %v1387_v40 = vfloor.f32 %v1339_v6  ;;  %v1292_v5 = vadd.f32 0.5, %v1244_v15  ;;  %v15265_v16 = vsel %vm15222_vm14, 1.0, %v19536_v52  ;;  %v20322_v51 = vld [vmem:[#allocation243_spill] sm:$0xff]  ;;  %v20323_v3 = vld [vmem:[#allocation242_spill] sm:$0xff] }
 0x69d   : > { %20319 = vst [vmem:[#allocation17_spill] sm:$0xff] %v15260_v29  ;;  %20320 = vst [vmem:[#allocation121_spill] sm:$0xff] %v15265_v16  ;;  %v4610_v32 = vmul.f32 %v20322_v51, %v20321_v11  ;;  %v11603_v57 = vtrunc.f32 %v1677_v47  ;;  %v4562_v62 = vadd.f32 %v4514_v56, %v4274_v38  ;;  %vm20324_vm0 = vnez %v20323_v3  ;;  %v4387_v47 = vpop.permute.xlu0 %4386  ;;  %v20330_v38 = vld [vmem:[#allocation111_spill] sm:$0xff]  ;;  %v15296_v51 = vpop.f32.mrb[104].mxu1  ;;  %v20340_v1 = vld [vmem:[#allocation122_spill] sm:$0xff] }
 0x69e   : > { %vm15273_vm10 = vmand %vm1949_vm4, %vm20324_vm0  ;;  %v15282_v15 = vsel %vm15235_vm6, 1.0, %v19536_v52  ;;  %v15287_v22 = vsel %vm15249_vm8, 1.0, %v19536_v52  ;;  %v1678_v3 = vfloor.f32 %v1630_v35  ;;  %vm1950_vm14 = vcmp.eq.s32.totalorder %v14199_v8, 1  ;;  %20332 = vst [vmem:[#allocation242_spill] sm:$0xff] %v15296_v51  ;;  %4444 = vrot.lane.b32.xlu1 %v15296_v51, %s11712_s26  ;;  %v15300_v35 = vpop.f32.mrb[105].mxu1 }
 0x69f   : > { %20327 = vst [vmem:[#allocation95_spill] sm:$0xff] %v15282_v15  ;;  %20328 = vst [vmem:[#allocation207_spill] sm:$0xff] %v15287_v22  ;;  %v4275_v56 = vmul.f32 %v20330_v38, %v20329_v42  ;;  %v1529_v11 = vsub.s32 %v20184_v34, %v1481_v17  ;;  %v15293_v6 = vadd.f32 %v4610_v32, %v4562_v62  ;;  %v1482_v29 = vmul.u32 8, %v11506_v48  ;;  %v20335_v34 = vld [vmem:[#allocation215_spill] sm:$0xff]  ;;  %v20336_v17 = vld [vmem:[#allocation245_spill] sm:$0xff] }
 0x6a0   : > { %v4515_v50 = vmul.f32 %v15265_v16, %v4387_v47  ;;  %v11507_v12 = vtrunc.f32 %v1387_v40  ;;  %v1340_v20 = vmul.f32 0.125, %v1292_v5  ;;  %20333 = vst [vmem:[#allocation213_spill] sm:$0xff] %v15300_v35  ;;  %v15305_v42 = vsel %vm15273_vm10, 1.0, %v19536_v52  ;;  %v20341_v16 = vld [vmem:[#allocation132_spill] sm:$0xff]  ;;  %v4389_v35 = vpop.permute.xlu1 %4388 }
 0x6a1   : > { %20331 = vst [vmem:[#allocation210_spill] sm:$0xff] %v15293_v6  ;;  %20334 = vst [vmem:[#allocation283_spill] sm:$0xff] %v15305_v42  ;;  %v4611_v32 = vmul.f32 %v20336_v17, %v20335_v34  ;;  %v15310_v62 = vcvt.f32.s32 %v11603_v57  ;;  %vm20337_vm4 = vnez %v19983_v23  ;;  %v11605_v40 = vtrunc.f32 %v1678_v3  ;;  %v20342_v34 = vld [vmem:[#allocation219_spill] sm:$0xff]  ;;  %v20343_v57 = vld [vmem:[#allocation246_spill] sm:$0xff]  ;;  %v15333_v3 = vpop.f32.mrb[106].mxu1  ;;  %v4391_v5 = vpop.permute.xlu0 %4390 }
 0x6a2   : > { %v4563_v48 = vadd.f32 %v4515_v50, %v4275_v56  ;;  %vm15316_vm8 = vmand %vm1950_vm14, %vm20337_vm4  ;;  %v1631_v47 = vmul.f32 0.0078125, %v20340_v1  ;;  %v1245_v38 = vcvt.s32.f32 %v20341_v16  ;;  %vm1951_vm0 = vcmp.eq.s32.totalorder %v14269_v33, 1  ;;  %20347 = vst [vmem:[#allocation122_spill] sm:$0xff] %v15333_v3  ;;  %4446 = vrot.lane.b32.xlu0 %v15333_v3, %s11712_s26  ;;  %v15338_v10 = vpop.f32.mrb[107].mxu1 }
 0x6a3   : > { %v4276_v17 = vmul.f32 %v20343_v57, %v20342_v34  ;;  %vm15326_vm10 = vcmp.eq.s32.totalorder %v1529_v11, %v13558_v61  ;;  %v20344_v23 = vmov 0  ;;  %v4516_v56 = vmul.f32 %v15305_v42, %v4389_v35  ;;  %20348 = vst [vmem:[#allocation132_spill] sm:$0xff] %v15338_v10 }
 0x6a4   : > { %v20345_v23 = vsel %vm15326_vm10, 4294967295, %v20344_v23  ;;  %v15330_v8 = vadd.f32 %v4611_v32, %v4563_v48  ;;  %v1530_v50 = vsub.s32 %v20213_v30, %v1482_v29  ;;  %v11508_v1 = vcvt.f32.s32 %v11507_v12  ;;  %v20350_v32 = vld [vmem:[#allocation222_spill] sm:$0xff]  ;;  %v20351_v48 = vld [vmem:[#allocation247_spill] sm:$0xff]  ;;  %v15373_v12 = vpop.f32.mrb[108].mxu1 }
 0x6a5   : > { %v1388_v51 = vfloor.f32 %v1340_v20  ;;  %v15343_v11 = vsel %vm15316_vm8, 1.0, %v19536_v52  ;;  %v4612_v34 = vmul.f32 %v20351_v48, %v20350_v32  ;;  %v4564_v35 = vadd.f32 %v4516_v56, %v4276_v17  ;;  %v20355_v17 = vld [vmem:[#allocation226_spill] sm:$0xff]  ;;  %20359 = vst [vmem:[#allocation222_spill] sm:$0xff] %v15373_v12  ;;  %4448 = vrot.lane.b32.xlu1 %v15373_v12, %s11712_s26  ;;  %v4393_v12 = vpop.permute.xlu1 %4392 }
 0x6a6   : > { %20346 = vst [vmem:[#allocation215_spill] sm:$0xff] %v15330_v8  ;;  %20349 = vst [vmem:[#allocation219_spill] sm:$0xff] %v15343_v11  ;;  %vm20352_vm4 = vnez %v19994_v26  ;;  %v15359_v29 = vcvt.f32.s32 %v11605_v40  ;;  %v1293_v20 = vadd.f32 0.5, %v1245_v38  ;;  %v4277_v26 = vmul.f32 %v14325_v14, %v20355_v17  ;;  %v20395_v8 = vld [vmem:[#allocation126_spill] sm:$0xff] }
 0x6a7   : > { %vm15352_vm6 = vmand %vm1951_vm0, %vm20352_vm4  ;;  %vm20356_vm0 = vcmp.eq.s32.totalorder %v15239_v39, 0  ;;  %v1679_v56 = vfloor.f32 %v1631_v47  ;;  %v4660_v32 = vadd.f32 %v4612_v34, %v4564_v35  ;;  %v4517_v40 = vmul.f32 %v15343_v11, %v4391_v5  ;;  %v15390_v34 = vpop.f32.mrb[109].mxu1  ;;  %v20367_v5 = vld [vmem:[#allocation92_spill] sm:$0xff]  ;;  %v20368_v11 = vld [vmem:[#allocation253_spill] sm:$0xff] }
 0x6a8   : > { %vm15368_vm4 = vmand %vm20356_vm0, %vm15326_vm10  ;;  %vm20360_vm8 = vcmp.eq.s32.totalorder %v15239_v39, 2  ;;  %vm15384_vm15 = vcmp.eq.s32.totalorder %v1530_v50, %v13558_v61  ;;  %v1483_v14 = vmul.u32 8, %v11508_v1  ;;  %v11509_v47 = vtrunc.f32 %v1388_v51  ;;  %20365 = vst [vmem:[#allocation226_spill] sm:$0xff] %v15390_v34  ;;  %v20369_v50 = vld [vmem:[#allocation48_spill] sm:$0xff] }
 0x6a9   : > { %vm15379_vm14 = vmand %vm20360_vm8, %vm15326_vm10  ;;  %v15395_v35 = vsel %vm15352_vm6, 1.0, %v19536_v52  ;;  %v4613_v48 = vmul.f32 %v20368_v11, %v20367_v5  ;;  %vm2157_vm8 = vcmp.eq.s32.totalorder %v15310_v62, 2  ;;  %v1246_v42 = vcvt.s32.f32 %v20369_v50  ;;  %v20375_v5 = vld [vmem:[#allocation124_spill] sm:$0xff] }
 0x6aa   : > { %20366 = vst [vmem:[#allocation284_spill] sm:$0xff] %v15395_v35  ;;  %v4565_v57 = vadd.f32 %v4517_v40, %v4277_v26  ;;  %vm20371_vm0 = vcmp.eq.s32.totalorder %v14293_v24, 1  ;;  %v15412_v30 = vsel %vm15368_vm4, 1.0, %v19536_v52  ;;  %v1341_v34 = vmul.f32 0.125, %v1293_v20  ;;  %v20376_v26 = vld [vmem:[#allocation93_spill] sm:$0xff] }
 0x6ab   : > { %vm15405_vm10 = vmand %vm20371_vm0, %vm14339_vm3  ;;  %20374 = vst [vmem:[#allocation92_spill] sm:$0xff] %v15412_v30  ;;  %v1632_v11 = vmul.f32 0.0078125, %v20375_v5  ;;  %vm1953_vm6 = vcmp.eq.s32.totalorder %v14315_v63, 1  ;;  %v4278_v40 = vmul.f32 %v14420_v9, %v20376_v26  ;;  %v15421_v24 = vsel %vm15379_vm14, 1.0, %v19536_v52  ;;  %v15433_v5 = vpop.f32.mrb[110].mxu1  ;;  %v4395_v63 = vpop.permute.xlu0 %4394 }
 0x6ac   : > { %20377 = vst [vmem:[#allocation48_spill] sm:$0xff] %v15421_v24  ;;  %vm20378_vm3 = vcmp.eq.s32.totalorder %v15310_v62, 0  ;;  %vm1774_vm0 = vcmp.eq.s32.totalorder %v15359_v29, 0  ;;  %v4661_v20 = vadd.f32 %v4613_v48, %v4565_v57  ;;  %v4518_v1 = vmul.f32 %v15395_v35, %v4393_v12  ;;  %20381 = vst [vmem:[#allocation250_spill] sm:$0xff] %v15433_v5  ;;  %4450 = vrot.lane.b32.xlu0 %v15433_v5, %s11712_s26  ;;  %v15439_v10 = vpop.f32.mrb[111].mxu1  ;;  %v20383_v57 = vld [vmem:[#allocation229_spill] sm:$0xff] }
 0x6ad   : > { %vm15427_vm4 = vmand %vm20378_vm3, %vm15384_vm15  ;;  %v1531_v26 = vsub.s32 %v20253_v49, %v1483_v14  ;;  %v11510_v38 = vcvt.f32.s32 %v11509_v47  ;;  %v11607_v9 = vtrunc.f32 %v1679_v56  ;;  %20382 = vst [vmem:[#allocation124_spill] sm:$0xff] %v15439_v10  ;;  %v15444_v3 = vsel %vm15405_vm10, 1.0, %v19536_v52  ;;  %v20384_v49 = vld [vmem:[#allocation252_spill] sm:$0xff]  ;;  %v4397_v56 = vpop.permute.xlu1 %4396 }
 0x6ae   : > { %v4614_v48 = vmul.f32 %v14438_v53, %v20383_v57  ;;  %v1294_v12 = vadd.f32 0.5, %v1246_v42  ;;  %v4566_v35 = vadd.f32 %v4518_v1, %v4278_v40  ;;  %v10838_v14 = vpack.c.bf16 %v4661_v20, %v4660_v32  ;;  %vm15465_vm10 = vmand %vm2157_vm8, %vm15384_vm15  ;;  %v20391_v40 = vld [vmem:[#allocation249_spill] sm:$0xff]  ;;  %v20392_v20 = vld [vmem:[#allocation94_spill] sm:$0xff] }
 0x6af   : > { %vm20385_vm3 = vnez %v20384_v49  ;;  %v15459_v47 = vsel %vm15427_vm4, 1.0, %v19536_v52  ;;  %v1389_v32 = vfloor.f32 %v1341_v34  ;;  %v1680_v51 = vfloor.f32 %v1632_v11  ;;  %v20393_v1 = vld [vmem:[#allocation258_spill] sm:$0xff]  ;;  %v20394_v49 = vld [vmem:[#allocation49_spill] sm:$0xff]  ;;  %v20404_v42 = vld [vmem:[#allocation235_spill] sm:$0xff] }
 0x6b0   : > { %vm15452_vm14 = vmand %vm1953_vm6, %vm20385_vm3  ;;  %20388 = vst [vmem:[#allocation93_spill] sm:$0xff] %v15459_v47  ;;  %vm1954_vm6 = vcmp.eq.s32.totalorder %v20391_v40, 1  ;;  %v4279_v57 = vmul.f32 %v20393_v1, %v20392_v20  ;;  %v1247_v33 = vcvt.s32.f32 %v20394_v49  ;;  %v4662_v53 = vadd.f32 %v4614_v48, %v4566_v35  ;;  %10839 = vmatprep.subr.bf16.mxu0 %v10838_v14  ;;  %v20398_v20 = vld [vmem:[#allocation104_spill] sm:$0xff]  ;;  %v20399_v1 = vld [vmem:[#allocation259_spill] sm:$0xff] }
 0x6b1   : > { %v4519_v10 = vmul.f32 %v15444_v3, %v4395_v63  ;;  %v1484_v5 = vmul.u32 8, %v11510_v38  ;;  %v15474_v6 = vcvt.f32.s32 %v11607_v9  ;;  %v1633_v47 = vmul.f32 0.0078125, %v20395_v8  ;;  %vm2002_vm8 = vmand %vm1954_vm6, %vm14410_vm7 }
 0x6b2   : > { %v20396_v11 = vpack.c.bf16 %v14654_v58, %v14611_v21  ;;  %v15483_v34 = vsel %vm15452_vm14, 1.0, %v19536_v52  ;;  %v4615_v35 = vmul.f32 %v20399_v1, %v20398_v20  ;;  %v15490_v38 = vsel %vm15465_vm10, 1.0, %v19536_v52 }
 0x6b3   : > { %20397 = vst [vmem:[#allocation229_spill] sm:$0xff] %v15483_v34  ;;  %20400 = vst [vmem:[#allocation252_spill] sm:$0xff] %v15490_v38  ;;  %v1342_v9 = vmul.f32 0.125, %v1294_v12  ;;  %v4567_v48 = vadd.f32 %v4519_v10, %v4279_v57  ;;  %vm15497_vm4 = vcmp.eq.s32.totalorder %v1531_v26, %v13558_v61  ;;  %v11511_v58 = vtrunc.f32 %v1389_v32  ;;  %v20406_v32 = vld [vmem:[#allocation236_spill] sm:$0xff] }
 0x6b4   : > { %10841 = vmatpush3.bf16.msra.mxu0 %v20396_v11  ;;  %v11609_v14 = vtrunc.f32 %v1680_v51  ;;  %vm1955_vm14 = vcmp.eq.s32.totalorder %v14397_v59, 1  ;;  %v4280_v63 = vmul.f32 %v14502_v31, %v20404_v42  ;;  %v1295_v12 = vadd.f32 0.5, %v1247_v33  ;;  %vm15522_vm10 = vmand %vm1774_vm0, %vm15497_vm4 }
 0x6b5   : > { %v4663_v10 = vadd.f32 %v4615_v35, %v4567_v48  ;;  %v4520_v57 = vmul.f32 %v15483_v34, %v4397_v56  ;;  %v1532_v40 = vsub.s32 %v20297_v25, %v1484_v5  ;;  %vm1775_vm7 = vcmp.eq.s32.totalorder %v15474_v6, 0  ;;  %vm15514_vm3 = vmand %vm1955_vm14, %vm14480_vm9  ;;  %v20412_v35 = vld [vmem:[#allocation263_spill] sm:$0xff] }
 0x6b6   : > { %v1681_v26 = vfloor.f32 %v1633_v47  ;;  %v15508_v11 = vsel %vm2002_vm8, 1.0, %v19536_v52  ;;  %v4616_v51 = vmul.f32 %v14507_v19, %v20406_v32  ;;  %v1390_v20 = vfloor.f32 %v1342_v9 }
 0x6b7   : > { %20405 = vst [vmem:[#allocation249_spill] sm:$0xff] %v15508_v11  ;;  %v4568_v59 = vadd.f32 %v4520_v57, %v4280_v63  ;;  %v10842_v8 = vpack.c.bf16 %v4663_v10, %v4662_v53  ;;  %vm2159_vm6 = vcmp.eq.s32.totalorder %v15474_v6, 2  ;;  %v11512_v5 = vcvt.f32.s32 %v11511_v58  ;;  %v4399_v53 = vpop.permute.xlu0 %4398  ;;  %v20418_v10 = vld [vmem:[#allocation139_spill] sm:$0xff] }
 0x6b8   : > { %v15527_v47 = vcvt.f32.s32 %v11609_v14  ;;  %vm1956_vm8 = vcmp.eq.s32.totalorder %v14450_v13, 1  ;;  %v4281_v9 = vmul.f32 %v20412_v35, %v20411_v55  ;;  %vm20413_vm9 = vcmp.eq.s32.totalorder %v15359_v29, 2  ;;  %v20427_v55 = vld [vmem:[#allocation128_spill] sm:$0xff]  ;;  %v20495_v35 = vld [vmem:[#allocation82_spill] sm:$0xff]  ;;  %v20562_v14 = vld [vmem:[#allocation27_spill] sm:$0xff] }
 0x6b9   : > { %vm15536_vm14 = vmand %vm20413_vm9, %vm15497_vm4  ;;  %v1343_v56 = vmul.f32 0.125, %v1295_v12  ;;  %v4664_v42 = vadd.f32 %v4616_v51, %v4568_v59  ;;  %v4521_v58 = vmul.f32 %v15508_v11, %v4399_v53  ;;  %10843 = vmatprep.subr.bf16.mxu0 %v10842_v8  ;;  %vm15542_vm0 = vcmp.eq.s32.totalorder %v1532_v40, %v13558_v61  ;;  %v20421_v51 = vld [vmem:[#allocation39_spill] sm:$0xff]  ;;  %v20422_v59 = vld [vmem:[#allocation264_spill] sm:$0xff] }
 0x6ba   : > { %v11611_v63 = vtrunc.f32 %v1681_v26  ;;  %v1248_v57 = vcvt.s32.f32 %v20418_v10  ;;  %v20419_v32 = vpack.c.bf16 %v14745_v45, %v14703_v18  ;;  %v15553_v12 = vsel %vm15514_vm3, 1.0, %v19536_v52  ;;  %vm15566_vm9 = vmand %vm1956_vm8, %vm14549_vm12  ;;  %v20457_v11 = vld [vmem:[#allocation100_spill] sm:$0xff] }
 0x6bb   : > { %20420 = vst [vmem:[#allocation94_spill] sm:$0xff] %v15553_v12  ;;  %v4617_v8 = vmul.f32 %v20422_v59, %v20421_v51  ;;  %v15560_v40 = vsel %vm15522_vm10, 1.0, %v19536_v52  ;;  %v11513_v26 = vtrunc.f32 %v1390_v20  ;;  %v4569_v53 = vadd.f32 %v4521_v58, %v4281_v9  ;;  %v20428_v20 = vld [vmem:[#allocation241_spill] sm:$0xff]  ;;  %vm15583_vm12 = vmand %vm1775_vm7, %vm15542_vm0 }
 0x6bc   : > { %10845 = vmatpush3.bf16.msra.mxu0 %v20419_v32  ;;  %20423 = vst [vmem:[#allocation49_spill] sm:$0xff] %v15560_v40  ;;  %v15573_v45 = vsel %vm15536_vm14, 1.0, %v19536_v52  ;;  %v1485_v33 = vmul.u32 8, %v11512_v5  ;;  %v1634_v25 = vmul.f32 0.0078125, %v20427_v55  ;;  %v4401_v32 = vpop.permute.xlu1 %4400  ;;  %vm1957_vm3 = vcmp.eq.s32.totalorder %v14485_v41, 1  ;;  %vm15593_vm8 = vmand %vm2159_vm6, %vm15542_vm0 }
 0x6bd   : > { %20426 = vst [vmem:[#allocation126_spill] sm:$0xff] %v15573_v45  ;;  %v4282_v44 = vmul.f32 %v14582_v54, %v20428_v20  ;;  %vm1776_vm10 = vcmp.eq.s32.totalorder %v15527_v47, 0  ;;  %v1391_v9 = vfloor.f32 %v1343_v56  ;;  %v4665_v5 = vadd.f32 %v4617_v8, %v4569_v53  ;;  %v20434_v8 = vld [vmem:[#allocation96_spill] sm:$0xff]  ;;  %vm2005_vm7 = vmand %vm1957_vm3, %vm14650_vm13  ;;  %v4403_v54 = vpop.permute.xlu0 %4402 }
 0x6be   : > { %v4522_v48 = vmul.f32 %v15553_v12, %v4401_v32  ;;  %vm2160_vm14 = vcmp.eq.s32.totalorder %v15527_v47, 2  ;;  %v15598_v51 = vcvt.f32.s32 %v11611_v63  ;;  %v1296_v55 = vadd.f32 0.5, %v1248_v57 }
 0x6bf   : > { %v15603_v56 = vsel %vm15566_vm9, 1.0, %v19536_v52  ;;  %v4618_v53 = vmul.f32 %v14587_v60, %v20434_v8  ;;  %v11514_v32 = vcvt.f32.s32 %v11513_v26  ;;  %v10846_v12 = vpack.c.bf16 %v4665_v5, %v4664_v42  ;;  %v20436_v8 = vld [vmem:[#allocation97_spill] sm:$0xff] }
 0x6c0   : > { %20433 = vst [vmem:[#allocation104_spill] sm:$0xff] %v15603_v56  ;;  %v4570_v20 = vadd.f32 %v4522_v48, %v4282_v44  ;;  %v15614_v63 = vsel %vm15583_vm12, 1.0, %v19536_v52  ;;  %v1533_v57 = vsub.s32 %v20341_v16, %v1485_v33  ;;  %v1682_v18 = vfloor.f32 %v1634_v25  ;;  %v20438_v5 = vld [vmem:[#allocation141_spill] sm:$0xff] }
 0x6c1   : > { %20435 = vst [vmem:[#allocation259_spill] sm:$0xff] %v15614_v63  ;;  %vm1958_vm6 = vcmp.eq.s32.totalorder %v14597_v0, 1  ;;  %v4283_v26 = vmul.f32 %v14638_v27, %v20436_v8  ;;  %v11515_v42 = vtrunc.f32 %v1391_v9  ;;  %v4523_v36 = vmul.f32 %v15603_v56, %v4403_v54  ;;  %10847 = vmatprep.subr.bf16.mxu0 %v10846_v12  ;;  %v20441_v9 = vld [vmem:[#allocation244_spill] sm:$0xff]  ;;  %v20447_v8 = vld [vmem:[#allocation169_spill] sm:$0xff]  ;;  %v20451_v27 = vld [vmem:[#allocation190_spill] sm:$0xff] }
 0x6c2   : > { %v4666_v44 = vadd.f32 %v4618_v53, %v4570_v20  ;;  %v15624_v41 = vsel %vm15593_vm8, 1.0, %v19536_v52  ;;  %v1344_v13 = vmul.f32 0.125, %v1296_v55  ;;  %v1249_v16 = vcvt.s32.f32 %v20438_v5  ;;  %vm2006_vm9 = vmand %vm1958_vm6, %vm14751_vm5  ;;  %v4405_v53 = vpop.permute.xlu1 %4404  ;;  %v20445_v20 = vld [vmem:[#allocation275_spill] sm:$0xff] }
 0x6c3   : > { %20437 = vst [vmem:[#allocation105_spill] sm:$0xff] %v15624_v41  ;;  %v20439_v33 = vpack.c.bf16 %v14841_v28, %v14792_v46  ;;  %v15631_v25 = vsel %vm2005_vm7, 1.0, %v19536_v52  ;;  %v4619_v48 = vmul.f32 %v14643_v43, %v20441_v9  ;;  %v1486_v54 = vmul.u32 8, %v11514_v32  ;;  %v20444_v28 = vld [vmem:[#allocation131_spill] sm:$0xff]  ;;  %v20446_v32 = vld [vmem:[#allocation98_spill] sm:$0xff] }
 0x6c4   : > { %20440 = vst [vmem:[#allocation235_spill] sm:$0xff] %v15631_v25  ;;  %vm1777_vm13 = vcmp.eq.s32.totalorder %v15598_v51, 0  ;;  %v4571_v12 = vadd.f32 %v4523_v36, %v4283_v26  ;;  %vm15641_vm3 = vcmp.eq.s32.totalorder %v1533_v57, %v13558_v61  ;;  %v11613_v46 = vtrunc.f32 %v1682_v18  ;;  %v20448_v43 = vld [vmem:[#allocation143_spill] sm:$0xff]  ;;  %v20450_v18 = vld [vmem:[#allocation248_spill] sm:$0xff] }
 0x6c5   : > { %10849 = vmatpush3.bf16.msra.mxu0 %v20439_v33  ;;  %v1635_v55 = vmul.f32 0.0078125, %v20444_v28  ;;  %vm1959_vm12 = vcmp.eq.s32.totalorder %v20445_v20, 1  ;;  %v4284_v33 = vmul.f32 %v20447_v8, %v20446_v32  ;;  %v11516_v26 = vcvt.f32.s32 %v11515_v42  ;;  %vm15667_vm8 = vmand %vm1776_vm10, %vm15641_vm3  ;;  %v20474_v42 = vld [vmem:[#allocation176_spill] sm:$0xff] }
 0x6c6   : > { %v4667_v36 = vadd.f32 %v4619_v48, %v4571_v12  ;;  %v4524_v7 = vmul.f32 %v15631_v25, %v4405_v53  ;;  %v1392_v0 = vfloor.f32 %v1344_v13  ;;  %v1297_v9 = vadd.f32 0.5, %v1249_v16  ;;  %vm15659_vm5 = vmand %vm1959_vm12, %vm14812_vm2  ;;  %v20458_v48 = vld [vmem:[#allocation114_spill] sm:$0xff]  ;;  %v20466_v25 = vld [vmem:[#allocation175_spill] sm:$0xff] }
 0x6c7   : > { %v1250_v57 = vcvt.s32.f32 %v20448_v43  ;;  %v15652_v56 = vsel %vm2006_vm9, 1.0, %v19536_v52  ;;  %v4620_v28 = vmul.f32 %v20451_v27, %v20450_v18  ;;  %v1534_v60 = vsub.s32 %v20369_v50, %v1486_v54  ;;  %vm15681_vm2 = vmand %vm2160_vm14, %vm15641_vm3  ;;  %v20462_v18 = vld [vmem:[#allocation208_spill] sm:$0xff] }
 0x6c8   : > { %20449 = vst [vmem:[#allocation236_spill] sm:$0xff] %v15652_v56  ;;  %v4572_v20 = vadd.f32 %v4524_v7, %v4284_v33  ;;  %v10850_v59 = vpack.c.bf16 %v4667_v36, %v4666_v44  ;;  %vm2161_vm7 = vcmp.eq.s32.totalorder %v15598_v51, 2  ;;  %v15672_v16 = vcvt.f32.s32 %v11613_v46  ;;  %v4407_v44 = vpop.permute.xlu0 %4406  ;;  %v20461_v7 = vld [vmem:[#allocation211_spill] sm:$0xff] }
 0x6c9   : > { %v1683_v50 = vfloor.f32 %v1635_v55  ;;  %vm1960_vm6 = vcmp.eq.s32.totalorder %v14790_v2, 1  ;;  %v4285_v54 = vmul.f32 %v20458_v48, %v20457_v11  ;;  %v1487_v53 = vmul.u32 8, %v11516_v26  ;;  %v20465_v48 = vld [vmem:[#allocation103_spill] sm:$0xff] }
 0x6ca   : > { %v4668_v32 = vadd.f32 %v4620_v28, %v4572_v20  ;;  %v4525_v46 = vmul.f32 %v15652_v56, %v4407_v44  ;;  %10851 = vmatprep.subr.bf16.mxu0 %v10850_v59  ;;  %v11517_v55 = vtrunc.f32 %v1392_v0  ;;  %v1345_v33 = vmul.f32 0.125, %v1297_v9  ;;  %vm2008_vm14 = vmand %vm1960_vm6, %vm14909_vm1  ;;  %v4409_v28 = vpop.permute.xlu1 %4408  ;;  %v20472_v20 = vld [vmem:[#allocation278_spill] sm:$0xff]  ;;  %v20491_v56 = vld [vmem:[#allocation216_spill] sm:$0xff] }
 0x6cb   : > { %v1298_v36 = vadd.f32 0.5, %v1250_v57  ;;  %v20463_v27 = vpack.c.bf16 %v20461_v7, %v20462_v18  ;;  %v15692_v11 = vsel %vm15659_vm5, 1.0, %v19536_v52  ;;  %v4621_v8 = vmul.f32 %v20466_v25, %v20465_v48  ;;  %v20478_v18 = vld [vmem:[#allocation115_spill] sm:$0xff] }
 0x6cc   : > { %20464 = vst [vmem:[#allocation239_spill] sm:$0xff] %v15692_v11  ;;  %v15699_v26 = vsel %vm15667_vm8, 1.0, %v19536_v52  ;;  %vm15702_vm10 = vcmp.eq.s32.totalorder %v1534_v60, %v13558_v61  ;;  %v4573_v0 = vadd.f32 %v4525_v46, %v4285_v54  ;;  %v15713_v9 = vsel %vm15681_vm2, 1.0, %v19536_v52  ;;  %v20473_v60 = vld [vmem:[#allocation251_spill] sm:$0xff] }
 0x6cd   : > { %10853 = vmatpush3.bf16.msra.mxu0 %v20463_v27  ;;  %20467 = vst [vmem:[#allocation139_spill] sm:$0xff] %v15699_v26  ;;  %20471 = vst [vmem:[#allocation39_spill] sm:$0xff] %v15713_v9  ;;  %vm1778_vm9 = vcmp.eq.s32.totalorder %v15672_v16, 0  ;;  %v11615_v57 = vtrunc.f32 %v1683_v50  ;;  %vm1961_vm12 = vcmp.eq.s32.totalorder %v20472_v20, 1  ;;  %v4286_v13 = vmul.f32 %v20474_v42, %v20473_v60  ;;  %v20479_v27 = vld [vmem:[#allocation186_spill] sm:$0xff]  ;;  %v20486_v42 = vld [vmem:[#allocation209_spill] sm:$0xff] }
 0x6ce   : > { %v1535_v44 = vsub.s32 %v20394_v49, %v1487_v53  ;;  %v4669_v48 = vadd.f32 %v4621_v8, %v4573_v0  ;;  %v4526_v2 = vmul.f32 %v15692_v11, %v4409_v28  ;;  %vm15725_vm1 = vmand %vm1777_vm13, %vm15702_vm10  ;;  %v11518_v50 = vcvt.f32.s32 %v11517_v55  ;;  %v20480_v8 = vld [vmem:[#allocation145_spill] sm:$0xff]  ;;  %v20481_v20 = vld [vmem:[#allocation182_spill] sm:$0xff]  ;;  %v4411_v11 = vpop.permute.xlu0 %4410  ;;  %v4413_v60 = vpop.permute.xlu1 %4412 }
 0x6cf   : > { %v1393_v12 = vfloor.f32 %v1345_v33  ;;  %v1346_v46 = vmul.f32 0.125, %v1298_v36  ;;  %v15730_v7 = vsel %vm2008_vm14, 1.0, %v19536_v52  ;;  %v4622_v49 = vmul.f32 %v20479_v27, %v20478_v18  ;;  %v20485_v33 = vld [vmem:[#allocation133_spill] sm:$0xff]  ;;  %v20487_v18 = vld [vmem:[#allocation254_spill] sm:$0xff]  ;;  %vm2209_vm2 = vmand %vm2161_vm7, %vm15702_vm10 }
 0x6d0   : > { %20477 = vst [vmem:[#allocation128_spill] sm:$0xff] %v15730_v7  ;;  %v1251_v53 = vcvt.s32.f32 %v20480_v8  ;;  %v4574_v0 = vadd.f32 %v4526_v2, %v4286_v13  ;;  %v10854_v28 = vpack.c.bf16 %v4669_v48, %v4668_v32  ;;  %vm20482_vm5 = vnez %v20481_v20  ;;  %v20488_v27 = vld [vmem:[#allocation281_spill] sm:$0xff] }
 0x6d1   : > { %vm15737_vm8 = vmand %vm1961_vm12, %vm20482_vm5  ;;  %vm2162_vm13 = vcmp.eq.s32.totalorder %v15672_v16, 2  ;;  %v15742_v55 = vcvt.f32.s32 %v11615_v57  ;;  %v1636_v36 = vmul.f32 0.0078125, %v20485_v33  ;;  %vm1962_vm6 = vcmp.eq.s32.totalorder %v20486_v42, 1  ;;  %v20490_v33 = vld [vmem:[#allocation187_spill] sm:$0xff] }
 0x6d2   : > { %v4287_v25 = vmul.f32 %v20488_v27, %v20487_v18  ;;  %v15751_v32 = vsel %vm15725_vm1, 1.0, %v19536_v52  ;;  %v4670_v57 = vadd.f32 %v4622_v49, %v4574_v0  ;;  %v4527_v13 = vmul.f32 %v15730_v7, %v4411_v11  ;;  %10855 = vmatprep.subr.bf16.mxu0 %v10854_v28  ;;  %v20494_v27 = vld [vmem:[#allocation256_spill] sm:$0xff]  ;;  %vm2010_vm14 = vmand %vm1962_vm6, %vm15135_vm11 }
 0x6d3   : > { %20489 = vst [vmem:[#allocation241_spill] sm:$0xff] %v15751_v32  ;;  %v1488_v48 = vmul.u32 8, %v11518_v50  ;;  %v11519_v2 = vtrunc.f32 %v1393_v12  ;;  %v1394_v20 = vfloor.f32 %v1346_v46  ;;  %v20492_v18 = vpack.c.bf16 %v20490_v33, %v20491_v56  ;;  %v20500_v0 = vld [vmem:[#allocation136_spill] sm:$0xff]  ;;  %v20506_v12 = vld [vmem:[#allocation117_spill] sm:$0xff] }
 0x6d4   : > { %v15764_v54 = vsel %vm15737_vm8, 1.0, %v19536_v52  ;;  %v4623_v19 = vmul.f32 %v20495_v35, %v20494_v27  ;;  %vm15769_vm7 = vcmp.eq.s32.totalorder %v1535_v44, %v13558_v61  ;;  %v1299_v11 = vadd.f32 0.5, %v1251_v53  ;;  %v20501_v44 = vld [vmem:[#allocation260_spill] sm:$0xff]  ;;  %v20502_v27 = vld [vmem:[#allocation189_spill] sm:$0xff]  ;;  %v20513_v35 = vld [vmem:[#allocation202_spill] sm:$0xff] }
 0x6d5   : > { %10857 = vmatpush3.bf16.msra.mxu0 %v20492_v18  ;;  %20493 = vst [vmem:[#allocation96_spill] sm:$0xff] %v15764_v54  ;;  %v4575_v50 = vadd.f32 %v4527_v13, %v4287_v25  ;;  %v15778_v56 = vsel %vm2209_vm2, 1.0, %v19536_v52  ;;  %v1684_v46 = vfloor.f32 %v1636_v36  ;;  %v1637_v28 = vmul.f32 0.0078125, %v20500_v0  ;;  %vm15790_vm11 = vmand %vm1778_vm9, %vm15769_vm7  ;;  %v20507_v0 = vld [vmem:[#allocation191_spill] sm:$0xff] }
 0x6d6   : > { %20499 = vst [vmem:[#allocation97_spill] sm:$0xff] %v15778_v56  ;;  %vm1963_vm12 = vcmp.eq.s32.totalorder %v15104_v37, 1  ;;  %v4288_v33 = vmul.f32 %v20502_v27, %v20501_v44  ;;  %vm1779_vm1 = vcmp.eq.s32.totalorder %v15742_v55, 0  ;;  %v4528_v53 = vmul.f32 %v15764_v54, %v4413_v60  ;;  %v20508_v54 = vld [vmem:[#allocation198_spill] sm:$0xff]  ;;  %vm15814_vm2 = vmand %vm2162_vm13, %vm15769_vm7 }
 0x6d7   : > { %v4671_v25 = vadd.f32 %v4623_v19, %v4575_v50  ;;  %v1536_v36 = vsub.s32 %v20418_v10, %v1488_v48  ;;  %v11520_v13 = vcvt.f32.s32 %v11519_v2  ;;  %v11521_v37 = vtrunc.f32 %v1394_v20  ;;  %v4415_v2 = vpop.permute.xlu0 %4414  ;;  %v20512_v20 = vld [vmem:[#allocation265_spill] sm:$0xff] }
 0x6d8   : > { %v15796_v18 = vsel %vm2010_vm14, 1.0, %v19536_v52  ;;  %v4624_v19 = vmul.f32 %v20507_v0, %v20506_v12  ;;  %v1347_v50 = vmul.f32 0.125, %v1299_v11  ;;  %v4576_v60 = vadd.f32 %v4528_v53, %v4288_v33  ;;  %v20518_v12 = vld [vmem:[#allocation167_spill] sm:$0xff] }
 0x6d9   : > { %20505 = vst [vmem:[#allocation141_spill] sm:$0xff] %v15796_v18  ;;  %v10858_v44 = vpack.c.bf16 %v4671_v25, %v4670_v57  ;;  %vm20509_vm5 = vnez %v20508_v54  ;;  %vm2163_vm9 = vcmp.eq.s32.totalorder %v15742_v55, 2  ;;  %v11617_v10 = vtrunc.f32 %v1684_v46  ;;  %v20516_v54 = vld [vmem:[#allocation138_spill] sm:$0xff]  ;;  %v20531_v57 = vld [vmem:[#allocation147_spill] sm:$0xff] }
 0x6da   : > { %vm15802_vm8 = vmand %vm1963_vm12, %vm20509_vm5  ;;  %v1685_v48 = vfloor.f32 %v1637_v28  ;;  %vm1964_vm6 = vcmp.eq.s32.totalorder %v15239_v39, 1  ;;  %v4289_v7 = vmul.f32 %v20513_v35, %v20512_v20  ;;  %v1638_v11 = vmul.f32 0.0078125, %v20516_v54  ;;  %v20519_v20 = vld [vmem:[#allocation228_spill] sm:$0xff]  ;;  %v4417_v54 = vpop.permute.xlu1 %4416 }
 0x6db   : > { %v4672_v33 = vadd.f32 %v4624_v19, %v4576_v60  ;;  %v4529_v46 = vmul.f32 %v15796_v18, %v4415_v2  ;;  %10859 = vmatprep.subr.bf16.mxu0 %v10858_v44  ;;  %v15823_v28 = vsel %vm15790_vm11, 1.0, %v19536_v52  ;;  %v1489_v25 = vmul.u32 8, %v11520_v13  ;;  %v20522_v19 = vld [vmem:[#allocation266_spill] sm:$0xff] }
 0x6dc   : > { %20517 = vst [vmem:[#allocation244_spill] sm:$0xff] %v15823_v28  ;;  %v11522_v53 = vcvt.f32.s32 %v11521_v37  ;;  %v20520_v35 = vpack.c.bf16 %v20518_v12, %v20519_v20  ;;  %v15831_v0 = vsel %vm15802_vm8, 1.0, %v19536_v52  ;;  %v20523_v60 = vld [vmem:[#allocation130_spill] sm:$0xff]  ;;  %vm15836_vm13 = vcmp.eq.s32.totalorder %v1536_v36, %v13558_v61  ;;  %v20528_v36 = vld [vmem:[#allocation268_spill] sm:$0xff] }
 0x6dd   : > { %20521 = vst [vmem:[#allocation131_spill] sm:$0xff] %v15831_v0  ;;  %v4625_v2 = vmul.f32 %v20523_v60, %v20522_v19  ;;  %v1395_v42 = vfloor.f32 %v1347_v50  ;;  %v4577_v13 = vadd.f32 %v4529_v46, %v4289_v7  ;;  %vm20526_vm14 = vnez %v20345_v23  ;;  %vm15859_vm5 = vmand %vm1779_vm1, %vm15836_vm13  ;;  %v20896_v18 = vld [vmem:[#allocation178_spill] sm:$0xff] }
 0x6de   : > { %10861 = vmatpush3.bf16.msra.mxu0 %v20520_v35  ;;  %vm2012_vm12 = vmand %vm1964_vm6, %vm20526_vm14  ;;  %v15847_v35 = vsel %vm15814_vm2, 1.0, %v19536_v52  ;;  %v15849_v27 = vcvt.f32.s32 %v11617_v10  ;;  %v11619_v37 = vtrunc.f32 %v1685_v48  ;;  %vm1965_vm11 = vcmp.eq.s32.totalorder %v15310_v62, 1 }
 0x6df   : > { %20527 = vst [vmem:[#allocation275_spill] sm:$0xff] %v15847_v35  ;;  %v4290_v50 = vmul.f32 %v15282_v15, %v20528_v36  ;;  %v1686_v7 = vfloor.f32 %v1638_v11  ;;  %v4673_v46 = vadd.f32 %v4625_v2, %v4577_v13  ;;  %v4530_v23 = vmul.f32 %v15831_v0, %v4417_v54  ;;  %v20533_v11 = vld [vmem:[#allocation269_spill] sm:$0xff]  ;;  %vm15872_vm1 = vmand %vm1965_vm11, %vm15384_vm15  ;;  %v20548_v54 = vld [vmem:[#allocation2_spill] sm:$0xff] }
 0x6e0   : > { %v1537_v10 = vsub.s32 %v20438_v5, %v1489_v25  ;;  %v1490_v48 = vmul.u32 8, %v11522_v53  ;;  %v1252_v62 = vcvt.s32.f32 %v20531_v57  ;;  %v15866_v12 = vsel %vm2012_vm12, 1.0, %v19536_v52  ;;  %v4419_v25 = vpop.permute.xlu0 %4418  ;;  %v20536_v53 = vld [vmem:[#allocation110_spill] sm:$0xff]  ;;  %vm15887_vm15 = vmand %vm2163_vm9, %vm15836_vm13 }
 0x6e1   : > { %20532 = vst [vmem:[#allocation98_spill] sm:$0xff] %v15866_v12  ;;  %v4626_v20 = vmul.f32 %v15287_v22, %v20533_v11  ;;  %v11523_v19 = vtrunc.f32 %v1395_v42  ;;  %v4578_v2 = vadd.f32 %v4530_v23, %v4290_v50  ;;  %v10862_v13 = vpack.c.bf16 %v4673_v46, %v4672_v33  ;;  %v20540_v11 = vld [vmem:[#allocation201_spill] sm:$0xff] }
 0x6e2   : > { %vm1780_vm8 = vcmp.eq.s32.totalorder %v15849_v27, 0  ;;  %vm2164_vm6 = vcmp.eq.s32.totalorder %v15849_v27, 2  ;;  %v15878_v5 = vcvt.f32.s32 %v11619_v37  ;;  %vm1966_vm2 = vcmp.eq.s32.totalorder %v15359_v29, 1 }
 0x6e3   : > { %v4291_v42 = vmul.f32 %v15412_v30, %v20536_v53  ;;  %v11621_v33 = vtrunc.f32 %v1686_v7  ;;  %v4674_v36 = vadd.f32 %v4626_v20, %v4578_v2  ;;  %v4531_v50 = vmul.f32 %v15866_v12, %v4419_v25  ;;  %10863 = vmatprep.subr.bf16.mxu0 %v10862_v13  ;;  %v20543_v20 = vld [vmem:[#allocation273_spill] sm:$0xff]  ;;  %vm2014_vm14 = vmand %vm1966_vm2, %vm15497_vm4 }
 0x6e4   : > { %v15895_v37 = vsel %vm15859_vm5, 1.0, %v19536_v52  ;;  %v1538_v46 = vsub.s32 %v20448_v43, %v1490_v48  ;;  %v1300_v23 = vadd.f32 0.5, %v1252_v62  ;;  %v20541_v53 = vpack.c.bf16 %v15253_v4, %v20540_v11  ;;  %v20547_v48 = vld [vmem:[#allocation149_spill] sm:$0xff]  ;;  %v20554_v11 = vld [vmem:[#allocation140_spill] sm:$0xff] }
 0x6e5   : > { %20539 = vst [vmem:[#allocation143_spill] sm:$0xff] %v15895_v37  ;;  %v15904_v7 = vsel %vm15872_vm1, 1.0, %v19536_v52  ;;  %v4627_v2 = vmul.f32 %v15421_v24, %v20543_v20  ;;  %vm15909_vm9 = vcmp.eq.s32.totalorder %v1537_v10, %v13558_v61  ;;  %v11524_v13 = vcvt.f32.s32 %v11523_v19  ;;  %v4421_v10 = vpop.permute.xlu1 %4420  ;;  %v20549_v19 = vld [vmem:[#allocation93_spill] sm:$0xff]  ;;  %v20556_v20 = vld [vmem:[#allocation168_spill] sm:$0xff] }
 0x6e6   : > { %10865 = vmatpush3.bf16.msra.mxu0 %v20541_v53  ;;  %20542 = vst [vmem:[#allocation248_spill] sm:$0xff] %v15904_v7  ;;  %v4579_v43 = vadd.f32 %v4531_v50, %v4291_v42  ;;  %v15920_v4 = vsel %vm15887_vm15, 1.0, %v19536_v52  ;;  %vm1781_vm12 = vcmp.eq.s32.totalorder %v15878_v5, 0  ;;  %v1253_v62 = vcvt.s32.f32 %v20547_v48  ;;  %vm15934_vm4 = vmand %vm1780_vm8, %vm15909_vm9 }
 0x6e7   : > { %20546 = vst [vmem:[#allocation172_spill] sm:$0xff] %v15920_v4  ;;  %vm1967_vm11 = vcmp.eq.s32.totalorder %v15474_v6, 1  ;;  %v4292_v25 = vmul.f32 %v20549_v19, %v20548_v54  ;;  %v15927_v42 = vcvt.f32.s32 %v11621_v33  ;;  %v4532_v29 = vmul.f32 %v15904_v7, %v4421_v10  ;;  %vm15959_vm8 = vmand %vm2164_vm6, %vm15909_vm9 }
 0x6e8   : > { %v4675_v21 = vadd.f32 %v4627_v2, %v4579_v43  ;;  %vm15939_vm5 = vcmp.eq.s32.totalorder %v1538_v46, %v13558_v61  ;;  %v1348_v6 = vmul.f32 0.125, %v1300_v23  ;;  %v1639_v33 = vmul.f32 0.0078125, %v20554_v11  ;;  %vm15951_vm1 = vmand %vm1967_vm11, %vm15542_vm0  ;;  %v20575_v46 = vld [vmem:[#allocation171_spill] sm:$0xff] }
 0x6e9   : > { %v15945_v53 = vsel %vm2014_vm14, 1.0, %v19536_v52  ;;  %v4628_v2 = vmul.f32 %v15490_v38, %v20556_v20  ;;  %v1491_v43 = vmul.u32 8, %v11524_v13  ;;  %v4580_v10 = vadd.f32 %v4532_v29, %v4292_v25  ;;  %v20561_v13 = vld [vmem:[#allocation152_spill] sm:$0xff]  ;;  %vm15979_vm6 = vmand %vm1781_vm12, %vm15939_vm5  ;;  %v20566_v38 = vld [vmem:[#allocation215_spill] sm:$0xff] }
 0x6ea   : > { %20555 = vst [vmem:[#allocation100_spill] sm:$0xff] %v15945_v53  ;;  %v10866_v54 = vpack.c.bf16 %v4675_v21, %v4674_v36  ;;  %vm2165_vm2 = vcmp.eq.s32.totalorder %v15878_v5, 2  ;;  %v1301_v23 = vadd.f32 0.5, %v1253_v62  ;;  %v1254_v25 = vcvt.s32.f32 %v20561_v13  ;;  %v4423_v36 = vpop.permute.xlu0 %4422 }
 0x6eb   : > { %vm1968_vm15 = vcmp.eq.s32.totalorder %v15527_v47, 1  ;;  %v4293_v21 = vmul.f32 %v15560_v40, %v20562_v14  ;;  %vm1782_vm0 = vcmp.eq.s32.totalorder %v15927_v42, 0  ;;  %v4676_v29 = vadd.f32 %v4628_v2, %v4580_v10  ;;  %v20567_v2 = vld [vmem:[#allocation210_spill] sm:$0xff]  ;;  %vm16023_vm11 = vmand %vm2165_vm2, %vm15939_vm5 }
 0x6ec   : > { %v4533_v11 = vmul.f32 %v15945_v53, %v4423_v36  ;;  %10867 = vmatprep.subr.bf16.mxu0 %v10866_v54  ;;  %v15973_v20 = vsel %vm15934_vm4, 1.0, %v19536_v52  ;;  %v1396_v14 = vfloor.f32 %v1348_v6  ;;  %v1687_v40 = vfloor.f32 %v1639_v33  ;;  %v20570_v54 = vld [vmem:[#allocation170_spill] sm:$0xff]  ;;  %vm16003_vm14 = vmand %vm1968_vm15, %vm15641_vm3 }
 0x6ed   : > { %20563 = vst [vmem:[#allocation211_spill] sm:$0xff] %v15973_v20  ;;  %v20568_v10 = vpack.c.bf16 %v20566_v38, %v20567_v2  ;;  %v15989_v17 = vsel %vm15951_vm1, 1.0, %v19536_v52  ;;  %v4629_v36 = vmul.f32 %v15573_v45, %v20570_v54  ;;  %v15996_v53 = vsel %vm15959_vm8, 1.0, %v19536_v52  ;;  %v20574_v2 = vld [vmem:[#allocation142_spill] sm:$0xff]  ;;  %v4425_v45 = vpop.permute.xlu1 %4424 }
 0x6ee   : > { %20569 = vst [vmem:[#allocation208_spill] sm:$0xff] %v15989_v17  ;;  %20571 = vst [vmem:[#allocation103_spill] sm:$0xff] %v15996_v53  ;;  %v1539_v6 = vsub.s32 %v20480_v8, %v1491_v43  ;;  %v4581_v33 = vadd.f32 %v4533_v11, %v4293_v21  ;;  %v1349_v7 = vmul.f32 0.125, %v1301_v23  ;;  %v1302_v54 = vadd.f32 0.5, %v1254_v25  ;;  %v20577_v43 = vld [vmem:[#allocation163_spill] sm:$0xff]  ;;  %v20580_v11 = vld [vmem:[#allocation154_spill] sm:$0xff] }
 0x6ef   : > { %10869 = vmatpush3.bf16.msra.mxu0 %v20568_v10  ;;  %v1640_v10 = vmul.f32 0.0078125, %v20574_v2  ;;  %vm1969_vm12 = vcmp.eq.s32.totalorder %v15598_v51, 1  ;;  %v4294_v19 = vmul.f32 %v15614_v63, %v20575_v46  ;;  %v16014_v58 = vsel %vm15979_vm6, 1.0, %v19536_v52  ;;  %v20581_v2 = vld [vmem:[#allocation166_spill] sm:$0xff]  ;;  %v4427_v63 = vpop.permute.xlu0 %4426 }
 0x6f0   : > { %20576 = vst [vmem:[#allocation177_spill] sm:$0xff] %v16014_v58  ;;  %vm2166_vm3 = vcmp.eq.s32.totalorder %v15927_v42, 2  ;;  %v4677_v47 = vadd.f32 %v4629_v36, %v4581_v33  ;;  %v4534_v8 = vmul.f32 %v15989_v17, %v4425_v45  ;;  %v11525_v25 = vtrunc.f32 %v1396_v14  ;;  %v20583_v36 = vld [vmem:[#allocation196_spill] sm:$0xff]  ;;  %vm16045_vm1 = vmand %vm1969_vm12, %vm15702_vm10 }
 0x6f1   : > { %v11623_v21 = vtrunc.f32 %v1687_v40  ;;  %v1255_v62 = vcvt.s32.f32 %v20580_v11  ;;  %v16032_v45 = vsel %vm16003_vm14, 1.0, %v19536_v52  ;;  %v4630_v33 = vmul.f32 %v15624_v41, %v20583_v36  ;;  %v20598_v40 = vld [vmem:[#allocation206_spill] sm:$0xff] }
 0x6f2   : > { %4757 = vmatmul.mubr.f32.vlgmr.msra.gmra.mrb[30].mxu0 %v20577_v43  ;;  %20582 = vst [vmem:[#allocation278_spill] sm:$0xff] %v16032_v45  ;;  %vm16037_vm4 = vcmp.eq.s32.totalorder %v1539_v6, %v13558_v61  ;;  %v4582_v43 = vadd.f32 %v4534_v8, %v4294_v19  ;;  %v10870_v14 = vpack.c.bf16 %v4677_v47, %v4676_v29  ;;  %v1397_v38 = vfloor.f32 %v1349_v7  ;;  %v20588_v6 = vld [vmem:[#allocation173_spill] sm:$0xff]  ;;  %v20594_v8 = vld [vmem:[#allocation156_spill] sm:$0xff] }
 0x6f3   : > { %4761 = vmatprep.mubr.f32.mxu0 %v20581_v2  ;;  %v1688_v2 = vfloor.f32 %v1640_v10  ;;  %v1350_v17 = vmul.f32 0.125, %v1302_v54  ;;  %vm1970_vm8 = vcmp.eq.s32.totalorder %v15672_v16, 1  ;;  %v4295_v36 = vmul.f32 %v15699_v26, %v20588_v6  ;;  %v20590_v29 = vld [vmem:[#allocation129_spill] sm:$0xff]  ;;  %vm16063_vm10 = vmand %vm1782_vm0, %vm16037_vm4  ;;  %v20593_v10 = vld [vmem:[#allocation144_spill] sm:$0xff] }
 0x6f4   : > { %v16055_v19 = vsel %vm16023_vm11, 1.0, %v19536_v52  ;;  %v4678_v59 = vadd.f32 %v4630_v33, %v4582_v43  ;;  %v4535_v51 = vmul.f32 %v16032_v45, %v4427_v63  ;;  %10871 = vmatprep.subr.bf16.mxu0 %v10870_v14  ;;  %v1641_v54 = vmul.f32 0.0078125, %v20593_v10  ;;  %v20595_v33 = vld [vmem:[#allocation223_spill] sm:$0xff]  ;;  %v20597_v43 = vld [vmem:[#allocation174_spill] sm:$0xff]  ;;  %vm2018_vm2 = vmand %vm1970_vm8, %vm15769_vm7 }
 0x6f5   : > { %20589 = vst [vmem:[#allocation251_spill] sm:$0xff] %v16055_v19  ;;  %v1303_v47 = vadd.f32 0.5, %v1255_v62  ;;  %v1256_v23 = vcvt.s32.f32 %v20594_v8  ;;  %10873 = vmatpush3.bf16.msra.mxu0 %v10870_v14  ;;  %v16073_v63 = vsel %vm16045_vm1, 1.0, %v19536_v52  ;;  %v4631_v6 = vmul.f32 %v15713_v9, %v20597_v43  ;;  %vm16108_vm0 = vmand %vm2166_vm3, %vm16037_vm4 }
 0x6f6   : > { %4762 = vmatmul.mubr.f32.gmra.mrb[32].mxu0 %v20590_v29  ;;  %20596 = vst [vmem:[#allocation115_spill] sm:$0xff] %v16073_v63  ;;  %v11526_v29 = vcvt.f32.s32 %v11525_v25  ;;  %v16077_v45 = vcvt.f32.s32 %v11623_v21  ;;  %v4583_v26 = vadd.f32 %v4535_v51, %v4295_v36  ;;  %v11527_v62 = vtrunc.f32 %v1397_v38 }
 0x6f7   : > { %10451 = vmatprep.mubr.f32.mxu0 %v20595_v33  ;;  %v11625_v14 = vtrunc.f32 %v1688_v2  ;;  %v1398_v10 = vfloor.f32 %v1350_v17  ;;  %v4429_v33 = vpop.permute.xlu1 %4428  ;;  %vm1971_vm15 = vcmp.eq.s32.totalorder %v15742_v55, 1  ;;  %v4296_v41 = vmul.f32 %v15751_v32, %v20598_v40  ;;  %v20601_v17 = vld [vmem:[#allocation279_spill] sm:$0xff]  ;;  %v20602_v2 = vld [vmem:[#allocation158_spill] sm:$0xff] }
 0x6f8   : > { %v16089_v25 = vsel %vm16063_vm10, 1.0, %v19536_v52  ;;  %v4679_v21 = vadd.f32 %v4631_v6, %v4583_v26  ;;  %v4536_v49 = vmul.f32 %v16073_v63, %v4429_v33  ;;  %v1689_v36 = vfloor.f32 %v1641_v54  ;;  %vm16100_vm7 = vmand %vm1971_vm15, %vm15836_vm13  ;;  %v4431_v6 = vpop.permute.xlu0 %4430 }
 0x6f9   : > { %20599 = vst [vmem:[#allocation145_spill] sm:$0xff] %v16089_v25  ;;  %v1351_v16 = vmul.f32 0.125, %v1303_v47  ;;  %v1304_v51 = vadd.f32 0.5, %v1256_v23  ;;  %v16093_v38 = vsel %vm2018_vm2, 1.0, %v19536_v52  ;;  %v4632_v55 = vmul.f32 %v15778_v56, %v20601_v17 }
 0x6fa   : > { %20600 = vst [vmem:[#allocation182_spill] sm:$0xff] %v16093_v38  ;;  %v1257_v43 = vcvt.s32.f32 %v20602_v2  ;;  %v4584_v40 = vadd.f32 %v4536_v49, %v4296_v41  ;;  %v10874_v32 = vpack.c.bf16 %v4679_v21, %v4678_v59  ;;  %v1492_v54 = vmul.u32 8, %v11526_v29  ;;  %v20607_v41 = vld [vmem:[#allocation116_spill] sm:$0xff] }
 0x6fb   : > { %v11528_v47 = vcvt.f32.s32 %v11527_v62  ;;  %v11529_v23 = vtrunc.f32 %v1398_v10  ;;  %vm1972_vm6 = vcmp.eq.s32.totalorder %v15849_v27, 1  ;;  %v4297_v44 = vmul.f32 %v15823_v28, %v20607_v41  ;;  %v20609_v62 = vld [vmem:[#allocation181_spill] sm:$0xff]  ;;  %v4433_v7 = vpop.permute.xlu1 %4432 }
 0x6fc   : > { %v16115_v59 = vcvt.f32.s32 %v11625_v14  ;;  %v4680_v33 = vadd.f32 %v4632_v55, %v4584_v40  ;;  %v4537_v21 = vmul.f32 %v16093_v38, %v4431_v6  ;;  %10875 = vmatprep.subr.bf16.mxu0 %v10874_v32  ;;  %vm1783_vm13 = vcmp.eq.s32.totalorder %v16077_v45, 0  ;;  %vm2020_vm14 = vmand %vm1972_vm6, %vm15909_vm9  ;;  %v20612_v6 = vld [vmem:[#allocation218_spill] sm:$0xff] }
 0x6fd   : > { %v11627_v49 = vtrunc.f32 %v1689_v36  ;;  %v1399_v17 = vfloor.f32 %v1351_v16  ;;  %v1352_v56 = vmul.f32 0.125, %v1304_v51  ;;  %10877 = vmatpush3.bf16.msra.mxu0 %v10874_v32  ;;  %v16122_v29 = vsel %vm16100_vm7, 1.0, %v19536_v52  ;;  %v20611_v16 = vld [vmem:[#allocation146_spill] sm:$0xff] }
 0x6fe   : > { %20608 = vst [vmem:[#allocation133_spill] sm:$0xff] %v16122_v29  ;;  %v4633_v10 = vmul.f32 %v15847_v35, %v20609_v62  ;;  %v16129_v14 = vsel %vm16108_vm0, 1.0, %v19536_v52  ;;  %v1305_v55 = vadd.f32 0.5, %v1257_v43  ;;  %v4585_v40 = vadd.f32 %v4537_v21, %v4297_v44  ;;  %v20614_v21 = vld [vmem:[#allocation127_spill] sm:$0xff] }
 0x6ff   : > { %20610 = vst [vmem:[#allocation209_spill] sm:$0xff] %v16129_v14  ;;  %v1493_v32 = vmul.u32 8, %v11528_v47  ;;  %v11530_v36 = vcvt.f32.s32 %v11529_v23  ;;  %v1642_v51 = vmul.f32 0.0078125, %v20611_v16  ;;  %vm1973_vm12 = vcmp.eq.s32.totalorder %v15878_v5, 1 }
 0x700   : > { %v4298_v41 = vmul.f32 %v15895_v37, %v20612_v6  ;;  %v1540_v26 = vsub.s32 %v20531_v57, %v1492_v54  ;;  %vm2167_vm3 = vcmp.eq.s32.totalorder %v16077_v45, 2  ;;  %v4681_v43 = vadd.f32 %v4633_v10, %v4585_v40  ;;  %vm16154_vm9 = vmand %vm1973_vm12, %vm15939_vm5  ;;  %v4435_v10 = vpop.permute.xlu0 %4434  ;;  %v20617_v40 = vld [vmem:[#allocation225_spill] sm:$0xff] }
 0x701   : > { %v4538_v39 = vmul.f32 %v16122_v29, %v4433_v7  ;;  %vm1784_vm11 = vcmp.eq.s32.totalorder %v16115_v59, 0  ;;  %v16143_v27 = vcvt.f32.s32 %v11627_v49  ;;  %v11531_v47 = vtrunc.f32 %v1399_v17  ;;  %v20618_v7 = vld [vmem:[#allocation148_spill] sm:$0xff] }
 0x702   : > { %v1400_v23 = vfloor.f32 %v1352_v56  ;;  %v16146_v44 = vsel %vm2020_vm14, 1.0, %v19536_v52  ;;  %v4634_v62 = vmul.f32 %v15920_v4, %v20614_v21  ;;  %v1353_v16 = vmul.f32 0.125, %v1305_v55 }
 0x703   : > { %20613 = vst [vmem:[#allocation254_spill] sm:$0xff] %v16146_v44  ;;  %v4586_v6 = vadd.f32 %v4538_v39, %v4298_v41  ;;  %v10878_v57 = vpack.c.bf16 %v4681_v43, %v4680_v33  ;;  %v1541_v49 = vsub.s32 %v20547_v48, %v1493_v32  ;;  %v1494_v56 = vmul.u32 8, %v11530_v36 }
 0x704   : > { %v1690_v17 = vfloor.f32 %v1642_v51  ;;  %vm1974_vm1 = vcmp.eq.s32.totalorder %v15927_v42, 1  ;;  %v4299_v55 = vmul.f32 %v15973_v20, %v20617_v40  ;;  %v1643_v33 = vmul.f32 0.0078125, %v20618_v7  ;;  %v20622_v51 = vld [vmem:[#allocation165_spill] sm:$0xff] }
 0x705   : > { %v4682_v41 = vadd.f32 %v4634_v62, %v4586_v6  ;;  %v4539_v50 = vmul.f32 %v16146_v44, %v4435_v10  ;;  %10879 = vmatprep.subr.bf16.mxu0 %v10878_v57  ;;  %vm16165_vm5 = vcmp.eq.s32.totalorder %v1540_v26, %v13558_v61  ;;  %vm2168_vm8 = vcmp.eq.s32.totalorder %v16115_v59, 2  ;;  %vm2022_vm2 = vmand %vm1974_vm1, %vm16037_vm4  ;;  %v4437_v62 = vpop.permute.xlu1 %4436  ;;  %v20625_v6 = vld [vmem:[#allocation118_spill] sm:$0xff] }
 0x706   : > { %v11532_v48 = vcvt.f32.s32 %v11531_v47  ;;  %v11533_v32 = vtrunc.f32 %v1400_v23  ;;  %10881 = vmatpush3.bf16.msra.mxu0 %v10878_v57  ;;  %v16173_v36 = vsel %vm16154_vm9, 1.0, %v19536_v52  ;;  %v4635_v43 = vmul.f32 %v15996_v53, %v20622_v51  ;;  %vm1831_vm0 = vmand %vm1783_vm13, %vm16165_vm5  ;;  %v20626_v10 = vld [vmem:[#allocation150_spill] sm:$0xff]  ;;  %v4439_v51 = vpop.permute.xlu0 %4438 }
 0x707   : > { %20621 = vst [vmem:[#allocation187_spill] sm:$0xff] %v16173_v36  ;;  %vm1785_vm10 = vcmp.eq.s32.totalorder %v16143_v27, 0  ;;  %v1401_v39 = vfloor.f32 %v1353_v16  ;;  %v4587_v26 = vadd.f32 %v4539_v50, %v4299_v55  ;;  %vm16183_vm15 = vcmp.eq.s32.totalorder %v1541_v49, %v13558_v61  ;;  %vm16215_vm6 = vmand %vm2167_vm3, %vm16165_vm5 }
 0x708   : > { %v1542_v23 = vsub.s32 %v20561_v13, %v1494_v56  ;;  %v11629_v21 = vtrunc.f32 %v1690_v17  ;;  %vm1975_vm7 = vcmp.eq.s32.totalorder %v16077_v45, 1  ;;  %v4300_v16 = vmul.f32 %v16014_v58, %v20625_v6  ;;  %v20628_v17 = vld [vmem:[#allocation99_spill] sm:$0xff]  ;;  %vm16229_vm12 = vmand %vm1784_vm11, %vm16183_vm15 }
 0x709   : > { %v1691_v42 = vfloor.f32 %v1643_v33  ;;  %v4683_v46 = vadd.f32 %v4635_v43, %v4587_v26  ;;  %v4540_v57 = vmul.f32 %v16173_v36, %v4437_v62  ;;  %v1495_v54 = vmul.u32 8, %v11532_v48  ;;  %vm16204_vm4 = vmand %vm1975_vm7, %vm16165_vm5  ;;  %v20634_v43 = vld [vmem:[#allocation83_spill] sm:$0xff] }
 0x70a   : > { %v11534_v49 = vcvt.f32.s32 %v11533_v32  ;;  %v1644_v13 = vmul.f32 0.0078125, %v20626_v10  ;;  %v16198_v56 = vsel %vm2022_vm2, 1.0, %v19536_v52  ;;  %v4636_v40 = vmul.f32 %v16055_v19, %v20628_v17  ;;  %vm2216_vm5 = vmand %vm2168_vm8, %vm16183_vm15  ;;  %v20667_v32 = vld [vmem:[#allocation213_spill] sm:$0xff] }
 0x70b   : > { %20627 = vst [vmem:[#allocation216_spill] sm:$0xff] %v16198_v56  ;;  %v11535_v55 = vtrunc.f32 %v1401_v39  ;;  %v4588_v7 = vadd.f32 %v4540_v57, %v4300_v16  ;;  %v10882_v50 = vpack.c.bf16 %v4683_v46, %v4682_v41  ;;  %v16209_v48 = vsel %vm1831_vm0, 1.0, %v19536_v52  ;;  %v20638_v57 = vld [vmem:[#allocation195_spill] sm:$0xff] }
 0x70c   : > { %20631 = vst [vmem:[#allocation256_spill] sm:$0xff] %v16209_v48  ;;  %vm2169_vm13 = vcmp.eq.s32.totalorder %v16143_v27, 2  ;;  %v16220_v41 = vcvt.f32.s32 %v11629_v21  ;;  %vm1976_vm14 = vcmp.eq.s32.totalorder %v16115_v59, 1  ;;  %v4301_v39 = vmul.f32 %v16089_v25, %v20634_v43  ;;  %v20649_v43 = vld [vmem:[#allocation234_spill] sm:$0xff] }
 0x70d   : > { %v11631_v5 = vtrunc.f32 %v1691_v42  ;;  %v4684_v26 = vadd.f32 %v4636_v40, %v4588_v7  ;;  %v4541_v62 = vmul.f32 %v16198_v56, %v4439_v51  ;;  %10883 = vmatprep.subr.bf16.mxu0 %v10882_v50  ;;  %v1543_v21 = vsub.s32 %v20580_v11, %v1495_v54  ;;  %vm2024_vm11 = vmand %vm1976_vm14, %vm16183_vm15 }
 0x70e   : > { %v1496_v6 = vmul.u32 8, %v11534_v49  ;;  %v1692_v16 = vfloor.f32 %v1644_v13  ;;  %10885 = vmatpush3.bf16.msra.mxu0 %v10882_v50  ;;  %v16238_v46 = vsel %vm16204_vm4, 1.0, %v19536_v52  ;;  %v4637_v10 = vmul.f32 %v16129_v14, %v20638_v57  ;;  %v20643_v49 = vld [vmem:[#allocation120_spill] sm:$0xff]  ;;  %v4443_v57 = vpop.permute.xlu0 %4442 }
 0x70f   : > { %20637 = vst [vmem:[#allocation84_spill] sm:$0xff] %v16238_v46  ;;  %vm16243_vm3 = vcmp.eq.s32.totalorder %v1542_v23, %v13558_v61  ;;  %v11536_v17 = vcvt.f32.s32 %v11535_v55  ;;  %v4589_v40 = vadd.f32 %v4541_v62, %v4301_v39  ;;  %v16254_v11 = vsel %vm16215_vm6, 1.0, %v19536_v52  ;;  %v4441_v23 = vpop.permute.xlu1 %4440 }
 0x710   : > { %20641 = vst [vmem:[#allocation136_spill] sm:$0xff] %v16254_v11  ;;  %v16259_v54 = vsel %vm16229_vm12, 1.0, %v19536_v52  ;;  %vm1786_vm9 = vcmp.eq.s32.totalorder %v16220_v41, 0  ;;  %vm1977_vm1 = vcmp.eq.s32.totalorder %v16143_v27, 1  ;;  %v4302_v13 = vmul.f32 %v16209_v48, %v20643_v49  ;;  %vm16274_vm2 = vmand %vm1785_vm10, %vm16243_vm3 }
 0x711   : > { %20642 = vst [vmem:[#allocation260_spill] sm:$0xff] %v16259_v54  ;;  %v11632_v55 = vcvt.f32.s32 %v11631_v5  ;;  %v4685_v7 = vadd.f32 %v4637_v10, %v4589_v40  ;;  %v4542_v50 = vmul.f32 %v16238_v46, %v4441_v23  ;;  %vm16279_vm7 = vcmp.eq.s32.totalorder %v1543_v21, %v13558_v61  ;;  %vm2025_vm8 = vmand %vm1977_vm1, %vm16243_vm3  ;;  %v20658_v23 = vld [vmem:[#allocation17_spill] sm:$0xff]  ;;  %v20742_v46 = vld [vmem:[#allocation75_spill] sm:$0xff] }
 0x712   : > { %v1544_v59 = vsub.s32 %v20594_v8, %v1496_v6  ;;  %v11633_v47 = vtrunc.f32 %v1692_v16  ;;  %v16285_v51 = vsel %vm2024_vm11, 1.0, %v19536_v52  ;;  %v4638_v39 = vmul.f32 %v16254_v11, %v20649_v43  ;;  %v20651_v8 = vld [vmem:[#allocation205_spill] sm:$0xff]  ;;  %vm16303_vm15 = vmand %vm2169_vm13, %vm16243_vm3  ;;  %v20662_v43 = vld [vmem:[#allocation242_spill] sm:$0xff] }
 0x713   : > { %20648 = vst [vmem:[#allocation117_spill] sm:$0xff] %v16285_v51  ;;  %v1497_v45 = vmul.u32 8, %v11536_v17  ;;  %v4590_v5 = vadd.f32 %v4542_v50, %v4302_v13  ;;  %v10886_v62 = vpack.c.bf16 %v4685_v7, %v4684_v26  ;;  %v16294_v21 = vsel %vm2216_vm5, 1.0, %v19536_v52  ;;  %vm16318_vm4 = vmand %vm1786_vm9, %vm16279_vm7  ;;  %v20674_v13 = vld [vmem:[#allocation132_spill] sm:$0xff] }
 0x714   : > { %20650 = vst [vmem:[#allocation198_spill] sm:$0xff] %v16294_v21  ;;  %vm1978_vm10 = vcmp.eq.s32.totalorder %v16220_v41, 1  ;;  %v4303_v6 = vmul.f32 %v16259_v54, %v20651_v8  ;;  %vm2170_vm0 = vcmp.eq.s32.totalorder %v16220_v41, 2  ;;  %v4543_v10 = vmul.f32 %v16285_v51, %v4443_v57 }
 0x715   : > { %v4686_v16 = vadd.f32 %v4638_v39, %v4590_v5  ;;  %10887 = vmatprep.subr.bf16.mxu0 %v10886_v62  ;;  %v16312_v17 = vsel %vm16274_vm2, 1.0, %v19536_v52  ;;  %vm1787_vm6 = vcmp.eq.s32.totalorder %v11632_v55, 0  ;;  %v11634_v42 = vcvt.f32.s32 %v11633_v47  ;;  %vm2026_vm14 = vmand %vm1978_vm10, %vm16279_vm7  ;;  %v4445_v47 = vpop.permute.xlu1 %4444 }
 0x716   : > { %20654 = vst [vmem:[#allocation265_spill] sm:$0xff] %v16312_v17  ;;  %10889 = vmatpush3.bf16.msra.mxu0 %v10886_v62  ;;  %v16323_v40 = vsel %vm2025_vm8, 1.0, %v19536_v52  ;;  %v4639_v49 = vmul.f32 %v16294_v21, %v20658_v23  ;;  %vm16328_vm13 = vcmp.eq.s32.totalorder %v1544_v59, %v13558_v61  ;;  %v1545_v7 = vsub.s32 %v20602_v2, %v1497_v45  ;;  %vm2218_vm3 = vmand %vm2170_vm0, %vm16279_vm7  ;;  %v20741_v21 = vld [vmem:[#allocation74_spill] sm:$0xff] }
 0x717   : > { %20657 = vst [vmem:[#allocation138_spill] sm:$0xff] %v16323_v40  ;;  %v4591_v50 = vadd.f32 %v4543_v10, %v4303_v6  ;;  %v16340_v33 = vsel %vm16303_vm15, 1.0, %v19536_v52  ;;  %vm1979_vm12 = vcmp.eq.s32.totalorder %v11632_v55, 1  ;;  %v4304_v59 = vmul.f32 %v16312_v17, %v20662_v43  ;;  %vm16357_vm11 = vmand %vm1787_vm6, %vm16328_vm13  ;;  %v20671_v10 = vld [vmem:[#allocation122_spill] sm:$0xff] }
 0x718   : > { %20661 = vst [vmem:[#allocation167_spill] sm:$0xff] %v16340_v33  ;;  %v4544_v39 = vmul.f32 %v16323_v40, %v4445_v47  ;;  %v16352_v45 = vsel %vm16318_vm4, 1.0, %v19536_v52  ;;  %vm2171_vm9 = vcmp.eq.s32.totalorder %v11632_v55, 2  ;;  %vm1788_vm1 = vcmp.eq.s32.totalorder %v11634_v42, 0  ;;  %vm2027_vm2 = vmand %vm1979_vm12, %vm16328_vm13  ;;  %v4447_v55 = vpop.permute.xlu0 %4446 }
 0x719   : > { %v4687_v2 = vadd.f32 %v4639_v49, %v4591_v50  ;;  %20663 = vst [vmem:[#allocation228_spill] sm:$0xff] %v16352_v45  ;;  %v16362_v41 = vsel %vm2026_vm14, 1.0, %v19536_v52  ;;  %v4640_v62 = vmul.f32 %v16340_v33, %v20667_v32  ;;  %vm16367_vm5 = vcmp.eq.s32.totalorder %v1545_v7, %v13558_v61  ;;  %vm2219_vm8 = vmand %vm2171_vm9, %vm16328_vm13  ;;  %v4449_v43 = vpop.permute.xlu1 %4448 }
 0x71a   : > { %20666 = vst [vmem:[#allocation266_spill] sm:$0xff] %v16362_v41  ;;  %v4592_v8 = vadd.f32 %v4544_v39, %v4304_v59  ;;  %v16374_v26 = vsel %vm2218_vm3, 1.0, %v19536_v52  ;;  %vm1980_vm7 = vcmp.eq.s32.totalorder %v11634_v42, 1  ;;  %v4305_v27 = vmul.f32 %v16352_v45, %v20671_v10  ;;  %vm1836_vm10 = vmand %vm1788_vm1, %vm16367_vm5  ;;  %v20676_v59 = vld [vmem:[#allocation222_spill] sm:$0xff] }
 0x71b   : > { %v10890_v6 = vpack.c.bf16 %v4687_v2, %v4686_v16  ;;  %20670 = vst [vmem:[#allocation268_spill] sm:$0xff] %v16374_v26  ;;  %v4545_v23 = vmul.f32 %v16362_v41, %v4447_v55  ;;  %v16384_v16 = vsel %vm16357_vm11, 1.0, %v19536_v52  ;;  %vm2172_vm15 = vcmp.eq.s32.totalorder %v11634_v42, 2  ;;  %vm2028_vm0 = vmand %vm1980_vm7, %vm16367_vm5 }
 0x71c   : > { %v4688_v61 = vadd.f32 %v4640_v62, %v4592_v8  ;;  %20672 = vst [vmem:[#allocation147_spill] sm:$0xff] %v16384_v16  ;;  %v16390_v49 = vsel %vm2027_vm2, 1.0, %v19536_v52  ;;  %v4641_v7 = vmul.f32 %v16374_v26, %v20674_v13  ;;  %v16397_v47 = vsel %vm2219_vm8, 1.0, %v19536_v52  ;;  %vm2220_vm4 = vmand %vm2172_vm15, %vm16367_vm5  ;;  %v20679_v62 = vld [vmem:[#allocation226_spill] sm:$0xff] }
 0x71d   : > { %10891 = vmatprep.subr.bf16.mxu0 %v10890_v6  ;;  %20673 = vst [vmem:[#allocation269_spill] sm:$0xff] %v16390_v49  ;;  %v4593_v50 = vadd.f32 %v4545_v23, %v4305_v27  ;;  %20675 = vst [vmem:[#allocation110_spill] sm:$0xff] %v16397_v47  ;;  %v4306_v2 = vmul.f32 %v16384_v16, %v20676_v59  ;;  %v4546_v39 = vmul.f32 %v16390_v49, %v4449_v43  ;;  %v20681_v27 = vld [vmem:[#allocation250_spill] sm:$0xff]  ;;  %vm20688_vm6 = vcmask 523264  }
 0x71e   : > { %10893 = vmatpush3.bf16.msra.mxu0 %v10890_v6  ;;  %v16405_v5 = vsel %vm1836_vm10, 1.0, %v19536_v52  ;;  %v16408_v32 = vsel %vm2028_vm0, 1.0, %v19536_v52  ;;  %v4642_v8 = vmul.f32 %v16397_v47, %v20679_v62  ;;  %v16413_v10 = vsel %vm2220_vm4, 1.0, %v19536_v52  ;;  %v4451_v57 = vpop.permute.xlu0 %4450  ;;  %vm20691_vm13 = vmmov %vm20688_vm6 }
 0x71f   : > { %v4689_v42 = vadd.f32 %v4641_v7, %v4593_v50  ;;  %20677 = vst [vmem:[#allocation201_spill] sm:$0xff] %v16405_v5  ;;  %20678 = vst [vmem:[#allocation273_spill] sm:$0xff] %v16408_v32  ;;  %v4594_v6 = vadd.f32 %v4546_v39, %v4306_v2  ;;  %v4307_v23 = vmul.f32 %v16405_v5, %v20681_v27  ;;  %v20682_v50 = vld [vmem:[#allocation124_spill] sm:$0xff]  ;;  %v20684_v39 = vld [vmem:[#allocation86_spill] sm:$0xff]  ;;  %vm20706_vm2 = vcmask 392384  }
 0x720   : > { %20680 = vst [vmem:[#allocation149_spill] sm:$0xff] %v16413_v10  ;;  %v4547_v7 = vmul.f32 %v16408_v32, %v4451_v57  ;;  %v4643_v43 = vmul.f32 %v16413_v10, %v20682_v50  ;;  %v9512_v27 = vld [vmem:[%s11791_s11 + $0x90] sm:$0xff]  ;;  %v9528_v32 = vld [vmem:[%s11859_s18 + $0xc0] sm:$0xff]  ;;  %v9529_v5 = vld [vmem:[%s11859_s18 + $0xc8] sm:$0xff]  ;;  %vm20708_vm8 = vcmask 195584  }
 0x721   : > { %v10894_v55 = vpack.c.bf16 %v4689_v42, %v4688_v61  ;;  %v4690_v13 = vadd.f32 %v4642_v8, %v4594_v6  ;;  %v20683_v42 = vld [vmem:[#allocation164_spill] sm:$0xff]  ;;  %v9511_v8 = vld [vmem:[%s11791_s11 + $0x88] sm:$0xff]  ;;  %v9513_v6 = vld [vmem:[%s11791_s11 + $0x98] sm:$0xff] }
 0x722   : > { %v4595_v61 = vadd.f32 %v4547_v7, %v4307_v23  ;;  %v3762_v62 = vmul.f32 %v20684_v39, %v20683_v42  ;;  %v10902_v57 = vpack.c.bf16 %v9513_v6, %v9511_v8  ;;  %v9517_v7 = vld [vmem:[%s11791_s11 + $0xb8] sm:$0xff]  ;;  %v9520_v8 = vld [vmem:[%s11791_s11 + $0xd0] sm:$0xff]  ;;  %vm20695_vm12 = vmmov %vm20688_vm6 }
 0x723   : > { %10895 = vmatprep.subr.bf16.mxu0 %v10894_v55  ;;  %v9521_v42 = vld [vmem:[%s11791_s11 + $0xd8] sm:$0xff]  ;;  %vm20701_vm9 = vmmov %vm20688_vm6 }
 0x724   : > { %10897 = vmatpush3.bf16.msra.mxu0 %v10894_v55  ;;  %v4691_v59 = vadd.f32 %v4643_v43, %v4595_v61  ;;  %v9510_v55 = vld [vmem:[%s11791_s11 + $0x80] sm:$0xff]  ;;  %v9516_v61 = vld [vmem:[%s11791_s11 + $0xb0] sm:$0xff]  ;;  %vm20707_vm7 = vmmov %vm20706_vm2 }
 0x725   : > { %v10904_v23 = vpack.c.bf16 %v9512_v27, %v9510_v55  ;;  %v9514_v43 = vld [vmem:[%s11791_s11 + $0xa0] sm:$0xff]  ;;  %v9523_v55 = vld [vmem:[%s11791_s11 + $0xe8] sm:$0xff]  ;;  %vm20711_vm15 = vmmov %vm20708_vm8 }
 0x726   : > { %v10898_v2 = vpack.c.bf16 %v4691_v59, %v4690_v13  ;;  %v9515_v13 = vld [vmem:[%s11791_s11 + $0xa8] sm:$0xff]  ;;  %v10908_v59 = vpack.c.bf16 %v9516_v61, %v9514_v43  ;;  %vm20712_vm0 = vmmov %vm20708_vm8 }
 0x727   : > { %v10906_v50 = vpack.c.bf16 %v9517_v7, %v9515_v13  ;;  %v9524_v13 = vld [vmem:[%s11791_s11 + $0xf0] sm:$0xff]  ;;  %vm20713_vm4 = vmmov %vm20712_vm0 }
 0x728   : > { %10899 = vmatprep.subr.bf16.mxu0 %v10898_v2 }
 0x729   : > { %10901 = vmatpush3.bf16.msra.mxu0 %v10898_v2  ;;  %v9519_v2 = vld [vmem:[%s11791_s11 + $0xc8] sm:$0xff] }
 0x72a   : > { %10903 = vmatprep.subr.bf16.mxu0 %v10902_v57  ;;  %v10910_v39 = vpack.c.bf16 %v9521_v42, %v9519_v2  ;;  %v9525_v57 = vld [vmem:[%s11791_s11 + $0xf8] sm:$0xff] }
 0x72b   : > { %v10914_v27 = vpack.c.bf16 %v9525_v57, %v9523_v55 }
 0x72c   : > { %10452 = vmatmul.mubr.f32.vlgmr.msra.gmra.mrb[34].mxu0 %v3762_v62  ;;  %v9518_v62 = vld [vmem:[%s11791_s11 + $0xc0] sm:$0xff] }
 0x72d   : > { %4947 = vmatprep.mubr.f32.mxu0 %v19536_v52  ;;  %10905 = vmatpush1.bf16.msra.mxu0 %v10904_v23  ;;  %v10912_v6 = vpack.c.bf16 %v9520_v8, %v9518_v62  ;;  %v9522_v23 = vld [vmem:[%s11791_s11 + $0xe0] sm:$0xff] }
 0x72e   : > { %10907 = vmatprep.subr.bf16.mxu0 %v10906_v50  ;;  %v10916_v7 = vpack.c.bf16 %v9524_v13, %v9522_v23  ;;  %v20685_v50 = vmov 0.0|0.0   ;;  %v9508_v62 = vld [vmem:[%s11907_s24 + $0x1] ss:$0 sm:$0xff]  ;;  %v9509_v23 = vld [vmem:[%s11907_s24 + $0x2] ss:$0 sm:$0xff] }
 0x731   : > { %10909 = vmatpush1.bf16.msra.mxu0 %v10908_v59 }
 0x732   : > { %10911 = vmatprep.subr.bf16.mxu0 %v10910_v39 }
 0x735   : > { %10913 = vmatpush1.bf16.msra.mxu0 %v10912_v6 }
 0x736   : > { %10915 = vmatprep.subr.bf16.mxu0 %v10914_v27 }
 0x739   : > { %10917 = vmatpush1.bf16.msra.mxu0 %v10916_v7 }
 0x73a   : > { %10918 = vmatprep.subr.bf16.mxu0 %v20685_v50 }
 0x7c5   : > { %v10028_v43 = vpop.f32.mrb[30].mxu0 }
 0x7c6   : > { %v10029_v61 = vpop.f32.mrb[31].mxu0 }
 0x7c7   : > { %v10030_v59 = vadd.f32 %v10029_v61, %v10028_v43  ;;  %v10919_v61 = vpack.c.bf16 %v9529_v5, %v9528_v32  ;;  %v9532_v5 = vld [vmem:[%s11859_s18 + $0xe0] sm:$0xff]  ;;  %v9533_v32 = vld [vmem:[%s11859_s18 + $0xe8] sm:$0xff] }
 0x7c9   : > { %v10031_v2 = vpop.f32.mrb[32].mxu0 }
 0x7ca   : > { %v10032_v42 = vpop.f32.mrb[33].mxu0 }
 0x7cb   : > { %v10033_v39 = vadd.f32 %v10032_v42, %v10031_v2  ;;  %v20686_v2 = vld [vmem:[#allocation3_spill] sm:$0xff] }
 0x7ff   : > { %v10453_v8 = vpop.f32.mrb[34].mxu0 }
 0x800   : > { %v4839_v6 = vadd.f32 %v10453_v8, %v10033_v39  ;;  %v4833_v55 = vpop.f32.mrb[35].mxu0  ;;  %v9530_v39 = vld [vmem:[%s11859_s18 + $0xd0] sm:$0xff]  ;;  %v9531_v8 = vld [vmem:[%s11859_s18 + $0xd8] sm:$0xff] }
 0x801   : > { %v4834_v57 = vadd.f32 %v10030_v59, %v4833_v55  ;;  %v10922_v59 = vpack.c.bf16 %v9531_v8, %v9530_v39  ;;  %v9534_v55 = vld [vmem:[%s11859_s18 + $0xf0] sm:$0xff]  ;;  %v9541_v39 = vld [vmem:[%s11859_s18 + $0x128] sm:$0xff] }
 0x802   : > { %v4847_v27 = vmul.f32 %v9508_v62, %v4839_v6  ;;  %v10925_v6 = vpack.c.bf16 %v9533_v32, %v9532_v5  ;;  %v9544_v32 = vld [vmem:[%s11859_s18 + $0x140] sm:$0xff] }
 0x803   : > { %v4846_v13 = vmul.f32 %v9508_v62, %v4834_v57  ;;  %v20689_v62 = vld [vmem:[#allocation4_spill] sm:$0xff]  ;;  %v9535_v57 = vld [vmem:[%s11859_s18 + $0xf8] sm:$0xff] }
 0x804   : > { %v4853_v7 = vadd.f32 %v9509_v23, %v4847_v27  ;;  %v9537_v27 = vld [vmem:[%s11859_s18 + $0x108] sm:$0xff] }
 0x805   : > { %v4852_v10 = vadd.f32 %v9509_v23, %v4846_v13  ;;  %v9536_v23 = vld [vmem:[%s11859_s18 + $0x100] sm:$0xff] }
 0x806   : > { %v4855_v47 = vmax.f32 %v4853_v7, 0.0  ;;  %v10931_v13 = vpack.c.bf16 %v9537_v27, %v9536_v23  ;;  %v9538_v7 = vld [vmem:[%s11859_s18 + $0x110] sm:$0xff]  ;;  %v9548_v27 = vld [vmem:[%s11859_s18 + $0x160] sm:$0xff] }
 0x807   : > { %v4854_v43 = vmax.f32 %v4852_v10, 0.0 }
 0x808   : > { %v16453_v10 = vadd.f32 %v4855_v47, %v20689_v62  ;;  %v10928_v47 = vpack.c.bf16 %v9535_v57, %v9534_v55  ;;  %v9543_v62 = vld [vmem:[%s11859_s18 + $0x138] sm:$0xff]  ;;  %v9546_v57 = vld [vmem:[%s11859_s18 + $0x150] sm:$0xff] }
 0x809   : > { %v16445_v42 = vadd.f32 %v4854_v43, %v20686_v2  ;;  %v9539_v43 = vld [vmem:[%s11859_s18 + $0x118] sm:$0xff]  ;;  %v9540_v2 = vld [vmem:[%s11859_s18 + $0x120] sm:$0xff] }
 0x80a   : > { %20690 = vst [vmem:[#allocation140_spill] sm:$0xff] %v16453_v10  ;;  %v10937_v8 = vpack.c.bf16 %v9541_v39, %v9540_v2  ;;  %v20692_v39 = vmov 1.0|1.0  }
 0x80b   : > { %20687 = vst [vmem:[#allocation2_spill] sm:$0xff] %v16445_v42  ;;  %9526 = vmatmul.mubr.msk.f32.vlgmr.msra.gmra.mrb[36].mxu0 %vm20688_vm6, %v16445_v42  ;;  %vm20714_vm6 = vmmov %vm20712_vm0 }
 0x80c   : > { %4953 = vmatprep.mubr.f32.mxu0 %v19536_v52  ;;  %10920 = vmatpush1.bf16.msra.mxu0 %v10919_v61  ;;  %v10934_v61 = vpack.c.bf16 %v9539_v43, %v9538_v7  ;;  %v9550_v43 = vld [vmem:[%s11859_s18 + $0x170] sm:$0xff] }
 0x80d   : > { %10921 = vmatprep.subr.bf16.mxu0 %v20685_v50 }
 0x80f   : > { %9527 = vmatmul.mubr.msk.f32.gmra.mrb[38].mxu0 %vm20691_vm13, %v16453_v10  ;;  %vm20715_vm13 = vmmov %vm20712_vm0 }
 0x810   : > { %10923 = vmatpush1.bf16.msra.mxu0 %v10922_v59  ;;  %v9542_v59 = vld [vmem:[%s11859_s18 + $0x130] sm:$0xff] }
 0x811   : > { %10924 = vmatprep.subr.bf16.mxu0 %v20685_v50  ;;  %v10940_v5 = vpack.c.bf16 %v9543_v62, %v9542_v59 }
 0x814   : > { %10926 = vmatpush1.bf16.msra.mxu0 %v10925_v6  ;;  %v9545_v6 = vld [vmem:[%s11859_s18 + $0x148] sm:$0xff] }
 0x815   : > { %10927 = vmatprep.subr.bf16.mxu0 %v20685_v50  ;;  %v10943_v55 = vpack.c.bf16 %v9545_v6, %v9544_v32  ;;  %v20696_v32 = vld [vmem:[#allocation7_spill] sm:$0xff] }
 0x816   : > { %vm20697_vm3 = vnez %v20696_v32 }
 0x818   : > { %10929 = vmatpush1.bf16.msra.mxu0 %v10928_v47  ;;  %v9547_v47 = vld [vmem:[%s11859_s18 + $0x158] sm:$0xff] }
 0x819   : > { %10930 = vmatprep.subr.bf16.mxu0 %v20685_v50  ;;  %v10946_v23 = vpack.c.bf16 %v9547_v47, %v9546_v57  ;;  %v20698_v57 = vmov 1.0   ;;  %v20699_v47 = vld [vmem:[#allocation8_spill] sm:$0xff] }
 0x81a   : > { %vm20700_vm11 = vnez %v20699_v47 }
 0x81c   : > { %10932 = vmatpush1.bf16.msra.mxu0 %v10931_v13  ;;  %v9549_v13 = vld [vmem:[%s11859_s18 + $0x168] sm:$0xff] }
 0x81d   : > { %10933 = vmatprep.subr.bf16.mxu0 %v20685_v50  ;;  %v10949_v7 = vpack.c.bf16 %v9549_v13, %v9548_v27  ;;  %v20702_v27 = vld [vmem:[#allocation10_spill] sm:$0xff] }
 0x81e   : > { %vm20703_vm1 = vnez %v20702_v27  ;;  %v20704_v13 = vld [vmem:[#allocation6_spill] sm:$0xff] }
 0x81f   : > { %vm20705_vm5 = vnez %v20704_v13 }
 0x820   : > { %10935 = vmatpush1.bf16.msra.mxu0 %v10934_v61  ;;  %v9551_v61 = vld [vmem:[%s11859_s18 + $0x178] sm:$0xff] }
 0x821   : > { %10936 = vmatprep.subr.bf16.mxu0 %v20685_v50  ;;  %v10952_v2 = vpack.c.bf16 %v9551_v61, %v9550_v43 }
 0x824   : > { %10938 = vmatpush1.bf16.msra.mxu0 %v10937_v8  ;;  %v20693_v8 = vld [vmem:[#allocation5_spill] sm:$0xff] }
 0x825   : > { %10939 = vmatprep.subr.bf16.mxu0 %v20685_v50  ;;  %vm20694_vm14 = vnez %v20693_v8 }
 0x828   : > { %10941 = vmatpush1.bf16.msra.mxu0 %v10940_v5 }
 0x829   : > { %10942 = vmatprep.subr.bf16.mxu0 %v20685_v50 }
 0x82c   : > { %10944 = vmatpush1.bf16.msra.mxu0 %v10943_v55 }
 0x82d   : > { %10945 = vmatprep.subr.bf16.mxu0 %v20685_v50 }
 0x830   : > { %10947 = vmatpush1.bf16.msra.mxu0 %v10946_v23 }
 0x831   : > { %10948 = vmatprep.subr.bf16.mxu0 %v20685_v50 }
 0x834   : > { %10950 = vmatpush1.bf16.msra.mxu0 %v10949_v7 }
 0x835   : > { %10951 = vmatprep.subr.bf16.mxu0 %v20685_v50 }
 0x838   : > { %10953 = vmatpush1.bf16.msra.mxu0 %v10952_v2 }
 0x839   : > { %10955 = vmatprep.subr.msk.bf16.mxu0 %vm20694_vm14, %v20692_v39 }
 0x8de   : > { %v16491_v59 = vpop.f32.mrb[36].mxu0 }
 0x8df   : > { %v16493_v62 = vpop.f32.mrb[37].mxu0 }
 0x8e0   : > { %9552 = vmatprep.mubr.msk.f32.mxu0 %vm20695_vm12, %v16493_v62  ;;  %vm20716_vm12 = vmmov %vm20712_vm0 }
 0x8e1   : > { %5056 = vmatmul.mubr.f32.vlgmr.msra.gmra.mrb[40].mxu0 %v16491_v59 }
 0x8e2   : > { %v16498_v5 = vpop.f32.mrb[38].mxu0  ;;  %10957 = vmatpush1.bf16.msk.msra.mxu0 %vm20697_vm3, %v20692_v39 }
 0x8e3   : > { %v16505_v55 = vpop.f32.mrb[39].mxu0  ;;  %9558 = vmatprep.subr.msk.mxu0 %vm20700_vm11, %v20698_v57 }
 0x8e4   : > { %9553 = vmatprep.mubr.msk.f32.mxu0 %vm20701_vm9, %v16505_v55  ;;  %vm20717_vm9 = vmmov %vm20712_vm0 }
 0x8e5   : > { %5061 = vmatmul.mubr.f32.gmra.mrb[42].mxu0 %v16498_v5 }
 0x8e6   : > { %9559 = vmatpush1.msk.msra.mxu0 %vm20703_vm1, %v20698_v57  ;;  %5140 = vmatprep.mubr.f32.mxu0 %v19536_v52 }
 0x8e7   : > { %10959 = vmatprep.subr.msk.bf16.mxu0 %vm20705_vm5, %v20692_v39 }
 0x9b4   : > { %v5057_v7 = vpop.f32.mrb[40].mxu0 }
 0x9b5   : > { %5068 = vrot.lane.b32.xlu1 %v5057_v7, %s11710_s25  ;;  %v5059_v43 = vpop.f32.mrb[41].mxu0  ;;  %v5435_v2 = vsel %vm20706_vm2, %v5057_v7, -inf }
 0x9b6   : > { %v20725_v43 = vld [vmem:[#allocation40_spill] sm:$0xff] }
 0x9b8   : > { %v5062_v61 = vpop.f32.mrb[42].mxu0 }
 0x9b9   : > { %v5436_v6 = vsel %vm20707_vm7, %v5062_v61, -inf  ;;  %5070 = vrot.lane.b32.xlu0 %v5062_v61, %s11710_s25  ;;  %v5064_v23 = vpop.f32.mrb[43].mxu0  ;;  %vm20718_vm7 = vmmov %vm20712_vm0 }
 0x9ba   : > { %v5437_v10 = vmax.f32 %v5435_v2, %v5436_v6  ;;  %v20709_v23 = vld [vmem:[#allocation9_spill] sm:$0xff]  ;;  %v20720_v6 = vld [vmem:[#allocation26_spill] sm:$0xff]  ;;  %v20729_v2 = vld [vmem:[#allocation55_spill] sm:$0xff] }
 0x9bb   : > { %vm20710_vm10 = vnez %v20709_v23 }
 0x9bc   : > { %v5438_v42 = vrot.slane %v5437_v10, 4 }
 0x9be   : > { %v5439_v50 = vmax.f32 %v5437_v10, %v5438_v42 }
 0x9c0   : > { %v5440_v49 = vrot.slane %v5439_v50, 2 }
 0x9c2   : > { %v5441_v16 = vmax.f32 %v5439_v50, %v5440_v49 }
 0x9c4   : > { %v5442_v26 = vrot.slane %v5441_v16, 1 }
 0x9c6   : > { %v5443_v41 = vmax.f32 %v5441_v16, %v5442_v26 }
 0x9c8   : > { %5445 = vrot.lane.b32.xlu1 %v5443_v41, %s11710_s25 }
 0xa27   : > { %v5069_v45 = vpop.permute.xlu1 %5068 }
 0xa28   : > { %9560 = vmatmul.mubr.msk.f32.vlgmr.msra.gmra.mrb[44].mxu0 %vm20708_vm8, %v5069_v45 }
 0xa29   : > { %10961 = vmatpush3.bf16.msk.msra.mxu0 %vm20705_vm5, %v20692_v39  ;;  %5146 = vmatprep.mubr.f32.mxu0 %v19536_v52 }
 0xa2a   : > { %10458 = vmatprep.subr.msk.mxu0 %vm20710_vm10, %v20698_v57 }
 0xa2b   : > { %v5071_v42 = vpop.permute.xlu0 %5070 }
 0xa2c   : > { %9561 = vmatmul.mubr.msk.f32.gmra.mrb[46].mxu0 %vm20711_vm15, %v5071_v42  ;;  %vm20719_vm15 = vmmov %vm20712_vm0 }
 0xa2d   : > { %10459 = vmatpush3.msk.msra.mxu0 %vm20710_vm10, %v20698_v57  ;;  %10460 = vmatprep.mubr.msk.f32.mxu0 %vm20712_vm0, %v5069_v45 }
 0xa2e   : > { %10963 = vmatprep.subr.msk.bf16.mxu0 %vm20694_vm14, %v20692_v39 }
 0xa30   : > { %10461 = vmatmul.mubr.msk.f32.vlgmr.msra.gmra.mrb[48].mxu0 %vm20713_vm4, %v5071_v42  ;;  %vm20721_vm4 = vnez %v20720_v6  ;;  %v20731_v42 = vld [vmem:[#allocation64_spill] sm:$0xff] }
 0xa31   : > { %10965 = vmatpush1.bf16.msk.msra.mxu0 %vm20697_vm3, %v20692_v39  ;;  %5323 = vmatprep.mubr.f32.mxu0 %v19536_v52 }
 0xa32   : > { %9571 = vmatprep.subr.msk.mxu0 %vm20700_vm11, %v20698_v57 }
 0xa35   : > { %9572 = vmatpush1.msk.msra.mxu0 %vm20703_vm1, %v20698_v57 }
 0xa36   : > { %9573 = vmatmul.mubr.msk.f32.vlgmr.msra.gmra.mrb[50].mxu0 %vm20714_vm6, %v5057_v7  ;;  %10967 = vmatprep.subr.msk.bf16.mxu0 %vm20705_vm5, %v20692_v39  ;;  %vm20722_vm6 = vmmov %vm20712_vm0 }
 0xa37   : > { %10969 = vmatpush3.bf16.msk.msra.mxu0 %vm20705_vm5, %v20692_v39  ;;  %5329 = vmatprep.mubr.f32.mxu0 %v19536_v52 }
 0xa38   : > { %10467 = vmatprep.subr.msk.mxu0 %vm20710_vm10, %v20698_v57 }
 0xa3a   : > { %9574 = vmatmul.mubr.msk.f32.gmra.mrb[52].mxu0 %vm20715_vm13, %v5062_v61  ;;  %v5446_v45 = vpop.permute.xlu1 %5445 }
 0xa3b   : > { %10468 = vmatpush3.msk.msra.mxu0 %vm20710_vm10, %v20698_v57  ;;  %10469 = vmatprep.mubr.msk.f32.mxu0 %vm20716_vm12, %v5057_v7  ;;  %v5448_v41 = vadd.f32 %v5446_v45, %v5057_v7  ;;  %v5449_v26 = vadd.f32 %v5446_v45, %v5062_v61  ;;  %v20723_v7 = vld [vmem:[#allocation33_spill] sm:$0xff]  ;;  %vm20726_vm12 = vnez %v20725_v43  ;;  %v20733_v45 = vld [vmem:[#allocation68_spill] sm:$0xff] }
 0xa3c   : > { %10971 = vmatprep.subr.msk.bf16.mxu0 %vm20694_vm14, %v20692_v39  ;;  %vm20724_vm13 = vnez %v20723_v7  ;;  %v20740_v7 = vld [vmem:[#allocation73_spill] sm:$0xff] }
 0xa3d   : > { %v5452_v16 = vmul.f32 0.2, %v5448_v41  ;;  %vm5450_vm2 = vcmp.ge.f32.partialorder %v5448_v41, 0.0  ;;  %v5453_v50 = vmul.f32 0.2, %v5449_v26  ;;  %vm5451_vm8 = vcmp.ge.f32.partialorder %v5449_v26, 0.0 }
 0xa3e   : > { %10470 = vmatmul.mubr.msk.f32.vlgmr.msra.gmra.mrb[54].mxu0 %vm20717_vm9, %v5062_v61  ;;  %v20727_v61 = vld [vmem:[#allocation47_spill] sm:$0xff] }
 0xa3f   : > { %10973 = vmatpush1.bf16.msk.msra.mxu0 %vm20697_vm3, %v20692_v39  ;;  %5526 = vmatprep.mubr.f32.mxu0 %v19536_v52  ;;  %v5454_v49 = vsel %vm5450_vm2, %v5448_v41, %v5452_v16  ;;  %v5455_v10 = vsel %vm5451_vm8, %v5449_v26, %v5453_v50  ;;  %vm20728_vm9 = vnez %v20727_v61  ;;  %vm20730_vm2 = vnez %v20729_v2  ;;  %v20735_v41 = vld [vmem:[#allocation69_spill] sm:$0xff]  ;;  %v20737_v50 = vld [vmem:[#allocation70_spill] sm:$0xff]  ;;  %v20739_v61 = vld [vmem:[#allocation72_spill] sm:$0xff] }
 0xa40   : > { %9584 = vmatprep.subr.msk.mxu0 %vm20700_vm11, %v20698_v57  ;;  %vm20734_vm8 = vnez %v20733_v45 }
 0xa43   : > { %9585 = vmatpush1.msk.msra.mxu0 %vm20703_vm1, %v20698_v57 }
 0xa44   : > { %9586 = vmatmul.mubr.msk.f32.vlgmr.msra.gmra.mrb[56].mxu0 %vm20718_vm7, %v5454_v49  ;;  %10975 = vmatprep.subr.msk.bf16.mxu0 %vm20705_vm5, %v20692_v39  ;;  %vm20732_vm7 = vnez %v20731_v42  ;;  %v20738_v42 = vld [vmem:[#allocation71_spill] sm:$0xff] }
 0xa45   : > { %10977 = vmatpush3.bf16.msk.msra.mxu0 %vm20705_vm5, %v20692_v39  ;;  %5532 = vmatprep.mubr.f32.mxu0 %v19536_v52 }
 0xa46   : > { %10476 = vmatprep.subr.msk.mxu0 %vm20710_vm10, %v20698_v57 }
 0xa48   : > { %9587 = vmatmul.mubr.msk.f32.gmra.mrb[58].mxu0 %vm20719_vm15, %v5455_v10  ;;  %vm20736_vm15 = vnez %v20735_v41 }
 0xa49   : > { %10477 = vmatpush3.msk.msra.mxu0 %vm20710_vm10, %v20698_v57  ;;  %10478 = vmatprep.mubr.msk.f32.mxu0 %vm20712_vm0, %v5454_v49 }
 0xa4a   : > { %11011 = vmatprep.subr.msk.bf16.mxu0 %vm20721_vm4, %v20692_v39 }
 0xa4c   : > { %10479 = vmatmul.mubr.msk.f32.vlgmr.msra.gmra.mrb[60].mxu0 %vm20722_vm6, %v5455_v10 }
 0xa4d   : > { %11013 = vmatpush3.bf16.msk.msra.mxu0 %vm20721_vm4, %v20692_v39 }
 0xa4e   : > { %11015 = vmatprep.subr.msk.bf16.mxu0 %vm20724_vm13, %v20692_v39 }
 0xa51   : > { %11017 = vmatpush3.bf16.msk.msra.mxu0 %vm20724_vm13, %v20692_v39 }
 0xa52   : > { %11019 = vmatprep.subr.msk.bf16.mxu0 %vm20726_vm12, %v20692_v39 }
 0xa55   : > { %11021 = vmatpush3.bf16.msk.msra.mxu0 %vm20726_vm12, %v20692_v39 }
 0xa56   : > { %11023 = vmatprep.subr.msk.bf16.mxu0 %vm20728_vm9, %v20692_v39 }
 0xa59   : > { %11025 = vmatpush3.bf16.msk.msra.mxu0 %vm20728_vm9, %v20692_v39 }
 0xa5a   : > { %11027 = vmatprep.subr.msk.bf16.mxu0 %vm20730_vm2, %v20692_v39 }
 0xa5d   : > { %11029 = vmatpush3.bf16.msk.msra.mxu0 %vm20730_vm2, %v20692_v39 }
 0xa5e   : > { %11031 = vmatprep.subr.msk.bf16.mxu0 %vm20732_vm7, %v20692_v39 }
 0xa61   : > { %11033 = vmatpush3.bf16.msk.msra.mxu0 %vm20732_vm7, %v20692_v39 }
 0xa62   : > { %11035 = vmatprep.subr.msk.bf16.mxu0 %vm20734_vm8, %v20692_v39 }
 0xa65   : > { %11037 = vmatpush3.bf16.msk.msra.mxu0 %vm20734_vm8, %v20692_v39 }
 0xa66   : > { %11039 = vmatprep.subr.msk.bf16.mxu0 %vm20736_vm15, %v20692_v39 }
 0xa69   : > { %11041 = vmatpush3.bf16.msk.msra.mxu0 %vm20736_vm15, %v20692_v39 }
 0xa6a   : > { %11047 = vmatprep.subr.msk.bf16.mxu0 %vm20705_vm5, %v20692_v39 }
 0xafb   : > { %v5142_v26 = vpop.f32.mrb[44].mxu0 }
 0xafc   : > { %v5144_v16 = vpop.f32.mrb[45].mxu0  ;;  %v5228_v10 = vmul.f32 %v20737_v50, %v5142_v26 }
 0xafd   : > { %v5229_v43 = vmul.f32 %v20739_v61, %v5144_v16 }
 0xaff   : > { %v5148_v49 = vpop.f32.mrb[46].mxu0 }
 0xb00   : > { %v5231_v45 = vmul.f32 %v20738_v42, %v5148_v49  ;;  %v5150_v2 = vpop.f32.mrb[47].mxu0 }
 0xb01   : > { %v5232_v6 = vmul.f32 %v20740_v7, %v5150_v2 }
 0xb02   : > { %v5234_v33 = vadd.f32 %v5231_v45, %v5228_v10 }
 0xb03   : > { %v5241_v40 = vadd.f32 %v5232_v6, %v5229_v43  ;;  %v10462_v41 = vpop.f32.mrb[48].mxu0 }
 0xb04   : > { %v5235_v17 = vrot.slane %v5234_v33, 4  ;;  %v5233_v51 = vmul.f32 %v10462_v41, %v20741_v21  ;;  %v5219_v54 = vpop.f32.mrb[49].mxu0 }
 0xb05   : > { %v5242_v11 = vrot.slane %v5241_v40, 4  ;;  %v5230_v48 = vmul.f32 %v20742_v46, %v5219_v54 }
 0xb06   : > { %v5236_v14 = vadd.f32 %v5235_v17, %v5234_v33 }
 0xb07   : > { %v5243_v56 = vadd.f32 %v5242_v11, %v5241_v40  ;;  %v5248_v26 = vadd.f32 %v5233_v51, %v5230_v48 }
 0xb08   : > { %v5237_v50 = vrot.slane %v5236_v14, 2 }
 0xb09   : > { %v5249_v49 = vrot.slane %v5248_v26, 4  ;;  %v5325_v42 = vpop.f32.mrb[50].mxu0  ;;  %v5244_v25 = vrot.slane %v5243_v56, 2 }
 0xb0a   : > { %v5238_v16 = vadd.f32 %v5237_v50, %v5236_v14  ;;  %v5327_v61 = vpop.f32.mrb[51].mxu0 }
 0xb0b   : > { %v5250_v2 = vadd.f32 %v5249_v49, %v5248_v26  ;;  %v5245_v45 = vadd.f32 %v5244_v25, %v5243_v56 }
 0xb0c   : > { %v5239_v6 = vrot.slane %v5238_v16, 1 }
 0xb0d   : > { %v5246_v43 = vrot.slane %v5245_v45, 1  ;;  %v5331_v10 = vpop.f32.mrb[52].mxu0  ;;  %v5251_v7 = vrot.slane %v5250_v2, 2 }
 0xb0e   : > { %v5240_v41 = vadd.f32 %v5239_v6, %v5238_v16  ;;  %v5333_v21 = vpop.f32.mrb[53].mxu0  ;;  %v20743_v16 = vld [vmem:[#allocation76_spill] sm:$0xff] }
 0xb0f   : > { %v5247_v19 = vadd.f32 %v5246_v43, %v5245_v45  ;;  %v5252_v36 = vadd.f32 %v5251_v7, %v5250_v2 }
 0xb10   : > { %v5326_v54 = vadd.f32 %v5325_v42, %v5240_v41  ;;  %v5332_v17 = vadd.f32 %v5331_v10, %v5240_v41 }
 0xb11   : > { %v5328_v11 = vadd.f32 %v5327_v61, %v5247_v19  ;;  %v5334_v48 = vadd.f32 %v5333_v21, %v5247_v19  ;;  %v5253_v51 = vrot.slane %v5252_v36, 1  ;;  %v10471_v40 = vpop.f32.mrb[54].mxu0  ;;  %v20744_v61 = vld [vmem:[#allocation77_spill] sm:$0xff] }
 0xb12   : > { %vm5411_vm0 = vcmp.ge.f32.partialorder %v5326_v54, 0.0  ;;  %v5417_v33 = vmul.f32 0.2, %v5326_v54  ;;  %v5420_v50 = vmul.f32 0.2, %v5332_v17  ;;  %vm5414_vm15 = vcmp.ge.f32.partialorder %v5332_v17, 0.0 }
 0xb13   : > { %vm5412_vm6 = vcmp.ge.f32.partialorder %v5328_v11, 0.0  ;;  %v5418_v14 = vmul.f32 0.2, %v5328_v11  ;;  %v5421_v25 = vmul.f32 0.2, %v5334_v48  ;;  %v5254_v56 = vadd.f32 %v5253_v51, %v5252_v36  ;;  %v5402_v26 = vpop.f32.mrb[55].mxu0 }
 0xb14   : > { %v5423_v49 = vsel %vm5411_vm0, %v5326_v54, %v5417_v33  ;;  %vm5415_vm8 = vcmp.ge.f32.partialorder %v5334_v48, 0.0  ;;  %v5426_v6 = vsel %vm5414_vm15, %v5332_v17, %v5420_v50  ;;  %v20745_v51 = vld [vmem:[#allocation78_spill] sm:$0xff]  ;;  %v20747_v50 = vld [vmem:[#allocation80_spill] sm:$0xff] }
 0xb15   : > { %v5429_v45 = vadd.f32 %v5423_v49, %v20743_v16  ;;  %v5424_v7 = vsel %vm5412_vm6, %v5328_v11, %v5418_v14  ;;  %v5408_v42 = vadd.f32 %v10471_v40, %v5254_v56  ;;  %v5403_v2 = vadd.f32 %v5402_v26, %v5254_v56  ;;  %v20746_v49 = vld [vmem:[#allocation79_spill] sm:$0xff] }
 0xb16   : > { %v5430_v19 = vadd.f32 %v5424_v7, %v20744_v61  ;;  %v5427_v41 = vsel %vm5415_vm8, %v5334_v48, %v5421_v25  ;;  %v5432_v54 = vadd.f32 %v5426_v6, %v20745_v51  ;;  %vm20763_vm6 = vcmask 130048  }
 0xb17   : > { %v5528_v21 = vpop.f32.mrb[56].mxu0  ;;  %vm5416_vm7 = vcmp.ge.f32.partialorder %v5408_v42, 0.0  ;;  %v5422_v43 = vmul.f32 0.2, %v5408_v42  ;;  %v5419_v10 = vmul.f32 0.2, %v5403_v2  ;;  %v5433_v11 = vadd.f32 %v5427_v41, %v20746_v49 }
 0xb18   : > { %vm5413_vm2 = vcmp.ge.f32.partialorder %v5403_v2, 0.0  ;;  %v5614_v46 = vsub.f32 %v5429_v45, %v5528_v21  ;;  %v5530_v58 = vpop.f32.mrb[57].mxu0 }
 0xb19   : > { %v5615_v36 = vsub.f32 %v5430_v19, %v5530_v58  ;;  %v5428_v40 = vsel %vm5416_vm7, %v5408_v42, %v5422_v43  ;;  %v5425_v7 = vsel %vm5413_vm2, %v5403_v2, %v5419_v10  ;;  %v20748_v58 = vld [vmem:[#allocation81_spill] sm:$0xff]  ;;  %vm20755_vm2 = vcmask 195584  }
 0xb1a   : > { %v5620_v33 = vmul.f32 1.442695, %v5614_v46  ;;  %v5434_v61 = vadd.f32 %v5428_v40, %v20747_v50  ;;  %v5431_v19 = vadd.f32 %v5425_v7, %v20748_v58  ;;  %vm20756_vm7 = vmmov %vm20755_vm2 }
 0xb1b   : > { %v5534_v53 = vpop.f32.mrb[58].mxu0  ;;  %v5622_v14 = vmul.f32 1.442695, %v5615_v36  ;;  %vm20758_vm8 = vmmov %vm20755_vm2 }
 0xb1c   : > { %v5617_v56 = vsub.f32 %v5432_v54, %v5534_v53  ;;  %v5536_v26 = vpop.f32.mrb[59].mxu0  ;;  %v20754_v54 = vpack.c.bf16 %v16505_v55, %v16493_v62  ;;  %vm20761_vm0 = vmmov %vm20755_vm2 }
 0xb1d   : > { %v5618_v17 = vsub.f32 %v5433_v11, %v5536_v26  ;;  %11666 = vpow2.f32 %v5622_v14 }
 0xb1e   : > { %11668 = vpow2.f32 %v5620_v33  ;;  %v5626_v48 = vmul.f32 1.442695, %v5617_v56 }
 0xb1f   : > { %v5628_v25 = vmul.f32 1.442695, %v5618_v17  ;;  %v10480_v45 = vpop.f32.mrb[60].mxu0 }
 0xb20   : > { %v5619_v21 = vsub.f32 %v5434_v61, %v10480_v45  ;;  %v5605_v46 = vpop.f32.mrb[61].mxu0  ;;  %v20757_v45 = vpack.c.bf16 %v16498_v5, %v16491_v59  ;;  %v20764_v59 = vld [vmem:[#allocation16_spill] sm:$0xff]  ;;  %v20766_v5 = vld [vmem:[#allocation19_spill] sm:$0xff] }
 0xb21   : > { %11670 = vpow2.f32 %v5628_v25  ;;  %v5616_v6 = vsub.f32 %v5431_v19, %v5605_v46  ;;  %v20759_v19 = vld [vmem:[#allocation15_spill] sm:$0xff]  ;;  %v20768_v46 = vld [vmem:[#allocation88_spill] sm:$0xff] }
 0xb22   : > { %v5630_v41 = vmul.f32 1.442695, %v5619_v21  ;;  %11672 = vpow2.f32 %v5626_v48  ;;  %vm20760_vm15 = vnez %v20759_v19  ;;  %v20762_v21 = vld [vmem:[#allocation87_spill] sm:$0xff]  ;;  %v20801_v19 = vld [vmem:[#allocation60_spill] sm:$0xff] }
 0xb23   : > { %v5624_v42 = vmul.f32 1.442695, %v5616_v6  ;;  %v20770_v6 = vld [vmem:[#allocation22_spill] sm:$0xff] }
 0xb25   : > { %11674 = vpow2.f32 %v5624_v42  ;;  %v20774_v42 = vld [vmem:[#allocation89_spill] sm:$0xff] }
 0xb26   : > { %11676 = vpow2.f32 %v5630_v41  ;;  %v20772_v41 = vld [vmem:[#allocation23_spill] sm:$0xff] }
 0xb27   : > { %v16664_v53 = vpop.eup %11666 }
 0xb28   : > { %v16666_v2 = vpop.eup %11668  ;;  %5696 = vmatprep.mubr.f32.mxu1 %v16664_v53 }
 0xb29   : > { %20749 = vst [vmem:[#allocation168_spill] sm:$0xff] %v16666_v2  ;;  %5697 = vmatmul.mubr.f32.vlgmr.msra.gmra.mrb[112].mxu1 %v16666_v2 }
 0xb2a   : > { %11045 = vmatpush1.bf16.msk.msra.mxu1 %vm20697_vm3, %v20692_v39 }
 0xb2b   : > { %v16670_v43 = vpop.eup %11670  ;;  %9645 = vmatprep.subr.msk.mxu1 %vm20700_vm11, %v20698_v57 }
 0xb2c   : > { %20750 = vst [vmem:[#allocation152_spill] sm:$0xff] %v16670_v43  ;;  %5701 = vmatprep.mubr.f32.mxu1 %v16670_v43  ;;  %v16679_v61 = vpop.eup %11672 }
 0xb2d   : > { %20751 = vst [vmem:[#allocation27_spill] sm:$0xff] %v16679_v61  ;;  %5702 = vmatmul.mubr.f32.gmra.mrb[114].mxu1 %v16679_v61 }
 0xb2e   : > { %9646 = vmatpush1.msk.msra.mxu1 %vm20703_vm1, %v20698_v57  ;;  %5854 = vmatprep.mubr.f32.mxu1 %v19536_v52 }
 0xb2f   : > { %v16682_v10 = vpop.eup %11674  ;;  %11051 = vmatprep.subr.bf16.mxu1 %v20754_v54  ;;  %v20775_v54 = vld [vmem:[#allocation29_spill] sm:$0xff] }
 0xb30   : > { %20752 = vst [vmem:[#allocation215_spill] sm:$0xff] %v16682_v10  ;;  %v16688_v36 = vpop.eup %11676  ;;  %10513 = vmatprep.mubr.f32.mxu0 %v16682_v10 }
 0xb31   : > { %20753 = vst [vmem:[#allocation210_spill] sm:$0xff] %v16688_v36  ;;  %10514 = vmatmul.mubr.f32.vlgmr.msra.gmra.mrb[62].mxu0 %v16688_v36 }
 0xb32   : > { %11049 = vmatpush3.bf16.msk.msra.mxu0 %vm20705_vm5, %v20692_v39 }
 0xb33   : > { %10520 = vmatprep.subr.msk.mxu0 %vm20710_vm10, %v20698_v57 }
 0xb36   : > { %10521 = vmatpush3.msk.msra.mxu0 %vm20710_vm10, %v20698_v57 }
 0xbfc   : > { %v10099_v33 = vpop.f32.mrb[112].mxu1 }
 0xbfd   : > { %v10100_v11 = vpop.f32.mrb[113].mxu1 }
 0xbfe   : > { %v10101_v62 = vadd.f32 %v10100_v11, %v10099_v33  ;;  %v20777_v33 = vld [vmem:[#allocation30_spill] sm:$0xff] }
 0xbff   : > { %v20779_v11 = vld [vmem:[#allocation90_spill] sm:$0xff] }
 0xc00   : > { %v10102_v55 = vpop.f32.mrb[114].mxu1 }
 0xc01   : > { %v10103_v40 = vpop.f32.mrb[115].mxu1 }
 0xc02   : > { %v10104_v14 = vadd.f32 %v10103_v40, %v10102_v55  ;;  %v20783_v55 = vld [vmem:[#allocation37_spill] sm:$0xff]  ;;  %v20785_v40 = vld [vmem:[#allocation91_spill] sm:$0xff] }
 0xc04   : > { %v10515_v56 = vpop.f32.mrb[62].mxu0 }
 0xc05   : > { %v5779_v26 = vadd.f32 %v10515_v56, %v10104_v14  ;;  %v5773_v7 = vpop.f32.mrb[63].mxu0  ;;  %v20786_v14 = vld [vmem:[#allocation43_spill] sm:$0xff]  ;;  %v20788_v56 = vld [vmem:[#allocation44_spill] sm:$0xff] }
 0xc06   : > { %v5774_v17 = vadd.f32 %v10101_v62, %v5773_v7  ;;  %v20781_v62 = vld [vmem:[#allocation36_spill] sm:$0xff]  ;;  %v20792_v7 = vld [vmem:[#allocation50_spill] sm:$0xff] }
 0xc08   : > { %11678 = vrcp.f32 %v5774_v17  ;;  %v20794_v17 = vld [vmem:[#allocation52_spill] sm:$0xff] }
 0xc09   : > { %11680 = vrcp.f32 %v5779_v26  ;;  %v20790_v26 = vld [vmem:[#allocation51_spill] sm:$0xff] }
 0xc12   : > { %v11679_v48 = vpop.eup %11678 }
 0xc13   : > { %v11681_v25 = vpop.eup %11680  ;;  %9647 = vmatmul.mubr.msk.f32.vlgmr.msra.gmra.mrb[116].mxu1 %vm20755_vm2, %v11679_v48  ;;  %10522 = vmatprep.mubr.msk.f32.mxu0 %vm20756_vm7, %v11679_v48  ;;  %vm20765_vm2 = vnez %v20764_v59  ;;  %vm20767_vm7 = vnez %v20766_v5  ;;  %v20796_v48 = vld [vmem:[#allocation59_spill] sm:$0xff] }
 0xc14   : > { %11053 = vmatpush1.bf16.msra.mxu1 %v20757_v45  ;;  %10523 = vmatmul.mubr.msk.f32.vlgmr.msra.gmra.mrb[64].mxu0 %vm20758_vm8, %v11681_v25  ;;  %vm20769_vm8 = vmmov %vm20763_vm6  ;;  %v20799_v45 = vld [vmem:[#allocation61_spill] sm:$0xff]  ;;  %v20803_v59 = vld [vmem:[#allocation67_spill] sm:$0xff] }
 0xc15   : > { %5860 = vmatprep.mubr.f32.mxu1 %v19536_v52  ;;  %11195 = vmatprep.subr.msk.bf16.mxu1 %vm20760_vm15, %v20692_v39  ;;  %vm20771_vm15 = vnez %v20770_v6  ;;  %v20805_v5 = vld [vmem:[#allocation11_spill] sm:$0xff]  ;;  %v20807_v6 = vld [vmem:[#allocation12_spill] sm:$0xff] }
 0xc17   : > { %9648 = vmatmul.mubr.msk.f32.gmra.mrb[118].mxu1 %vm20761_vm0, %v11681_v25  ;;  %vm20773_vm0 = vnez %v20772_v41  ;;  %v20797_v25 = vld [vmem:[#allocation58_spill] sm:$0xff]  ;;  %v20809_v41 = vld [vmem:[#allocation13_spill] sm:$0xff] }
 0xc18   : > { %6012 = vmatprep.mubr.f32.mxu1 %v19536_v52 }
 0xc1b   : > { %9654 = vmatmul.mubr.msk.f32.vlgmr.msra.gmra.mrb[120].mxu1 %vm20763_vm6, %v20762_v21 }
 0xc1c   : > { %6018 = vmatprep.mubr.f32.mxu1 %v19536_v52  ;;  %11197 = vmatpush3.bf16.msk.msra.mxu1 %vm20765_vm2, %v20692_v39  ;;  %vm20776_vm2 = vnez %v20775_v54  ;;  %v20811_v54 = vld [vmem:[#allocation14_spill] sm:$0xff] }
 0xc1d   : > { %11199 = vmatprep.subr.msk.bf16.mxu1 %vm20767_vm7, %v20692_v39  ;;  %vm20778_vm7 = vnez %v20777_v33  ;;  %v20813_v33 = vld [vmem:[#allocation18_spill] sm:$0xff] }
 0xc1f   : > { %9655 = vmatmul.mubr.msk.f32.gmra.mrb[122].mxu1 %vm20769_vm8, %v20768_v46  ;;  %vm20780_vm8 = vmmov %vm20763_vm6 }
 0xc20   : > { %6024 = vmatprep.mubr.f32.mxu1 %v19536_v52  ;;  %11201 = vmatpush3.bf16.msk.msra.mxu1 %vm20771_vm15, %v20692_v39  ;;  %vm20782_vm15 = vnez %v20781_v62  ;;  %v20815_v62 = vld [vmem:[#allocation24_spill] sm:$0xff] }
 0xc21   : > { %11203 = vmatprep.subr.msk.bf16.mxu1 %vm20773_vm0, %v20692_v39  ;;  %vm20784_vm0 = vnez %v20783_v55  ;;  %v20817_v55 = vld [vmem:[#allocation25_spill] sm:$0xff] }
 0xc23   : > { %9656 = vmatmul.mubr.msk.f32.gmra.mrb[124].mxu1 %vm20763_vm6, %v20774_v42 }
 0xc24   : > { %6030 = vmatprep.mubr.f32.mxu1 %v19536_v52  ;;  %11205 = vmatpush3.bf16.msk.msra.mxu1 %vm20776_vm2, %v20692_v39  ;;  %vm20787_vm2 = vnez %v20786_v14  ;;  %v20818_v14 = vld [vmem:[#allocation31_spill] sm:$0xff] }
 0xc25   : > { %11207 = vmatprep.subr.msk.bf16.mxu1 %vm20778_vm7, %v20692_v39  ;;  %vm20789_vm7 = vnez %v20788_v56  ;;  %v20820_v56 = vld [vmem:[#allocation32_spill] sm:$0xff] }
 0xc27   : > { %9657 = vmatmul.mubr.msk.f32.gmra.mrb[126].mxu1 %vm20780_vm8, %v20779_v11  ;;  %vm20791_vm8 = vmmov %vm20763_vm6 }
 0xc28   : > { %6036 = vmatprep.mubr.f32.mxu1 %v19536_v52  ;;  %11209 = vmatpush3.bf16.msk.msra.mxu1 %vm20782_vm15, %v20692_v39  ;;  %vm20793_vm15 = vnez %v20792_v7  ;;  %v20822_v7 = vld [vmem:[#allocation106_spill] sm:$0xff] }
 0xc29   : > { %11211 = vmatprep.subr.msk.bf16.mxu1 %vm20784_vm0, %v20692_v39  ;;  %vm20795_vm0 = vnez %v20794_v17  ;;  %v20824_v17 = vld [vmem:[#allocation107_spill] sm:$0xff] }
 0xc2b   : > { %9658 = vmatmul.mubr.msk.f32.gmra.mrb[128].mxu1 %vm20763_vm6, %v20785_v40 }
 0xc2c   : > { %6042 = vmatprep.mubr.f32.mxu1 %v19536_v52  ;;  %11213 = vmatpush3.bf16.msk.msra.mxu1 %vm20787_vm2, %v20692_v39  ;;  %vm20798_vm2 = vnez %v20797_v25  ;;  %v20826_v25 = vld [vmem:[#allocation109_spill] sm:$0xff] }
 0xc2d   : > { %11215 = vmatprep.subr.msk.bf16.mxu1 %vm20789_vm7, %v20692_v39  ;;  %vm20800_vm7 = vnez %v20799_v45  ;;  %v20828_v45 = vld [vmem:[#allocation45_spill] sm:$0xff] }
 0xc2f   : > { %9659 = vmatmul.mubr.msk.f32.gmra.mrb[130].mxu1 %vm20791_vm8, %v20790_v26  ;;  %vm20802_vm8 = vmmov %vm20763_vm6 }
 0xc30   : > { %6048 = vmatprep.mubr.f32.mxu1 %v19536_v52  ;;  %11217 = vmatpush3.bf16.msk.msra.mxu1 %vm20793_vm15, %v20692_v39  ;;  %vm20804_vm15 = vnez %v20803_v59  ;;  %v20829_v59 = vld [vmem:[#allocation46_spill] sm:$0xff] }
 0xc31   : > { %11219 = vmatprep.subr.msk.bf16.mxu1 %vm20795_vm0, %v20692_v39  ;;  %vm20806_vm0 = vmmov %vm20763_vm6 }
 0xc33   : > { %9660 = vmatmul.mubr.msk.f32.gmra.mrb[132].mxu1 %vm20763_vm6, %v20796_v48  ;;  %vm20808_vm6 = vmmov %vm20806_vm0 }
 0xc34   : > { %6054 = vmatprep.mubr.f32.mxu1 %v19536_v52  ;;  %11221 = vmatpush3.bf16.msk.msra.mxu1 %vm20798_vm2, %v20692_v39  ;;  %vm20810_vm2 = vmmov %vm20806_vm0 }
 0xc35   : > { %11223 = vmatprep.subr.msk.bf16.mxu1 %vm20800_vm7, %v20692_v39  ;;  %vm20812_vm7 = vmmov %vm20806_vm0 }
 0xc37   : > { %9661 = vmatmul.mubr.msk.f32.gmra.mrb[134].mxu1 %vm20802_vm8, %v20801_v19  ;;  %vm20814_vm8 = vmmov %vm20806_vm0 }
 0xc38   : > { %6060 = vmatprep.mubr.f32.mxu1 %v19536_v52  ;;  %11225 = vmatpush3.bf16.msk.msra.mxu1 %vm20804_vm15, %v20692_v39  ;;  %vm20816_vm15 = vmmov %vm20806_vm0 }
 0xc39   : > { %11259 = vmatprep.subr.msk.bf16.mxu1 %vm20694_vm14, %v20692_v39 }
 0xc3b   : > { %9662 = vmatmul.mubr.msk.f32.gmra.mrb[136].mxu1 %vm20806_vm0, %v20805_v5 }
 0xc3c   : > { %6066 = vmatprep.mubr.f32.mxu1 %v19536_v52 }
 0xc3f   : > { %9663 = vmatmul.mubr.msk.f32.gmra.mrb[138].mxu1 %vm20808_vm6, %v20807_v6  ;;  %vm20819_vm6 = vmmov %vm20806_vm0 }
 0xc40   : > { %6072 = vmatprep.mubr.f32.mxu1 %v19536_v52 }
 0xc43   : > { %9664 = vmatmul.mubr.msk.f32.gmra.mrb[140].mxu1 %vm20810_vm2, %v20809_v41  ;;  %vm20821_vm2 = vmmov %vm20806_vm0 }
 0xc44   : > { %6078 = vmatprep.mubr.f32.mxu1 %v19536_v52 }
 0xc47   : > { %9665 = vmatmul.mubr.msk.f32.gmra.mrb[142].mxu1 %vm20812_vm7, %v20811_v54  ;;  %vm20823_vm7 = vmmov %vm20806_vm0 }
 0xc48   : > { %6084 = vmatprep.mubr.f32.mxu1 %v19536_v52 }
 0xc4b   : > { %9666 = vmatmul.mubr.msk.f32.gmra.mrb[144].mxu1 %vm20814_vm8, %v20813_v33  ;;  %vm20825_vm8 = vmmov %vm20806_vm0 }
 0xc4c   : > { %6090 = vmatprep.mubr.f32.mxu1 %v19536_v52 }
 0xc4f   : > { %9667 = vmatmul.mubr.msk.f32.gmra.mrb[146].mxu1 %vm20816_vm15, %v20815_v62  ;;  %vm20827_vm15 = vmmov %vm20806_vm0 }
 0xc50   : > { %6096 = vmatprep.mubr.f32.mxu1 %v19536_v52 }
 0xc53   : > { %9668 = vmatmul.mubr.msk.f32.gmra.mrb[148].mxu1 %vm20806_vm0, %v20817_v55 }
 0xc54   : > { %6102 = vmatprep.mubr.f32.mxu1 %v19536_v52 }
 0xc57   : > { %9669 = vmatmul.mubr.msk.f32.gmra.mrb[150].mxu1 %vm20819_vm6, %v20818_v14  ;;  %vm20830_vm6 = vmmov %vm20806_vm0 }
 0xc58   : > { %6108 = vmatprep.mubr.f32.mxu1 %v19536_v52 }
 0xc5b   : > { %9670 = vmatmul.mubr.msk.f32.gmra.mrb[152].mxu1 %vm20821_vm2, %v20820_v56  ;;  %vm20832_vm2 = vmmov %vm20806_vm0 }
 0xc5c   : > { %6114 = vmatprep.mubr.f32.mxu1 %v19536_v52 }
 0xc5f   : > { %9671 = vmatmul.mubr.msk.f32.gmra.mrb[154].mxu1 %vm20823_vm7, %v20822_v7  ;;  %v20831_v7 = vld [vmem:[#allocation53_spill] sm:$0xff]  ;;  %vm20834_vm7 = vmmov %vm20806_vm0 }
 0xc60   : > { %6120 = vmatprep.mubr.f32.mxu1 %v19536_v52 }
 0xc63   : > { %9672 = vmatmul.mubr.msk.f32.gmra.mrb[156].mxu1 %vm20825_vm8, %v20824_v17  ;;  %v20833_v17 = vld [vmem:[#allocation54_spill] sm:$0xff]  ;;  %vm20836_vm8 = vmmov %vm20806_vm0 }
 0xc64   : > { %6126 = vmatprep.mubr.f32.mxu1 %v19536_v52 }
 0xc67   : > { %9673 = vmatmul.mubr.msk.f32.gmra.mrb[158].mxu1 %vm20827_vm15, %v20826_v25  ;;  %v20835_v25 = vld [vmem:[#allocation20_spill] sm:$0xff]  ;;  %vm20838_vm15 = vmmov %vm20806_vm0 }
 0xc68   : > { %6132 = vmatprep.mubr.f32.mxu1 %v19536_v52 }
 0xc6b   : > { %9674 = vmatmul.mubr.msk.f32.gmra.mrb[160].mxu1 %vm20806_vm0, %v20828_v45  ;;  %v20837_v45 = vld [vmem:[#allocation21_spill] sm:$0xff] }
 0xc6c   : > { %6138 = vmatprep.mubr.f32.mxu1 %v19536_v52 }
 0xc6f   : > { %9675 = vmatmul.mubr.msk.f32.gmra.mrb[162].mxu1 %vm20830_vm6, %v20829_v59  ;;  %v20839_v59 = vld [vmem:[#allocation28_spill] sm:$0xff]  ;;  %vm20841_vm6 = vmmov %vm20806_vm0 }
 0xc70   : > { %6144 = vmatprep.mubr.f32.mxu1 %v19536_v52 }
 0xc73   : > { %9676 = vmatmul.mubr.msk.f32.gmra.mrb[164].mxu1 %vm20832_vm2, %v20831_v7  ;;  %v20840_v7 = vld [vmem:[#allocation34_spill] sm:$0xff]  ;;  %vm20843_vm2 = vmmov %vm20806_vm0 }
 0xc74   : > { %6150 = vmatprep.mubr.f32.mxu1 %v19536_v52 }
 0xc77   : > { %9677 = vmatmul.mubr.msk.f32.gmra.mrb[166].mxu1 %vm20834_vm7, %v20833_v17  ;;  %v20842_v17 = vld [vmem:[#allocation35_spill] sm:$0xff]  ;;  %vm20845_vm7 = vmmov %vm20806_vm0 }
 0xc78   : > { %6156 = vmatprep.mubr.f32.mxu1 %v19536_v52 }
 0xc7b   : > { %9678 = vmatmul.mubr.msk.f32.gmra.mrb[168].mxu1 %vm20836_vm8, %v20835_v25  ;;  %v20844_v25 = vld [vmem:[#allocation41_spill] sm:$0xff]  ;;  %vm20847_vm8 = vmmov %vm20806_vm0 }
 0xc7c   : > { %6162 = vmatprep.mubr.f32.mxu1 %v19536_v52 }
 0xc7f   : > { %9679 = vmatmul.mubr.msk.f32.gmra.mrb[170].mxu1 %vm20838_vm15, %v20837_v45  ;;  %v20846_v45 = vld [vmem:[#allocation42_spill] sm:$0xff]  ;;  %vm20849_vm15 = vmmov %vm20806_vm0 }
 0xc80   : > { %6168 = vmatprep.mubr.f32.mxu1 %v19536_v52 }
 0xc83   : > { %9680 = vmatmul.mubr.msk.f32.gmra.mrb[172].mxu1 %vm20806_vm0, %v20839_v59  ;;  %v20848_v59 = vld [vmem:[#allocation134_spill] sm:$0xff] }
 0xc84   : > { %6174 = vmatprep.mubr.f32.mxu1 %v19536_v52 }
 0xc87   : > { %9681 = vmatmul.mubr.msk.f32.gmra.mrb[174].mxu1 %vm20841_vm6, %v20840_v7  ;;  %v20850_v7 = vld [vmem:[#allocation135_spill] sm:$0xff]  ;;  %vm20852_vm6 = vmmov %vm20806_vm0 }
 0xc88   : > { %6180 = vmatprep.mubr.f32.mxu1 %v19536_v52 }
 0xc8b   : > { %9682 = vmatmul.mubr.msk.f32.gmra.mrb[176].mxu1 %vm20843_vm2, %v20842_v17  ;;  %v20851_v17 = vld [vmem:[#allocation137_spill] sm:$0xff]  ;;  %vm20854_vm2 = vmmov %vm20806_vm0 }
 0xc8c   : > { %6186 = vmatprep.mubr.f32.mxu1 %v19536_v52 }
 0xc8f   : > { %9683 = vmatmul.mubr.msk.f32.gmra.mrb[178].mxu1 %vm20845_vm7, %v20844_v25  ;;  %v20853_v25 = vld [vmem:[#allocation56_spill] sm:$0xff]  ;;  %vm20856_vm7 = vmmov %vm20806_vm0 }
 0xc90   : > { %6192 = vmatprep.mubr.f32.mxu1 %v19536_v52 }
 0xc93   : > { %9684 = vmatmul.mubr.msk.f32.gmra.mrb[180].mxu1 %vm20847_vm8, %v20846_v45  ;;  %v20855_v45 = vld [vmem:[#allocation57_spill] sm:$0xff]  ;;  %vm20858_vm8 = vmmov %vm20806_vm0 }
 0xc94   : > { %6198 = vmatprep.mubr.f32.mxu1 %v19536_v52 }
 0xc97   : > { %9685 = vmatmul.mubr.msk.f32.gmra.mrb[182].mxu1 %vm20849_vm15, %v20848_v59  ;;  %v20857_v59 = vld [vmem:[#allocation62_spill] sm:$0xff]  ;;  %vm20860_vm15 = vmmov %vm20806_vm0 }
 0xc98   : > { %6204 = vmatprep.mubr.f32.mxu1 %v19536_v52 }
 0xc9b   : > { %9686 = vmatmul.mubr.msk.f32.gmra.mrb[184].mxu1 %vm20806_vm0, %v20850_v7  ;;  %v20859_v7 = vld [vmem:[#allocation63_spill] sm:$0xff] }
 0xc9c   : > { %6210 = vmatprep.mubr.f32.mxu1 %v19536_v52 }
 0xc9f   : > { %9687 = vmatmul.mubr.msk.f32.gmra.mrb[186].mxu1 %vm20852_vm6, %v20851_v17  ;;  %v20861_v17 = vld [vmem:[#allocation65_spill] sm:$0xff]  ;;  %vm20863_vm6 = vmmov %vm20806_vm0 }
 0xca0   : > { %6216 = vmatprep.mubr.f32.mxu1 %v19536_v52 }
 0xca3   : > { %9688 = vmatmul.mubr.msk.f32.gmra.mrb[188].mxu1 %vm20854_vm2, %v20853_v25  ;;  %v20862_v25 = vld [vmem:[#allocation66_spill] sm:$0xff]  ;;  %vm20865_vm2 = vmmov %vm20806_vm0 }
 0xca4   : > { %6222 = vmatprep.mubr.f32.mxu1 %v19536_v52 }
 0xca7   : > { %9689 = vmatmul.mubr.msk.f32.gmra.mrb[190].mxu1 %vm20856_vm7, %v20855_v45  ;;  %v20864_v45 = vld [vmem:[#allocation151_spill] sm:$0xff]  ;;  %vm20867_vm7 = vmmov %vm20806_vm0 }
 0xca8   : > { %6228 = vmatprep.mubr.f32.mxu1 %v19536_v52 }
 0xcab   : > { %9690 = vmatmul.mubr.msk.f32.gmra.mrb[192].mxu1 %vm20858_vm8, %v20857_v59  ;;  %v20866_v59 = vld [vmem:[#allocation153_spill] sm:$0xff]  ;;  %vm20869_vm8 = vmmov %vm20806_vm0 }
 0xcac   : > { %6234 = vmatprep.mubr.f32.mxu1 %v19536_v52 }
 0xcaf   : > { %9691 = vmatmul.mubr.msk.f32.gmra.mrb[194].mxu1 %vm20860_vm15, %v20859_v7  ;;  %v20868_v7 = vld [vmem:[#allocation155_spill] sm:$0xff]  ;;  %vm20871_vm15 = vmmov %vm20806_vm0 }
 0xcb0   : > { %6240 = vmatprep.mubr.f32.mxu1 %v19536_v52 }
 0xcb3   : > { %9692 = vmatmul.mubr.msk.f32.gmra.mrb[196].mxu1 %vm20806_vm0, %v20861_v17  ;;  %v20870_v17 = vld [vmem:[#allocation157_spill] sm:$0xff] }
 0xcb4   : > { %6246 = vmatprep.mubr.f32.mxu1 %v19536_v52 }
 0xcb7   : > { %9693 = vmatmul.mubr.msk.f32.gmra.mrb[198].mxu1 %vm20863_vm6, %v20862_v25  ;;  %v20872_v25 = vld [vmem:[#allocation159_spill] sm:$0xff]  ;;  %vm20874_vm6 = vmmov %vm20806_vm0 }
 0xcb8   : > { %6252 = vmatprep.mubr.f32.mxu1 %v19536_v52 }
 0xcbb   : > { %9694 = vmatmul.mubr.msk.f32.gmra.mrb[200].mxu1 %vm20865_vm2, %v20864_v45  ;;  %v20873_v45 = vld [vmem:[#allocation160_spill] sm:$0xff]  ;;  %vm20876_vm2 = vmmov %vm20806_vm0 }
 0xcbc   : > { %6258 = vmatprep.mubr.f32.mxu1 %v19536_v52 }
 0xcbf   : > { %9695 = vmatmul.mubr.msk.f32.gmra.mrb[202].mxu1 %vm20867_vm7, %v20866_v59  ;;  %v20875_v59 = vld [vmem:[#allocation161_spill] sm:$0xff]  ;;  %vm20878_vm7 = vmmov %vm20806_vm0 }
 0xcc0   : > { %6264 = vmatprep.mubr.f32.mxu1 %v19536_v52 }
 0xcc3   : > { %9696 = vmatmul.mubr.msk.f32.gmra.mrb[204].mxu1 %vm20869_vm8, %v20868_v7  ;;  %v20877_v7 = vld [vmem:[#allocation162_spill] sm:$0xff]  ;;  %vm21110_vm8 = vcmask 523264  }
 0xcc4   : > { %6270 = vmatprep.mubr.f32.mxu1 %v19536_v52 }
 0xcc7   : > { %9697 = vmatmul.mubr.msk.f32.gmra.mrb[206].mxu1 %vm20871_vm15, %v20870_v17  ;;  %vm21113_vm15 = vmmov %vm21110_vm8 }
 0xcc8   : > { %6276 = vmatprep.mubr.f32.mxu1 %v19536_v52 }
 0xccb   : > { %9698 = vmatmul.mubr.msk.f32.gmra.mrb[208].mxu1 %vm20806_vm0, %v20872_v25  ;;  %vm21116_vm0 = vmmov %vm21110_vm8 }
 0xccc   : > { %6282 = vmatprep.mubr.f32.mxu1 %v19536_v52 }
 0xccf   : > { %9699 = vmatmul.mubr.msk.f32.gmra.mrb[210].mxu1 %vm20874_vm6, %v20873_v45  ;;  %vm21120_vm6 = vmmov %vm21116_vm0 }
 0xcd0   : > { %6288 = vmatprep.mubr.f32.mxu1 %v19536_v52 }
 0xcd3   : > { %9700 = vmatmul.mubr.msk.f32.gmra.mrb[212].mxu1 %vm20876_vm2, %v20875_v59  ;;  %vm21123_vm2 = vcmask 392384  }
 0xcd4   : > { %6294 = vmatprep.mubr.f32.mxu1 %v19536_v52 }
 0xcd7   : > { %9701 = vmatmul.mubr.msk.f32.gmra.mrb[214].mxu1 %vm20878_vm7, %v20877_v7  ;;  %vm21124_vm7 = vmmov %vm21123_vm2 }
 0xce6   : > { %v16907_v17 = vpop.f32.mrb[116].mxu1 }
 0xce7   : > { %20879 = vst [vmem:[#allocation170_spill] sm:$0xff] %v16907_v17  ;;  %v5858_v56 = vpop.f32.mrb[117].mxu1  ;;  %v16909_v14 = vpop.f32.mrb[64].mxu0 }
 0xce8   : > { %20880 = vst [vmem:[#allocation142_spill] sm:$0xff] %v16909_v14  ;;  %v5943_v25 = vmul.f32 %v16664_v53, %v5858_v56  ;;  %v16912_v55 = vpop.f32.mrb[65].mxu0 }
 0xce9   : > { %20881 = vst [vmem:[#allocation171_spill] sm:$0xff] %v16912_v55 }
 0xcea   : > { %v16914_v45 = vpop.f32.mrb[118].mxu1  ;;  %6797 = vmatprep.mubr.f32.mxu0 %v5943_v25 }
 0xceb   : > { %20882 = vst [vmem:[#allocation163_spill] sm:$0xff] %v16914_v45  ;;  %v16916_v62 = vpop.f32.mrb[119].mxu1 }
 0xcec   : > { %20883 = vst [vmem:[#allocation154_spill] sm:$0xff] %v16916_v62 }
 0xcee   : > { %v16918_v59 = vpop.f32.mrb[120].mxu1 }
 0xcef   : > { %6397 = vrot.lane.b32.xlu0 %v16918_v59, %s11712_s26  ;;  %v16922_v7 = vpop.f32.mrb[121].mxu1 }
 0xcf2   : > { %v16924_v33 = vpop.f32.mrb[122].mxu1 }
 0xcf3   : > { %6399 = vrot.lane.b32.xlu1 %v16924_v33, %s11712_s26  ;;  %v16928_v53 = vpop.f32.mrb[123].mxu1 }
 0xcf6   : > { %v16930_v56 = vpop.f32.mrb[124].mxu1 }
 0xcf7   : > { %6401 = vrot.lane.b32.xlu0 %v16930_v56, %s11712_s26  ;;  %v16934_v25 = vpop.f32.mrb[125].mxu1 }
 0xcfa   : > { %v16936_v54 = vpop.f32.mrb[126].mxu1 }
 0xcfb   : > { %6403 = vrot.lane.b32.xlu1 %v16936_v54, %s11712_s26  ;;  %v16940_v41 = vpop.f32.mrb[127].mxu1 }
 0xcfe   : > { %v16942_v6 = vpop.f32.mrb[128].mxu1 }
 0xcff   : > { %6405 = vrot.lane.b32.xlu0 %v16942_v6, %s11712_s26  ;;  %v16946_v5 = vpop.f32.mrb[129].mxu1 }
 0xd02   : > { %v16948_v19 = vpop.f32.mrb[130].mxu1 }
 0xd03   : > { %6407 = vrot.lane.b32.xlu1 %v16948_v19, %s11712_s26  ;;  %v16952_v48 = vpop.f32.mrb[131].mxu1 }
 0xd06   : > { %v16954_v26 = vpop.f32.mrb[132].mxu1 }
 0xd07   : > { %6409 = vrot.lane.b32.xlu0 %v16954_v26, %s11712_s26  ;;  %v16958_v40 = vpop.f32.mrb[133].mxu1 }
 0xd0a   : > { %v16960_v11 = vpop.f32.mrb[134].mxu1 }
 0xd0b   : > { %6411 = vrot.lane.b32.xlu1 %v16960_v11, %s11712_s26  ;;  %v16964_v42 = vpop.f32.mrb[135].mxu1 }
 0xd0e   : > { %v16966_v46 = vpop.f32.mrb[136].mxu1 }
 0xd0f   : > { %6413 = vrot.lane.b32.xlu0 %v16966_v46, %s11712_s26  ;;  %v16970_v21 = vpop.f32.mrb[137].mxu1 }
 0xd12   : > { %v16972_v58 = vpop.f32.mrb[138].mxu1 }
 0xd13   : > { %6415 = vrot.lane.b32.xlu1 %v16972_v58, %s11712_s26  ;;  %v16976_v50 = vpop.f32.mrb[139].mxu1 }
 0xd16   : > { %v16978_v49 = vpop.f32.mrb[140].mxu1 }
 0xd17   : > { %6417 = vrot.lane.b32.xlu0 %v16978_v49, %s11712_s26  ;;  %v16982_v51 = vpop.f32.mrb[141].mxu1 }
 0xd1a   : > { %v16984_v16 = vpop.f32.mrb[142].mxu1 }
 0xd1b   : > { %6419 = vrot.lane.b32.xlu1 %v16984_v16, %s11712_s26  ;;  %v16988_v23 = vpop.f32.mrb[143].mxu1 }
 0xd1e   : > { %v16990_v13 = vpop.f32.mrb[144].mxu1 }
 0xd1f   : > { %6421 = vrot.lane.b32.xlu0 %v16990_v13, %s11712_s26  ;;  %v16994_v27 = vpop.f32.mrb[145].mxu1 }
 0xd22   : > { %v16996_v47 = vpop.f32.mrb[146].mxu1 }
 0xd23   : > { %6423 = vrot.lane.b32.xlu1 %v16996_v47, %s11712_s26  ;;  %v17000_v57 = vpop.f32.mrb[147].mxu1 }
 0xd26   : > { %v17002_v32 = vpop.f32.mrb[148].mxu1 }
 0xd27   : > { %6425 = vrot.lane.b32.xlu0 %v17002_v32, %s11712_s26  ;;  %v17006_v8 = vpop.f32.mrb[149].mxu1 }
 0xd2a   : > { %v17008_v39 = vpop.f32.mrb[150].mxu1 }
 0xd2b   : > { %6427 = vrot.lane.b32.xlu1 %v17008_v39, %s11712_s26  ;;  %v17012_v52 = vpop.f32.mrb[151].mxu1 }
 0xd2e   : > { %v17014_v36 = vpop.f32.mrb[152].mxu1 }
 0xd2f   : > { %6429 = vrot.lane.b32.xlu0 %v17014_v36, %s11712_s26  ;;  %v17018_v14 = vpop.f32.mrb[153].mxu1 }
 0xd32   : > { %v17020_v44 = vpop.f32.mrb[154].mxu1 }
 0xd33   : > { %6431 = vrot.lane.b32.xlu1 %v17020_v44, %s11712_s26  ;;  %v17024_v20 = vpop.f32.mrb[155].mxu1 }
 0xd36   : > { %v17026_v4 = vpop.f32.mrb[156].mxu1 }
 0xd37   : > { %6433 = vrot.lane.b32.xlu0 %v17026_v4, %s11712_s26  ;;  %v17030_v29 = vpop.f32.mrb[157].mxu1 }
 0xd3a   : > { %v17032_v37 = vpop.f32.mrb[158].mxu1 }
 0xd3b   : > { %6435 = vrot.lane.b32.xlu1 %v17032_v37, %s11712_s26  ;;  %v17036_v35 = vpop.f32.mrb[159].mxu1 }
 0xd3e   : > { %v17038_v38 = vpop.f32.mrb[160].mxu1 }
 0xd3f   : > { %6437 = vrot.lane.b32.xlu0 %v17038_v38, %s11712_s26  ;;  %v17042_v28 = vpop.f32.mrb[161].mxu1 }
 0xd42   : > { %v17044_v63 = vpop.f32.mrb[162].mxu1 }
 0xd43   : > { %6439 = vrot.lane.b32.xlu1 %v17044_v63, %s11712_s26  ;;  %v17048_v9 = vpop.f32.mrb[163].mxu1 }
 0xd46   : > { %v17050_v10 = vpop.f32.mrb[164].mxu1 }
 0xd47   : > { %6441 = vrot.lane.b32.xlu0 %v17050_v10, %s11712_s26  ;;  %v17054_v55 = vpop.f32.mrb[165].mxu1 }
 0xd4a   : > { %v17056_v61 = vpop.f32.mrb[166].mxu1 }
 0xd4b   : > { %20884 = vst [vmem:[#allocation166_spill] sm:$0xff] %v17056_v61  ;;  %6443 = vrot.lane.b32.xlu1 %v17056_v61, %s11712_s26  ;;  %v17060_v45 = vpop.f32.mrb[167].mxu1 }
 0xd4c   : > { %20885 = vst [vmem:[#allocation196_spill] sm:$0xff] %v17060_v45 }
 0xd4e   : > { %v17062_v43 = vpop.f32.mrb[168].mxu1 }
 0xd4f   : > { %20886 = vst [vmem:[#allocation173_spill] sm:$0xff] %v17062_v43  ;;  %6445 = vrot.lane.b32.xlu0 %v17062_v43, %s11712_s26  ;;  %v17066_v62 = vpop.f32.mrb[169].mxu1 }
 0xd50   : > { %20887 = vst [vmem:[#allocation129_spill] sm:$0xff] %v17066_v62 }
 0xd52   : > { %v17068_v2 = vpop.f32.mrb[170].mxu1 }
 0xd53   : > { %20888 = vst [vmem:[#allocation144_spill] sm:$0xff] %v17068_v2  ;;  %6447 = vrot.lane.b32.xlu1 %v17068_v2, %s11712_s26  ;;  %v17072_v17 = vpop.f32.mrb[171].mxu1 }
 0xd54   : > { %20889 = vst [vmem:[#allocation156_spill] sm:$0xff] %v17072_v17  ;;  %v20897_v17 = vld [vmem:[#allocation261_spill] sm:$0xff] }
 0xd56   : > { %v17074_v24 = vpop.f32.mrb[172].mxu1 }
 0xd57   : > { %20890 = vst [vmem:[#allocation223_spill] sm:$0xff] %v17074_v24  ;;  %6449 = vrot.lane.b32.xlu0 %v17074_v24, %s11712_s26  ;;  %v17078_v12 = vpop.f32.mrb[173].mxu1  ;;  %v6301_v24 = vmul.f32 %v20896_v18, %v16918_v59  ;;  %v20902_v59 = vld [vmem:[#allocation267_spill] sm:$0xff] }
 0xd58   : > { %20891 = vst [vmem:[#allocation174_spill] sm:$0xff] %v17078_v12 }
 0xd5a   : > { %v17080_v30 = vpop.f32.mrb[174].mxu1 }
 0xd5b   : > { %20892 = vst [vmem:[#allocation206_spill] sm:$0xff] %v17080_v30  ;;  %6451 = vrot.lane.b32.xlu1 %v17080_v30, %s11712_s26  ;;  %v17084_v22 = vpop.f32.mrb[175].mxu1 }
 0xd5c   : > { %20893 = vst [vmem:[#allocation279_spill] sm:$0xff] %v17084_v22  ;;  %v20900_v22 = vld [vmem:[#allocation179_spill] sm:$0xff] }
 0xd5d   : > { %v6637_v62 = vmul.f32 %v20900_v22, %v16922_v7 }
 0xd5e   : > { %v17086_v0 = vpop.f32.mrb[176].mxu1 }
 0xd5f   : > { %20894 = vst [vmem:[#allocation158_spill] sm:$0xff] %v17086_v0  ;;  %6453 = vrot.lane.b32.xlu0 %v17086_v0, %s11712_s26  ;;  %v17090_v15 = vpop.f32.mrb[177].mxu1 }
 0xd60   : > { %20895 = vst [vmem:[#allocation116_spill] sm:$0xff] %v17090_v15  ;;  %v20901_v15 = vld [vmem:[#allocation180_spill] sm:$0xff] }
 0xd61   : > { %v6398_v60 = vpop.permute.xlu0 %6397  ;;  %v6302_v45 = vmul.f32 %v20901_v15, %v16924_v33  ;;  %v20908_v15 = vld [vmem:[#allocation185_spill] sm:$0xff] }
 0xd62   : > { %v6541_v12 = vmul.f32 %v20897_v17, %v6398_v60  ;;  %v17095_v2 = vpop.f32.mrb[178].mxu1 }
 0xd63   : > { %20898 = vst [vmem:[#allocation181_spill] sm:$0xff] %v17095_v2  ;;  %6455 = vrot.lane.b32.xlu1 %v17095_v2, %s11712_s26  ;;  %v17099_v30 = vpop.f32.mrb[179].mxu1 }
 0xd64   : > { %20899 = vst [vmem:[#allocation146_spill] sm:$0xff] %v17099_v30  ;;  %v6589_v43 = vadd.f32 %v6541_v12, %v6301_v24  ;;  %v20904_v30 = vld [vmem:[#allocation183_spill] sm:$0xff]  ;;  %v20905_v12 = vld [vmem:[#allocation184_spill] sm:$0xff] }
 0xd65   : > { %v6400_v0 = vpop.permute.xlu1 %6399  ;;  %v6638_v2 = vmul.f32 %v20904_v30, %v16928_v53  ;;  %v6303_v22 = vmul.f32 %v20905_v12, %v16930_v56 }
 0xd66   : > { %v17105_v61 = vadd.f32 %v6637_v62, %v6589_v43  ;;  %v6542_v18 = vmul.f32 %v20902_v59, %v6400_v0  ;;  %v17108_v60 = vpop.f32.mrb[180].mxu1  ;;  %v20906_v43 = vld [vmem:[#allocation270_spill] sm:$0xff] }
 0xd67   : > { %6457 = vrot.lane.b32.xlu0 %v17108_v60, %s11712_s26  ;;  %v17112_v17 = vpop.f32.mrb[181].mxu1 }
 0xd68   : > { %20903 = vst [vmem:[#allocation218_spill] sm:$0xff] %v17112_v17  ;;  %v6590_v7 = vadd.f32 %v6542_v18, %v6302_v45  ;;  %v6639_v17 = vmul.f32 %v20908_v15, %v16934_v25  ;;  %v20913_v15 = vld [vmem:[#allocation193_spill] sm:$0xff] }
 0xd69   : > { %v6402_v24 = vpop.permute.xlu0 %6401 }
 0xd6a   : > { %v17118_v33 = vadd.f32 %v6638_v2, %v6590_v7  ;;  %v6543_v62 = vmul.f32 %v20906_v43, %v6402_v24  ;;  %v17121_v0 = vpop.f32.mrb[182].mxu1  ;;  %v20909_v2 = vld [vmem:[#allocation188_spill] sm:$0xff]  ;;  %v20910_v24 = vld [vmem:[#allocation274_spill] sm:$0xff] }
 0xd6b   : > { %6459 = vrot.lane.b32.xlu1 %v17121_v0, %s11712_s26  ;;  %v17125_v59 = vpop.f32.mrb[183].mxu1  ;;  %v6304_v56 = vmul.f32 %v20909_v2, %v16936_v54  ;;  %v20916_v2 = vld [vmem:[#allocation197_spill] sm:$0xff] }
 0xd6c   : > { %20907 = vst [vmem:[#allocation127_spill] sm:$0xff] %v17125_v59  ;;  %v6591_v53 = vadd.f32 %v6543_v62, %v6303_v22  ;;  %v20912_v22 = vld [vmem:[#allocation192_spill] sm:$0xff]  ;;  %v6305_v59 = vmul.f32 %v20913_v15, %v16942_v6  ;;  %v20917_v6 = vld [vmem:[#allocation199_spill] sm:$0xff] }
 0xd6d   : > { %v6404_v45 = vpop.permute.xlu1 %6403  ;;  %v6640_v25 = vmul.f32 %v20912_v22, %v16940_v41 }
 0xd6e   : > { %v17133_v7 = vadd.f32 %v6639_v17, %v6591_v53  ;;  %v6544_v43 = vmul.f32 %v20910_v24, %v6404_v45  ;;  %v17136_v12 = vpop.f32.mrb[184].mxu1  ;;  %v20914_v17 = vld [vmem:[#allocation112_spill] sm:$0xff] }
 0xd6f   : > { %6461 = vrot.lane.b32.xlu0 %v17136_v12, %s11712_s26  ;;  %v17140_v30 = vpop.f32.mrb[185].mxu1 }
 0xd70   : > { %20911 = vst [vmem:[#allocation225_spill] sm:$0xff] %v17140_v30  ;;  %v6592_v62 = vadd.f32 %v6544_v43, %v6304_v56  ;;  %v6641_v30 = vmul.f32 %v20916_v2, %v16946_v5  ;;  %v20920_v5 = vld [vmem:[#allocation200_spill] sm:$0xff] }
 0xd71   : > { %v6406_v18 = vpop.permute.xlu0 %6405  ;;  %v6642_v2 = vmul.f32 %v20920_v5, %v16952_v48 }
 0xd72   : > { %v17146_v54 = vadd.f32 %v6640_v25, %v6592_v62  ;;  %v6545_v53 = vmul.f32 %v20914_v17, %v6406_v18  ;;  %v17149_v45 = vpop.f32.mrb[186].mxu1  ;;  %v6306_v25 = vmul.f32 %v20917_v6, %v16948_v19  ;;  %v20918_v18 = vld [vmem:[#allocation276_spill] sm:$0xff] }
 0xd73   : > { %6463 = vrot.lane.b32.xlu1 %v17149_v45, %s11712_s26  ;;  %v17153_v24 = vpop.f32.mrb[187].mxu1  ;;  %v20924_v6 = vld [vmem:[#allocation204_spill] sm:$0xff] }
 0xd74   : > { %20915 = vst [vmem:[#allocation148_spill] sm:$0xff] %v17153_v24  ;;  %v6593_v43 = vadd.f32 %v6545_v53, %v6305_v59  ;;  %v20921_v53 = vld [vmem:[#allocation203_spill] sm:$0xff] }
 0xd75   : > { %v6408_v56 = vpop.permute.xlu1 %6407  ;;  %v6307_v24 = vmul.f32 %v20921_v53, %v16954_v26  ;;  %v20925_v26 = vld [vmem:[#allocation212_spill] sm:$0xff] }
 0xd76   : > { %v17161_v62 = vadd.f32 %v6641_v30, %v6593_v43  ;;  %v6546_v17 = vmul.f32 %v20918_v18, %v6408_v56  ;;  %v17164_v15 = vpop.f32.mrb[188].mxu1  ;;  %v20922_v30 = vld [vmem:[#allocation123_spill] sm:$0xff] }
 0xd77   : > { %6465 = vrot.lane.b32.xlu0 %v17164_v15, %s11712_s26  ;;  %v17168_v22 = vpop.f32.mrb[189].mxu1 }
 0xd78   : > { %20919 = vst [vmem:[#allocation165_spill] sm:$0xff] %v17168_v22  ;;  %v6594_v41 = vadd.f32 %v6546_v17, %v6306_v25  ;;  %v6643_v22 = vmul.f32 %v20924_v6, %v16958_v40  ;;  %v20928_v40 = vld [vmem:[#allocation214_spill] sm:$0xff] }
 0xd79   : > { %v6410_v59 = vpop.permute.xlu0 %6409  ;;  %v6644_v6 = vmul.f32 %v20928_v40, %v16964_v42 }
 0xd7a   : > { %v17174_v19 = vadd.f32 %v6642_v2, %v6594_v41  ;;  %v6547_v43 = vmul.f32 %v20922_v30, %v6410_v59  ;;  %v17177_v56 = vpop.f32.mrb[190].mxu1  ;;  %v6308_v2 = vmul.f32 %v20925_v26, %v16960_v11  ;;  %v20926_v59 = vld [vmem:[#allocation277_spill] sm:$0xff]  ;;  %v20932_v26 = vld [vmem:[#allocation220_spill] sm:$0xff] }
 0xd7b   : > { %6467 = vrot.lane.b32.xlu1 %v17177_v56, %s11712_s26  ;;  %v17181_v18 = vpop.f32.mrb[191].mxu1 }
 0xd7c   : > { %20923 = vst [vmem:[#allocation118_spill] sm:$0xff] %v17181_v18  ;;  %v6595_v17 = vadd.f32 %v6547_v43, %v6307_v24  ;;  %v20929_v43 = vld [vmem:[#allocation217_spill] sm:$0xff] }
 0xd7d   : > { %v6412_v25 = vpop.permute.xlu1 %6411  ;;  %v6309_v18 = vmul.f32 %v20929_v43, %v16966_v46  ;;  %v20933_v46 = vld [vmem:[#allocation221_spill] sm:$0xff] }
 0xd7e   : > { %v17189_v41 = vadd.f32 %v6643_v22, %v6595_v17  ;;  %v6548_v30 = vmul.f32 %v20926_v59, %v6412_v25  ;;  %v17192_v53 = vpop.f32.mrb[192].mxu1  ;;  %v20930_v22 = vld [vmem:[#allocation280_spill] sm:$0xff] }
 0xd7f   : > { %6469 = vrot.lane.b32.xlu0 %v17192_v53, %s11712_s26  ;;  %v17196_v5 = vpop.f32.mrb[193].mxu1 }
 0xd80   : > { %20927 = vst [vmem:[#allocation150_spill] sm:$0xff] %v17196_v5  ;;  %v6596_v48 = vadd.f32 %v6548_v30, %v6308_v2  ;;  %v6645_v5 = vmul.f32 %v20932_v26, %v16970_v21  ;;  %v20936_v21 = vld [vmem:[#allocation224_spill] sm:$0xff] }
 0xd81   : > { %v6414_v24 = vpop.permute.xlu0 %6413  ;;  %v6646_v26 = vmul.f32 %v20936_v21, %v16976_v50 }
 0xd82   : > { %v17202_v11 = vadd.f32 %v6644_v6, %v6596_v48  ;;  %v6549_v17 = vmul.f32 %v20930_v22, %v6414_v24  ;;  %v17205_v25 = vpop.f32.mrb[194].mxu1  ;;  %v6310_v6 = vmul.f32 %v20933_v46, %v16972_v58  ;;  %v20934_v24 = vld [vmem:[#allocation125_spill] sm:$0xff] }
 0xd83   : > { %6471 = vrot.lane.b32.xlu1 %v17205_v25, %s11712_s26  ;;  %v17209_v59 = vpop.f32.mrb[195].mxu1  ;;  %v20940_v46 = vld [vmem:[#allocation101_spill] sm:$0xff] }
 0xd84   : > { %20931 = vst [vmem:[#allocation99_spill] sm:$0xff] %v17209_v59  ;;  %v6597_v30 = vadd.f32 %v6549_v17, %v6309_v18  ;;  %v20937_v17 = vld [vmem:[#allocation227_spill] sm:$0xff] }
 0xd85   : > { %v6416_v2 = vpop.permute.xlu1 %6415  ;;  %v6311_v59 = vmul.f32 %v20937_v17, %v16978_v49  ;;  %v20941_v49 = vld [vmem:[#allocation102_spill] sm:$0xff] }
 0xd86   : > { %v17217_v48 = vadd.f32 %v6645_v5, %v6597_v30  ;;  %v6550_v22 = vmul.f32 %v20934_v24, %v6416_v2  ;;  %v17220_v43 = vpop.f32.mrb[196].mxu1  ;;  %v20938_v5 = vld [vmem:[#allocation282_spill] sm:$0xff] }
 0xd87   : > { %6473 = vrot.lane.b32.xlu0 %v17220_v43, %s11712_s26  ;;  %v17224_v40 = vpop.f32.mrb[197].mxu1 }
 0xd88   : > { %20935 = vst [vmem:[#allocation83_spill] sm:$0xff] %v17224_v40  ;;  %v6598_v42 = vadd.f32 %v6550_v22, %v6310_v6  ;;  %v6647_v40 = vmul.f32 %v20940_v46, %v16982_v51  ;;  %v20944_v51 = vld [vmem:[#allocation231_spill] sm:$0xff] }
 0xd89   : > { %v6418_v18 = vpop.permute.xlu0 %6417  ;;  %v6648_v46 = vmul.f32 %v20944_v51, %v16988_v23 }
 0xd8a   : > { %v17230_v58 = vadd.f32 %v6646_v26, %v6598_v42  ;;  %v6551_v30 = vmul.f32 %v20938_v5, %v6418_v18  ;;  %v17233_v2 = vpop.f32.mrb[198].mxu1  ;;  %v6312_v26 = vmul.f32 %v20941_v49, %v16984_v16  ;;  %v20942_v18 = vld [vmem:[#allocation85_spill] sm:$0xff] }
 0xd8b   : > { %6475 = vrot.lane.b32.xlu1 %v17233_v2, %s11712_s26  ;;  %v17237_v24 = vpop.f32.mrb[199].mxu1  ;;  %v20948_v49 = vld [vmem:[#allocation233_spill] sm:$0xff] }
 0xd8c   : > { %20939 = vst [vmem:[#allocation195_spill] sm:$0xff] %v17237_v24  ;;  %v6599_v22 = vadd.f32 %v6551_v30, %v6311_v59  ;;  %v20945_v30 = vld [vmem:[#allocation232_spill] sm:$0xff] }
 0xd8d   : > { %v6420_v6 = vpop.permute.xlu1 %6419  ;;  %v6313_v24 = vmul.f32 %v20945_v30, %v16990_v13  ;;  %v20949_v13 = vld [vmem:[#allocation237_spill] sm:$0xff] }
 0xd8e   : > { %v17245_v42 = vadd.f32 %v6647_v40, %v6599_v22  ;;  %v6552_v5 = vmul.f32 %v20942_v18, %v6420_v6  ;;  %v17248_v17 = vpop.f32.mrb[200].mxu1  ;;  %v20946_v40 = vld [vmem:[#allocation194_spill] sm:$0xff] }
 0xd8f   : > { %6477 = vrot.lane.b32.xlu0 %v17248_v17, %s11712_s26  ;;  %v17252_v21 = vpop.f32.mrb[201].mxu1 }
 0xd90   : > { %20943 = vst [vmem:[#allocation120_spill] sm:$0xff] %v17252_v21  ;;  %v6600_v50 = vadd.f32 %v6552_v5, %v6312_v26  ;;  %v6649_v21 = vmul.f32 %v20948_v49, %v16994_v27  ;;  %v20952_v27 = vld [vmem:[#allocation238_spill] sm:$0xff] }
 0xd91   : > { %v6422_v59 = vpop.permute.xlu0 %6421  ;;  %v6650_v49 = vmul.f32 %v20952_v27, %v17000_v57 }
 0xd92   : > { %v17258_v16 = vadd.f32 %v6648_v46, %v6600_v50  ;;  %v6553_v22 = vmul.f32 %v20946_v40, %v6422_v59  ;;  %v17261_v6 = vpop.f32.mrb[202].mxu1  ;;  %v6314_v46 = vmul.f32 %v20949_v13, %v16996_v47  ;;  %v20950_v59 = vld [vmem:[#allocation230_spill] sm:$0xff]  ;;  %v20956_v13 = vld [vmem:[#allocation243_spill] sm:$0xff] }
 0xd93   : > { %6479 = vrot.lane.b32.xlu1 %v17261_v6, %s11712_s26  ;;  %v17265_v18 = vpop.f32.mrb[203].mxu1 }
 0xd94   : > { %20947 = vst [vmem:[#allocation234_spill] sm:$0xff] %v17265_v18  ;;  %v6601_v5 = vadd.f32 %v6553_v22, %v6313_v24  ;;  %v20953_v22 = vld [vmem:[#allocation240_spill] sm:$0xff] }
 0xd95   : > { %v6424_v26 = vpop.permute.xlu1 %6423  ;;  %v6315_v18 = vmul.f32 %v20953_v22, %v17002_v32  ;;  %v20957_v32 = vld [vmem:[#allocation111_spill] sm:$0xff] }
 0xd96   : > { %v17273_v50 = vadd.f32 %v6649_v21, %v6601_v5  ;;  %v6554_v40 = vmul.f32 %v20950_v59, %v6424_v26  ;;  %v17276_v30 = vpop.f32.mrb[204].mxu1  ;;  %v20954_v21 = vld [vmem:[#allocation38_spill] sm:$0xff] }
 0xd97   : > { %6481 = vrot.lane.b32.xlu0 %v17276_v30, %s11712_s26  ;;  %v17280_v51 = vpop.f32.mrb[205].mxu1 }
 0xd98   : > { %20951 = vst [vmem:[#allocation205_spill] sm:$0xff] %v17280_v51  ;;  %v6602_v23 = vadd.f32 %v6554_v40, %v6314_v46  ;;  %v6651_v51 = vmul.f32 %v20956_v13, %v17006_v8  ;;  %v20960_v8 = vld [vmem:[#allocation245_spill] sm:$0xff] }
 0xd99   : > { %v6426_v24 = vpop.permute.xlu0 %6425  ;;  %v6652_v13 = vmul.f32 %v20960_v8, %v17012_v52 }
 0xd9a   : > { %v17286_v47 = vadd.f32 %v6650_v49, %v6602_v23  ;;  %v6555_v5 = vmul.f32 %v20954_v21, %v6426_v24  ;;  %v17289_v26 = vpop.f32.mrb[206].mxu1  ;;  %v6316_v49 = vmul.f32 %v20957_v32, %v17008_v39  ;;  %v20958_v24 = vld [vmem:[#allocation121_spill] sm:$0xff]  ;;  %v20965_v32 = vld [vmem:[#allocation247_spill] sm:$0xff] }
 0xd9b   : > { %6483 = vrot.lane.b32.xlu1 %v17289_v26, %s11712_s26  ;;  %v17293_v59 = vpop.f32.mrb[207].mxu1 }
 0xd9c   : > { %20955 = vst [vmem:[#allocation17_spill] sm:$0xff] %v17293_v59  ;;  %v6603_v40 = vadd.f32 %v6555_v5, %v6315_v18  ;;  %v20961_v5 = vld [vmem:[#allocation246_spill] sm:$0xff] }
 0xd9d   : > { %v6428_v46 = vpop.permute.xlu1 %6427  ;;  %v6317_v59 = vmul.f32 %v20961_v5, %v17014_v36  ;;  %v20966_v36 = vld [vmem:[#allocation113_spill] sm:$0xff] }
 0xd9e   : > { %v17301_v23 = vadd.f32 %v6651_v51, %v6603_v40  ;;  %v6556_v21 = vmul.f32 %v20958_v24, %v6428_v46  ;;  %v17304_v22 = vpop.f32.mrb[208].mxu1  ;;  %v20962_v51 = vld [vmem:[#allocation283_spill] sm:$0xff] }
 0xd9f   : > { %6485 = vrot.lane.b32.xlu0 %v17304_v22, %s11712_s26  ;;  %v17308_v27 = vpop.f32.mrb[209].mxu1 }
 0xda0   : > { %20959 = vst [vmem:[#allocation242_spill] sm:$0xff] %v17308_v27  ;;  %v6604_v57 = vadd.f32 %v6556_v21, %v6316_v49  ;;  %v6653_v27 = vmul.f32 %v20965_v32, %v17018_v14  ;;  %v20969_v14 = vld [vmem:[#allocation253_spill] sm:$0xff] }
 0xda1   : > { %v6430_v18 = vpop.permute.xlu0 %6429  ;;  %v6654_v32 = vmul.f32 %v20969_v14, %v17024_v20 }
 0xda2   : > { %v17314_v39 = vadd.f32 %v6652_v13, %v6604_v57  ;;  %v6557_v40 = vmul.f32 %v20962_v51, %v6430_v18  ;;  %v17317_v46 = vpop.f32.mrb[210].mxu1  ;;  %v6318_v13 = vmul.f32 %v20966_v36, %v17020_v44  ;;  %v20967_v18 = vld [vmem:[#allocation219_spill] sm:$0xff]  ;;  %v20971_v44 = vld [vmem:[#allocation284_spill] sm:$0xff] }
 0xda3   : > { %20963 = vst [vmem:[#allocation213_spill] sm:$0xff] %v17317_v46  ;;  %6487 = vrot.lane.b32.xlu1 %v17317_v46, %s11712_s26  ;;  %v17321_v24 = vpop.f32.mrb[211].mxu1 }
 0xda4   : > { %20964 = vst [vmem:[#allocation122_spill] sm:$0xff] %v17321_v24  ;;  %v6605_v21 = vadd.f32 %v6557_v40, %v6317_v59  ;;  %v20970_v59 = vld [vmem:[#allocation255_spill] sm:$0xff] }
 0xda5   : > { %v6432_v49 = vpop.permute.xlu1 %6431  ;;  %v6319_v40 = vmul.f32 %v20970_v59, %v17026_v4 }
 0xda6   : > { %v6701_v57 = vadd.f32 %v6653_v27, %v6605_v21  ;;  %v6558_v51 = vmul.f32 %v20967_v18, %v6432_v49  ;;  %v17330_v5 = vpop.f32.mrb[212].mxu1  ;;  %v20972_v18 = vld [vmem:[#allocation257_spill] sm:$0xff] }
 0xda7   : > { %6489 = vrot.lane.b32.xlu0 %v17330_v5, %s11712_s26  ;;  %v17334_v8 = vpop.f32.mrb[213].mxu1  ;;  %v6655_v36 = vmul.f32 %v20972_v18, %v17030_v29  ;;  %v6321_v29 = vmul.f32 %v14502_v31, %v17038_v38  ;;  %v20979_v38 = vld [vmem:[#allocation264_spill] sm:$0xff] }
 0xda8   : > { %20968 = vst [vmem:[#allocation132_spill] sm:$0xff] %v17334_v8  ;;  %v6606_v24 = vadd.f32 %v6558_v51, %v6318_v13  ;;  %v20973_v13 = vld [vmem:[#allocation258_spill] sm:$0xff] }
 0xda9   : > { %v6434_v52 = vpop.permute.xlu0 %6433  ;;  %v6320_v14 = vmul.f32 %v20973_v13, %v17032_v37  ;;  %v20975_v37 = vld [vmem:[#allocation262_spill] sm:$0xff] }
 0xdaa   : > { %v6702_v46 = vadd.f32 %v6654_v32, %v6606_v24  ;;  %v6559_v27 = vmul.f32 %v20971_v44, %v6434_v52  ;;  %v17341_v21 = vpop.f32.mrb[214].mxu1  ;;  %v20974_v24 = vpack.c.bf16 %v17118_v33, %v17105_v61  ;;  %v6656_v52 = vmul.f32 %v20399_v1, %v17036_v35  ;;  %v20976_v61 = vld [vmem:[#allocation263_spill] sm:$0xff] }
 0xdab   : > { %6491 = vrot.lane.b32.xlu1 %v17341_v21, %s11712_s26  ;;  %v17345_v49 = vpop.f32.mrb[215].mxu1  ;;  %v6322_v33 = vmul.f32 %v20976_v61, %v17044_v63  ;;  %v20982_v63 = vld [vmem:[#allocation119_spill] sm:$0xff] }
 0xdac   : > { %v6607_v8 = vadd.f32 %v6559_v27, %v6319_v40  ;;  %v11054_v20 = vpack.c.bf16 %v6702_v46, %v6701_v57 }
 0xdad   : > { %v6436_v51 = vpop.permute.xlu1 %6435 }
 0xdae   : > { %v6703_v4 = vadd.f32 %v6655_v36, %v6607_v8  ;;  %v6560_v32 = vmul.f32 %v15444_v3, %v6436_v51  ;;  %11055 = vmatprep.subr.bf16.mxu0 %v11054_v20  ;;  %v6657_v8 = vmul.f32 %v20975_v37, %v17042_v28  ;;  %v20977_v51 = vld [vmem:[#allocation249_spill] sm:$0xff]  ;;  %v20980_v28 = vld [vmem:[#allocation108_spill] sm:$0xff] }
 0xdaf   : > { %11057 = vmatpush3.bf16.msra.mxu0 %v20974_v24 }
 0xdb0   : > { %v6608_v44 = vadd.f32 %v6560_v32, %v6320_v14  ;;  %v20978_v14 = vpack.c.bf16 %v17146_v54, %v17133_v7  ;;  %v20984_v7 = vld [vmem:[#allocation271_spill] sm:$0xff] }
 0xdb1   : > { %v6438_v59 = vpop.permute.xlu0 %6437 }
 0xdb2   : > { %v6704_v46 = vadd.f32 %v6656_v52, %v6608_v44  ;;  %v6561_v57 = vmul.f32 %v15483_v34, %v6438_v59  ;;  %v6658_v59 = vmul.f32 %v20979_v38, %v17048_v9  ;;  %v20981_v52 = vld [vmem:[#allocation94_spill] sm:$0xff] }
 0xdb4   : > { %v6609_v36 = vadd.f32 %v6561_v57, %v6321_v29  ;;  %v11058_v40 = vpack.c.bf16 %v6704_v46, %v6703_v4  ;;  %v6323_v4 = vmul.f32 %v20980_v28, %v17050_v10  ;;  %v6659_v46 = vmul.f32 %v20982_v63, %v17054_v55  ;;  %v20987_v10 = vld [vmem:[#allocation196_spill] sm:$0xff]  ;;  %v20989_v55 = vld [vmem:[#allocation173_spill] sm:$0xff] }
 0xdb5   : > { %v6440_v27 = vpop.permute.xlu1 %6439  ;;  %v20996_v63 = vld [vmem:[#allocation236_spill] sm:$0xff] }
 0xdb6   : > { %v6705_v20 = vadd.f32 %v6657_v8, %v6609_v36  ;;  %v6562_v35 = vmul.f32 %v20977_v51, %v6440_v27  ;;  %11059 = vmatprep.subr.bf16.mxu0 %v11058_v40  ;;  %v20983_v40 = vld [vmem:[#allocation166_spill] sm:$0xff]  ;;  %v21284_v51 = vld [vmem:[#allocation180_spill] sm:$0xff] }
 0xdb7   : > { %11061 = vmatpush3.bf16.msra.mxu0 %v20978_v14  ;;  %v6324_v54 = vmul.f32 %v20984_v7, %v20983_v40  ;;  %v20985_v14 = vld [vmem:[#allocation104_spill] sm:$0xff]  ;;  %v20992_v40 = vld [vmem:[#allocation129_spill] sm:$0xff] }
 0xdb8   : > { %v6610_v44 = vadd.f32 %v6562_v35, %v6322_v33  ;;  %v20986_v33 = vpack.c.bf16 %v17174_v19, %v17161_v62  ;;  %v20988_v35 = vld [vmem:[#allocation272_spill] sm:$0xff]  ;;  %v20995_v62 = vld [vmem:[#allocation114_spill] sm:$0xff] }
 0xdb9   : > { %v6442_v32 = vpop.permute.xlu0 %6441  ;;  %v20994_v7 = vld [vmem:[#allocation144_spill] sm:$0xff] }
 0xdba   : > { %v6706_v24 = vadd.f32 %v6658_v59, %v6610_v44  ;;  %v6563_v29 = vmul.f32 %v20981_v52, %v6442_v32  ;;  %v6660_v59 = vmul.f32 %v20988_v35, %v20987_v10  ;;  %v6326_v19 = vmul.f32 %v20995_v62, %v20994_v7  ;;  %v21003_v7 = vld [vmem:[#allocation174_spill] sm:$0xff] }
 0xdbb   : > { %v21005_v62 = vld [vmem:[#allocation206_spill] sm:$0xff] }
 0xdbc   : > { %v6611_v57 = vadd.f32 %v6563_v29, %v6323_v4  ;;  %v11062_v8 = vpack.c.bf16 %v6706_v24, %v6705_v20  ;;  %v20990_v4 = vld [vmem:[#allocation169_spill] sm:$0xff]  ;;  %v20991_v29 = vld [vmem:[#allocation235_spill] sm:$0xff] }
 0xdbd   : > { %v6444_v36 = vpop.permute.xlu1 %6443  ;;  %v6325_v20 = vmul.f32 %v20990_v4, %v20989_v55 }
 0xdbe   : > { %v6707_v27 = vadd.f32 %v6659_v46, %v6611_v57  ;;  %v6564_v9 = vmul.f32 %v20985_v14, %v6444_v36  ;;  %11063 = vmatprep.subr.bf16.mxu0 %v11062_v8  ;;  %v20993_v46 = vld [vmem:[#allocation190_spill] sm:$0xff] }
 0xdbf   : > { %11065 = vmatpush3.bf16.msra.mxu0 %v20986_v33  ;;  %v6661_v57 = vmul.f32 %v20993_v46, %v20992_v40  ;;  %v21000_v40 = vld [vmem:[#allocation223_spill] sm:$0xff]  ;;  %v21007_v46 = vld [vmem:[#allocation128_spill] sm:$0xff] }
 0xdc0   : > { %v6612_v44 = vadd.f32 %v6564_v9, %v6324_v54  ;;  %v20997_v54 = vpack.c.bf16 %v17202_v11, %v17189_v41  ;;  %v20998_v9 = vld [vmem:[#allocation156_spill] sm:$0xff]  ;;  %v21006_v41 = vld [vmem:[#allocation281_spill] sm:$0xff] }
 0xdc1   : > { %v6446_v32 = vpop.permute.xlu0 %6445  ;;  %v6328_v11 = vmul.f32 %v21006_v41, %v21005_v62  ;;  %v21014_v62 = vld [vmem:[#allocation116_spill] sm:$0xff]  ;;  %v21016_v41 = vld [vmem:[#allocation181_spill] sm:$0xff] }
 0xdc2   : > { %v6708_v24 = vadd.f32 %v6660_v59, %v6612_v44  ;;  %v6565_v52 = vmul.f32 %v20991_v29, %v6446_v32  ;;  %v20999_v59 = vld [vmem:[#allocation175_spill] sm:$0xff] }
 0xdc3   : > { %v6662_v44 = vmul.f32 %v20999_v59, %v20998_v9  ;;  %v21270_v59 = vld [vmem:[#allocation162_spill] sm:$0xff] }
 0xdc4   : > { %v6613_v36 = vadd.f32 %v6565_v52, %v6325_v20  ;;  %v11066_v8 = vpack.c.bf16 %v6708_v24, %v6707_v27  ;;  %v21001_v52 = vld [vmem:[#allocation176_spill] sm:$0xff]  ;;  %v21002_v24 = vld [vmem:[#allocation239_spill] sm:$0xff] }
 0xdc5   : > { %v6448_v14 = vpop.permute.xlu1 %6447  ;;  %v6327_v27 = vmul.f32 %v21001_v52, %v21000_v40 }
 0xdc6   : > { %v6709_v33 = vadd.f32 %v6661_v57, %v6613_v36  ;;  %v6566_v10 = vmul.f32 %v20996_v63, %v6448_v14  ;;  %11067 = vmatprep.subr.bf16.mxu0 %v11066_v8  ;;  %v21004_v57 = vld [vmem:[#allocation186_spill] sm:$0xff] }
 0xdc7   : > { %11069 = vmatpush3.bf16.msra.mxu0 %v20997_v54  ;;  %v6663_v36 = vmul.f32 %v21004_v57, %v21003_v7  ;;  %v21011_v7 = vld [vmem:[#allocation158_spill] sm:$0xff]  ;;  %v21018_v57 = vld [vmem:[#allocation141_spill] sm:$0xff] }
 0xdc8   : > { %v6614_v32 = vadd.f32 %v6566_v10, %v6326_v19  ;;  %v21008_v19 = vpack.c.bf16 %v17230_v58, %v17217_v48  ;;  %v21009_v10 = vld [vmem:[#allocation279_spill] sm:$0xff]  ;;  %v21017_v48 = vld [vmem:[#allocation202_spill] sm:$0xff] }
 0xdc9   : > { %v6450_v55 = vpop.permute.xlu0 %6449  ;;  %v6330_v58 = vmul.f32 %v21017_v48, %v21016_v41  ;;  %v21024_v41 = vld [vmem:[#allocation218_spill] sm:$0xff] }
 0xdca   : > { %v6710_v20 = vadd.f32 %v6662_v44, %v6614_v32  ;;  %v6567_v29 = vmul.f32 %v21002_v24, %v6450_v55  ;;  %v21010_v44 = vld [vmem:[#allocation82_spill] sm:$0xff] }
 0xdcb   : > { %v6664_v32 = vmul.f32 %v21010_v44, %v21009_v10  ;;  %v21027_v48 = vld [vmem:[#allocation98_spill] sm:$0xff] }
 0xdcc   : > { %v6615_v14 = vadd.f32 %v6567_v29, %v6327_v27  ;;  %v11070_v8 = vpack.c.bf16 %v6710_v20, %v6709_v33  ;;  %v21012_v29 = vld [vmem:[#allocation189_spill] sm:$0xff]  ;;  %v21013_v20 = vld [vmem:[#allocation96_spill] sm:$0xff] }
 0xdcd   : > { %v6452_v63 = vpop.permute.xlu1 %6451  ;;  %v6329_v33 = vmul.f32 %v21012_v29, %v21011_v7  ;;  %v21262_v29 = vld [vmem:[#allocation160_spill] sm:$0xff] }
 0xdce   : > { %v6711_v54 = vadd.f32 %v6663_v36, %v6615_v14  ;;  %v6568_v9 = vmul.f32 %v21007_v46, %v6452_v63  ;;  %11071 = vmatprep.subr.bf16.mxu0 %v11070_v8  ;;  %v21015_v36 = vld [vmem:[#allocation191_spill] sm:$0xff] }
 0xdcf   : > { %11073 = vmatpush3.bf16.msra.mxu0 %v21008_v19  ;;  %v6665_v14 = vmul.f32 %v21015_v36, %v21014_v62 }
 0xdd0   : > { %v6616_v55 = vadd.f32 %v6568_v9, %v6328_v11  ;;  %v21019_v11 = vpack.c.bf16 %v17258_v16, %v17245_v42  ;;  %v21020_v9 = vld [vmem:[#allocation146_spill] sm:$0xff]  ;;  %v21026_v42 = vld [vmem:[#allocation92_spill] sm:$0xff] }
 0xdd1   : > { %v6454_v40 = vpop.permute.xlu0 %6453  ;;  %v6332_v16 = vmul.f32 %v21026_v42, %v17121_v0  ;;  %v21033_v0 = vld [vmem:[#allocation225_spill] sm:$0xff]  ;;  %v21036_v42 = vld [vmem:[#allocation100_spill] sm:$0xff] }
 0xdd2   : > { %v6712_v27 = vadd.f32 %v6664_v32, %v6616_v55  ;;  %v6569_v24 = vmul.f32 %v21013_v20, %v6454_v40  ;;  %v21021_v32 = vld [vmem:[#allocation130_spill] sm:$0xff] }
 0xdd3   : > { %v6666_v55 = vmul.f32 %v21021_v32, %v21020_v9 }
 0xdd4   : > { %v6617_v63 = vadd.f32 %v6569_v24, %v6329_v33  ;;  %v11074_v8 = vpack.c.bf16 %v6712_v27, %v6711_v54  ;;  %v21022_v24 = vld [vmem:[#allocation95_spill] sm:$0xff] }
 0xdd5   : > { %v6456_v46 = vpop.permute.xlu1 %6455  ;;  %v6331_v54 = vmul.f32 %v21022_v24, %v17108_v60  ;;  %v21023_v27 = vld [vmem:[#allocation131_spill] sm:$0xff]  ;;  %v21255_v24 = vld [vmem:[#allocation157_spill] sm:$0xff] }
 0xdd6   : > { %v6713_v19 = vadd.f32 %v6665_v14, %v6617_v63  ;;  %v6570_v10 = vmul.f32 %v21018_v57, %v6456_v46  ;;  %11075 = vmatprep.subr.bf16.mxu0 %v11074_v8  ;;  %v21025_v14 = vld [vmem:[#allocation207_spill] sm:$0xff] }
 0xdd7   : > { %11077 = vmatpush3.bf16.msra.mxu0 %v21019_v11  ;;  %v6667_v63 = vmul.f32 %v21025_v14, %v21024_v41  ;;  %v21029_v60 = vld [vmem:[#allocation127_spill] sm:$0xff] }
 0xdd8   : > { %v6618_v40 = vadd.f32 %v6570_v10, %v6330_v58  ;;  %v21028_v58 = vpack.c.bf16 %v17286_v47, %v17273_v50  ;;  %v21030_v10 = vld [vmem:[#allocation48_spill] sm:$0xff]  ;;  %v21035_v50 = vld [vmem:[#allocation49_spill] sm:$0xff] }
 0xdd9   : > { %v6458_v7 = vpop.permute.xlu0 %6457  ;;  %v6334_v47 = vmul.f32 %v21035_v50, %v17149_v45  ;;  %v21044_v45 = vld [vmem:[#allocation259_spill] sm:$0xff] }
 0xdda   : > { %v6714_v33 = vadd.f32 %v6666_v55, %v6618_v40  ;;  %v6571_v62 = vmul.f32 %v21023_v27, %v6458_v7  ;;  %v6668_v55 = vmul.f32 %v21030_v10, %v21029_v60  ;;  %v21052_v50 = vld [vmem:[#allocation139_spill] sm:$0xff] }
 0xddc   : > { %v6619_v46 = vadd.f32 %v6571_v62, %v6331_v54  ;;  %v11078_v8 = vpack.c.bf16 %v6714_v33, %v6713_v19  ;;  %v21031_v54 = vld [vmem:[#allocation93_spill] sm:$0xff]  ;;  %v21032_v62 = vld [vmem:[#allocation248_spill] sm:$0xff] }
 0xddd   : > { %v6460_v57 = vpop.permute.xlu1 %6459  ;;  %v6333_v19 = vmul.f32 %v21031_v54, %v17136_v12  ;;  %v21038_v12 = vld [vmem:[#allocation170_spill] sm:$0xff]  ;;  %v21251_v54 = vld [vmem:[#allocation153_spill] sm:$0xff] }
 0xdde   : > { %v6715_v11 = vadd.f32 %v6667_v63, %v6619_v46  ;;  %v6572_v9 = vmul.f32 %v21027_v48, %v6460_v57  ;;  %11079 = vmatprep.subr.bf16.mxu0 %v11078_v8  ;;  %v21034_v63 = vld [vmem:[#allocation252_spill] sm:$0xff] }
 0xddf   : > { %11081 = vmatpush3.bf16.msra.mxu0 %v21028_v58  ;;  %v6669_v46 = vmul.f32 %v21034_v63, %v21033_v0 }
 0xde0   : > { %v6620_v40 = vadd.f32 %v6572_v9, %v6332_v16  ;;  %v21037_v16 = vpack.c.bf16 %v17314_v39, %v17301_v23  ;;  %v21039_v9 = vld [vmem:[#allocation168_spill] sm:$0xff]  ;;  %v21046_v23 = vld [vmem:[#allocation163_spill] sm:$0xff] }
 0xde1   : > { %v6462_v7 = vpop.permute.xlu0 %6461  ;;  %v21047_v39 = vld [vmem:[#allocation27_spill] sm:$0xff] }
 0xde2   : > { %v6716_v33 = vadd.f32 %v6668_v55, %v6620_v40  ;;  %v6573_v41 = vmul.f32 %v21032_v62, %v6462_v7  ;;  %v5942_v55 = vmul.f32 %v21039_v9, %v21038_v12  ;;  %v21040_v40 = vld [vmem:[#allocation148_spill] sm:$0xff]  ;;  %v21041_v7 = vld [vmem:[#allocation126_spill] sm:$0xff]  ;;  %v21048_v12 = vld [vmem:[#allocation165_spill] sm:$0xff] }
 0xde3   : > { %v6670_v0 = vmul.f32 %v21041_v7, %v21040_v40  ;;  %v21049_v9 = vld [vmem:[#allocation105_spill] sm:$0xff]  ;;  %v21051_v7 = vld [vmem:[#allocation215_spill] sm:$0xff] }
 0xde4   : > { %v6621_v57 = vadd.f32 %v6573_v41, %v6333_v19  ;;  %v11082_v8 = vpack.c.bf16 %v6716_v33, %v6715_v11  ;;  %v21042_v11 = vld [vmem:[#allocation154_spill] sm:$0xff]  ;;  %v21043_v33 = vld [vmem:[#allocation152_spill] sm:$0xff] }
 0xde5   : > { %v6464_v48 = vpop.permute.xlu1 %6463  ;;  %v5946_v41 = vmul.f32 %v21043_v33, %v21042_v11 }
 0xde6   : > { %v6717_v58 = vadd.f32 %v6669_v46, %v6621_v57  ;;  %v6574_v60 = vmul.f32 %v21036_v42, %v6464_v48  ;;  %11083 = vmatprep.subr.bf16.mxu0 %v11082_v8  ;;  %v6335_v46 = vmul.f32 %v21044_v45, %v17164_v15  ;;  %v21045_v57 = vld [vmem:[#allocation208_spill] sm:$0xff]  ;;  %v6671_v42 = vmul.f32 %v21049_v9, %v21048_v12 }
 0xde7   : > { %11085 = vmatpush3.bf16.msra.mxu0 %v21037_v16  ;;  %v5945_v16 = vmul.f32 %v21047_v39, %v21046_v23  ;;  %v6336_v15 = vmul.f32 %v21052_v50, %v17177_v56  ;;  %v21059_v56 = vld [vmem:[#allocation97_spill] sm:$0xff]  ;;  %v21061_v50 = vld [vmem:[#allocation182_spill] sm:$0xff] }
 0xde8   : > { %v6622_v19 = vadd.f32 %v6574_v60, %v6334_v47  ;;  %v21050_v60 = vld [vmem:[#allocation171_spill] sm:$0xff] }
 0xde9   : > { %v6466_v63 = vpop.permute.xlu0 %6465  ;;  %v5944_v11 = vmul.f32 %v21051_v7, %v21050_v60  ;;  %v21058_v60 = vld [vmem:[#allocation150_spill] sm:$0xff] }
 0xdea   : > { %v6718_v48 = vadd.f32 %v6670_v0, %v6622_v19  ;;  %v6575_v8 = vmul.f32 %v21045_v57, %v6466_v63  ;;  %6798 = vmatmul.mubr.f32.vlgmr.msra.gmra.mrb[66].mxu0 %v5942_v55  ;;  %v21053_v19 = vld [vmem:[#allocation278_spill] sm:$0xff] }
 0xdeb   : > { %6802 = vmatprep.mubr.f32.mxu0 %v5946_v41  ;;  %v21054_v55 = vld [vmem:[#allocation118_spill] sm:$0xff]  ;;  %v21055_v41 = vld [vmem:[#allocation39_spill] sm:$0xff] }
 0xdec   : > { %v6623_v40 = vadd.f32 %v6575_v8, %v6335_v46  ;;  %v11086_v47 = vpack.c.bf16 %v6718_v48, %v6717_v58  ;;  %v6672_v23 = vmul.f32 %v21055_v41, %v21054_v55  ;;  %v21056_v58 = vld [vmem:[#allocation241_spill] sm:$0xff]  ;;  %v21057_v8 = vld [vmem:[#allocation115_spill] sm:$0xff] }
 0xded   : > { %v6468_v33 = vpop.permute.xlu1 %6467  ;;  %v6337_v48 = vmul.f32 %v21056_v58, %v17192_v53 }
 0xdee   : > { %v6719_v0 = vadd.f32 %v6671_v42, %v6623_v40  ;;  %v6576_v63 = vmul.f32 %v21053_v19, %v6468_v33  ;;  %6803 = vmatmul.mubr.f32.gmra.mrb[68].mxu0 %v5945_v16  ;;  %11087 = vmatprep.subr.bf16.mxu0 %v11086_v47  ;;  %v6673_v42 = vmul.f32 %v21059_v56, %v21058_v60 }
 0xdef   : > { %11089 = vmatpush3.bf16.msra.mxu0 %v11086_v47  ;;  %10557 = vmatprep.mubr.f32.mxu0 %v5944_v11  ;;  %v21060_v47 = vld [vmem:[#allocation244_spill] sm:$0xff] }
 0xdf0   : > { %v6624_v39 = vadd.f32 %v6576_v63, %v6336_v15  ;;  %v6338_v11 = vmul.f32 %v21060_v47, %v17205_v25  ;;  %v21062_v15 = vld [vmem:[#allocation99_spill] sm:$0xff]  ;;  %v21069_v47 = vld [vmem:[#allocation254_spill] sm:$0xff] }
 0xdf1   : > { %v6470_v46 = vpop.permute.xlu0 %6469  ;;  %v21063_v63 = vld [vmem:[#allocation275_spill] sm:$0xff] }
 0xdf2   : > { %v6720_v7 = vadd.f32 %v6672_v23, %v6624_v39  ;;  %v6577_v12 = vmul.f32 %v21057_v8, %v6470_v46  ;;  %v6674_v53 = vmul.f32 %v21063_v63, %v21062_v15  ;;  %v21064_v46 = vld [vmem:[#allocation143_spill] sm:$0xff] }
 0xdf3   : > { %v6339_v8 = vmul.f32 %v21064_v46, %v17220_v43 }
 0xdf4   : > { %v6625_v40 = vadd.f32 %v6577_v12, %v6337_v48  ;;  %v11090_v33 = vpack.c.bf16 %v6720_v7, %v6719_v0  ;;  %v21065_v48 = vld [vmem:[#allocation133_spill] sm:$0xff]  ;;  %v21066_v7 = vld [vmem:[#allocation83_spill] sm:$0xff]  ;;  %v21067_v12 = vld [vmem:[#allocation172_spill] sm:$0xff] }
 0xdf5   : > { %v6472_v16 = vpop.permute.xlu1 %6471  ;;  %v6675_v56 = vmul.f32 %v21067_v12, %v21066_v7 }
 0xdf6   : > { %v6721_v19 = vadd.f32 %v6673_v42, %v6625_v40  ;;  %v6578_v55 = vmul.f32 %v21061_v50, %v6472_v16  ;;  %11091 = vmatprep.subr.bf16.mxu0 %v11090_v33  ;;  %v21068_v16 = vld [vmem:[#allocation211_spill] sm:$0xff] }
 0xdf7   : > { %11093 = vmatpush3.bf16.msra.mxu0 %v11090_v33  ;;  %v6340_v33 = vmul.f32 %v21068_v16, %v17233_v2  ;;  %v21077_v16 = vld [vmem:[#allocation216_spill] sm:$0xff] }
 0xdf8   : > { %v6626_v23 = vadd.f32 %v6578_v55, %v6338_v11  ;;  %v21070_v11 = vld [vmem:[#allocation195_spill] sm:$0xff] }
 0xdf9   : > { %v6474_v39 = vpop.permute.xlu0 %6473  ;;  %v21071_v55 = vld [vmem:[#allocation103_spill] sm:$0xff] }
 0xdfa   : > { %v6722_v60 = vadd.f32 %v6674_v53, %v6626_v23  ;;  %v6579_v0 = vmul.f32 %v21065_v48, %v6474_v39  ;;  %v6676_v43 = vmul.f32 %v21071_v55, %v21070_v11  ;;  %v21072_v39 = vld [vmem:[#allocation177_spill] sm:$0xff]  ;;  %v21154_v55 = vld [vmem:[#allocation75_spill] sm:$0xff] }
 0xdfb   : > { %v6341_v48 = vmul.f32 %v21072_v39, %v17248_v17 }
 0xdfc   : > { %v6627_v25 = vadd.f32 %v6579_v0, %v6339_v8  ;;  %v11094_v42 = vpack.c.bf16 %v6722_v60, %v6721_v19  ;;  %v21073_v8 = vld [vmem:[#allocation187_spill] sm:$0xff]  ;;  %v21074_v60 = vld [vmem:[#allocation120_spill] sm:$0xff] }
 0xdfd   : > { %v6476_v40 = vpop.permute.xlu1 %6475  ;;  %v21075_v0 = vld [vmem:[#allocation251_spill] sm:$0xff] }
 0xdfe   : > { %v6723_v50 = vadd.f32 %v6675_v56, %v6627_v25  ;;  %v6580_v15 = vmul.f32 %v21069_v47, %v6476_v40  ;;  %11095 = vmatprep.subr.bf16.mxu0 %v11094_v42  ;;  %v6677_v12 = vmul.f32 %v21075_v0, %v21074_v60  ;;  %v21076_v40 = vld [vmem:[#allocation145_spill] sm:$0xff] }
 0xdff   : > { %11097 = vmatpush3.bf16.msra.mxu0 %v11094_v42  ;;  %v6342_v42 = vmul.f32 %v21076_v40, %v17261_v6  ;;  %v21085_v40 = vld [vmem:[#allocation117_spill] sm:$0xff] }
 0xe00   : > { %v6628_v53 = vadd.f32 %v6580_v15, %v6340_v33  ;;  %v21078_v33 = vld [vmem:[#allocation234_spill] sm:$0xff]  ;;  %v21079_v15 = vld [vmem:[#allocation209_spill] sm:$0xff] }
 0xe01   : > { %v6478_v23 = vpop.permute.xlu0 %6477  ;;  %v6678_v17 = vmul.f32 %v21079_v15, %v21078_v33 }
 0xe02   : > { %v6724_v7 = vadd.f32 %v6676_v43, %v6628_v53  ;;  %v6581_v19 = vmul.f32 %v21073_v8, %v6478_v23  ;;  %v21080_v23 = vld [vmem:[#allocation256_spill] sm:$0xff] }
 0xe03   : > { %v6343_v8 = vmul.f32 %v21080_v23, %v17276_v30  ;;  %v21094_v23 = vld [vmem:[#allocation266_spill] sm:$0xff] }
 0xe04   : > { %v6629_v2 = vadd.f32 %v6581_v19, %v6341_v48  ;;  %v11098_v56 = vpack.c.bf16 %v6724_v7, %v6723_v50  ;;  %v21081_v48 = vld [vmem:[#allocation84_spill] sm:$0xff]  ;;  %v21082_v7 = vld [vmem:[#allocation205_spill] sm:$0xff] }
 0xe05   : > { %v6480_v25 = vpop.permute.xlu1 %6479  ;;  %v21083_v19 = vld [vmem:[#allocation136_spill] sm:$0xff] }
 0xe06   : > { %v6725_v47 = vadd.f32 %v6677_v12, %v6629_v2  ;;  %v6582_v11 = vmul.f32 %v21077_v16, %v6480_v25  ;;  %11099 = vmatprep.subr.bf16.mxu0 %v11098_v56  ;;  %v6679_v0 = vmul.f32 %v21083_v19, %v21082_v7  ;;  %v21084_v25 = vld [vmem:[#allocation260_spill] sm:$0xff] }
 0xe07   : > { %11101 = vmatpush3.bf16.msra.mxu0 %v11098_v56  ;;  %v6344_v56 = vmul.f32 %v21084_v25, %v17289_v26 }
 0xe08   : > { %v6630_v43 = vadd.f32 %v6582_v11, %v6342_v42  ;;  %v21086_v42 = vld [vmem:[#allocation17_spill] sm:$0xff]  ;;  %v21087_v11 = vld [vmem:[#allocation198_spill] sm:$0xff] }
 0xe09   : > { %v6482_v53 = vpop.permute.xlu0 %6481  ;;  %v6680_v30 = vmul.f32 %v21087_v11, %v21086_v42 }
 0xe0a   : > { %v6726_v60 = vadd.f32 %v6678_v17, %v6630_v43  ;;  %v6583_v50 = vmul.f32 %v21081_v48, %v6482_v53  ;;  %v21088_v53 = vld [vmem:[#allocation265_spill] sm:$0xff] }
 0xe0b   : > { %v6345_v48 = vmul.f32 %v21088_v53, %v17304_v22 }
 0xe0c   : > { %v6631_v6 = vadd.f32 %v6583_v50, %v6343_v8  ;;  %v11102_v12 = vpack.c.bf16 %v6726_v60, %v6725_v47  ;;  %v21089_v8 = vld [vmem:[#allocation138_spill] sm:$0xff]  ;;  %v21091_v50 = vld [vmem:[#allocation167_spill] sm:$0xff] }
 0xe0d   : > { %v6484_v2 = vpop.permute.xlu1 %6483  ;;  %v21090_v60 = vld [vmem:[#allocation242_spill] sm:$0xff] }
 0xe0e   : > { %v6727_v16 = vadd.f32 %v6679_v0, %v6631_v6  ;;  %v6584_v33 = vmul.f32 %v21085_v40, %v6484_v2  ;;  %11103 = vmatprep.subr.bf16.mxu0 %v11102_v12  ;;  %v6681_v19 = vmul.f32 %v21091_v50, %v21090_v60  ;;  %v21092_v2 = vld [vmem:[#allocation213_spill] sm:$0xff]  ;;  %v21093_v40 = vld [vmem:[#allocation228_spill] sm:$0xff] }
 0xe0f   : > { %11105 = vmatpush3.bf16.msra.mxu0 %v11102_v12  ;;  %v6346_v12 = vmul.f32 %v21093_v40, %v21092_v2 }
 0xe10   : > { %v6632_v17 = vadd.f32 %v6584_v33, %v6344_v56  ;;  %v21095_v56 = vld [vmem:[#allocation122_spill] sm:$0xff]  ;;  %v21096_v33 = vld [vmem:[#allocation268_spill] sm:$0xff] }
 0xe11   : > { %v6486_v43 = vpop.permute.xlu0 %6485  ;;  %v6682_v22 = vmul.f32 %v21096_v33, %v21095_v56 }
 0xe12   : > { %v6728_v7 = vadd.f32 %v6680_v30, %v6632_v17  ;;  %v6585_v47 = vmul.f32 %v21089_v8, %v6486_v43  ;;  %v21097_v43 = vld [vmem:[#allocation147_spill] sm:$0xff] }
 0xe13   : > { %v6347_v8 = vmul.f32 %v21097_v43, %v17330_v5  ;;  %v21103_v5 = vld [vmem:[#allocation149_spill] sm:$0xff] }
 0xe14   : > { %v6633_v26 = vadd.f32 %v6585_v47, %v6345_v48  ;;  %v11106_v0 = vpack.c.bf16 %v6728_v7, %v6727_v16  ;;  %v21098_v48 = vld [vmem:[#allocation269_spill] sm:$0xff]  ;;  %v21099_v7 = vld [vmem:[#allocation132_spill] sm:$0xff]  ;;  %v21100_v47 = vld [vmem:[#allocation110_spill] sm:$0xff] }
 0xe15   : > { %v6488_v6 = vpop.permute.xlu1 %6487  ;;  %v6683_v50 = vmul.f32 %v21100_v47, %v21099_v7  ;;  %v9707_v7 = vld [vmem:[%s11791_s11 + $0x118] sm:$0xff] }
 0xe16   : > { %v6729_v25 = vadd.f32 %v6681_v19, %v6633_v26  ;;  %v6586_v42 = vmul.f32 %v21094_v23, %v6488_v6  ;;  %11107 = vmatprep.subr.bf16.mxu0 %v11106_v0 }
 0xe17   : > { %11109 = vmatpush3.bf16.msra.mxu0 %v11106_v0  ;;  %v21101_v0 = vld [vmem:[#allocation201_spill] sm:$0xff] }
 0xe18   : > { %v6634_v30 = vadd.f32 %v6586_v42, %v6346_v12  ;;  %v6348_v6 = vmul.f32 %v21101_v0, %v17341_v21  ;;  %v21102_v42 = vld [vmem:[#allocation273_spill] sm:$0xff]  ;;  %v21105_v21 = vld [vmem:[#allocation210_spill] sm:$0xff]  ;;  %v9723_v0 = vld [vmem:[%s11859_s18 + $0x188] sm:$0xff] }
 0xe19   : > { %v6490_v17 = vpop.permute.xlu0 %6489 }
 0xe1a   : > { %v6730_v60 = vadd.f32 %v6682_v22, %v6634_v30  ;;  %v6587_v16 = vmul.f32 %v21098_v48, %v6490_v17  ;;  %v6684_v22 = vmul.f32 %v21103_v5, %v17345_v49  ;;  %v21104_v17 = vld [vmem:[#allocation142_spill] sm:$0xff] }
 0xe1b   : > { %v9704_v49 = vld [vmem:[%s11791_s11 + $0x100] sm:$0xff] }
 0xe1c   : > { %v6635_v2 = vadd.f32 %v6587_v16, %v6347_v8  ;;  %v11110_v19 = vpack.c.bf16 %v6730_v60, %v6729_v25  ;;  %v21106_v60 = vmov 0.0   ;;  %v9705_v16 = vld [vmem:[%s11791_s11 + $0x108] sm:$0xff] }
 0xe1d   : > { %v6492_v26 = vpop.permute.xlu1 %6491 }
 0xe1e   : > { %v6731_v12 = vadd.f32 %v6683_v50, %v6635_v2  ;;  %v6588_v56 = vmul.f32 %v21102_v42, %v6492_v26  ;;  %11111 = vmatprep.subr.bf16.mxu0 %v11110_v19  ;;  %v5947_v50 = vmul.f32 %v21105_v21, %v21104_v17  ;;  %v11118_v2 = vpack.c.bf16 %v9707_v7, %v9705_v16  ;;  %v9715_v17 = vld [vmem:[%s11791_s11 + $0x158] sm:$0xff]  ;;  %v9714_v16 = vld [vmem:[%s11791_s11 + $0x150] sm:$0xff]  ;;  %v9722_v42 = vld [vmem:[%s11859_s18 + $0x180] sm:$0xff] }
 0xe1f   : > { %11113 = vmatpush3.bf16.msra.mxu0 %v11110_v19  ;;  %v9706_v19 = vld [vmem:[%s11791_s11 + $0x110] sm:$0xff] }
 0xe20   : > { %v6636_v30 = vadd.f32 %v6588_v56, %v6348_v6  ;;  %v11120_v26 = vpack.c.bf16 %v9706_v19, %v9704_v49  ;;  %v9709_v6 = vld [vmem:[%s11791_s11 + $0x128] sm:$0xff] }
 0xe21   : > { %v9717_v49 = vld [vmem:[%s11791_s11 + $0x168] sm:$0xff] }
 0xe22   : > { %v6732_v8 = vadd.f32 %v6684_v22, %v6636_v30  ;;  %v9708_v22 = vld [vmem:[%s11791_s11 + $0x120] sm:$0xff]  ;;  %v9710_v30 = vld [vmem:[%s11791_s11 + $0x130] sm:$0xff] }
 0xe24   : > { %v11114_v25 = vpack.c.bf16 %v6732_v8, %v6731_v12  ;;  %v9711_v12 = vld [vmem:[%s11791_s11 + $0x138] sm:$0xff]  ;;  %v11124_v8 = vpack.c.bf16 %v9710_v30, %v9708_v22 }
 0xe25   : > { %v11122_v56 = vpack.c.bf16 %v9711_v12, %v9709_v6  ;;  %v9718_v6 = vld [vmem:[%s11791_s11 + $0x170] sm:$0xff] }
 0xe26   : > { %11115 = vmatprep.subr.bf16.mxu0 %v11114_v25 }
 0xe27   : > { %11117 = vmatpush3.bf16.msra.mxu0 %v11114_v25  ;;  %v9713_v25 = vld [vmem:[%s11791_s11 + $0x148] sm:$0xff] }
 0xe28   : > { %11119 = vmatprep.subr.bf16.mxu0 %v11118_v2  ;;  %v11126_v21 = vpack.c.bf16 %v9715_v17, %v9713_v25  ;;  %v9719_v2 = vld [vmem:[%s11791_s11 + $0x178] sm:$0xff] }
 0xe29   : > { %v11130_v19 = vpack.c.bf16 %v9719_v2, %v9717_v49 }
 0xe2a   : > { %10558 = vmatmul.mubr.f32.vlgmr.msra.gmra.mrb[70].mxu0 %v5947_v50  ;;  %v9712_v50 = vld [vmem:[%s11791_s11 + $0x140] sm:$0xff] }
 0xe2b   : > { %6988 = vmatprep.mubr.f32.mxu0 %v21106_v60  ;;  %11121 = vmatpush1.bf16.msra.mxu0 %v11120_v26  ;;  %v11128_v7 = vpack.c.bf16 %v9714_v16, %v9712_v50  ;;  %v9716_v26 = vld [vmem:[%s11791_s11 + $0x160] sm:$0xff] }
 0xe2c   : > { %11123 = vmatprep.subr.bf16.mxu0 %v11122_v56  ;;  %v11132_v12 = vpack.c.bf16 %v9718_v6, %v9716_v26  ;;  %v21107_v56 = vmov 0.0|0.0   ;;  %v9702_v50 = vld [vmem:[%s11907_s24 + $0x3] ss:$0 sm:$0xff]  ;;  %v9703_v26 = vld [vmem:[%s11907_s24 + $0x4] ss:$0 sm:$0xff] }
 0xe2f   : > { %11125 = vmatpush1.bf16.msra.mxu0 %v11124_v8 }
 0xe30   : > { %11127 = vmatprep.subr.bf16.mxu0 %v11126_v21 }
 0xe33   : > { %11129 = vmatpush1.bf16.msra.mxu0 %v11128_v7 }
 0xe34   : > { %11131 = vmatprep.subr.bf16.mxu0 %v11130_v19 }
 0xe37   : > { %11133 = vmatpush1.bf16.msra.mxu0 %v11132_v12 }
 0xe38   : > { %11134 = vmatprep.subr.bf16.mxu0 %v21107_v56 }
 0xebd   : > { %v10160_v22 = vpop.f32.mrb[66].mxu0 }
 0xebe   : > { %v10161_v30 = vpop.f32.mrb[67].mxu0 }
 0xebf   : > { %v10162_v8 = vadd.f32 %v10161_v30, %v10160_v22  ;;  %v11135_v30 = vpack.c.bf16 %v9723_v0, %v9722_v42  ;;  %v9726_v0 = vld [vmem:[%s11859_s18 + $0x1a0] sm:$0xff]  ;;  %v9727_v42 = vld [vmem:[%s11859_s18 + $0x1a8] sm:$0xff] }
 0xec1   : > { %v10163_v25 = vpop.f32.mrb[68].mxu0 }
 0xec2   : > { %v10164_v17 = vpop.f32.mrb[69].mxu0 }
 0xec3   : > { %v10165_v21 = vadd.f32 %v10164_v17, %v10163_v25  ;;  %v21108_v25 = vld [vmem:[#allocation2_spill] sm:$0xff] }
 0xefd   : > { %v10559_v16 = vpop.f32.mrb[70].mxu0 }
 0xefe   : > { %v6880_v7 = vadd.f32 %v10559_v16, %v10165_v21  ;;  %v6874_v49 = vpop.f32.mrb[71].mxu0  ;;  %v9724_v21 = vld [vmem:[%s11859_s18 + $0x190] sm:$0xff]  ;;  %v9725_v16 = vld [vmem:[%s11859_s18 + $0x198] sm:$0xff] }
 0xeff   : > { %v6875_v2 = vadd.f32 %v10162_v8, %v6874_v49  ;;  %v11138_v8 = vpack.c.bf16 %v9725_v16, %v9724_v21  ;;  %v9728_v49 = vld [vmem:[%s11859_s18 + $0x1b0] sm:$0xff]  ;;  %v9735_v21 = vld [vmem:[%s11859_s18 + $0x1e8] sm:$0xff] }
 0xf00   : > { %v6888_v19 = vmul.f32 %v9702_v50, %v6880_v7  ;;  %v11141_v7 = vpack.c.bf16 %v9727_v42, %v9726_v0  ;;  %v9738_v42 = vld [vmem:[%s11859_s18 + $0x200] sm:$0xff] }
 0xf01   : > { %v6887_v6 = vmul.f32 %v9702_v50, %v6875_v2  ;;  %v21111_v50 = vld [vmem:[#allocation140_spill] sm:$0xff]  ;;  %v9729_v2 = vld [vmem:[%s11859_s18 + $0x1b8] sm:$0xff] }
 0xf02   : > { %v6894_v12 = vadd.f32 %v9703_v26, %v6888_v19  ;;  %v9731_v19 = vld [vmem:[%s11859_s18 + $0x1c8] sm:$0xff] }
 0xf03   : > { %v6893_v5 = vadd.f32 %v9703_v26, %v6887_v6  ;;  %v9730_v26 = vld [vmem:[%s11859_s18 + $0x1c0] sm:$0xff] }
 0xf04   : > { %v6896_v47 = vmax.f32 %v6894_v12, 0.0  ;;  %v11147_v6 = vpack.c.bf16 %v9731_v19, %v9730_v26  ;;  %v9732_v12 = vld [vmem:[%s11859_s18 + $0x1d0] sm:$0xff]  ;;  %v9742_v19 = vld [vmem:[%s11859_s18 + $0x220] sm:$0xff] }
 0xf05   : > { %v6895_v22 = vmax.f32 %v6893_v5, 0.0 }
 0xf06   : > { %v17559_v5 = vadd.f32 %v6896_v47, %v21111_v50  ;;  %v11144_v47 = vpack.c.bf16 %v9729_v2, %v9728_v49  ;;  %v9737_v50 = vld [vmem:[%s11859_s18 + $0x1f8] sm:$0xff]  ;;  %v9740_v2 = vld [vmem:[%s11859_s18 + $0x210] sm:$0xff] }
 0xf07   : > { %v17551_v17 = vadd.f32 %v6895_v22, %v21108_v25  ;;  %v9733_v22 = vld [vmem:[%s11859_s18 + $0x1d8] sm:$0xff]  ;;  %v9734_v25 = vld [vmem:[%s11859_s18 + $0x1e0] sm:$0xff] }
 0xf08   : > { %21112 = vst [vmem:[#allocation226_spill] sm:$0xff] %v17559_v5  ;;  %v11153_v16 = vpack.c.bf16 %v9735_v21, %v9734_v25  ;;  %v21114_v21 = vmov 1.0|1.0  }
 0xf09   : > { %21109 = vst [vmem:[#allocation222_spill] sm:$0xff] %v17551_v17  ;;  %9720 = vmatmul.mubr.msk.f32.vlgmr.msra.gmra.mrb[72].mxu0 %vm21110_vm8, %v17551_v17  ;;  %vm21125_vm8 = vcmask 195584  }
 0xf0a   : > { %6994 = vmatprep.mubr.f32.mxu0 %v21106_v60  ;;  %11136 = vmatpush1.bf16.msra.mxu0 %v11135_v30  ;;  %v11150_v30 = vpack.c.bf16 %v9733_v22, %v9732_v12  ;;  %v9744_v22 = vld [vmem:[%s11859_s18 + $0x230] sm:$0xff] }
 0xf0b   : > { %11137 = vmatprep.subr.bf16.mxu0 %v21107_v56 }
 0xf0d   : > { %9721 = vmatmul.mubr.msk.f32.gmra.mrb[74].mxu0 %vm21113_vm15, %v17559_v5  ;;  %vm21127_vm15 = vmmov %vm21125_vm8 }
 0xf0e   : > { %11139 = vmatpush1.bf16.msra.mxu0 %v11138_v8  ;;  %v9736_v8 = vld [vmem:[%s11859_s18 + $0x1f0] sm:$0xff] }
 0xf0f   : > { %11140 = vmatprep.subr.bf16.mxu0 %v21107_v56  ;;  %v11156_v0 = vpack.c.bf16 %v9737_v50, %v9736_v8 }
 0xf12   : > { %11142 = vmatpush1.bf16.msra.mxu0 %v11141_v7  ;;  %v9739_v7 = vld [vmem:[%s11859_s18 + $0x208] sm:$0xff] }
 0xf13   : > { %11143 = vmatprep.subr.bf16.mxu0 %v21107_v56  ;;  %v11159_v49 = vpack.c.bf16 %v9739_v7, %v9738_v42 }
 0xf16   : > { %11145 = vmatpush1.bf16.msra.mxu0 %v11144_v47  ;;  %v9741_v47 = vld [vmem:[%s11859_s18 + $0x218] sm:$0xff] }
 0xf17   : > { %11146 = vmatprep.subr.bf16.mxu0 %v21107_v56  ;;  %v11162_v26 = vpack.c.bf16 %v9741_v47, %v9740_v2  ;;  %v21167_v2 = vld [vmem:[#allocation87_spill] sm:$0xff] }
 0xf1a   : > { %11148 = vmatpush1.bf16.msra.mxu0 %v11147_v6  ;;  %v9743_v6 = vld [vmem:[%s11859_s18 + $0x228] sm:$0xff] }
 0xf1b   : > { %11149 = vmatprep.subr.bf16.mxu0 %v21107_v56  ;;  %v11165_v12 = vpack.c.bf16 %v9743_v6, %v9742_v19 }
 0xf1e   : > { %11151 = vmatpush1.bf16.msra.mxu0 %v11150_v30  ;;  %v9745_v30 = vld [vmem:[%s11859_s18 + $0x238] sm:$0xff] }
 0xf1f   : > { %11152 = vmatprep.subr.bf16.mxu0 %v21107_v56  ;;  %v11168_v25 = vpack.c.bf16 %v9745_v30, %v9744_v22 }
 0xf22   : > { %11154 = vmatpush1.bf16.msra.mxu0 %v11153_v16 }
 0xf23   : > { %11155 = vmatprep.subr.bf16.mxu0 %v21107_v56 }
 0xf26   : > { %11157 = vmatpush1.bf16.msra.mxu0 %v11156_v0 }
 0xf27   : > { %11158 = vmatprep.subr.bf16.mxu0 %v21107_v56 }
 0xf2a   : > { %11160 = vmatpush1.bf16.msra.mxu0 %v11159_v49  ;;  %v21118_v49 = vmov 1.0  }
 0xf2b   : > { %11161 = vmatprep.subr.bf16.mxu0 %v21107_v56 }
 0xf2e   : > { %11163 = vmatpush1.bf16.msra.mxu0 %v11162_v26  ;;  %v21169_v26 = vld [vmem:[#allocation88_spill] sm:$0xff] }
 0xf2f   : > { %11164 = vmatprep.subr.bf16.mxu0 %v21107_v56 }
 0xf32   : > { %11166 = vmatpush1.bf16.msra.mxu0 %v11165_v12 }
 0xf33   : > { %11167 = vmatprep.subr.bf16.mxu0 %v21107_v56 }
 0xf36   : > { %11169 = vmatpush1.bf16.msra.mxu0 %v11168_v25 }
 0xf37   : > { %11171 = vmatprep.subr.msk.bf16.mxu0 %vm20694_vm14, %v21114_v21 }
 0xfdc   : > { %v6990_v8 = vpop.f32.mrb[72].mxu0 }
 0xfdd   : > { %v6992_v50 = vpop.f32.mrb[73].mxu0 }
 0xfde   : > { %9746 = vmatprep.mubr.msk.f32.mxu0 %vm21116_vm0, %v6992_v50  ;;  %vm21128_vm0 = vmmov %vm21125_vm8 }
 0xfdf   : > { %7097 = vmatmul.mubr.f32.vlgmr.msra.gmra.mrb[76].mxu0 %v6990_v8 }
 0xfe0   : > { %v6996_v0 = vpop.f32.mrb[74].mxu0  ;;  %11173 = vmatpush1.bf16.msk.msra.mxu0 %vm20697_vm3, %v21114_v21 }
 0xfe1   : > { %v17601_v7 = vpack.c.bf16 %v6996_v0, %v6990_v8  ;;  %v6998_v56 = vpop.f32.mrb[75].mxu0  ;;  %9752 = vmatprep.subr.msk.mxu0 %vm20700_vm11, %v21118_v49 }
 0xfe2   : > { %v17606_v47 = vpack.c.bf16 %v6998_v56, %v6992_v50  ;;  %9747 = vmatprep.mubr.msk.f32.mxu0 %vm21120_vm6, %v6998_v56  ;;  %vm21129_vm6 = vmmov %vm21128_vm0 }
 0xfe3   : > { %7102 = vmatmul.mubr.f32.gmra.mrb[78].mxu0 %v6996_v0 }
 0xfe4   : > { %9753 = vmatpush1.msk.msra.mxu0 %vm20703_vm1, %v21118_v49  ;;  %7181 = vmatprep.mubr.f32.mxu0 %v21106_v60 }
 0xfe5   : > { %11175 = vmatprep.subr.msk.bf16.mxu0 %vm20705_vm5, %v21114_v21 }
0x10b2   : > { %v7098_v6 = vpop.f32.mrb[76].mxu0 }
0x10b3   : > { %7109 = vrot.lane.b32.xlu0 %v7098_v6, %s11710_s25  ;;  %v7100_v12 = vpop.f32.mrb[77].mxu0  ;;  %v7476_v30 = vsel %vm21123_vm2, %v7098_v6, -inf  ;;  %vm21130_vm2 = vmmov %vm21128_vm0 }
0x10b4   : > { %v21228_v12 = vld [vmem:[#allocation41_spill] sm:$0xff] }
0x10b6   : > { %v7103_v22 = vpop.f32.mrb[78].mxu0 }
0x10b7   : > { %v7477_v25 = vsel %vm21124_vm7, %v7103_v22, -inf  ;;  %7111 = vrot.lane.b32.xlu1 %v7103_v22, %s11710_s25  ;;  %v7105_v8 = vpop.f32.mrb[79].mxu0  ;;  %vm21131_vm7 = vmmov %vm21128_vm0 }
0x10b8   : > { %v7478_v50 = vmax.f32 %v7476_v30, %v7477_v25  ;;  %v21151_v8 = vld [vmem:[#allocation72_spill] sm:$0xff] }
0x10ba   : > { %v7479_v0 = vrot.slane %v7478_v50, 4 }
0x10bc   : > { %v7480_v56 = vmax.f32 %v7478_v50, %v7479_v0  ;;  %v21141_v0 = vld [vmem:[#allocation55_spill] sm:$0xff] }
0x10be   : > { %v7481_v17 = vrot.slane %v7480_v56, 2 }
0x10c0   : > { %v7482_v5 = vmax.f32 %v7480_v56, %v7481_v17  ;;  %v21143_v56 = vld [vmem:[#allocation64_spill] sm:$0xff] }
0x10c2   : > { %v7483_v48 = vrot.slane %v7482_v5, 1 }
0x10c4   : > { %v7484_v43 = vmax.f32 %v7482_v5, %v7483_v48 }
0x10c6   : > { %7486 = vrot.lane.b32.xlu0 %v7484_v43, %s11710_s25 }
0x1125   : > { %v7110_v33 = vpop.permute.xlu0 %7109 }
0x1126   : > { %9754 = vmatmul.mubr.msk.f32.vlgmr.msra.gmra.mrb[80].mxu0 %vm21125_vm8, %v7110_v33  ;;  %vm21132_vm8 = vmmov %vm21128_vm0 }
0x1127   : > { %11177 = vmatpush3.bf16.msk.msra.mxu0 %vm20705_vm5, %v21114_v21  ;;  %7187 = vmatprep.mubr.f32.mxu0 %v21106_v60 }
0x1128   : > { %10564 = vmatprep.subr.msk.mxu0 %vm20710_vm10, %v21118_v49 }
0x1129   : > { %v7112_v30 = vpop.permute.xlu1 %7111 }
0x112a   : > { %9755 = vmatmul.mubr.msk.f32.gmra.mrb[82].mxu0 %vm21127_vm15, %v7112_v30  ;;  %vm21133_vm15 = vmmov %vm21128_vm0 }
0x112b   : > { %10565 = vmatpush3.msk.msra.mxu0 %vm20710_vm10, %v21118_v49  ;;  %10566 = vmatprep.mubr.msk.f32.mxu0 %vm21128_vm0, %v7110_v33 }
0x112c   : > { %11179 = vmatprep.subr.msk.bf16.mxu0 %vm20694_vm14, %v21114_v21 }
0x112e   : > { %10567 = vmatmul.mubr.msk.f32.vlgmr.msra.gmra.mrb[84].mxu0 %vm21129_vm6, %v7112_v30  ;;  %v21145_v30 = vld [vmem:[#allocation68_spill] sm:$0xff] }
0x112f   : > { %11181 = vmatpush1.bf16.msk.msra.mxu0 %vm20697_vm3, %v21114_v21  ;;  %7364 = vmatprep.mubr.f32.mxu0 %v21106_v60 }
0x1130   : > { %9765 = vmatprep.subr.msk.mxu0 %vm20700_vm11, %v21118_v49 }
0x1133   : > { %9766 = vmatpush1.msk.msra.mxu0 %vm20703_vm1, %v21118_v49 }
0x1134   : > { %9767 = vmatmul.mubr.msk.f32.vlgmr.msra.gmra.mrb[86].mxu0 %vm21130_vm2, %v7098_v6  ;;  %11183 = vmatprep.subr.msk.bf16.mxu0 %vm20705_vm5, %v21114_v21 }
0x1135   : > { %11185 = vmatpush3.bf16.msk.msra.mxu0 %vm20705_vm5, %v21114_v21  ;;  %7370 = vmatprep.mubr.f32.mxu0 %v21106_v60 }
0x1136   : > { %10573 = vmatprep.subr.msk.mxu0 %vm20710_vm10, %v21118_v49 }
0x1138   : > { %9768 = vmatmul.mubr.msk.f32.gmra.mrb[88].mxu0 %vm21131_vm7, %v7103_v22  ;;  %v7487_v33 = vpop.permute.xlu0 %7486  ;;  %vm21135_vm7 = vmmov %vm21130_vm2 }
0x1139   : > { %10574 = vmatpush3.msk.msra.mxu0 %vm20710_vm10, %v21118_v49  ;;  %10575 = vmatprep.mubr.msk.f32.mxu0 %vm21132_vm8, %v7098_v6  ;;  %v7489_v43 = vadd.f32 %v7487_v33, %v7098_v6  ;;  %v7490_v48 = vadd.f32 %v7487_v33, %v7103_v22  ;;  %vm21137_vm8 = vmmov %vm21130_vm2  ;;  %v21147_v33 = vld [vmem:[#allocation69_spill] sm:$0xff] }
0x113a   : > { %11187 = vmatprep.subr.msk.bf16.mxu0 %vm20694_vm14, %v21114_v21  ;;  %vm21134_vm14 = vmmov %vm21130_vm2 }
0x113b   : > { %v7493_v17 = vmul.f32 0.2, %v7489_v43  ;;  %vm7491_vm0 = vcmp.ge.f32.partialorder %v7489_v43, 0.0  ;;  %v7494_v5 = vmul.f32 0.2, %v7490_v48  ;;  %vm7492_vm6 = vcmp.ge.f32.partialorder %v7490_v48, 0.0 }
0x113c   : > { %10576 = vmatmul.mubr.msk.f32.vlgmr.msra.gmra.mrb[90].mxu0 %vm21133_vm15, %v7103_v22 }
0x113d   : > { %11189 = vmatpush1.bf16.msk.msra.mxu0 %vm20697_vm3, %v21114_v21  ;;  %7567 = vmatprep.mubr.f32.mxu0 %v21106_v60  ;;  %v7495_v16 = vsel %vm7491_vm0, %v7489_v43, %v7493_v17  ;;  %v7496_v6 = vsel %vm7492_vm6, %v7490_v48, %v7494_v5  ;;  %v21149_v5 = vld [vmem:[#allocation70_spill] sm:$0xff] }
0x113e   : > { %9778 = vmatprep.subr.msk.mxu0 %vm20700_vm11, %v21118_v49 }
0x1141   : > { %9779 = vmatpush1.msk.msra.mxu0 %vm20703_vm1, %v21118_v49 }
0x1142   : > { %9780 = vmatmul.mubr.msk.f32.vlgmr.msra.gmra.mrb[92].mxu0 %vm21134_vm14, %v7495_v16  ;;  %11191 = vmatprep.subr.msk.bf16.mxu0 %vm20705_vm5, %v21114_v21 }
0x1143   : > { %11193 = vmatpush3.bf16.msk.msra.mxu0 %vm20705_vm5, %v21114_v21  ;;  %7573 = vmatprep.mubr.f32.mxu0 %v21106_v60 }
0x1144   : > { %10582 = vmatprep.subr.msk.mxu0 %vm20710_vm10, %v21118_v49 }
0x1146   : > { %9781 = vmatmul.mubr.msk.f32.gmra.mrb[94].mxu0 %vm21130_vm2, %v7496_v6 }
0x1147   : > { %10583 = vmatpush3.msk.msra.mxu0 %vm20710_vm10, %v21118_v49  ;;  %10584 = vmatprep.mubr.msk.f32.mxu0 %vm21135_vm7, %v7495_v16 }
0x1148   : > { %11227 = vmatprep.subr.msk.bf16.mxu0 %vm20721_vm4, %v21114_v21 }
0x114a   : > { %10585 = vmatmul.mubr.msk.f32.vlgmr.msra.gmra.mrb[96].mxu0 %vm21137_vm8, %v7496_v6  ;;  %v21150_v6 = vld [vmem:[#allocation71_spill] sm:$0xff] }
0x114b   : > { %11229 = vmatpush3.bf16.msk.msra.mxu0 %vm20721_vm4, %v21114_v21  ;;  %vm21142_vm4 = vnez %v21141_v0  ;;  %v21152_v0 = vld [vmem:[#allocation73_spill] sm:$0xff] }
0x114c   : > { %11231 = vmatprep.subr.msk.bf16.mxu0 %vm20724_vm13, %v21114_v21 }
0x114f   : > { %11233 = vmatpush3.bf16.msk.msra.mxu0 %vm20724_vm13, %v21114_v21  ;;  %vm21144_vm13 = vnez %v21143_v56 }
0x1150   : > { %11235 = vmatprep.subr.msk.bf16.mxu0 %vm20726_vm12, %v21114_v21 }
0x1153   : > { %11237 = vmatpush3.bf16.msk.msra.mxu0 %vm20726_vm12, %v21114_v21  ;;  %vm21146_vm12 = vnez %v21145_v30 }
0x1154   : > { %11239 = vmatprep.subr.msk.bf16.mxu0 %vm20728_vm9, %v21114_v21 }
0x1157   : > { %11241 = vmatpush3.bf16.msk.msra.mxu0 %vm20728_vm9, %v21114_v21  ;;  %vm21148_vm9 = vnez %v21147_v33  ;;  %v21153_v33 = vld [vmem:[#allocation74_spill] sm:$0xff] }
0x1158   : > { %11243 = vmatprep.subr.msk.bf16.mxu0 %vm21142_vm4, %v21114_v21 }
0x115b   : > { %11245 = vmatpush3.bf16.msk.msra.mxu0 %vm21142_vm4, %v21114_v21 }
0x115c   : > { %11247 = vmatprep.subr.msk.bf16.mxu0 %vm21144_vm13, %v21114_v21 }
0x115f   : > { %11249 = vmatpush3.bf16.msk.msra.mxu0 %vm21144_vm13, %v21114_v21 }
0x1160   : > { %11251 = vmatprep.subr.msk.bf16.mxu0 %vm21146_vm12, %v21114_v21 }
0x1163   : > { %11253 = vmatpush3.bf16.msk.msra.mxu0 %vm21146_vm12, %v21114_v21 }
0x1164   : > { %11255 = vmatprep.subr.msk.bf16.mxu0 %vm21148_vm9, %v21114_v21 }
0x1167   : > { %11257 = vmatpush3.bf16.msk.msra.mxu0 %vm21148_vm9, %v21114_v21 }
0x1168   : > { %11267 = vmatprep.subr.bf16.mxu0 %v17606_v47 }
0x11f9   : > { %v7183_v43 = vpop.f32.mrb[80].mxu0 }
0x11fa   : > { %v7185_v48 = vpop.f32.mrb[81].mxu0  ;;  %v7269_v16 = vmul.f32 %v21149_v5, %v7183_v43 }
0x11fb   : > { %v7270_v50 = vmul.f32 %v21151_v8, %v7185_v48 }
0x11fd   : > { %v7189_v17 = vpop.f32.mrb[82].mxu0 }
0x11fe   : > { %v7272_v22 = vmul.f32 %v21150_v6, %v7189_v17  ;;  %v7191_v25 = vpop.f32.mrb[83].mxu0 }
0x11ff   : > { %v7273_v56 = vmul.f32 %v21152_v0, %v7191_v25 }
0x1200   : > { %v7275_v30 = vadd.f32 %v7272_v22, %v7269_v16 }
0x1201   : > { %v7282_v23 = vadd.f32 %v7273_v56, %v7270_v50  ;;  %v10568_v40 = vpop.f32.mrb[84].mxu0 }
0x1202   : > { %v7276_v53 = vrot.slane %v7275_v30, 4  ;;  %v7274_v11 = vmul.f32 %v10568_v40, %v21153_v33  ;;  %v7260_v15 = vpop.f32.mrb[85].mxu0 }
0x1203   : > { %v7283_v39 = vrot.slane %v7282_v23, 4  ;;  %v7271_v46 = vmul.f32 %v21154_v55, %v7260_v15 }
0x1204   : > { %v7277_v63 = vadd.f32 %v7276_v53, %v7275_v30 }
0x1205   : > { %v7284_v58 = vadd.f32 %v7283_v39, %v7282_v23  ;;  %v7289_v43 = vadd.f32 %v7274_v11, %v7271_v46 }
0x1206   : > { %v7278_v5 = vrot.slane %v7277_v63, 2 }
0x1207   : > { %v7290_v17 = vrot.slane %v7289_v43, 4  ;;  %v7366_v6 = vpop.f32.mrb[86].mxu0  ;;  %v7285_v41 = vrot.slane %v7284_v58, 2 }
0x1208   : > { %v7279_v48 = vadd.f32 %v7278_v5, %v7277_v63  ;;  %v7368_v8 = vpop.f32.mrb[87].mxu0 }
0x1209   : > { %v7291_v25 = vadd.f32 %v7290_v17, %v7289_v43  ;;  %v7286_v16 = vadd.f32 %v7285_v41, %v7284_v58  ;;  %v21155_v17 = vld [vmem:[#allocation76_spill] sm:$0xff] }
0x120a   : > { %v7280_v22 = vrot.slane %v7279_v48, 1 }
0x120b   : > { %v7287_v50 = vrot.slane %v7286_v16, 1  ;;  %v7372_v0 = vpop.f32.mrb[88].mxu0  ;;  %v7292_v56 = vrot.slane %v7291_v25, 2 }
0x120c   : > { %v7281_v40 = vadd.f32 %v7280_v22, %v7279_v48  ;;  %v7374_v33 = vpop.f32.mrb[89].mxu0 }
0x120d   : > { %v7288_v9 = vadd.f32 %v7287_v50, %v7286_v16  ;;  %v7293_v57 = vadd.f32 %v7292_v56, %v7291_v25 }
0x120e   : > { %v7367_v55 = vadd.f32 %v7366_v6, %v7281_v40  ;;  %v7373_v15 = vadd.f32 %v7372_v0, %v7281_v40 }
0x120f   : > { %v7369_v39 = vadd.f32 %v7368_v8, %v7288_v9  ;;  %v7375_v46 = vadd.f32 %v7374_v33, %v7288_v9  ;;  %v7294_v23 = vrot.slane %v7293_v57, 1  ;;  %v10577_v11 = vpop.f32.mrb[90].mxu0  ;;  %v21156_v8 = vld [vmem:[#allocation77_spill] sm:$0xff] }
0x1210   : > { %vm7452_vm15 = vcmp.ge.f32.partialorder %v7367_v55, 0.0  ;;  %v7458_v53 = vmul.f32 0.2, %v7367_v55  ;;  %v7461_v30 = vmul.f32 0.2, %v7373_v15  ;;  %vm7455_vm14 = vcmp.ge.f32.partialorder %v7373_v15, 0.0 }
0x1211   : > { %vm7453_vm0 = vcmp.ge.f32.partialorder %v7369_v39, 0.0  ;;  %v7459_v63 = vmul.f32 0.2, %v7369_v39  ;;  %v7462_v41 = vmul.f32 0.2, %v7375_v46  ;;  %v7295_v58 = vadd.f32 %v7294_v23, %v7293_v57  ;;  %v7443_v43 = vpop.f32.mrb[91].mxu0 }
0x1212   : > { %v7464_v5 = vsel %vm7452_vm15, %v7367_v55, %v7458_v53  ;;  %vm7456_vm6 = vcmp.ge.f32.partialorder %v7375_v46, 0.0  ;;  %v7467_v50 = vsel %vm7455_vm14, %v7373_v15, %v7461_v30  ;;  %v21157_v23 = vld [vmem:[#allocation78_spill] sm:$0xff]  ;;  %v21159_v30 = vld [vmem:[#allocation80_spill] sm:$0xff] }
0x1213   : > { %v7470_v48 = vadd.f32 %v7464_v5, %v21155_v17  ;;  %v7465_v25 = vsel %vm7453_vm0, %v7369_v39, %v7459_v63  ;;  %v7449_v6 = vadd.f32 %v10577_v11, %v7295_v58  ;;  %v7444_v16 = vadd.f32 %v7443_v43, %v7295_v58  ;;  %v21158_v5 = vld [vmem:[#allocation79_spill] sm:$0xff] }
0x1214   : > { %v7471_v9 = vadd.f32 %v7465_v25, %v21156_v8  ;;  %v7468_v40 = vsel %vm7456_vm6, %v7375_v46, %v7462_v41  ;;  %v7473_v55 = vadd.f32 %v7467_v50, %v21157_v23  ;;  %v21173_v23 = vld [vmem:[#allocation90_spill] sm:$0xff] }
0x1215   : > { %v7569_v22 = vpop.f32.mrb[92].mxu0  ;;  %vm7457_vm2 = vcmp.ge.f32.partialorder %v7449_v6, 0.0  ;;  %v7463_v0 = vmul.f32 0.2, %v7449_v6  ;;  %v7460_v56 = vmul.f32 0.2, %v7444_v16  ;;  %v7474_v39 = vadd.f32 %v7468_v40, %v21158_v5 }
0x1216   : > { %vm7454_vm7 = vcmp.ge.f32.partialorder %v7444_v16, 0.0  ;;  %v7655_v33 = vsub.f32 %v7470_v48, %v7569_v22  ;;  %v7571_v45 = vpop.f32.mrb[93].mxu0  ;;  %v21179_v5 = vld [vmem:[#allocation59_spill] sm:$0xff] }
0x1217   : > { %v7656_v57 = vsub.f32 %v7471_v9, %v7571_v45  ;;  %v7469_v11 = vsel %vm7457_vm2, %v7449_v6, %v7463_v0  ;;  %v7466_v17 = vsel %vm7454_vm7, %v7444_v16, %v7460_v56  ;;  %v21160_v45 = vld [vmem:[#allocation81_spill] sm:$0xff] }
0x1218   : > { %v7661_v53 = vmul.f32 1.442695, %v7655_v33  ;;  %v7475_v25 = vadd.f32 %v7469_v11, %v21159_v30  ;;  %v7472_v8 = vadd.f32 %v7466_v17, %v21160_v45  ;;  %v21183_v11 = vld [vmem:[#allocation11_spill] sm:$0xff]  ;;  %v21191_v17 = vld [vmem:[#allocation18_spill] sm:$0xff]  ;;  %v21195_v30 = vld [vmem:[#allocation25_spill] sm:$0xff] }
0x1219   : > { %v7575_v62 = vpop.f32.mrb[94].mxu0  ;;  %v7663_v63 = vmul.f32 1.442695, %v7656_v57  ;;  %v21171_v57 = vld [vmem:[#allocation89_spill] sm:$0xff] }
0x121a   : > { %v7658_v58 = vsub.f32 %v7473_v55, %v7575_v62  ;;  %v7577_v43 = vpop.f32.mrb[95].mxu0  ;;  %v21175_v55 = vld [vmem:[#allocation91_spill] sm:$0xff]  ;;  %v21205_v45 = vld [vmem:[#allocation109_spill] sm:$0xff] }
0x121b   : > { %v7659_v15 = vsub.f32 %v7474_v39, %v7577_v43  ;;  %11682 = vpow2.f32 %v7663_v63  ;;  %v21181_v39 = vld [vmem:[#allocation60_spill] sm:$0xff]  ;;  %v21189_v43 = vld [vmem:[#allocation14_spill] sm:$0xff] }
0x121c   : > { %11684 = vpow2.f32 %v7661_v53  ;;  %v7667_v46 = vmul.f32 1.442695, %v7658_v58  ;;  %v21177_v53 = vld [vmem:[#allocation51_spill] sm:$0xff]  ;;  %v21185_v63 = vld [vmem:[#allocation12_spill] sm:$0xff]  ;;  %v21187_v58 = vld [vmem:[#allocation13_spill] sm:$0xff] }
0x121d   : > { %v7669_v41 = vmul.f32 1.442695, %v7659_v15  ;;  %v10586_v48 = vpop.f32.mrb[96].mxu0  ;;  %v21193_v15 = vld [vmem:[#allocation24_spill] sm:$0xff] }
0x121e   : > { %v7660_v9 = vsub.f32 %v7475_v25, %v10586_v48  ;;  %v7646_v22 = vpop.f32.mrb[97].mxu0  ;;  %v21197_v25 = vld [vmem:[#allocation31_spill] sm:$0xff] }
0x121f   : > { %11686 = vpow2.f32 %v7669_v41  ;;  %v7657_v50 = vsub.f32 %v7472_v8, %v7646_v22  ;;  %v21201_v41 = vld [vmem:[#allocation106_spill] sm:$0xff]  ;;  %v21203_v48 = vld [vmem:[#allocation107_spill] sm:$0xff]  ;;  %v21207_v8 = vld [vmem:[#allocation45_spill] sm:$0xff] }
0x1220   : > { %v7671_v40 = vmul.f32 1.442695, %v7660_v9  ;;  %11688 = vpow2.f32 %v7667_v46  ;;  %v21199_v46 = vld [vmem:[#allocation32_spill] sm:$0xff]  ;;  %v21209_v9 = vld [vmem:[#allocation46_spill] sm:$0xff]  ;;  %v21211_v22 = vld [vmem:[#allocation53_spill] sm:$0xff] }
0x1221   : > { %v7665_v6 = vmul.f32 1.442695, %v7657_v50  ;;  %v21213_v50 = vld [vmem:[#allocation54_spill] sm:$0xff] }
0x1223   : > { %11690 = vpow2.f32 %v7665_v6  ;;  %v21216_v6 = vld [vmem:[#allocation21_spill] sm:$0xff] }
0x1224   : > { %11692 = vpow2.f32 %v7671_v40  ;;  %v21214_v40 = vld [vmem:[#allocation20_spill] sm:$0xff] }
0x1225   : > { %v17756_v62 = vpop.eup %11682 }
0x1226   : > { %21161 = vst [vmem:[#allocation250_spill] sm:$0xff] %v17756_v62  ;;  %v17758_v16 = vpop.eup %11684  ;;  %7737 = vmatprep.mubr.f32.mxu1 %v17756_v62 }
0x1227   : > { %21162 = vst [vmem:[#allocation124_spill] sm:$0xff] %v17758_v16  ;;  %7738 = vmatmul.mubr.f32.vlgmr.msra.gmra.mrb[216].mxu1 %v17758_v16 }
0x1228   : > { %11261 = vmatpush1.bf16.msk.msra.mxu1 %vm20697_vm3, %v21114_v21  ;;  %vm21168_vm3 = vcmask 130048  }
0x1229   : > { %v17762_v0 = vpop.eup %11686  ;;  %9839 = vmatprep.subr.msk.mxu1 %vm20700_vm11, %v21118_v49  ;;  %vm21170_vm11 = vmmov %vm21168_vm3 }
0x122a   : > { %21163 = vst [vmem:[#allocation164_spill] sm:$0xff] %v17762_v0  ;;  %7742 = vmatprep.mubr.f32.mxu1 %v17762_v0  ;;  %v17771_v56 = vpop.eup %11688 }
0x122b   : > { %21164 = vst [vmem:[#allocation86_spill] sm:$0xff] %v17771_v56  ;;  %7743 = vmatmul.mubr.f32.gmra.mrb[218].mxu1 %v17771_v56 }
0x122c   : > { %9840 = vmatpush1.msk.msra.mxu1 %vm20703_vm1, %v21118_v49  ;;  %7895 = vmatprep.mubr.f32.mxu1 %v21106_v60  ;;  %vm21172_vm1 = vmmov %vm21168_vm3 }
0x122d   : > { %v17774_v33 = vpop.eup %11690  ;;  %11263 = vmatprep.subr.msk.bf16.mxu1 %vm20705_vm5, %v21114_v21  ;;  %vm21174_vm8 = vmmov %vm21172_vm1 }
0x122e   : > { %21165 = vst [vmem:[#allocation3_spill] sm:$0xff] %v17774_v33  ;;  %v17780_v42 = vpop.eup %11692  ;;  %10619 = vmatprep.mubr.f32.mxu0 %v17774_v33  ;;  %vm21176_vm4 = vmmov %vm21172_vm1  ;;  %v21247_v33 = vld [vmem:[#allocation66_spill] sm:$0xff] }
0x122f   : > { %21166 = vst [vmem:[#allocation4_spill] sm:$0xff] %v17780_v42  ;;  %10620 = vmatmul.mubr.f32.vlgmr.msra.gmra.mrb[98].mxu0 %v17780_v42  ;;  %vm21178_vm13 = vmmov %vm21172_vm1 }
0x1230   : > { %11269 = vmatpush1.bf16.msra.mxu0 %v17601_v7  ;;  %8053 = vmatprep.mubr.f32.mxu0 %v21106_v60  ;;  %vm21180_vm12 = vmmov %vm21172_vm1 }
0x1231   : > { %vm21182_vm9 = vmmov %vm21172_vm1 }
0x1232   : > { %vm21184_vm15 = vmmov %vm21172_vm1 }
0x1233   : > { %9848 = vmatmul.mubr.msk.f32.vlgmr.msra.gmra.mrb[100].mxu0 %vm21168_vm3, %v21167_v2  ;;  %vm21186_vm0 = vmmov %vm21172_vm1  ;;  %v21218_v2 = vld [vmem:[#allocation28_spill] sm:$0xff] }
0x1234   : > { %8059 = vmatprep.mubr.f32.mxu0 %v21106_v60  ;;  %vm21188_vm14 = vmmov %vm21186_vm0 }
0x1235   : > { %vm21190_vm6 = vmmov %vm21186_vm0 }
0x1236   : > { %vm21192_vm2 = vmmov %vm21186_vm0 }
0x1237   : > { %9849 = vmatmul.mubr.msk.f32.gmra.mrb[102].mxu0 %vm21170_vm11, %v21169_v26  ;;  %vm21194_vm7 = vmmov %vm21186_vm0  ;;  %v21220_v26 = vld [vmem:[#allocation34_spill] sm:$0xff] }
0x1238   : > { %8065 = vmatprep.mubr.f32.mxu0 %v21106_v60  ;;  %vm21196_vm3 = vmmov %vm21186_vm0 }
0x1239   : > { %vm21198_vm11 = vmmov %vm21186_vm0 }
0x123b   : > { %9850 = vmatmul.mubr.msk.f32.gmra.mrb[104].mxu0 %vm21172_vm1, %v21171_v57  ;;  %vm21200_vm1 = vmmov %vm21186_vm0  ;;  %v21222_v57 = vld [vmem:[#allocation35_spill] sm:$0xff] }
0x123c   : > { %8071 = vmatprep.mubr.f32.mxu0 %v21106_v60 }
0x123f   : > { %9851 = vmatmul.mubr.msk.f32.gmra.mrb[106].mxu0 %vm21174_vm8, %v21173_v23  ;;  %vm21202_vm8 = vmmov %vm21186_vm0 }
0x1240   : > { %8077 = vmatprep.mubr.f32.mxu0 %v21106_v60 }
0x1243   : > { %9852 = vmatmul.mubr.msk.f32.gmra.mrb[108].mxu0 %vm21176_vm4, %v21175_v55  ;;  %vm21204_vm4 = vmmov %vm21186_vm0 }
0x1244   : > { %8083 = vmatprep.mubr.f32.mxu0 %v21106_v60 }
0x1247   : > { %9853 = vmatmul.mubr.msk.f32.gmra.mrb[110].mxu0 %vm21178_vm13, %v21177_v53  ;;  %vm21206_vm13 = vmmov %vm21186_vm0 }
0x1248   : > { %8089 = vmatprep.mubr.f32.mxu0 %v21106_v60 }
0x124b   : > { %9854 = vmatmul.mubr.msk.f32.gmra.mrb[112].mxu0 %vm21180_vm12, %v21179_v5  ;;  %vm21208_vm12 = vmmov %vm21186_vm0 }
0x124c   : > { %8095 = vmatprep.mubr.f32.mxu0 %v21106_v60 }
0x124f   : > { %9855 = vmatmul.mubr.msk.f32.gmra.mrb[114].mxu0 %vm21182_vm9, %v21181_v39  ;;  %vm21210_vm9 = vmmov %vm21186_vm0 }
0x1250   : > { %8101 = vmatprep.mubr.f32.mxu0 %v21106_v60 }
0x1253   : > { %9856 = vmatmul.mubr.msk.f32.gmra.mrb[116].mxu0 %vm21184_vm15, %v21183_v11  ;;  %vm21212_vm15 = vmmov %vm21186_vm0 }
0x1254   : > { %8107 = vmatprep.mubr.f32.mxu0 %v21106_v60 }
0x1257   : > { %9857 = vmatmul.mubr.msk.f32.gmra.mrb[118].mxu0 %vm21186_vm0, %v21185_v63 }
0x1258   : > { %8113 = vmatprep.mubr.f32.mxu0 %v21106_v60 }
0x125b   : > { %9858 = vmatmul.mubr.msk.f32.gmra.mrb[120].mxu0 %vm21188_vm14, %v21187_v58  ;;  %vm21215_vm14 = vmmov %vm21186_vm0 }
0x125c   : > { %8119 = vmatprep.mubr.f32.mxu0 %v21106_v60 }
0x125f   : > { %9859 = vmatmul.mubr.msk.f32.gmra.mrb[122].mxu0 %vm21190_vm6, %v21189_v43  ;;  %vm21217_vm6 = vmmov %vm21186_vm0 }
0x1260   : > { %8125 = vmatprep.mubr.f32.mxu0 %v21106_v60 }
0x1263   : > { %9860 = vmatmul.mubr.msk.f32.gmra.mrb[124].mxu0 %vm21192_vm2, %v21191_v17  ;;  %vm21219_vm2 = vmmov %vm21186_vm0 }
0x1264   : > { %8131 = vmatprep.mubr.f32.mxu0 %v21106_v60 }
0x1267   : > { %9861 = vmatmul.mubr.msk.f32.gmra.mrb[126].mxu0 %vm21194_vm7, %v21193_v15  ;;  %vm21221_vm7 = vmmov %vm21186_vm0 }
0x1268   : > { %8137 = vmatprep.mubr.f32.mxu0 %v21106_v60 }
0x126b   : > { %9862 = vmatmul.mubr.msk.f32.gmra.mrb[128].mxu0 %vm21196_vm3, %v21195_v30  ;;  %vm21223_vm3 = vmmov %vm21186_vm0 }
0x126c   : > { %8143 = vmatprep.mubr.f32.mxu0 %v21106_v60 }
0x126f   : > { %9863 = vmatmul.mubr.msk.f32.gmra.mrb[130].mxu0 %vm21198_vm11, %v21197_v25  ;;  %vm21224_vm11 = vcmask 195584  }
0x1270   : > { %8149 = vmatprep.mubr.f32.mxu0 %v21106_v60 }
0x1273   : > { %9864 = vmatmul.mubr.msk.f32.gmra.mrb[132].mxu0 %vm21200_vm1, %v21199_v46  ;;  %vm21225_vm1 = vmmov %vm21224_vm11 }
0x1274   : > { %8155 = vmatprep.mubr.f32.mxu0 %v21106_v60 }
0x1277   : > { %9865 = vmatmul.mubr.msk.f32.gmra.mrb[134].mxu0 %vm21202_vm8, %v21201_v41  ;;  %vm21227_vm8 = vmmov %vm21225_vm1 }
0x1278   : > { %8161 = vmatprep.mubr.f32.mxu0 %v21106_v60 }
0x127b   : > { %9866 = vmatmul.mubr.msk.f32.gmra.mrb[136].mxu0 %vm21204_vm4, %v21203_v48  ;;  %vm21231_vm4 = vmmov %vm21186_vm0 }
0x127c   : > { %8167 = vmatprep.mubr.f32.mxu0 %v21106_v60 }
0x127f   : > { %9867 = vmatmul.mubr.msk.f32.gmra.mrb[138].mxu0 %vm21206_vm13, %v21205_v45  ;;  %vm21233_vm13 = vmmov %vm21186_vm0 }
0x1280   : > { %8173 = vmatprep.mubr.f32.mxu0 %v21106_v60 }
0x1283   : > { %9868 = vmatmul.mubr.msk.f32.gmra.mrb[140].mxu0 %vm21208_vm12, %v21207_v8  ;;  %vm21235_vm12 = vmmov %vm21186_vm0 }
0x1284   : > { %8179 = vmatprep.mubr.f32.mxu0 %v21106_v60 }
0x1287   : > { %9869 = vmatmul.mubr.msk.f32.gmra.mrb[142].mxu0 %vm21210_vm9, %v21209_v9  ;;  %vm21237_vm9 = vmmov %vm21186_vm0 }
0x1288   : > { %8185 = vmatprep.mubr.f32.mxu0 %v21106_v60 }
0x128b   : > { %9870 = vmatmul.mubr.msk.f32.gmra.mrb[144].mxu0 %vm21212_vm15, %v21211_v22  ;;  %vm21239_vm15 = vmmov %vm21186_vm0 }
0x128c   : > { %8191 = vmatprep.mubr.f32.mxu0 %v21106_v60 }
0x128f   : > { %9871 = vmatmul.mubr.msk.f32.gmra.mrb[146].mxu0 %vm21186_vm0, %v21213_v50 }
0x1290   : > { %8197 = vmatprep.mubr.f32.mxu0 %v21106_v60 }
0x1293   : > { %9872 = vmatmul.mubr.msk.f32.gmra.mrb[148].mxu0 %vm21215_vm14, %v21214_v40  ;;  %vm21242_vm14 = vmmov %vm21186_vm0 }
0x1294   : > { %8203 = vmatprep.mubr.f32.mxu0 %v21106_v60 }
0x1297   : > { %9873 = vmatmul.mubr.msk.f32.gmra.mrb[150].mxu0 %vm21217_vm6, %v21216_v6  ;;  %vm21244_vm6 = vmmov %vm21186_vm0 }
0x1298   : > { %8209 = vmatprep.mubr.f32.mxu0 %v21106_v60 }
0x129b   : > { %9874 = vmatmul.mubr.msk.f32.gmra.mrb[152].mxu0 %vm21219_vm2, %v21218_v2  ;;  %vm21246_vm2 = vmmov %vm21186_vm0 }
0x129c   : > { %8215 = vmatprep.mubr.f32.mxu0 %v21106_v60 }
0x129f   : > { %9875 = vmatmul.mubr.msk.f32.gmra.mrb[154].mxu0 %vm21221_vm7, %v21220_v26  ;;  %v21232_v26 = vld [vmem:[#allocation134_spill] sm:$0xff]  ;;  %vm21248_vm7 = vmmov %vm21186_vm0 }
0x12a0   : > { %8221 = vmatprep.mubr.f32.mxu0 %v21106_v60 }
0x12a3   : > { %9876 = vmatmul.mubr.msk.f32.gmra.mrb[156].mxu0 %vm21223_vm3, %v21222_v57  ;;  %vm21250_vm3 = vmmov %vm21186_vm0 }
0x12fa   : > { %v10231_v23 = vpop.f32.mrb[216].mxu1 }
0x12fb   : > { %v10232_v55 = vpop.f32.mrb[217].mxu1 }
0x12fc   : > { %v10233_v53 = vadd.f32 %v10232_v55, %v10231_v23  ;;  %v21234_v55 = vld [vmem:[#allocation135_spill] sm:$0xff] }
0x12fe   : > { %v10234_v5 = vpop.f32.mrb[218].mxu1 }
0x12ff   : > { %v10235_v39 = vpop.f32.mrb[219].mxu1 }
0x1300   : > { %v10236_v11 = vadd.f32 %v10235_v39, %v10234_v5  ;;  %v21236_v39 = vld [vmem:[#allocation137_spill] sm:$0xff] }
0x1302   : > { %v10621_v63 = vpop.f32.mrb[98].mxu0 }
0x1303   : > { %v7820_v58 = vadd.f32 %v10621_v63, %v10236_v11  ;;  %v7814_v43 = vpop.f32.mrb[99].mxu0 }
0x1304   : > { %v7815_v17 = vadd.f32 %v10233_v53, %v7814_v43 }
0x1306   : > { %11694 = vrcp.f32 %v7815_v17  ;;  %v17875_v15 = vpop.f32.mrb[100].mxu0 }
0x1307   : > { %v17877_v30 = vpop.f32.mrb[101].mxu0  ;;  %8438 = vrot.lane.b32.xlu1 %v17875_v15, %s11712_s26  ;;  %11696 = vrcp.f32 %v7820_v58  ;;  %v21238_v58 = vld [vmem:[#allocation56_spill] sm:$0xff] }
0x130a   : > { %v17881_v25 = vpop.f32.mrb[102].mxu0 }
0x130b   : > { %8440 = vrot.lane.b32.xlu0 %v17881_v25, %s11712_s26  ;;  %v17885_v46 = vpop.f32.mrb[103].mxu0  ;;  %v8343_v38 = vmul.f32 %v21284_v51, %v17881_v25  ;;  %v21289_v51 = vld [vmem:[#allocation270_spill] sm:$0xff]  ;;  %v21290_v25 = vld [vmem:[#allocation188_spill] sm:$0xff] }
0x130e   : > { %v17887_v41 = vpop.f32.mrb[104].mxu0 }
0x130f   : > { %v17889_v48 = vpop.f32.mrb[105].mxu0  ;;  %8442 = vrot.lane.b32.xlu1 %v17887_v41, %s11712_s26 }
0x1310   : > { %v11695_v45 = vpop.eup %11694 }
0x1311   : > { %9841 = vmatmul.mubr.msk.f32.vlgmr.msra.gmra.mrb[220].mxu1 %vm21224_vm11, %v11695_v45  ;;  %v11697_v22 = vpop.eup %11696  ;;  %vm21252_vm11 = vmmov %vm21186_vm0 }
0x1312   : > { %11265 = vmatpush3.bf16.msk.msra.mxu1 %vm20705_vm5, %v21114_v21  ;;  %7901 = vmatprep.mubr.f32.mxu1 %v21106_v60  ;;  %v17898_v8 = vpop.f32.mrb[106].mxu0  ;;  %vm21226_vm5 = vmmov %vm21225_vm1 }
0x1313   : > { %10626 = vmatprep.subr.msk.mxu1 %vm20710_vm10, %v21118_v49  ;;  %8444 = vrot.lane.b32.xlu0 %v17898_v8, %s11712_s26  ;;  %v17905_v9 = vpop.f32.mrb[107].mxu0 }
0x1315   : > { %9842 = vmatmul.mubr.msk.f32.gmra.mrb[222].mxu1 %vm21225_vm1, %v11697_v22  ;;  %vm21254_vm1 = vmmov %vm21186_vm0 }
0x1316   : > { %10627 = vmatpush3.msk.msra.mxu1 %vm20710_vm10, %v21118_v49  ;;  %10628 = vmatprep.mubr.msk.f32.mxu1 %vm21226_vm5, %v11695_v45  ;;  %v17912_v21 = vpop.f32.mrb[108].mxu0  ;;  %vm21229_vm10 = vmmov %vm21186_vm0  ;;  %v21240_v45 = vld [vmem:[#allocation57_spill] sm:$0xff] }
0x1317   : > { %11334 = vmatprep.subr.bf16.mxu1 %v17606_v47  ;;  %v17915_v19 = vpop.f32.mrb[109].mxu0  ;;  %8446 = vrot.lane.b32.xlu1 %v17912_v21, %s11712_s26  ;;  %vm21256_vm5 = vmmov %vm21186_vm0 }
0x1319   : > { %10629 = vmatmul.mubr.msk.f32.vlgmr.msra.gmra.mrb[224].mxu1 %vm21227_vm8, %v11697_v22  ;;  %vm21259_vm8 = vmmov %vm21186_vm0 }
0x131a   : > { %11335 = vmatpush1.bf16.msra.mxu1 %v17601_v7  ;;  %8227 = vmatprep.mubr.f32.mxu1 %v21106_v60  ;;  %v17922_v50 = vpop.f32.mrb[110].mxu0  ;;  %v21230_v7 = vld [vmem:[#allocation42_spill] sm:$0xff] }
0x131b   : > { %8448 = vrot.lane.b32.xlu0 %v17922_v50, %s11712_s26  ;;  %v17926_v49 = vpop.f32.mrb[111].mxu0 }
0x131d   : > { %9877 = vmatmul.mubr.msk.f32.vlgmr.msra.gmra.mrb[226].mxu1 %vm21229_vm10, %v21228_v12  ;;  %vm21263_vm10 = vmmov %vm21186_vm0 }
0x131e   : > { %8233 = vmatprep.mubr.f32.mxu1 %v21106_v60  ;;  %v17931_v47 = vpop.f32.mrb[112].mxu0 }
0x131f   : > { %v17933_v40 = vpop.f32.mrb[113].mxu0  ;;  %8450 = vrot.lane.b32.xlu1 %v17931_v47, %s11712_s26 }
0x1321   : > { %9878 = vmatmul.mubr.msk.f32.gmra.mrb[228].mxu1 %vm21231_vm4, %v21230_v7  ;;  %v21241_v7 = vld [vmem:[#allocation62_spill] sm:$0xff]  ;;  %vm21267_vm4 = vmmov %vm21186_vm0 }
0x1322   : > { %8239 = vmatprep.mubr.f32.mxu1 %v21106_v60  ;;  %v17940_v6 = vpop.f32.mrb[114].mxu0 }
0x1323   : > { %8452 = vrot.lane.b32.xlu0 %v17940_v6, %s11712_s26  ;;  %v17944_v2 = vpop.f32.mrb[115].mxu0 }
0x1325   : > { %9879 = vmatmul.mubr.msk.f32.gmra.mrb[230].mxu1 %vm21233_vm13, %v21232_v26  ;;  %vm21271_vm13 = vmmov %vm21186_vm0 }
0x1326   : > { %8245 = vmatprep.mubr.f32.mxu1 %v21106_v60  ;;  %v17949_v57 = vpop.f32.mrb[116].mxu0 }
0x1327   : > { %v17951_v23 = vpop.f32.mrb[117].mxu0  ;;  %8454 = vrot.lane.b32.xlu1 %v17949_v57, %s11712_s26 }
0x1329   : > { %9880 = vmatmul.mubr.msk.f32.gmra.mrb[232].mxu1 %vm21235_vm12, %v21234_v55  ;;  %vm21454_vm12 = vcmask 523264  }
0x132a   : > { %8251 = vmatprep.mubr.f32.mxu1 %v21106_v60  ;;  %v17958_v53 = vpop.f32.mrb[118].mxu0 }
0x132b   : > { %8456 = vrot.lane.b32.xlu0 %v17958_v53, %s11712_s26  ;;  %v17962_v5 = vpop.f32.mrb[119].mxu0 }
0x132d   : > { %9881 = vmatmul.mubr.msk.f32.gmra.mrb[234].mxu1 %vm21237_vm9, %v21236_v39  ;;  %v21243_v39 = vld [vmem:[#allocation63_spill] sm:$0xff]  ;;  %vm21455_vm9 = vmmov %vm21454_vm12 }
0x132e   : > { %8257 = vmatprep.mubr.f32.mxu1 %v21106_v60  ;;  %v17967_v11 = vpop.f32.mrb[120].mxu0 }
0x132f   : > { %v17969_v63 = vpop.f32.mrb[121].mxu0  ;;  %8458 = vrot.lane.b32.xlu1 %v17967_v11, %s11712_s26 }
0x1331   : > { %9882 = vmatmul.mubr.msk.f32.gmra.mrb[236].mxu1 %vm21239_vm15, %v21238_v58  ;;  %vm21456_vm15 = vmmov %vm21455_vm9 }
0x1332   : > { %8263 = vmatprep.mubr.f32.mxu1 %v21106_v60  ;;  %v17976_v43 = vpop.f32.mrb[122].mxu0 }
0x1333   : > { %8460 = vrot.lane.b32.xlu0 %v17976_v43, %s11712_s26  ;;  %v17980_v17 = vpop.f32.mrb[123].mxu0 }
0x1335   : > { %9883 = vmatmul.mubr.msk.f32.gmra.mrb[238].mxu1 %vm21186_vm0, %v21240_v45  ;;  %vm21457_vm0 = vmmov %vm21455_vm9 }
0x1336   : > { %8269 = vmatprep.mubr.f32.mxu1 %v21106_v60  ;;  %v17985_v22 = vpop.f32.mrb[124].mxu0 }
0x1337   : > { %v17987_v12 = vpop.f32.mrb[125].mxu0  ;;  %8462 = vrot.lane.b32.xlu1 %v17985_v22, %s11712_s26 }
0x1339   : > { %9884 = vmatmul.mubr.msk.f32.gmra.mrb[240].mxu1 %vm21242_vm14, %v21241_v7  ;;  %v21245_v7 = vld [vmem:[#allocation65_spill] sm:$0xff]  ;;  %vm21458_vm14 = vmmov %vm21457_vm0 }
0x133a   : > { %8275 = vmatprep.mubr.f32.mxu1 %v21106_v60  ;;  %v17994_v26 = vpop.f32.mrb[126].mxu0 }
0x133b   : > { %8464 = vrot.lane.b32.xlu0 %v17994_v26, %s11712_s26  ;;  %v17998_v55 = vpop.f32.mrb[127].mxu0 }
0x133d   : > { %9885 = vmatmul.mubr.msk.f32.gmra.mrb[242].mxu1 %vm21244_vm6, %v21243_v39 }
0x133e   : > { %8281 = vmatprep.mubr.f32.mxu1 %v21106_v60  ;;  %v18003_v58 = vpop.f32.mrb[128].mxu0 }
0x133f   : > { %v18005_v45 = vpop.f32.mrb[129].mxu0  ;;  %8466 = vrot.lane.b32.xlu1 %v18003_v58, %s11712_s26 }
0x1341   : > { %9886 = vmatmul.mubr.msk.f32.gmra.mrb[244].mxu1 %vm21246_vm2, %v21245_v7  ;;  %v21249_v7 = vld [vmem:[#allocation151_spill] sm:$0xff] }
0x1342   : > { %8287 = vmatprep.mubr.f32.mxu1 %v21106_v60  ;;  %v18012_v42 = vpop.f32.mrb[130].mxu0 }
0x1343   : > { %8468 = vrot.lane.b32.xlu0 %v18012_v42, %s11712_s26  ;;  %v18016_v39 = vpop.f32.mrb[131].mxu0 }
0x1345   : > { %9887 = vmatmul.mubr.msk.f32.gmra.mrb[246].mxu1 %vm21248_vm7, %v21247_v33 }
0x1346   : > { %v18020_v56 = vpop.f32.mrb[132].mxu0  ;;  %8293 = vmatprep.mubr.f32.mxu1 %v21106_v60 }
0x1347   : > { %v18023_v0 = vpop.f32.mrb[133].mxu0  ;;  %8470 = vrot.lane.b32.xlu1 %v18020_v56, %s11712_s26 }
0x1349   : > { %9888 = vmatmul.mubr.msk.f32.gmra.mrb[248].mxu1 %vm21250_vm3, %v21249_v7  ;;  %v21253_v7 = vld [vmem:[#allocation155_spill] sm:$0xff] }
0x134a   : > { %v18029_v16 = vpop.f32.mrb[134].mxu0  ;;  %8299 = vmatprep.mubr.f32.mxu1 %v21106_v60 }
0x134b   : > { %8472 = vrot.lane.b32.xlu0 %v18029_v16, %s11712_s26  ;;  %v18034_v33 = vpop.f32.mrb[135].mxu0 }
0x134d   : > { %9889 = vmatmul.mubr.msk.f32.gmra.mrb[250].mxu1 %vm21252_vm11, %v21251_v54 }
0x134e   : > { %v18038_v10 = vpop.f32.mrb[136].mxu0  ;;  %8305 = vmatprep.mubr.f32.mxu1 %v21106_v60 }
0x134f   : > { %v18041_v14 = vpop.f32.mrb[137].mxu0  ;;  %8474 = vrot.lane.b32.xlu1 %v18038_v10, %s11712_s26 }
0x1351   : > { %9890 = vmatmul.mubr.msk.f32.gmra.mrb[252].mxu1 %vm21254_vm1, %v21253_v7  ;;  %v21258_v7 = vld [vmem:[#allocation159_spill] sm:$0xff] }
0x1352   : > { %v18047_v27 = vpop.f32.mrb[138].mxu0  ;;  %8311 = vmatprep.mubr.f32.mxu1 %v21106_v60 }
0x1353   : > { %8476 = vrot.lane.b32.xlu0 %v18047_v27, %s11712_s26  ;;  %v18052_v54 = vpop.f32.mrb[139].mxu0 }
0x1355   : > { %9891 = vmatmul.mubr.msk.f32.gmra.mrb[254].mxu1 %vm21256_vm5, %v21255_v24 }
0x1356   : > { %v18056_v32 = vpop.f32.mrb[140].mxu0  ;;  %8317 = vmatprep.mubr.f32.mxu1 %v21106_v60 }
0x1357   : > { %v18059_v36 = vpop.f32.mrb[141].mxu0  ;;  %8478 = vrot.lane.b32.xlu1 %v18056_v32, %s11712_s26 }
0x1358   : > { %21257 = vst [vmem:[#allocation15_spill] sm:$0xff] %v18059_v36 }
0x1359   : > { %9892 = vmatmul.mubr.msk.f32.gmra.mrb[0].mxu1 %vm21259_vm8, %v21258_v7  ;;  %v21266_v7 = vld [vmem:[#allocation161_spill] sm:$0xff] }
0x135a   : > { %v18065_v20 = vpop.f32.mrb[142].mxu0  ;;  %8323 = vmatprep.mubr.f32.mxu1 %v21106_v60 }
0x135b   : > { %21260 = vst [vmem:[#allocation16_spill] sm:$0xff] %v18065_v20  ;;  %8480 = vrot.lane.b32.xlu0 %v18065_v20, %s11712_s26  ;;  %v18070_v24 = vpop.f32.mrb[143].mxu0 }
0x135c   : > { %21261 = vst [vmem:[#allocation19_spill] sm:$0xff] %v18070_v24 }
0x135d   : > { %9893 = vmatmul.mubr.msk.f32.gmra.mrb[2].mxu1 %vm21263_vm10, %v21262_v29 }
0x135e   : > { %v18074_v62 = vpop.f32.mrb[144].mxu0  ;;  %8329 = vmatprep.mubr.f32.mxu1 %v21106_v60 }
0x135f   : > { %21264 = vst [vmem:[#allocation22_spill] sm:$0xff] %v18074_v62  ;;  %v18077_v44 = vpop.f32.mrb[145].mxu0  ;;  %8482 = vrot.lane.b32.xlu1 %v18074_v62, %s11712_s26 }
0x1360   : > { %21265 = vst [vmem:[#allocation23_spill] sm:$0xff] %v18077_v44 }
0x1361   : > { %9894 = vmatmul.mubr.msk.f32.gmra.mrb[4].mxu1 %vm21267_vm4, %v21266_v7 }
0x1362   : > { %v18083_v52 = vpop.f32.mrb[146].mxu0  ;;  %8335 = vmatprep.mubr.f32.mxu1 %v21106_v60 }
0x1363   : > { %21268 = vst [vmem:[#allocation29_spill] sm:$0xff] %v18083_v52  ;;  %8484 = vrot.lane.b32.xlu0 %v18083_v52, %s11712_s26  ;;  %v18088_v29 = vpop.f32.mrb[147].mxu0 }
0x1364   : > { %21269 = vst [vmem:[#allocation30_spill] sm:$0xff] %v18088_v29 }
0x1365   : > { %9895 = vmatmul.mubr.msk.f32.gmra.mrb[6].mxu1 %vm21271_vm13, %v21270_v59 }
0x1366   : > { %v18092_v4 = vpop.f32.mrb[148].mxu0 }
0x1367   : > { %21272 = vst [vmem:[#allocation36_spill] sm:$0xff] %v18092_v4  ;;  %v18094_v35 = vpop.f32.mrb[149].mxu0  ;;  %8486 = vrot.lane.b32.xlu1 %v18092_v4, %s11712_s26 }
0x1368   : > { %21273 = vst [vmem:[#allocation37_spill] sm:$0xff] %v18094_v35 }
0x136a   : > { %v18098_v7 = vpop.f32.mrb[150].mxu0 }
0x136b   : > { %21274 = vst [vmem:[#allocation43_spill] sm:$0xff] %v18098_v7  ;;  %8488 = vrot.lane.b32.xlu0 %v18098_v7, %s11712_s26  ;;  %v18102_v60 = vpop.f32.mrb[151].mxu0 }
0x136c   : > { %21275 = vst [vmem:[#allocation44_spill] sm:$0xff] %v18102_v60  ;;  %v21281_v60 = vld [vmem:[#allocation178_spill] sm:$0xff] }
0x136d   : > { %v8342_v7 = vmul.f32 %v21281_v60, %v17875_v15  ;;  %v21287_v15 = vld [vmem:[#allocation184_spill] sm:$0xff] }
0x136e   : > { %v18104_v52 = vpop.f32.mrb[152].mxu0  ;;  %v8344_v60 = vmul.f32 %v21287_v15, %v17887_v41  ;;  %v21295_v15 = vld [vmem:[#allocation112_spill] sm:$0xff] }
0x136f   : > { %21276 = vst [vmem:[#allocation50_spill] sm:$0xff] %v18104_v52  ;;  %v18106_v29 = vpop.f32.mrb[153].mxu0  ;;  %8490 = vrot.lane.b32.xlu1 %v18104_v52, %s11712_s26  ;;  %v21283_v52 = vld [vmem:[#allocation261_spill] sm:$0xff] }
0x1370   : > { %21277 = vst [vmem:[#allocation52_spill] sm:$0xff] %v18106_v29  ;;  %v21282_v29 = vld [vmem:[#allocation179_spill] sm:$0xff] }
0x1371   : > { %v8678_v28 = vmul.f32 %v21282_v29, %v17877_v30  ;;  %v21288_v30 = vld [vmem:[#allocation185_spill] sm:$0xff]  ;;  %v8345_v29 = vmul.f32 %v21290_v25, %v17898_v8 }
0x1372   : > { %v18110_v59 = vpop.f32.mrb[154].mxu0 }
0x1373   : > { %21278 = vst [vmem:[#allocation58_spill] sm:$0xff] %v18110_v59  ;;  %8492 = vrot.lane.b32.xlu0 %v18110_v59, %s11712_s26  ;;  %v18114_v35 = vpop.f32.mrb[155].mxu0 }
0x1374   : > { %21279 = vst [vmem:[#allocation61_spill] sm:$0xff] %v18114_v35  ;;  %v21285_v35 = vld [vmem:[#allocation183_spill] sm:$0xff] }
0x1375   : > { %v8679_v61 = vmul.f32 %v21285_v35, %v17885_v46  ;;  %v21291_v46 = vld [vmem:[#allocation192_spill] sm:$0xff] }
0x1376   : > { %v18116_v4 = vpop.f32.mrb[156].mxu0  ;;  %v8681_v41 = vmul.f32 %v21291_v46, %v17905_v9  ;;  %v21296_v9 = vld [vmem:[#allocation199_spill] sm:$0xff] }
0x1377   : > { %21280 = vst [vmem:[#allocation67_spill] sm:$0xff] %v18116_v4  ;;  %8494 = vrot.lane.b32.xlu1 %v18116_v4, %s11712_s26  ;;  %v21286_v4 = vld [vmem:[#allocation267_spill] sm:$0xff] }
0x1378   : > { %v21299_v46 = vld [vmem:[#allocation203_spill] sm:$0xff] }
0x1379   : > { %v8439_v44 = vpop.permute.xlu1 %8438 }
0x137a   : > { %v8582_v62 = vmul.f32 %v21283_v52, %v8439_v44  ;;  %v8680_v52 = vmul.f32 %v21288_v30, %v17889_v48  ;;  %v18155_v30 = vpop.f32.mrb[157].mxu0 }
0x137c   : > { %v8630_v59 = vadd.f32 %v8582_v62, %v8342_v7  ;;  %v21294_v7 = vld [vmem:[#allocation197_spill] sm:$0xff] }
0x137d   : > { %v8441_v24 = vpop.permute.xlu0 %8440  ;;  %v8682_v8 = vmul.f32 %v21294_v7, %v17915_v19  ;;  %v21298_v19 = vld [vmem:[#allocation276_spill] sm:$0xff] }
0x137e   : > { %v18129_v20 = vadd.f32 %v8678_v28, %v8630_v59  ;;  %v8583_v34 = vmul.f32 %v21286_v4, %v8441_v24  ;;  %v21302_v7 = vld [vmem:[#allocation212_spill] sm:$0xff] }
0x1380   : > { %v8631_v37 = vadd.f32 %v8583_v34, %v8343_v38  ;;  %v21292_v38 = vld [vmem:[#allocation274_spill] sm:$0xff] }
0x1381   : > { %v8443_v36 = vpop.permute.xlu1 %8442 }
0x1382   : > { %v18136_v44 = vadd.f32 %v8679_v61, %v8631_v37  ;;  %v8584_v62 = vmul.f32 %v21289_v51, %v8443_v36  ;;  %v21293_v37 = vld [vmem:[#allocation193_spill] sm:$0xff] }
0x1383   : > { %v8346_v61 = vmul.f32 %v21293_v37, %v17912_v21  ;;  %v21297_v21 = vld [vmem:[#allocation200_spill] sm:$0xff] }
0x1384   : > { %v11272_v28 = vpack.c.bf16 %v18136_v44, %v18129_v20  ;;  %v8632_v35 = vadd.f32 %v8584_v62, %v8344_v60  ;;  %v21300_v37 = vld [vmem:[#allocation204_spill] sm:$0xff] }
0x1385   : > { %v8445_v4 = vpop.permute.xlu0 %8444  ;;  %v21343_v20 = vld [vmem:[#allocation264_spill] sm:$0xff] }
0x1386   : > { %v18145_v34 = vadd.f32 %v8680_v52, %v8632_v35  ;;  %v8585_v24 = vmul.f32 %v21292_v38, %v8445_v4  ;;  %v8347_v52 = vmul.f32 %v21296_v9, %v17922_v50  ;;  %v8684_v50 = vmul.f32 %v21300_v37, %v17933_v40  ;;  %v21303_v9 = vld [vmem:[#allocation214_spill] sm:$0xff]  ;;  %v21305_v40 = vld [vmem:[#allocation217_spill] sm:$0xff] }
0x1388   : > { %v8633_v48 = vadd.f32 %v8585_v24, %v8345_v29  ;;  %v8683_v29 = vmul.f32 %v21297_v21, %v17926_v49  ;;  %v8350_v21 = vmul.f32 %v21305_v40, %v17949_v57  ;;  %v21313_v40 = vld [vmem:[#allocation282_spill] sm:$0xff] }
0x1389   : > { %v8447_v36 = vpop.permute.xlu1 %8446 }
0x138a   : > { %v18152_v59 = vadd.f32 %v8681_v41, %v8633_v48  ;;  %v8586_v60 = vmul.f32 %v21295_v15, %v8447_v36  ;;  %v8348_v41 = vmul.f32 %v21299_v46, %v17931_v47  ;;  %v21301_v36 = vld [vmem:[#allocation123_spill] sm:$0xff]  ;;  %v8349_v15 = vmul.f32 %v21302_v7, %v17940_v6 }
0x138b   : > { %v8685_v47 = vmul.f32 %v21303_v9, %v17944_v2 }
0x138c   : > { %v11276_v51 = vpack.c.bf16 %v18152_v59, %v18145_v34  ;;  %v8634_v62 = vadd.f32 %v8586_v60, %v8346_v61  ;;  %v21353_v34 = vld [vmem:[#allocation272_spill] sm:$0xff] }
0x138d   : > { %v8449_v25 = vpop.permute.xlu0 %8448 }
0x138e   : > { %v18163_v35 = vadd.f32 %v8682_v8, %v8634_v62  ;;  %v8587_v4 = vmul.f32 %v21298_v19, %v8449_v25  ;;  %v21304_v62 = vld [vmem:[#allocation277_spill] sm:$0xff] }
0x1390   : > { %v8635_v38 = vadd.f32 %v8587_v4, %v8347_v52  ;;  %v21306_v4 = vld [vmem:[#allocation220_spill] sm:$0xff] }
0x1391   : > { %v8451_v24 = vpop.permute.xlu1 %8450  ;;  %v8686_v6 = vmul.f32 %v21306_v4, %v17951_v23  ;;  %v21311_v23 = vld [vmem:[#allocation227_spill] sm:$0xff] }
0x1392   : > { %v18170_v48 = vadd.f32 %v8683_v29, %v8635_v38  ;;  %v8588_v61 = vmul.f32 %v21301_v36, %v8451_v24  ;;  %v21307_v38 = vld [vmem:[#allocation280_spill] sm:$0xff]  ;;  %v21308_v24 = vld [vmem:[#allocation221_spill] sm:$0xff] }
0x1393   : > { %v8351_v37 = vmul.f32 %v21308_v24, %v17958_v53  ;;  %v21316_v24 = vld [vmem:[#allocation85_spill] sm:$0xff] }
0x1394   : > { %v11280_v49 = vpack.c.bf16 %v18170_v48, %v18163_v35  ;;  %v8636_v8 = vadd.f32 %v8588_v61, %v8348_v41  ;;  %v21309_v61 = vld [vmem:[#allocation224_spill] sm:$0xff]  ;;  %v21363_v35 = vld [vmem:[#allocation175_spill] sm:$0xff] }
0x1395   : > { %v8453_v60 = vpop.permute.xlu0 %8452  ;;  %v8687_v57 = vmul.f32 %v21309_v61, %v17962_v5 }
0x1396   : > { %v18179_v52 = vadd.f32 %v8684_v50, %v8636_v8  ;;  %v8589_v25 = vmul.f32 %v21304_v62, %v8453_v60  ;;  %v8352_v60 = vmul.f32 %v21311_v23, %v17967_v11  ;;  %v21312_v62 = vld [vmem:[#allocation101_spill] sm:$0xff] }
0x1397   : > { %v8688_v53 = vmul.f32 %v21312_v62, %v17969_v63  ;;  %v21317_v63 = vld [vmem:[#allocation232_spill] sm:$0xff] }
0x1398   : > { %v8637_v29 = vadd.f32 %v8589_v25, %v8349_v15  ;;  %v21310_v15 = vld [vmem:[#allocation125_spill] sm:$0xff] }
0x1399   : > { %v8455_v19 = vpop.permute.xlu1 %8454 }
0x139a   : > { %v18186_v46 = vadd.f32 %v8685_v47, %v8637_v29  ;;  %v8590_v41 = vmul.f32 %v21307_v38, %v8455_v19  ;;  %v21314_v29 = vld [vmem:[#allocation102_spill] sm:$0xff]  ;;  %v21315_v38 = vld [vmem:[#allocation231_spill] sm:$0xff] }
0x139b   : > { %v8353_v19 = vmul.f32 %v21314_v29, %v17976_v43  ;;  %v8689_v11 = vmul.f32 %v21315_v38, %v17980_v17  ;;  %v21324_v38 = vld [vmem:[#allocation243_spill] sm:$0xff] }
0x139c   : > { %v11284_v2 = vpack.c.bf16 %v18186_v46, %v18179_v52  ;;  %v8638_v50 = vadd.f32 %v8590_v41, %v8350_v21 }
0x139d   : > { %v8457_v36 = vpop.permute.xlu0 %8456 }
0x139e   : > { %v18195_v7 = vadd.f32 %v8686_v6, %v8638_v50  ;;  %v8591_v8 = vmul.f32 %v21310_v15, %v8457_v36  ;;  %v8354_v50 = vmul.f32 %v21317_v63, %v17985_v22  ;;  %v21326_v63 = vld [vmem:[#allocation111_spill] sm:$0xff] }
0x13a0   : > { %v8639_v9 = vadd.f32 %v8591_v8, %v8351_v37  ;;  %v21319_v8 = vld [vmem:[#allocation194_spill] sm:$0xff] }
0x13a1   : > { %v8459_v47 = vpop.permute.xlu1 %8458 }
0x13a2   : > { %v18202_v25 = vadd.f32 %v8687_v57, %v8639_v9  ;;  %v8592_v21 = vmul.f32 %v21313_v40, %v8459_v47  ;;  %v21318_v57 = vld [vmem:[#allocation233_spill] sm:$0xff] }
0x13a3   : > { %v8690_v43 = vmul.f32 %v21318_v57, %v17987_v12  ;;  %v21323_v12 = vld [vmem:[#allocation240_spill] sm:$0xff]  ;;  %v21327_v57 = vld [vmem:[#allocation245_spill] sm:$0xff] }
0x13a4   : > { %v11288_v5 = vpack.c.bf16 %v18202_v25, %v18195_v7  ;;  %v8640_v4 = vadd.f32 %v8592_v21, %v8352_v60  ;;  %v21320_v60 = vld [vmem:[#allocation237_spill] sm:$0xff]  ;;  %v21322_v21 = vld [vmem:[#allocation230_spill] sm:$0xff] }
0x13a5   : > { %v8461_v6 = vpop.permute.xlu0 %8460  ;;  %v8355_v9 = vmul.f32 %v21320_v60, %v17994_v26  ;;  %v8692_v26 = vmul.f32 %v21324_v38, %v18005_v45  ;;  %v21329_v45 = vld [vmem:[#allocation246_spill] sm:$0xff] }
0x13a6   : > { %v18211_v41 = vadd.f32 %v8688_v53, %v8640_v4  ;;  %v8593_v37 = vmul.f32 %v21316_v24, %v8461_v6  ;;  %v21321_v53 = vld [vmem:[#allocation238_spill] sm:$0xff]  ;;  %v8358_v60 = vmul.f32 %v21329_v45, %v18020_v56  ;;  %v8697_v45 = vmul.f32 %v20399_v1, %v18052_v54  ;;  %v21340_v1 = vld [vmem:[#allocation16_spill] sm:$0xff]  ;;  %v21341_v54 = vld [vmem:[#allocation263_spill] sm:$0xff] }
0x13a7   : > { %v8691_v22 = vmul.f32 %v21321_v53, %v17998_v55  ;;  %v21325_v24 = vld [vmem:[#allocation38_spill] sm:$0xff] }
0x13a8   : > { %v8641_v36 = vadd.f32 %v8593_v37, %v8353_v19  ;;  %v8356_v19 = vmul.f32 %v21323_v12, %v18003_v58  ;;  %v8693_v58 = vmul.f32 %v21327_v57, %v18016_v39  ;;  %v21389_v39 = vld [vmem:[#allocation207_spill] sm:$0xff] }
0x13a9   : > { %v8463_v61 = vpop.permute.xlu1 %8462 }
0x13aa   : > { %v18218_v15 = vadd.f32 %v8689_v11, %v8641_v36  ;;  %v8594_v23 = vmul.f32 %v21319_v8, %v8463_v61  ;;  %v21328_v8 = vld [vmem:[#allocation121_spill] sm:$0xff] }
0x13ac   : > { %v11292_v17 = vpack.c.bf16 %v18218_v15, %v18211_v41  ;;  %v8642_v47 = vadd.f32 %v8594_v23, %v8354_v50  ;;  %v8357_v50 = vmul.f32 %v21326_v63, %v18012_v42 }
0x13ad   : > { %v8465_v62 = vpop.permute.xlu0 %8464 }
0x13ae   : > { %v18227_v40 = vadd.f32 %v8690_v43, %v8642_v47  ;;  %v8595_v29 = vmul.f32 %v21322_v21, %v8465_v62  ;;  %v21330_v62 = vld [vmem:[#allocation247_spill] sm:$0xff] }
0x13af   : > { %v8694_v42 = vmul.f32 %v21330_v62, %v18023_v0  ;;  %v21335_v0 = vld [vmem:[#allocation255_spill] sm:$0xff] }
0x13b0   : > { %v8643_v4 = vadd.f32 %v8595_v29, %v8355_v9  ;;  %v21332_v29 = vld [vmem:[#allocation113_spill] sm:$0xff] }
0x13b1   : > { %v8467_v6 = vpop.permute.xlu1 %8466  ;;  %v8359_v12 = vmul.f32 %v21332_v29, %v18029_v16 }
0x13b2   : > { %v18234_v11 = vadd.f32 %v8691_v22, %v8643_v4  ;;  %v8596_v37 = vmul.f32 %v21325_v24, %v8467_v6  ;;  %v21331_v22 = vld [vmem:[#allocation283_spill] sm:$0xff]  ;;  %v21333_v6 = vld [vmem:[#allocation253_spill] sm:$0xff] }
0x13b3   : > { %v8695_v56 = vmul.f32 %v21333_v6, %v18034_v33  ;;  %v21346_v6 = vld [vmem:[#allocation108_spill] sm:$0xff] }
0x13b4   : > { %v8644_v36 = vadd.f32 %v8596_v37, %v8356_v19  ;;  %v8360_v37 = vmul.f32 %v21335_v0, %v18038_v10  ;;  %v21348_v0 = vld [vmem:[#allocation119_spill] sm:$0xff] }
0x13b5   : > { %v8469_v61 = vpop.permute.xlu0 %8468 }
0x13b6   : > { %v18243_v43 = vadd.f32 %v8692_v26, %v8644_v36  ;;  %v8597_v23 = vmul.f32 %v21328_v8, %v8469_v61  ;;  %v21334_v26 = vld [vmem:[#allocation219_spill] sm:$0xff]  ;;  %v8696_v36 = vmul.f32 %v20972_v18, %v18041_v14  ;;  %v21336_v61 = vld [vmem:[#allocation284_spill] sm:$0xff]  ;;  %v8362_v18 = vmul.f32 %v14502_v31, %v18056_v32  ;;  %v21345_v32 = vld [vmem:[#allocation22_spill] sm:$0xff] }
0x13b8   : > { %v8645_v9 = vadd.f32 %v8597_v23, %v8357_v50 }
0x13b9   : > { %v8471_v47 = vpop.permute.xlu1 %8470 }
0x13ba   : > { %v18250_v53 = vadd.f32 %v8693_v58, %v8645_v9  ;;  %v8598_v21 = vmul.f32 %v21331_v22, %v8471_v47  ;;  %v8361_v58 = vmul.f32 %v20973_v13, %v18047_v27  ;;  %v21337_v13 = vld [vmem:[#allocation15_spill] sm:$0xff]  ;;  %v21338_v27 = vld [vmem:[#allocation262_spill] sm:$0xff] }
0x13bb   : > { %v8698_v47 = vmul.f32 %v21338_v27, %v21337_v13  ;;  %v21357_v27 = vld [vmem:[#allocation37_spill] sm:$0xff] }
0x13bc   : > { %v8646_v19 = vadd.f32 %v8598_v21, %v8358_v60  ;;  %v8363_v21 = vmul.f32 %v21341_v54, %v21340_v1  ;;  %v21360_v54 = vld [vmem:[#allocation43_spill] sm:$0xff] }
0x13bd   : > { %v8473_v4 = vpop.permute.xlu0 %8472 }
0x13be   : > { %v8742_v38 = vadd.f32 %v8694_v42, %v8646_v19  ;;  %v8599_v24 = vmul.f32 %v21334_v26, %v8473_v4  ;;  %v21339_v42 = vld [vmem:[#allocation229_spill] sm:$0xff]  ;;  %v21342_v19 = vld [vmem:[#allocation19_spill] sm:$0xff] }
0x13bf   : > { %v8699_v44 = vmul.f32 %v21343_v20, %v21342_v19  ;;  %v21344_v4 = vld [vmem:[#allocation249_spill] sm:$0xff]  ;;  %v21362_v20 = vld [vmem:[#allocation44_spill] sm:$0xff] }
0x13c0   : > { %v8647_v63 = vadd.f32 %v8599_v24, %v8359_v12  ;;  %v21347_v24 = vld [vmem:[#allocation23_spill] sm:$0xff]  ;;  %v8703_v48 = vmul.f32 %v21363_v35, %v21362_v20 }
0x13c1   : > { %v8475_v50 = vpop.permute.xlu1 %8474 }
0x13c2   : > { %v8743_v16 = vadd.f32 %v8695_v56, %v8647_v63  ;;  %v8600_v57 = vmul.f32 %v21336_v61, %v8475_v50  ;;  %v8364_v56 = vmul.f32 %v21346_v6, %v21345_v32  ;;  %v21349_v50 = vld [vmem:[#allocation94_spill] sm:$0xff]  ;;  %v21351_v61 = vld [vmem:[#allocation271_spill] sm:$0xff] }
0x13c4   : > { %v8648_v8 = vadd.f32 %v8600_v57, %v8360_v37  ;;  %v11270_v23 = vpack.c.bf16 %v8743_v16, %v8742_v38  ;;  %v8700_v37 = vmul.f32 %v21348_v0, %v21347_v24  ;;  %v21350_v16 = vld [vmem:[#allocation29_spill] sm:$0xff] }
0x13c5   : > { %v8477_v33 = vpop.permute.xlu0 %8476  ;;  %v8365_v57 = vmul.f32 %v21351_v61, %v21350_v16 }
0x13c6   : > { %v8744_v60 = vadd.f32 %v8696_v36, %v8648_v8  ;;  %v8601_v10 = vmul.f32 %v15444_v3, %v8477_v33  ;;  %11271 = vmatprep.subr.bf16.mxu1 %v11270_v23  ;;  %v21352_v33 = vld [vmem:[#allocation30_spill] sm:$0xff] }
0x13c7   : > { %11273 = vmatpush3.bf16.msra.mxu1 %v11272_v28  ;;  %v8701_v59 = vmul.f32 %v21353_v34, %v21352_v33  ;;  %v21374_v34 = vld [vmem:[#allocation128_spill] sm:$0xff] }
0x13c8   : > { %v8649_v14 = vadd.f32 %v8601_v10, %v8361_v58  ;;  %v21355_v10 = vld [vmem:[#allocation36_spill] sm:$0xff] }
0x13c9   : > { %v8479_v9 = vpop.permute.xlu1 %8478 }
0x13ca   : > { %v8745_v62 = vadd.f32 %v8697_v45, %v8649_v14  ;;  %v8602_v22 = vmul.f32 %v21339_v42, %v8479_v9  ;;  %v21354_v45 = vld [vmem:[#allocation104_spill] sm:$0xff] }
0x13cc   : > { %v8650_v3 = vadd.f32 %v8602_v22, %v8362_v18  ;;  %v11274_v29 = vpack.c.bf16 %v8745_v62, %v8744_v60  ;;  %v21356_v18 = vld [vmem:[#allocation169_spill] sm:$0xff]  ;;  %v21359_v22 = vld [vmem:[#allocation235_spill] sm:$0xff] }
0x13cd   : > { %v8481_v12 = vpop.permute.xlu0 %8480  ;;  %v8366_v14 = vmul.f32 %v21356_v18, %v21355_v10  ;;  %v21377_v10 = vld [vmem:[#allocation189_spill] sm:$0xff] }
0x13ce   : > { %v8746_v28 = vadd.f32 %v8698_v47, %v8650_v3  ;;  %v8603_v31 = vmul.f32 %v21344_v4, %v8481_v12  ;;  %11275 = vmatprep.subr.bf16.mxu1 %v11274_v29  ;;  %v21358_v47 = vld [vmem:[#allocation190_spill] sm:$0xff] }
0x13cf   : > { %11277 = vmatpush3.bf16.msra.mxu1 %v11276_v51  ;;  %v8702_v62 = vmul.f32 %v21358_v47, %v21357_v27  ;;  %v21365_v4 = vld [vmem:[#allocation50_spill] sm:$0xff] }
0x13d0   : > { %v8651_v38 = vadd.f32 %v8603_v31, %v8363_v21  ;;  %v21361_v21 = vld [vmem:[#allocation114_spill] sm:$0xff]  ;;  %v21366_v31 = vld [vmem:[#allocation176_spill] sm:$0xff] }
0x13d1   : > { %v8483_v26 = vpop.permute.xlu1 %8482  ;;  %v8367_v3 = vmul.f32 %v21361_v21, %v21360_v54  ;;  %v8368_v32 = vmul.f32 %v21366_v31, %v21365_v4 }
0x13d2   : > { %v8747_v63 = vadd.f32 %v8699_v44, %v8651_v38  ;;  %v8604_v36 = vmul.f32 %v21349_v50, %v8483_v26  ;;  %v21364_v44 = vld [vmem:[#allocation236_spill] sm:$0xff]  ;;  %v21368_v26 = vld [vmem:[#allocation186_spill] sm:$0xff] }
0x13d3   : > { %v21367_v38 = vld [vmem:[#allocation52_spill] sm:$0xff]  ;;  %v21370_v50 = vld [vmem:[#allocation58_spill] sm:$0xff] }
0x13d4   : > { %v8652_v58 = vadd.f32 %v8604_v36, %v8364_v56  ;;  %v11278_v8 = vpack.c.bf16 %v8747_v63, %v8746_v28  ;;  %v8704_v24 = vmul.f32 %v21368_v26, %v21367_v38  ;;  %v21371_v36 = vld [vmem:[#allocation281_spill] sm:$0xff] }
0x13d5   : > { %v8485_v23 = vpop.permute.xlu0 %8484  ;;  %v8369_v16 = vmul.f32 %v21371_v36, %v21370_v50 }
0x13d6   : > { %v8748_v51 = vadd.f32 %v8700_v37, %v8652_v58  ;;  %v8605_v60 = vmul.f32 %v21354_v45, %v8485_v23  ;;  %11279 = vmatprep.subr.bf16.mxu1 %v11278_v8  ;;  %v21369_v37 = vld [vmem:[#allocation239_spill] sm:$0xff]  ;;  %v21373_v8 = vld [vmem:[#allocation82_spill] sm:$0xff] }
0x13d7   : > { %11281 = vmatpush3.bf16.msra.mxu1 %v11280_v49 }
0x13d8   : > { %v8653_v9 = vadd.f32 %v8605_v60, %v8365_v57  ;;  %v21376_v60 = vld [vmem:[#allocation67_spill] sm:$0xff] }
0x13d9   : > { %v8487_v13 = vpop.permute.xlu1 %8486  ;;  %v8370_v18 = vmul.f32 %v21377_v10, %v21376_v60  ;;  %v21385_v10 = vld [vmem:[#allocation141_spill] sm:$0xff] }
0x13da   : > { %v8749_v42 = vadd.f32 %v8701_v59, %v8653_v9  ;;  %v8606_v1 = vmul.f32 %v21359_v22, %v8487_v13  ;;  %v21379_v22 = vld [vmem:[#allocation191_spill] sm:$0xff] }
0x13dc   : > { %v8654_v29 = vadd.f32 %v8606_v1, %v8366_v14  ;;  %v11282_v12 = vpack.c.bf16 %v8749_v42, %v8748_v51  ;;  %v21375_v51 = vld [vmem:[#allocation250_spill] sm:$0xff]  ;;  %v8706_v1 = vmul.f32 %v21379_v22, %v18155_v30 }
0x13dd   : > { %v8489_v19 = vpop.permute.xlu0 %8488 }
0x13de   : > { %v8750_v49 = vadd.f32 %v8702_v62, %v8654_v29  ;;  %v8607_v28 = vmul.f32 %v21364_v44, %v8489_v19  ;;  %11283 = vmatprep.subr.bf16.mxu1 %v11282_v12  ;;  %v21378_v62 = vld [vmem:[#allocation96_spill] sm:$0xff] }
0x13df   : > { %11285 = vmatpush3.bf16.msra.mxu1 %v11284_v2  ;;  %v21372_v2 = vld [vmem:[#allocation61_spill] sm:$0xff] }
0x13e0   : > { %v8655_v6 = vadd.f32 %v8607_v28, %v8367_v3  ;;  %v8705_v23 = vmul.f32 %v21373_v8, %v21372_v2 }
0x13e1   : > { %v8491_v56 = vpop.permute.xlu1 %8490 }
0x13e2   : > { %v8751_v0 = vadd.f32 %v8703_v48, %v8655_v6  ;;  %v8608_v63 = vmul.f32 %v21369_v37, %v8491_v56 }
0x13e4   : > { %v18319_v61 = vpop.f32.mrb[220].mxu1  ;;  %v8656_v57 = vadd.f32 %v8608_v63, %v8368_v32  ;;  %v11286_v58 = vpack.c.bf16 %v8751_v0, %v8750_v49 }
0x13e5   : > { %v8493_v52 = vpop.permute.xlu0 %8492  ;;  %v7899_v46 = vpop.f32.mrb[221].mxu1 }
0x13e6   : > { %v8752_v33 = vadd.f32 %v8704_v24, %v8656_v57  ;;  %v8609_v59 = vmul.f32 %v21374_v34, %v8493_v52  ;;  %v7984_v45 = vmul.f32 %v21375_v51, %v7899_v46  ;;  %11287 = vmatprep.subr.bf16.mxu1 %v11286_v58 }
0x13e7   : > { %11289 = vmatpush3.bf16.msra.mxu1 %v11288_v5 }
0x13e8   : > { %v8657_v14 = vadd.f32 %v8609_v59, %v8369_v16  ;;  %v18330_v9 = vpop.f32.mrb[222].mxu1  ;;  %8838 = vmatprep.mubr.f32.mxu1 %v7984_v45  ;;  %v21384_v45 = vld [vmem:[#allocation202_spill] sm:$0xff] }
0x13e9   : > { %v18332_v13 = vpop.f32.mrb[223].mxu1  ;;  %v8495_v27 = vpop.permute.xlu1 %8494 }
0x13ea   : > { %v8753_v47 = vadd.f32 %v8705_v23, %v8657_v14  ;;  %v8610_v42 = vmul.f32 %v21378_v62, %v8495_v27  ;;  %v21386_v14 = vld [vmem:[#allocation130_spill] sm:$0xff] }
0x13ec   : > { %v18337_v54 = vpop.f32.mrb[224].mxu1  ;;  %v11290_v7 = vpack.c.bf16 %v8753_v47, %v8752_v33  ;;  %v8658_v25 = vadd.f32 %v8610_v42, %v8370_v18  ;;  %v21387_v42 = vld [vmem:[#allocation95_spill] sm:$0xff] }
0x13ed   : > { %21380 = vst [vmem:[#allocation257_spill] sm:$0xff] %v18337_v54  ;;  %v18339_v5 = vpop.f32.mrb[225].mxu1 }
0x13ee   : > { %11291 = vmatprep.subr.bf16.mxu1 %v11290_v7  ;;  %v18341_v21 = vadd.f32 %v8706_v1, %v8658_v25  ;;  %v21388_v7 = vld [vmem:[#allocation131_spill] sm:$0xff] }
0x13ef   : > { %11293 = vmatpush3.bf16.msra.mxu1 %v11292_v17 }
0x13f0   : > { %v8229_v3 = vpop.f32.mrb[226].mxu1 }
0x13f1   : > { %8496 = vrot.lane.b32.xlu0 %v8229_v3, %s11712_s26  ;;  %v8231_v29 = vpop.f32.mrb[227].mxu1  ;;  %v8371_v60 = vmul.f32 %v21384_v45, %v8229_v3 }
0x13f2   : > { %v8707_v27 = vmul.f32 %v21386_v14, %v8231_v29  ;;  %v21392_v29 = vpack.c.bf16 %v18234_v11, %v18227_v40  ;;  %v21397_v40 = vld [vmem:[#allocation49_spill] sm:$0xff] }
0x13f4   : > { %v8235_v12 = vpop.f32.mrb[228].mxu1 }
0x13f5   : > { %8498 = vrot.lane.b32.xlu1 %v8235_v12, %s11712_s26  ;;  %v8237_v30 = vpop.f32.mrb[229].mxu1  ;;  %v8372_v22 = vmul.f32 %v21387_v42, %v8235_v12  ;;  %v21393_v12 = vld [vmem:[#allocation48_spill] sm:$0xff]  ;;  %v21399_v42 = vpack.c.bf16 %v18250_v53, %v18243_v43  ;;  %v21405_v43 = vld [vmem:[#allocation86_spill] sm:$0xff] }
0x13f6   : > { %v8708_v55 = vmul.f32 %v21389_v39, %v8237_v30  ;;  %v21394_v30 = vld [vmem:[#allocation93_spill] sm:$0xff]  ;;  %v7986_v53 = vmul.f32 %v21405_v43, %v18330_v9  ;;  %v21410_v9 = vld [vmem:[#allocation39_spill] sm:$0xff] }
0x13f8   : > { %v18348_v19 = vpop.f32.mrb[230].mxu1 }
0x13f9   : > { %8500 = vrot.lane.b32.xlu0 %v18348_v19, %s11712_s26  ;;  %v18352_v20 = vpop.f32.mrb[231].mxu1 }
0x13fc   : > { %v18354_v35 = vpop.f32.mrb[232].mxu1 }
0x13fd   : > { %8502 = vrot.lane.b32.xlu1 %v18354_v35, %s11712_s26  ;;  %v18358_v41 = vpop.f32.mrb[233].mxu1 }
0x1400   : > { %v18360_v15 = vpop.f32.mrb[234].mxu1 }
0x1401   : > { %8504 = vrot.lane.b32.xlu0 %v18360_v15, %s11712_s26  ;;  %v18364_v17 = vpop.f32.mrb[235].mxu1  ;;  %v8375_v11 = vmul.f32 %v21397_v40, %v18360_v15  ;;  %v21403_v15 = vld [vmem:[#allocation259_spill] sm:$0xff] }
0x1404   : > { %v18366_v48 = vpop.f32.mrb[236].mxu1 }
0x1405   : > { %8506 = vrot.lane.b32.xlu1 %v18366_v48, %s11712_s26  ;;  %v18370_v49 = vpop.f32.mrb[237].mxu1 }
0x1408   : > { %v18372_v44 = vpop.f32.mrb[238].mxu1 }
0x1409   : > { %8508 = vrot.lane.b32.xlu0 %v18372_v44, %s11712_s26  ;;  %v18376_v28 = vpop.f32.mrb[239].mxu1 }
0x140c   : > { %v18378_v4 = vpop.f32.mrb[240].mxu1 }
0x140d   : > { %8510 = vrot.lane.b32.xlu1 %v18378_v4, %s11712_s26  ;;  %v18382_v31 = vpop.f32.mrb[241].mxu1 }
0x1410   : > { %v18384_v32 = vpop.f32.mrb[242].mxu1 }
0x1411   : > { %8512 = vrot.lane.b32.xlu0 %v18384_v32, %s11712_s26  ;;  %v18388_v6 = vpop.f32.mrb[243].mxu1 }
0x1414   : > { %v18390_v56 = vpop.f32.mrb[244].mxu1 }
0x1415   : > { %8514 = vrot.lane.b32.xlu1 %v18390_v56, %s11712_s26  ;;  %v18394_v38 = vpop.f32.mrb[245].mxu1 }
0x1418   : > { %v18396_v26 = vpop.f32.mrb[246].mxu1 }
0x1419   : > { %8516 = vrot.lane.b32.xlu0 %v18396_v26, %s11712_s26  ;;  %v18400_v24 = vpop.f32.mrb[247].mxu1 }
0x141c   : > { %v18402_v0 = vpop.f32.mrb[248].mxu1 }
0x141d   : > { %8518 = vrot.lane.b32.xlu1 %v18402_v0, %s11712_s26  ;;  %v18406_v37 = vpop.f32.mrb[249].mxu1 }
0x1420   : > { %v18408_v63 = vpop.f32.mrb[250].mxu1 }
0x1421   : > { %8520 = vrot.lane.b32.xlu0 %v18408_v63, %s11712_s26  ;;  %v18412_v50 = vpop.f32.mrb[251].mxu1 }
0x1424   : > { %v18414_v36 = vpop.f32.mrb[252].mxu1 }
0x1425   : > { %8522 = vrot.lane.b32.xlu1 %v18414_v36, %s11712_s26  ;;  %v18418_v16 = vpop.f32.mrb[253].mxu1 }
0x1428   : > { %v18420_v57 = vpop.f32.mrb[254].mxu1 }
0x1429   : > { %8524 = vrot.lane.b32.xlu0 %v18420_v57, %s11712_s26  ;;  %v18424_v58 = vpop.f32.mrb[255].mxu1 }
0x142c   : > { %v18426_v52 = vpop.f32.mrb[0].mxu1 }
0x142d   : > { %8526 = vrot.lane.b32.xlu1 %v18426_v52, %s11712_s26  ;;  %v18430_v46 = vpop.f32.mrb[1].mxu1 }
0x1430   : > { %v18432_v2 = vpop.f32.mrb[2].mxu1 }
0x1431   : > { %8528 = vrot.lane.b32.xlu0 %v18432_v2, %s11712_s26  ;;  %v18436_v8 = vpop.f32.mrb[3].mxu1 }
0x1434   : > { %v18438_v23 = vpop.f32.mrb[4].mxu1 }
0x1435   : > { %8530 = vrot.lane.b32.xlu1 %v18438_v23, %s11712_s26  ;;  %v18442_v33 = vpop.f32.mrb[5].mxu1 }
0x1436   : > { %21381 = vst [vmem:[#allocation258_spill] sm:$0xff] %v18442_v33  ;;  %v21390_v33 = vld [vmem:[#allocation92_spill] sm:$0xff] }
0x1437   : > { %v8373_v3 = vmul.f32 %v21390_v33, %v18348_v19 }
0x1438   : > { %v18444_v34 = vpop.f32.mrb[6].mxu1 }
0x1439   : > { %21382 = vst [vmem:[#allocation166_spill] sm:$0xff] %v18444_v34  ;;  %8532 = vrot.lane.b32.xlu0 %v18444_v34, %s11712_s26  ;;  %v18448_v59 = vpop.f32.mrb[7].mxu1 }
0x143a   : > { %21383 = vst [vmem:[#allocation196_spill] sm:$0xff] %v18448_v59 }
0x1463   : > { %v8497_v51 = vpop.permute.xlu0 %8496 }
0x1464   : > { %v8611_v18 = vmul.f32 %v21385_v10, %v8497_v51  ;;  %v21391_v51 = vld [vmem:[#allocation98_spill] sm:$0xff] }
0x1466   : > { %v8659_v47 = vadd.f32 %v8611_v18, %v8371_v60  ;;  %v8709_v60 = vmul.f32 %v21393_v12, %v18352_v20 }
0x1467   : > { %v8499_v62 = vpop.permute.xlu1 %8498 }
0x1468   : > { %v8755_v1 = vadd.f32 %v8707_v27, %v8659_v47  ;;  %v8612_v25 = vmul.f32 %v21388_v7, %v8499_v62  ;;  %v21395_v27 = vld [vmem:[#allocation248_spill] sm:$0xff] }
0x1469   : > { %v21398_v62 = vld [vmem:[#allocation100_spill] sm:$0xff] }
0x146a   : > { %v8660_v54 = vadd.f32 %v8612_v25, %v8372_v22  ;;  %v11294_v34 = vpack.c.bf16 %v8755_v1, %v18341_v21  ;;  %v8374_v21 = vmul.f32 %v21394_v30, %v18354_v35  ;;  %v21400_v35 = vld [vmem:[#allocation124_spill] sm:$0xff]  ;;  %v21401_v1 = vld [vmem:[#allocation126_spill] sm:$0xff] }
0x146b   : > { %v8501_v59 = vpop.permute.xlu0 %8500  ;;  %v7983_v22 = vmul.f32 %v21400_v35, %v18319_v61  ;;  %v21402_v25 = vld [vmem:[#allocation164_spill] sm:$0xff]  ;;  %v21406_v61 = vld [vmem:[#allocation105_spill] sm:$0xff] }
0x146c   : > { %v8756_v45 = vadd.f32 %v8708_v55, %v8660_v54  ;;  %v8613_v10 = vmul.f32 %v21391_v51, %v8501_v59  ;;  %11295 = vmatprep.subr.bf16.mxu1 %v11294_v34  ;;  %v21396_v55 = vld [vmem:[#allocation252_spill] sm:$0xff]  ;;  %v8376_v51 = vmul.f32 %v21403_v15, %v18366_v48  ;;  %v21418_v15 = vld [vmem:[#allocation133_spill] sm:$0xff] }
0x146d   : > { %11297 = vmatpush3.bf16.msra.mxu1 %v21392_v29  ;;  %v8710_v54 = vmul.f32 %v21396_v55, %v18358_v41  ;;  %v8711_v41 = vmul.f32 %v21401_v1, %v18364_v17  ;;  %v21404_v29 = vld [vmem:[#allocation208_spill] sm:$0xff]  ;;  %v8713_v55 = vmul.f32 %v21410_v9, %v18376_v28  ;;  %v21415_v1 = vld [vmem:[#allocation182_spill] sm:$0xff] }
0x146e   : > { %v8661_v18 = vadd.f32 %v8613_v10, %v8373_v3  ;;  %v7987_v3 = vmul.f32 %v21402_v25, %v18332_v13 }
0x146f   : > { %v8503_v39 = vpop.permute.xlu1 %8502 }
0x1470   : > { %v8757_v14 = vadd.f32 %v8709_v60, %v8661_v18  ;;  %v8614_v47 = vmul.f32 %v21395_v27, %v8503_v39  ;;  %v8712_v60 = vmul.f32 %v21406_v61, %v18370_v49  ;;  %v21407_v39 = vld [vmem:[#allocation3_spill] sm:$0xff]  ;;  %v21409_v27 = vld [vmem:[#allocation278_spill] sm:$0xff] }
0x1471   : > { %v7985_v13 = vmul.f32 %v21407_v39, %v18339_v5 }
0x1472   : > { %v8662_v19 = vadd.f32 %v8614_v47, %v8374_v21  ;;  %v11298_v33 = vpack.c.bf16 %v8757_v14, %v8756_v45  ;;  %v21408_v21 = vld [vmem:[#allocation139_spill] sm:$0xff] }
0x1473   : > { %v8505_v34 = vpop.permute.xlu0 %8504  ;;  %v8377_v48 = vmul.f32 %v21408_v21, %v18372_v44  ;;  %v21413_v44 = vld [vmem:[#allocation97_spill] sm:$0xff] }
0x1474   : > { %v8758_v59 = vadd.f32 %v8710_v54, %v8662_v19  ;;  %v8615_v20 = vmul.f32 %v21398_v62, %v8505_v34  ;;  %11299 = vmatprep.subr.bf16.mxu1 %v11298_v33  ;;  %v21411_v19 = vld [vmem:[#allocation241_spill] sm:$0xff]  ;;  %v21412_v34 = vld [vmem:[#allocation115_spill] sm:$0xff] }
0x1475   : > { %11301 = vmatpush3.bf16.msra.mxu1 %v21399_v42  ;;  %v8378_v33 = vmul.f32 %v21411_v19, %v18378_v4  ;;  %v21414_v42 = vld [vmem:[#allocation244_spill] sm:$0xff] }
0x1476   : > { %v8663_v7 = vadd.f32 %v8615_v20, %v8375_v11  ;;  %v8714_v11 = vmul.f32 %v21413_v44, %v18382_v31  ;;  %v8379_v35 = vmul.f32 %v21414_v42, %v18384_v32  ;;  %v21429_v44 = vld [vmem:[#allocation256_spill] sm:$0xff] }
0x1477   : > { %v8507_v45 = vpop.permute.xlu1 %8506 }
0x1478   : > { %v8759_v10 = vadd.f32 %v8711_v41, %v8663_v7  ;;  %v8616_v12 = vmul.f32 %v21404_v29, %v8507_v45  ;;  %8839 = vmatmul.mubr.f32.vlgmr.msra.gmra.mrb[8].mxu1 %v7983_v22  ;;  %v21416_v41 = vld [vmem:[#allocation275_spill] sm:$0xff] }
0x1479   : > { %8843 = vmatprep.mubr.f32.mxu1 %v7987_v3  ;;  %v8715_v4 = vmul.f32 %v21416_v41, %v18388_v6  ;;  %v21417_v3 = vld [vmem:[#allocation143_spill] sm:$0xff] }
0x147a   : > { %v8664_v17 = vadd.f32 %v8616_v12, %v8376_v51  ;;  %v11302_v18 = vpack.c.bf16 %v8759_v10, %v8758_v59  ;;  %v8380_v45 = vmul.f32 %v21417_v3, %v18390_v56  ;;  %v21419_v10 = vld [vmem:[#allocation172_spill] sm:$0xff] }
0x147b   : > { %v8509_v30 = vpop.permute.xlu0 %8508  ;;  %v8716_v29 = vmul.f32 %v21419_v10, %v18394_v38  ;;  %v21437_v10 = vld [vmem:[#allocation167_spill] sm:$0xff] }
0x147c   : > { %v8760_v14 = vadd.f32 %v8712_v60, %v8664_v17  ;;  %v8617_v47 = vmul.f32 %v21409_v27, %v8509_v30  ;;  %8844 = vmatmul.mubr.f32.gmra.mrb[10].mxu1 %v7986_v53  ;;  %11303 = vmatprep.subr.bf16.mxu1 %v11302_v18  ;;  %v21420_v53 = vld [vmem:[#allocation211_spill] sm:$0xff]  ;;  %v21421_v17 = vld [vmem:[#allocation254_spill] sm:$0xff]  ;;  %v21423_v30 = vld [vmem:[#allocation177_spill] sm:$0xff] }
0x147d   : > { %11305 = vmatpush3.bf16.msra.mxu1 %v11302_v18  ;;  %10663 = vmatprep.mubr.f32.mxu1 %v7985_v13  ;;  %v8381_v61 = vmul.f32 %v21420_v53, %v18396_v26  ;;  %v21422_v18 = vld [vmem:[#allocation103_spill] sm:$0xff]  ;;  %v8382_v21 = vmul.f32 %v21423_v30, %v18402_v0 }
0x147e   : > { %v8665_v49 = vadd.f32 %v8617_v47, %v8377_v48  ;;  %v8717_v56 = vmul.f32 %v21422_v18, %v18400_v24  ;;  %v21424_v48 = vld [vmem:[#allocation187_spill] sm:$0xff] }
0x147f   : > { %v8511_v54 = vpop.permute.xlu1 %8510  ;;  %v21425_v27 = vld [vmem:[#allocation251_spill] sm:$0xff] }
0x1480   : > { %v8761_v5 = vadd.f32 %v8713_v55, %v8665_v49  ;;  %v8618_v40 = vmul.f32 %v21412_v34, %v8511_v54  ;;  %v8718_v47 = vmul.f32 %v21425_v27, %v18406_v37  ;;  %v21426_v49 = vld [vmem:[#allocation145_spill] sm:$0xff] }
0x1481   : > { %v8383_v54 = vmul.f32 %v21426_v49, %v18408_v63  ;;  %v21447_v49 = vld [vmem:[#allocation273_spill] sm:$0xff] }
0x1482   : > { %v8666_v59 = vadd.f32 %v8618_v40, %v8378_v33  ;;  %v11306_v62 = vpack.c.bf16 %v8761_v5, %v8760_v14  ;;  %v21427_v33 = vld [vmem:[#allocation216_spill] sm:$0xff]  ;;  %v21428_v5 = vld [vmem:[#allocation209_spill] sm:$0xff] }
0x1483   : > { %v8513_v20 = vpop.permute.xlu0 %8512  ;;  %v8719_v0 = vmul.f32 %v21428_v5, %v18412_v50 }
0x1484   : > { %v8762_v22 = vadd.f32 %v8714_v11, %v8666_v59  ;;  %v8619_v28 = vmul.f32 %v21415_v1, %v8513_v20  ;;  %11307 = vmatprep.subr.bf16.mxu1 %v11306_v62  ;;  %v8384_v11 = vmul.f32 %v21429_v44, %v18414_v36  ;;  %v21430_v59 = vld [vmem:[#allocation84_spill] sm:$0xff] }
0x1485   : > { %11309 = vmatpush3.bf16.msra.mxu1 %v11306_v62  ;;  %v21431_v20 = vld [vmem:[#allocation136_spill] sm:$0xff] }
0x1486   : > { %v8667_v7 = vadd.f32 %v8619_v28, %v8379_v35  ;;  %v8720_v42 = vmul.f32 %v21431_v20, %v18418_v16  ;;  %v21432_v1 = vld [vmem:[#allocation260_spill] sm:$0xff] }
0x1487   : > { %v8515_v25 = vpop.permute.xlu1 %8514  ;;  %v8385_v28 = vmul.f32 %v21432_v1, %v18420_v57  ;;  %v9897_v1 = vld [vmem:[%s11907_s24 + $0x6] ss:$0 sm:$0xff] }
0x1488   : > { %v8763_v31 = vadd.f32 %v8715_v4, %v8667_v7  ;;  %v8620_v51 = vmul.f32 %v21418_v15, %v8515_v25  ;;  %v21433_v4 = vld [vmem:[#allocation117_spill] sm:$0xff]  ;;  %v21434_v7 = vld [vmem:[#allocation198_spill] sm:$0xff] }
0x1489   : > { %v8721_v36 = vmul.f32 %v21434_v7, %v18424_v58  ;;  %v21436_v15 = vld [vmem:[#allocation138_spill] sm:$0xff] }
0x148a   : > { %v8668_v32 = vadd.f32 %v8620_v51, %v8380_v45  ;;  %v11310_v12 = vpack.c.bf16 %v8763_v31, %v8762_v22  ;;  %v21435_v45 = vld [vmem:[#allocation265_spill] sm:$0xff] }
0x148b   : > { %v8517_v43 = vpop.permute.xlu0 %8516  ;;  %v8386_v31 = vmul.f32 %v21435_v45, %v18426_v52 }
0x148c   : > { %v8764_v60 = vadd.f32 %v8716_v29, %v8668_v32  ;;  %v8621_v6 = vmul.f32 %v21421_v17, %v8517_v43  ;;  %11311 = vmatprep.subr.bf16.mxu1 %v11310_v12  ;;  %v8722_v29 = vmul.f32 %v21437_v10, %v18430_v46  ;;  %v21438_v43 = vld [vmem:[#allocation228_spill] sm:$0xff] }
0x148d   : > { %11313 = vmatpush3.bf16.msra.mxu1 %v11310_v12  ;;  %v8387_v53 = vmul.f32 %v21438_v43, %v18432_v2  ;;  %v21440_v17 = vld [vmem:[#allocation268_spill] sm:$0xff] }
0x148e   : > { %v8669_v39 = vadd.f32 %v8621_v6, %v8381_v61  ;;  %v8723_v52 = vmul.f32 %v21440_v17, %v18436_v8 }
0x148f   : > { %v8519_v13 = vpop.permute.xlu1 %8518 }
0x1490   : > { %v8765_v38 = vadd.f32 %v8717_v56, %v8669_v39  ;;  %v8622_v14 = vmul.f32 %v21424_v48, %v8519_v13  ;;  %v21441_v56 = vld [vmem:[#allocation147_spill] sm:$0xff]  ;;  %v21442_v13 = vld [vmem:[#allocation269_spill] sm:$0xff] }
0x1491   : > { %v8388_v39 = vmul.f32 %v21441_v56, %v18438_v23  ;;  %v21449_v23 = vld [vmem:[#allocation149_spill] sm:$0xff] }
0x1492   : > { %v8670_v26 = vadd.f32 %v8622_v14, %v8382_v21  ;;  %v11314_v9 = vpack.c.bf16 %v8765_v38, %v8764_v60  ;;  %v21439_v60 = vld [vmem:[#allocation266_spill] sm:$0xff] }
0x1493   : > { %v8521_v55 = vpop.permute.xlu0 %8520  ;;  %v21443_v21 = vld [vmem:[#allocation258_spill] sm:$0xff] }
0x1494   : > { %v8766_v19 = vadd.f32 %v8718_v47, %v8670_v26  ;;  %v8623_v24 = vmul.f32 %v21427_v33, %v8521_v55  ;;  %11315 = vmatprep.subr.bf16.mxu1 %v11314_v9  ;;  %v21444_v38 = vld [vmem:[#allocation110_spill] sm:$0xff]  ;;  %v21446_v26 = vld [vmem:[#allocation201_spill] sm:$0xff] }
0x1495   : > { %11317 = vmatpush3.bf16.msra.mxu1 %v11314_v9  ;;  %v8724_v48 = vmul.f32 %v21444_v38, %v21443_v21  ;;  %v21445_v47 = vld [vmem:[#allocation166_spill] sm:$0xff] }
0x1496   : > { %v8671_v34 = vadd.f32 %v8623_v24, %v8383_v54  ;;  %v8389_v9 = vmul.f32 %v21446_v26, %v21445_v47  ;;  %v21448_v54 = vld [vmem:[#allocation196_spill] sm:$0xff] }
0x1497   : > { %v8523_v40 = vpop.permute.xlu1 %8522 }
0x1498   : > { %v8767_v37 = vadd.f32 %v8719_v0, %v8671_v34  ;;  %v8624_v62 = vmul.f32 %v21430_v59, %v8523_v40  ;;  %v21450_v0 = vld [vmem:[#allocation257_spill] sm:$0xff]  ;;  %v21451_v34 = vld [vmem:[#allocation4_spill] sm:$0xff] }
0x1499   : > { %v7988_v40 = vmul.f32 %v21451_v34, %v21450_v0 }
0x149a   : > { %v8672_v63 = vadd.f32 %v8624_v62, %v8384_v11  ;;  %v11318_v35 = vpack.c.bf16 %v8767_v37, %v8766_v19  ;;  %v8725_v19 = vmul.f32 %v21449_v23, %v21448_v54 }
0x149b   : > { %v8525_v22 = vpop.permute.xlu0 %8524 }
0x149c   : > { %v8768_v41 = vadd.f32 %v8720_v42, %v8672_v63  ;;  %v8625_v50 = vmul.f32 %v21433_v4, %v8525_v22  ;;  %11319 = vmatprep.subr.bf16.mxu1 %v11318_v35  ;;  %v9896_v42 = vld [vmem:[%s11907_s24 + $0x5] ss:$0 sm:$0xff] }
0x149d   : > { %11321 = vmatpush3.bf16.msra.mxu1 %v11318_v35 }
0x149e   : > { %v8673_v25 = vadd.f32 %v8625_v50, %v8385_v28 }
0x149f   : > { %v8527_v3 = vpop.permute.xlu1 %8526 }
0x14a0   : > { %v8769_v16 = vadd.f32 %v8721_v36, %v8673_v25  ;;  %v8626_v51 = vmul.f32 %v21436_v15, %v8527_v3  ;;  %v21452_v3 = vld [vmem:[#allocation226_spill] sm:$0xff] }
0x14a2   : > { %v8674_v57 = vadd.f32 %v8626_v51, %v8386_v31  ;;  %v11322_v32 = vpack.c.bf16 %v8769_v16, %v8768_v41  ;;  %v21453_v31 = vld [vmem:[#allocation222_spill] sm:$0xff] }
0x14a3   : > { %v8529_v12 = vpop.permute.xlu0 %8528 }
0x14a4   : > { %v8770_v61 = vadd.f32 %v8722_v29, %v8674_v57  ;;  %v8627_v58 = vmul.f32 %v21439_v60, %v8529_v12  ;;  %11323 = vmatprep.subr.bf16.mxu1 %v11322_v32 }
0x14a5   : > { %11325 = vmatpush3.bf16.msra.mxu1 %v11322_v32 }
0x14a6   : > { %v8675_v6 = vadd.f32 %v8627_v58, %v8387_v53 }
0x14a7   : > { %v8531_v18 = vpop.permute.xlu1 %8530 }
0x14a8   : > { %v8771_v46 = vadd.f32 %v8723_v52, %v8675_v6  ;;  %v8628_v30 = vmul.f32 %v21442_v13, %v8531_v18 }
0x14aa   : > { %v8676_v2 = vadd.f32 %v8628_v30, %v8388_v39  ;;  %v11326_v14 = vpack.c.bf16 %v8771_v46, %v8770_v61 }
0x14ab   : > { %v8533_v27 = vpop.permute.xlu0 %8532 }
0x14ac   : > { %v8772_v55 = vadd.f32 %v8724_v48, %v8676_v2  ;;  %v8629_v8 = vmul.f32 %v21447_v49, %v8533_v27  ;;  %11327 = vmatprep.subr.bf16.mxu1 %v11326_v14 }
0x14ad   : > { %11329 = vmatpush3.bf16.msra.mxu1 %v11326_v14 }
0x14ae   : > { %v8677_v33 = vadd.f32 %v8629_v8, %v8389_v9 }
0x14b0   : > { %v8773_v24 = vadd.f32 %v8725_v19, %v8677_v33 }
0x14b2   : > { %v11330_v5 = vpack.c.bf16 %v8773_v24, %v8772_v55 }
0x14b4   : > { %11331 = vmatprep.subr.bf16.mxu1 %v11330_v5 }
0x14b5   : > { %11333 = vmatpush3.bf16.msra.mxu1 %v11330_v5 }
0x14b8   : > { %10664 = vmatmul.mubr.f32.vlgmr.msra.gmra.mrb[12].mxu1 %v7988_v40 }
0x154b   : > { %v10292_v44 = vpop.f32.mrb[8].mxu1 }
0x154c   : > { %v10293_v11 = vpop.f32.mrb[9].mxu1 }
0x154d   : > { %v10294_v37 = vadd.f32 %v10293_v11, %v10292_v44 }
0x154f   : > { %v10295_v59 = vpop.f32.mrb[10].mxu1 }
0x1550   : > { %v10296_v62 = vpop.f32.mrb[11].mxu1 }
0x1551   : > { %v10297_v20 = vadd.f32 %v10296_v62, %v10295_v59 }
0x158b   : > { %v10665_v63 = vpop.f32.mrb[12].mxu1 }
0x158c   : > { %v8921_v35 = vadd.f32 %v10665_v63, %v10297_v20  ;;  %v8915_v22 = vpop.f32.mrb[13].mxu1 }
0x158d   : > { %v8916_v28 = vadd.f32 %v10294_v37, %v8915_v22 }
0x158e   : > { %v8929_v41 = vmul.f32 %v9896_v42, %v8921_v35 }
0x158f   : > { %v8928_v4 = vmul.f32 %v9896_v42, %v8916_v28 }
0x1590   : > { %v8935_v50 = vadd.f32 %v9897_v1, %v8929_v41 }
0x1591   : > { %v8934_v7 = vadd.f32 %v9897_v1, %v8928_v4 }
0x1592   : > { %v8937_v36 = vmax.f32 %v8935_v50, 0.0 }
0x1593   : > { %v8936_v25 = vmax.f32 %v8934_v7, 0.0 }
0x1594   : > { %v8939_v45 = vadd.f32 %v8937_v36, %v21452_v3 }
0x1595   : > { %v8938_v16 = vadd.f32 %v8936_v25, %v21453_v31 }
0x1596   : > { %v8941_v15 = vsel %vm21454_vm12, %v8939_v45, 0.0  ;;  %v8952_v51 = vsel %vm21455_vm9, %v8939_v45, -inf }
0x1597   : > { %v8940_v10 = vsel %vm21456_vm15, %v8938_v16, 0.0  ;;  %v8951_v29 = vsel %vm21457_vm0, %v8938_v16, -inf }
0x1598   : > { %v8942_v57 = vadd.f32 %v8941_v15, %v8940_v10  ;;  %v8953_v32 = vmax.f32 %v8951_v29, %v8952_v51 }
0x159a   : > { %v8954_v12 = vrot.slane %v8953_v32, 4  ;;  %v8943_v17 = vrot.slane %v8942_v57, 4 }
0x159c   : > { %v8955_v43 = vmax.f32 %v8953_v32, %v8954_v12  ;;  %v8944_v52 = vadd.f32 %v8943_v17, %v8942_v57 }
0x159e   : > { %v8956_v53 = vrot.slane %v8955_v43, 2  ;;  %v8945_v6 = vrot.slane %v8944_v52, 2 }
0x15a0   : > { %v8957_v61 = vmax.f32 %v8955_v43, %v8956_v53  ;;  %v8946_v18 = vadd.f32 %v8945_v6, %v8944_v52 }
0x15a2   : > { %v8958_v60 = vrot.slane %v8957_v61, 1  ;;  %v8947_v56 = vrot.slane %v8946_v18, 1 }
0x15a4   : > { %v8959_v58 = vmax.f32 %v8957_v61, %v8958_v60  ;;  %v8948_v39 = vadd.f32 %v8947_v56, %v8946_v18 }
0x15a6   : > { %8961 = vrot.lane.b32.xlu1 %v8959_v58, %s11712_s26  ;;  %v8950_v46 = vmul.f32 0.0625, %v8948_v39 }
0x1618   : > { %v8962_v13 = vpop.permute.xlu1 %8961 }
0x1619   : > { %v8964_v30 = vsel %vm21458_vm14, %v8950_v46, %v8962_v13 }
0x161a   : > { %8965 = vst [vmem:[%s344_s29] sm:$0x1] %v8964_v30 }
0x161b PF: > { %s16_s21 = sadd.s32 1, %s11704_s21  }
0x161c   : > { %p13_p4 = scmp.ge.s32.totalorder %s16_s21, 4  }
0x161e   :  { %15 = sbr.rel (!%p13_p4) target bundleno = 1 (0x1), region = 93 }

</bundles_post_ra>
